<compile_context>
chip_gen: v7x
topology: tpu7x:2x2x1
jax: 0.10.0
libtpu: 0.0.40
codegen_flags: <defaults>
</compile_context>

<pallas_src>
import jax
import jax.numpy as jnp
from jax.experimental import pallas as pl
from jax.experimental.pallas import tpu as pltpu

IN_DIM = 32 * 32 * 3   # 3072
HID = 500
OUT = 10
HID_PAD = 512          # 500 -> 512 (multiple of 128)
OUT_PAD = 128          # 10  -> 128 (lane-dense output slab)


def mlp_fedcom_kernel(x_ref,
                      w1_ref, b1_ref,
                      w2_ref, b2_ref,
                      w3_ref, b3_ref,
                      w4_ref, b4_ref,
                      out_ref):
    # All matmuls: bf16 operands, f32 accumulation (MXU native operand dtype).
    # Layer 1: (TB, 3072) @ (3072, 512) + b1, ReLU
    h = jnp.dot(x_ref[...], w1_ref[...], preferred_element_type=jnp.float32)
    h = jnp.maximum(h + b1_ref[...], 0.0)
    # Layer 2: (TB, 512) @ (512, 512) + b2, ReLU
    h = jnp.dot(h.astype(jnp.bfloat16), w2_ref[...],
                preferred_element_type=jnp.float32)
    h = jnp.maximum(h + b2_ref[...], 0.0)
    # Layer 3: (TB, 512) @ (512, 512) + b3, ReLU
    h = jnp.dot(h.astype(jnp.bfloat16), w3_ref[...],
                preferred_element_type=jnp.float32)
    h = jnp.maximum(h + b3_ref[...], 0.0)
    # Layer 4: (TB, 512) @ (512, 128) + b4 (no activation)
    h = jnp.dot(h.astype(jnp.bfloat16), w4_ref[...],
                preferred_element_type=jnp.float32)
    out_ref[...] = (h + b4_ref[...]).astype(out_ref.dtype)


def _round_up(n, m):
    return ((n + m - 1) // m) * m


def _pad2d(a, rows, cols):
    return jnp.pad(a, ((0, rows - a.shape[0]), (0, cols - a.shape[1])))


def pad_params(params):
    """Zero-pad hidden 500->512, output 10->128; weights -> bf16, biases f32."""
    (w1, b1, w2, b2, w3, b3, w4, b4) = params
    return (
        _pad2d(w1, IN_DIM, HID_PAD).astype(jnp.bfloat16),
        _pad2d(b1, 1, HID_PAD).astype(jnp.float32),
        _pad2d(w2, HID_PAD, HID_PAD).astype(jnp.bfloat16),
        _pad2d(b2, 1, HID_PAD).astype(jnp.float32),
        _pad2d(w3, HID_PAD, HID_PAD).astype(jnp.bfloat16),
        _pad2d(b3, 1, HID_PAD).astype(jnp.float32),
        _pad2d(w4, HID_PAD, OUT_PAD).astype(jnp.bfloat16),
        _pad2d(b4, 1, OUT_PAD).astype(jnp.float32),
    )


def _pick_config():
    """(block_b, vmem_limit_bytes) per chip generation."""
    try:
        kind = jax.devices()[0].device_kind.lower()
    except Exception:  # pragma: no cover - defensive
        kind = ""
    if "v7" in kind:
        # v7x: 64 MiB VMEM/TC -> stay within the 32 MiB scoped budget.
        return 512, 32 << 20
    if "v5" in kind or "v6" in kind:
        # v5e/v6e: 128 MiB VMEM -> bigger tiles amortize per-step overhead.
        return 1024, 64 << 20
    return 512, 32 << 20


def _build_call(tb, b_pad, vmem_limit_bytes, single_buffer_weights):
    grid = (b_pad // tb,)
    weight_mode = pl.Buffered(1) if single_buffer_weights else None

    def const_spec(shape):
        # Weights/biases: same block every grid step -> stay resident in VMEM.
        return pl.BlockSpec(shape, lambda i: (0, 0), pipeline_mode=weight_mode)

    in_specs = [
        pl.BlockSpec((tb, IN_DIM), lambda i: (i, 0)),      # x tile, pipelined
        const_spec((IN_DIM, HID_PAD)), const_spec((1, HID_PAD)),
        const_spec((HID_PAD, HID_PAD)), const_spec((1, HID_PAD)),
        const_spec((HID_PAD, HID_PAD)), const_spec((1, HID_PAD)),
        const_spec((HID_PAD, OUT_PAD)), const_spec((1, OUT_PAD)),
    ]
    out_specs = pl.BlockSpec((tb, OUT_PAD), lambda i: (i, 0))

    # Advisory cost estimate (bf16 operand sizes) for XLA's scheduler.
    flops = 2 * b_pad * (IN_DIM * HID_PAD
                         + HID_PAD * HID_PAD
                         + HID_PAD * HID_PAD
                         + HID_PAD * OUT_PAD)
    weight_bytes = 2 * (IN_DIM * HID_PAD + 2 * HID_PAD * HID_PAD
                        + HID_PAD * OUT_PAD) \
        + 4 * (3 * HID_PAD + OUT_PAD)
    bytes_accessed = 2 * b_pad * IN_DIM + weight_bytes + 4 * b_pad * OUT_PAD
    cost = pl.CostEstimate(flops=flops, transcendentals=0,
                           bytes_accessed=bytes_accessed)

    return pl.pallas_call(
        mlp_fedcom_kernel,
        out_shape=jax.ShapeDtypeStruct((b_pad, OUT_PAD), jnp.float32),
        grid=grid,
        in_specs=in_specs,
        out_specs=out_specs,
        compiler_params=pltpu.CompilerParams(
            dimension_semantics=("parallel",),
            vmem_limit_bytes=vmem_limit_bytes,
        ),
        cost_estimate=cost,
    )


def mlp_fedcom_forward(x, params, *, block_b=None, vmem_limit_bytes=None):
    """x: (B, 3, 32, 32) float32 NCHW. Returns (B, 10) float32."""
    B = x.shape[0]
    # Glue: unsqueeze(1) + Flatten(start_dim=1) == reshape to (B, C*H*W).
    # Cast x to bf16 (MXU operand dtype; also halves the x HBM->VMEM stream).
    x_flat = x.reshape(B, -1).astype(jnp.bfloat16)

    default_tb, default_vmem = _pick_config()
    if block_b is None:
        block_b = default_tb
    if vmem_limit_bytes is None:
        vmem_limit_bytes = default_vmem

    # Batch tile: multiple of 8 (sublane), capped at block_b.
    tb = _round_up(min(block_b, _round_up(B, 8)), 8)
    b_pad = _round_up(B, tb)
    if b_pad != B:
        x_flat = jnp.pad(x_flat, ((0, b_pad - B), (0, 0)))

    padded = pad_params(params)
    args = (x_flat,) + padded

    # For tiny batches the grid is a single step and (on v7x) only one
    # TensorCore runs it; that is accepted here since the problem is then
    # weight-load bound anyway.
    try:
        out = _build_call(tb, b_pad, vmem_limit_bytes, True)(*args)
        out = jax.block_until_ready(out)
    except Exception:
        # TODO(synk): pl.Buffered(1) (single-buffered resident weights) not
        # accepted by this jax build; fall back to default double-buffering
        # (bf16 weights keep this well within the VMEM budget anyway).
        out = _build_call(tb, b_pad, vmem_limit_bytes, False)(*args)
        out = jax.block_until_ready(out)

    return out[:B, :OUT].astype(jnp.float32)


def init_params(key):
    """Deterministic init matching uniform_(-0.1, 0.1) on weights and biases.

    Weights are stored as (in_features, out_features) — the transpose of the
    PyTorch (out, in) layout — so the kernel does x @ W directly.
    """
    dims = [(IN_DIM, HID), (HID, HID), (HID, HID), (HID, OUT)]
    params = []
    for (fan_in, fan_out) in dims:
        key, kw, kb = jax.random.split(key, 3)
        w = jax.random.uniform(kw, (fan_in, fan_out), jnp.float32, -0.1, 0.1)
        b = jax.random.uniform(kb, (1, fan_out), jnp.float32, -0.1, 0.1)
        params += [w, b]
    return tuple(params)


def reference_forward(x, params):
    """Pure-JAX f32 reference of the original forward pass (unpadded)."""
    (w1, b1, w2, b2, w3, b3, w4, b4) = params
    h = x.reshape(x.shape[0], -1)
    h = jnp.maximum(h @ w1 + b1, 0.0)
    h = jnp.maximum(h @ w2 + b2, 0.0)
    h = jnp.maximum(h @ w3 + b3, 0.0)
    return h @ w4 + b4


def reference_forward_bf16(x, params):
    """Pure-JAX reference mirroring the kernel's bf16-operand / f32-acc math."""
    (w1, b1, w2, b2, w3, b3, w4, b4) = params
    bf = jnp.bfloat16
    f32 = jnp.float32
    h = x.reshape(x.shape[0], -1).astype(bf)
    h = jnp.maximum(jnp.dot(h, w1.astype(bf), preferred_element_type=f32) + b1, 0.0)
    h = jnp.maximum(jnp.dot(h.astype(bf), w2.astype(bf),
                            preferred_element_type=f32) + b2, 0.0)
    h = jnp.maximum(jnp.dot(h.astype(bf), w3.astype(bf),
                            preferred_element_type=f32) + b3, 0.0)
    return jnp.dot(h.astype(bf), w4.astype(bf), preferred_element_type=f32) + b4


if __name__ == "__main__":
    key = jax.random.PRNGKey(0)
    k_params, k_x = jax.random.split(key)
    params = init_params(k_params)

    # Small batch of CIFAR-like NCHW inputs: (B, 3, 32, 32).
    x = jax.random.normal(k_x, (2, 3, 32, 32), dtype=jnp.float32)

    out = mlp_fedcom_forward(x, params)
    out = jax.block_until_ready(out)
    assert out.shape == (2, 10), out.shape

    # Numerics-matched check (same bf16-operand / f32-accumulate math).
    ref_bf16 = reference_forward_bf16(x, params)
    assert jnp.allclose(out, ref_bf16, atol=5e-3, rtol=1e-2), \
        "mismatch vs bf16-matched reference"

    # Loose sanity check against the original f32 semantics (bf16 operand
    # rounding over 4 layers accounts for the widened tolerance).
    ref_f32 = reference_forward(x, params)
    assert jnp.allclose(out, ref_f32, atol=0.25, rtol=0.05), \
        "mismatch vs f32 reference"

    print("KERNEL_OK")
</pallas_src>

<mosaic_0001>
module attributes {stable_mosaic.version = 11 : i64} {
  func.func @mlp_fedcom_kernel(%arg0: i32, %arg1: memref<8x3072xbf16, #tpu.memory_space<vmem>>, %arg2: memref<3072x512xbf16, #tpu.memory_space<vmem>>, %arg3: memref<1x512xf32, #tpu.memory_space<vmem>>, %arg4: memref<512x512xbf16, #tpu.memory_space<vmem>>, %arg5: memref<1x512xf32, #tpu.memory_space<vmem>>, %arg6: memref<512x512xbf16, #tpu.memory_space<vmem>>, %arg7: memref<1x512xf32, #tpu.memory_space<vmem>>, %arg8: memref<512x128xbf16, #tpu.memory_space<vmem>>, %arg9: memref<1x128xf32, #tpu.memory_space<vmem>>, %arg10: memref<8x128xf32, #tpu.memory_space<vmem>>) attributes {dimension_semantics = [#tpu.dimension_semantics<parallel>], iteration_bounds = array<i64: 1>, scalar_prefetch = 0 : i64, scratch_operands = 0 : i64, tpu.core_type = #tpu.core_type<tc>, window_params = [{transform_indices = @transform_0, window_bounds = array<i64: 8, 3072>}, {pipeline_mode = #tpu.pipeline_mode<synchronous>, transform_indices = @transform_1, window_bounds = array<i64: 3072, 512>}, {pipeline_mode = #tpu.pipeline_mode<synchronous>, transform_indices = @transform_2, window_bounds = array<i64: 1, 512>}, {pipeline_mode = #tpu.pipeline_mode<synchronous>, transform_indices = @transform_3, window_bounds = array<i64: 512, 512>}, {pipeline_mode = #tpu.pipeline_mode<synchronous>, transform_indices = @transform_4, window_bounds = array<i64: 1, 512>}, {pipeline_mode = #tpu.pipeline_mode<synchronous>, transform_indices = @transform_5, window_bounds = array<i64: 512, 512>}, {pipeline_mode = #tpu.pipeline_mode<synchronous>, transform_indices = @transform_6, window_bounds = array<i64: 1, 512>}, {pipeline_mode = #tpu.pipeline_mode<synchronous>, transform_indices = @transform_7, window_bounds = array<i64: 512, 128>}, {pipeline_mode = #tpu.pipeline_mode<synchronous>, transform_indices = @transform_8, window_bounds = array<i64: 1, 128>}, {transform_indices = @transform_9, window_bounds = array<i64: 8, 128>}]} {
    %c0 = arith.constant 0 : index
    %c0_0 = arith.constant 0 : index
    %0 = vector.load %arg1[%c0, %c0_0] : memref<8x3072xbf16, #tpu.memory_space<vmem>>, vector<8x3072xbf16>
    %c0_1 = arith.constant 0 : index
    %c0_2 = arith.constant 0 : index
    %1 = vector.load %arg2[%c0_1, %c0_2] : memref<3072x512xbf16, #tpu.memory_space<vmem>>, vector<3072x512xbf16>
    %cst = arith.constant dense<0.000000e+00> : vector<8x512xf32>
    %2 = tpu.matmul %0, %1, %cst {dimension_numbers = #tpu.dot_dimension_numbers<[1], [0], [0], [1], [0, 0, 1, 1], [], []>} : vector<8x3072xbf16>, vector<3072x512xbf16>, vector<8x512xf32> -> vector<8x512xf32>
    %c0_3 = arith.constant 0 : index
    %c0_4 = arith.constant 0 : index
    %3 = vector.load %arg3[%c0_3, %c0_4] : memref<1x512xf32, #tpu.memory_space<vmem>>, vector<1x512xf32>
    %4 = vector.broadcast %3 : vector<1x512xf32> to vector<8x512xf32>
    %5 = arith.addf %2, %4 : vector<8x512xf32>
    %cst_5 = arith.constant 0.000000e+00 : f32
    %6 = vector.broadcast %cst_5 : f32 to vector<8x512xf32>
    %7 = arith.maximumf %5, %6 : vector<8x512xf32>
    %8 = arith.truncf %7 : vector<8x512xf32> to vector<8x512xbf16>
    %c0_6 = arith.constant 0 : index
    %c0_7 = arith.constant 0 : index
    %9 = vector.load %arg4[%c0_6, %c0_7] : memref<512x512xbf16, #tpu.memory_space<vmem>>, vector<512x512xbf16>
    %cst_8 = arith.constant dense<0.000000e+00> : vector<8x512xf32>
    %10 = tpu.matmul %8, %9, %cst_8 {dimension_numbers = #tpu.dot_dimension_numbers<[1], [0], [0], [1], [0, 0, 1, 1], [], []>} : vector<8x512xbf16>, vector<512x512xbf16>, vector<8x512xf32> -> vector<8x512xf32>
    %c0_9 = arith.constant 0 : index
    %c0_10 = arith.constant 0 : index
    %11 = vector.load %arg5[%c0_9, %c0_10] : memref<1x512xf32, #tpu.memory_space<vmem>>, vector<1x512xf32>
    %12 = vector.broadcast %11 : vector<1x512xf32> to vector<8x512xf32>
    %13 = arith.addf %10, %12 : vector<8x512xf32>
    %cst_11 = arith.constant 0.000000e+00 : f32
    %14 = vector.broadcast %cst_11 : f32 to vector<8x512xf32>
    %15 = arith.maximumf %13, %14 : vector<8x512xf32>
    %16 = arith.truncf %15 : vector<8x512xf32> to vector<8x512xbf16>
    %c0_12 = arith.constant 0 : index
    %c0_13 = arith.constant 0 : index
    %17 = vector.load %arg6[%c0_12, %c0_13] : memref<512x512xbf16, #tpu.memory_space<vmem>>, vector<512x512xbf16>
    %cst_14 = arith.constant dense<0.000000e+00> : vector<8x512xf32>
    %18 = tpu.matmul %16, %17, %cst_14 {dimension_numbers = #tpu.dot_dimension_numbers<[1], [0], [0], [1], [0, 0, 1, 1], [], []>} : vector<8x512xbf16>, vector<512x512xbf16>, vector<8x512xf32> -> vector<8x512xf32>
    %c0_15 = arith.constant 0 : index
    %c0_16 = arith.constant 0 : index
    %19 = vector.load %arg7[%c0_15, %c0_16] : memref<1x512xf32, #tpu.memory_space<vmem>>, vector<1x512xf32>
    %20 = vector.broadcast %19 : vector<1x512xf32> to vector<8x512xf32>
    %21 = arith.addf %18, %20 : vector<8x512xf32>
    %cst_17 = arith.constant 0.000000e+00 : f32
    %22 = vector.broadcast %cst_17 : f32 to vector<8x512xf32>
    %23 = arith.maximumf %21, %22 : vector<8x512xf32>
    %24 = arith.truncf %23 : vector<8x512xf32> to vector<8x512xbf16>
    %c0_18 = arith.constant 0 : index
    %c0_19 = arith.constant 0 : index
    %25 = vector.load %arg8[%c0_18, %c0_19] : memref<512x128xbf16, #tpu.memory_space<vmem>>, vector<512x128xbf16>
    %cst_20 = arith.constant dense<0.000000e+00> : vector<8x128xf32>
    %26 = tpu.matmul %24, %25, %cst_20 {dimension_numbers = #tpu.dot_dimension_numbers<[1], [0], [0], [1], [0, 0, 1, 1], [], []>} : vector<8x512xbf16>, vector<512x128xbf16>, vector<8x128xf32> -> vector<8x128xf32>
    %c0_21 = arith.constant 0 : index
    %c0_22 = arith.constant 0 : index
    %27 = vector.load %arg9[%c0_21, %c0_22] : memref<1x128xf32, #tpu.memory_space<vmem>>, vector<1x128xf32>
    %28 = vector.broadcast %27 : vector<1x128xf32> to vector<8x128xf32>
    %29 = arith.addf %26, %28 : vector<8x128xf32>
    %c0_23 = arith.constant 0 : index
    %c0_24 = arith.constant 0 : index
    %30 = vector.load %arg10[%c0_23, %c0_24] : memref<8x128xf32, #tpu.memory_space<vmem>>, vector<8x128xf32>
    tpu.vector_store %arg10[%c0_23, %c0_24], %29 {strides = array<i32>} : memref<8x128xf32, #tpu.memory_space<vmem>>, vector<8x128xf32>,
    return
  }
  func.func @transform_0(%arg0: i32) -> (i32, i32) {
    %c0_i32 = arith.constant 0 : i32
    %c0_i32_0 = arith.constant 0 : i32
    return %arg0, %c0_i32 : i32, i32
  }
  func.func @transform_1(%arg0: i32) -> (i32, i32) {
    %c0_i32 = arith.constant 0 : i32
    %c0_i32_0 = arith.constant 0 : i32
    %c0_i32_1 = arith.constant 0 : i32
    return %c0_i32, %c0_i32_0 : i32, i32
  }
  func.func @transform_2(%arg0: i32) -> (i32, i32) {
    %c0_i32 = arith.constant 0 : i32
    %c0_i32_0 = arith.constant 0 : i32
    %c0_i32_1 = arith.constant 0 : i32
    return %c0_i32, %c0_i32_0 : i32, i32
  }
  func.func @transform_3(%arg0: i32) -> (i32, i32) {
    %c0_i32 = arith.constant 0 : i32
    %c0_i32_0 = arith.constant 0 : i32
    %c0_i32_1 = arith.constant 0 : i32
    return %c0_i32, %c0_i32_0 : i32, i32
  }
  func.func @transform_4(%arg0: i32) -> (i32, i32) {
    %c0_i32 = arith.constant 0 : i32
    %c0_i32_0 = arith.constant 0 : i32
    %c0_i32_1 = arith.constant 0 : i32
    return %c0_i32, %c0_i32_0 : i32, i32
  }
  func.func @transform_5(%arg0: i32) -> (i32, i32) {
    %c0_i32 = arith.constant 0 : i32
    %c0_i32_0 = arith.constant 0 : i32
    %c0_i32_1 = arith.constant 0 : i32
    return %c0_i32, %c0_i32_0 : i32, i32
  }
  func.func @transform_6(%arg0: i32) -> (i32, i32) {
    %c0_i32 = arith.constant 0 : i32
    %c0_i32_0 = arith.constant 0 : i32
    %c0_i32_1 = arith.constant 0 : i32
    return %c0_i32, %c0_i32_0 : i32, i32
  }
  func.func @transform_7(%arg0: i32) -> (i32, i32) {
    %c0_i32 = arith.constant 0 : i32
    %c0_i32_0 = arith.constant 0 : i32
    %c0_i32_1 = arith.constant 0 : i32
    return %c0_i32, %c0_i32_0 : i32, i32
  }
  func.func @transform_8(%arg0: i32) -> (i32, i32) {
    %c0_i32 = arith.constant 0 : i32
    %c0_i32_0 = arith.constant 0 : i32
    %c0_i32_1 = arith.constant 0 : i32
    return %c0_i32, %c0_i32_0 : i32, i32
  }
  func.func @transform_9(%arg0: i32) -> (i32, i32) {
    %c0_i32 = arith.constant 0 : i32
    %c0_i32_0 = arith.constant 0 : i32
    return %arg0, %c0_i32 : i32, i32
  }
}

module attributes {stable_mosaic.version = 11 : i64} {
  func.func @mlp_fedcom_kernel(%arg0: i32, %arg1: memref<8x3072xbf16, #tpu.memory_space<vmem>>, %arg2: memref<3072x512xbf16, #tpu.memory_space<vmem>>, %arg3: memref<1x512xf32, #tpu.memory_space<vmem>>, %arg4: memref<512x512xbf16, #tpu.memory_space<vmem>>, %arg5: memref<1x512xf32, #tpu.memory_space<vmem>>, %arg6: memref<512x512xbf16, #tpu.memory_space<vmem>>, %arg7: memref<1x512xf32, #tpu.memory_space<vmem>>, %arg8: memref<512x128xbf16, #tpu.memory_space<vmem>>, %arg9: memref<1x128xf32, #tpu.memory_space<vmem>>, %arg10: memref<8x128xf32, #tpu.memory_space<vmem>>) attributes {dimension_semantics = [#tpu.dimension_semantics<parallel>], iteration_bounds = array<i64: 1>, scalar_prefetch = 0 : i64, scratch_operands = 0 : i64, tpu.core_type = #tpu.core_type<tc>, window_params = [{transform_indices = @transform_0, window_bounds = array<i64: 8, 3072>}, {pipeline_mode = #tpu.pipeline_mode<synchronous>, transform_indices = @transform_1, window_bounds = array<i64: 3072, 512>}, {pipeline_mode = #tpu.pipeline_mode<synchronous>, transform_indices = @transform_2, window_bounds = array<i64: 1, 512>}, {pipeline_mode = #tpu.pipeline_mode<synchronous>, transform_indices = @transform_3, window_bounds = array<i64: 512, 512>}, {pipeline_mode = #tpu.pipeline_mode<synchronous>, transform_indices = @transform_4, window_bounds = array<i64: 1, 512>}, {pipeline_mode = #tpu.pipeline_mode<synchronous>, transform_indices = @transform_5, window_bounds = array<i64: 512, 512>}, {pipeline_mode = #tpu.pipeline_mode<synchronous>, transform_indices = @transform_6, window_bounds = array<i64: 1, 512>}, {pipeline_mode = #tpu.pipeline_mode<synchronous>, transform_indices = @transform_7, window_bounds = array<i64: 512, 128>}, {pipeline_mode = #tpu.pipeline_mode<synchronous>, transform_indices = @transform_8, window_bounds = array<i64: 1, 128>}, {transform_indices = @transform_9, window_bounds = array<i64: 8, 128>}]} {
    %c0 = arith.constant 0 : index
    %c0_0 = arith.constant 0 : index
    %0 = vector.load %arg1[%c0, %c0_0] : memref<8x3072xbf16, #tpu.memory_space<vmem>>, vector<8x3072xbf16>
    %c0_1 = arith.constant 0 : index
    %c0_2 = arith.constant 0 : index
    %1 = vector.load %arg2[%c0_1, %c0_2] : memref<3072x512xbf16, #tpu.memory_space<vmem>>, vector<3072x512xbf16>
    %cst = arith.constant dense<0.000000e+00> : vector<8x512xf32>
    %2 = tpu.matmul %0, %1, %cst {dimension_numbers = #tpu.dot_dimension_numbers<[1], [0], [0], [1], [0, 0, 1, 1], [], []>} : vector<8x3072xbf16>, vector<3072x512xbf16>, vector<8x512xf32> -> vector<8x512xf32>
    %c0_3 = arith.constant 0 : index
    %c0_4 = arith.constant 0 : index
    %3 = vector.load %arg3[%c0_3, %c0_4] : memref<1x512xf32, #tpu.memory_space<vmem>>, vector<1x512xf32>
    %4 = vector.broadcast %3 : vector<1x512xf32> to vector<8x512xf32>
    %5 = arith.addf %2, %4 : vector<8x512xf32>
    %cst_5 = arith.constant 0.000000e+00 : f32
    %6 = vector.broadcast %cst_5 : f32 to vector<8x512xf32>
    %7 = arith.maximumf %5, %6 : vector<8x512xf32>
    %8 = arith.truncf %7 : vector<8x512xf32> to vector<8x512xbf16>
    %c0_6 = arith.constant 0 : index
    %c0_7 = arith.constant 0 : index
    %9 = vector.load %arg4[%c0_6, %c0_7] : memref<512x512xbf16, #tpu.memory_space<vmem>>, vector<512x512xbf16>
    %cst_8 = arith.constant dense<0.000000e+00> : vector<8x512xf32>
    %10 = tpu.matmul %8, %9, %cst_8 {dimension_numbers = #tpu.dot_dimension_numbers<[1], [0], [0], [1], [0, 0, 1, 1], [], []>} : vector<8x512xbf16>, vector<512x512xbf16>, vector<8x512xf32> -> vector<8x512xf32>
    %c0_9 = arith.constant 0 : index
    %c0_10 = arith.constant 0 : index
    %11 = vector.load %arg5[%c0_9, %c0_10] : memref<1x512xf32, #tpu.memory_space<vmem>>, vector<1x512xf32>
    %12 = vector.broadcast %11 : vector<1x512xf32> to vector<8x512xf32>
    %13 = arith.addf %10, %12 : vector<8x512xf32>
    %cst_11 = arith.constant 0.000000e+00 : f32
    %14 = vector.broadcast %cst_11 : f32 to vector<8x512xf32>
    %15 = arith.maximumf %13, %14 : vector<8x512xf32>
    %16 = arith.truncf %15 : vector<8x512xf32> to vector<8x512xbf16>
    %c0_12 = arith.constant 0 : index
    %c0_13 = arith.constant 0 : index
    %17 = vector.load %arg6[%c0_12, %c0_13] : memref<512x512xbf16, #tpu.memory_space<vmem>>, vector<512x512xbf16>
    %cst_14 = arith.constant dense<0.000000e+00> : vector<8x512xf32>
    %18 = tpu.matmul %16, %17, %cst_14 {dimension_numbers = #tpu.dot_dimension_numbers<[1], [0], [0], [1], [0, 0, 1, 1], [], []>} : vector<8x512xbf16>, vector<512x512xbf16>, vector<8x512xf32> -> vector<8x512xf32>
    %c0_15 = arith.constant 0 : index
    %c0_16 = arith.constant 0 : index
    %19 = vector.load %arg7[%c0_15, %c0_16] : memref<1x512xf32, #tpu.memory_space<vmem>>, vector<1x512xf32>
    %20 = vector.broadcast %19 : vector<1x512xf32> to vector<8x512xf32>
    %21 = arith.addf %18, %20 : vector<8x512xf32>
    %cst_17 = arith.constant 0.000000e+00 : f32
    %22 = vector.broadcast %cst_17 : f32 to vector<8x512xf32>
    %23 = arith.maximumf %21, %22 : vector<8x512xf32>
    %24 = arith.truncf %23 : vector<8x512xf32> to vector<8x512xbf16>
    %c0_18 = arith.constant 0 : index
    %c0_19 = arith.constant 0 : index
    %25 = vector.load %arg8[%c0_18, %c0_19] : memref<512x128xbf16, #tpu.memory_space<vmem>>, vector<512x128xbf16>
    %cst_20 = arith.constant dense<0.000000e+00> : vector<8x128xf32>
    %26 = tpu.matmul %24, %25, %cst_20 {dimension_numbers = #tpu.dot_dimension_numbers<[1], [0], [0], [1], [0, 0, 1, 1], [], []>} : vector<8x512xbf16>, vector<512x128xbf16>, vector<8x128xf32> -> vector<8x128xf32>
    %c0_21 = arith.constant 0 : index
    %c0_22 = arith.constant 0 : index
    %27 = vector.load %arg9[%c0_21, %c0_22] : memref<1x128xf32, #tpu.memory_space<vmem>>, vector<1x128xf32>
    %28 = vector.broadcast %27 : vector<1x128xf32> to vector<8x128xf32>
    %29 = arith.addf %26, %28 : vector<8x128xf32>
    %c0_23 = arith.constant 0 : index
    %c0_24 = arith.constant 0 : index
    %30 = vector.load %arg10[%c0_23, %c0_24] : memref<8x128xf32, #tpu.memory_space<vmem>>, vector<8x128xf32>
    tpu.vector_store %arg10[%c0_23, %c0_24], %29 {strides = array<i32>} : memref<8x128xf32, #tpu.memory_space<vmem>>, vector<8x128xf32>,
    return
  }
  func.func @transform_0(%arg0: i32) -> (i32, i32) {
    %c0_i32 = arith.constant 0 : i32
    %c0_i32_0 = arith.constant 0 : i32
    return %arg0, %c0_i32 : i32, i32
  }
  func.func @transform_1(%arg0: i32) -> (i32, i32) {
    %c0_i32 = arith.constant 0 : i32
    %c0_i32_0 = arith.constant 0 : i32
    %c0_i32_1 = arith.constant 0 : i32
    return %c0_i32, %c0_i32_0 : i32, i32
  }
  func.func @transform_2(%arg0: i32) -> (i32, i32) {
    %c0_i32 = arith.constant 0 : i32
    %c0_i32_0 = arith.constant 0 : i32
    %c0_i32_1 = arith.constant 0 : i32
    return %c0_i32, %c0_i32_0 : i32, i32
  }
  func.func @transform_3(%arg0: i32) -> (i32, i32) {
    %c0_i32 = arith.constant 0 : i32
    %c0_i32_0 = arith.constant 0 : i32
    %c0_i32_1 = arith.constant 0 : i32
    return %c0_i32, %c0_i32_0 : i32, i32
  }
  func.func @transform_4(%arg0: i32) -> (i32, i32) {
    %c0_i32 = arith.constant 0 : i32
    %c0_i32_0 = arith.constant 0 : i32
    %c0_i32_1 = arith.constant 0 : i32
    return %c0_i32, %c0_i32_0 : i32, i32
  }
  func.func @transform_5(%arg0: i32) -> (i32, i32) {
    %c0_i32 = arith.constant 0 : i32
    %c0_i32_0 = arith.constant 0 : i32
    %c0_i32_1 = arith.constant 0 : i32
    return %c0_i32, %c0_i32_0 : i32, i32
  }
  func.func @transform_6(%arg0: i32) -> (i32, i32) {
    %c0_i32 = arith.constant 0 : i32
    %c0_i32_0 = arith.constant 0 : i32
    %c0_i32_1 = arith.constant 0 : i32
    return %c0_i32, %c0_i32_0 : i32, i32
  }
  func.func @transform_7(%arg0: i32) -> (i32, i32) {
    %c0_i32 = arith.constant 0 : i32
    %c0_i32_0 = arith.constant 0 : i32
    %c0_i32_1 = arith.constant 0 : i32
    return %c0_i32, %c0_i32_0 : i32, i32
  }
  func.func @transform_8(%arg0: i32) -> (i32, i32) {
    %c0_i32 = arith.constant 0 : i32
    %c0_i32_0 = arith.constant 0 : i32
    %c0_i32_1 = arith.constant 0 : i32
    return %c0_i32, %c0_i32_0 : i32, i32
  }
  func.func @transform_9(%arg0: i32) -> (i32, i32) {
    %c0_i32 = arith.constant 0 : i32
    %c0_i32_0 = arith.constant 0 : i32
    return %arg0, %c0_i32 : i32, i32
  }
}

</mosaic_0001>

<bundles_post_ra>
// kernel: tpu_custom_call.1
= control target key start
LH: loop header
LB: loop body
LE: loop exit
PB: predicated region body
PF: predicated region fallthrough
CT: control target
= control target key end

     0   :  { %14 = vsyncpa [#allocation3], 0  ;;  %s11533_s0 = inlined_call_operand.hbm [shape: bf16[8,3072], index: 0, kind: input, shape index: {}]   ;;  %s11534_s1 = inlined_call_operand.hbm [shape: bf16[3072,512], index: 1, kind: input, shape index: {}]   ;;  %s11535_s2 = inlined_call_operand.hbm [shape: f32[1,512], index: 2, kind: input, shape index: {}]   ;;  %s11536_s3 = inlined_call_operand.hbm [shape: bf16[512,512], index: 3, kind: input, shape index: {}]   ;;  %s11537_s4 = inlined_call_operand.hbm [shape: f32[1,512], index: 4, kind: input, shape index: {}]   ;;  %s11538_s5 = inlined_call_operand.hbm [shape: bf16[512,512], index: 5, kind: input, shape index: {}]   ;;  %s11539_s6 = inlined_call_operand.hbm [shape: f32[1,512], index: 6, kind: input, shape index: {}]   ;;  %s11540_s7 = inlined_call_operand.hbm [shape: bf16[512,128], index: 7, kind: input, shape index: {}]   ;;  %s11541_s8 = inlined_call_operand.hbm [shape: f32[1,128], index: 8, kind: input, shape index: {}]   ;;  %s11542_s9 = inlined_call_operand.hbm [shape: f32[8,128], index: 9, kind: output, shape index: {}]  }
   0x1   :  { %15 = vsyncpa [#allocation6], 0 }
   0x2   :  { %16 = vsyncpa [#allocation9], 0 }
   0x3   :  { %17 = vsyncpa [#allocation12], 0 }
   0x4   :  { %18 = vsyncpa [#allocation15], 0 }
   0x5   :  { %19 = vsyncpa [#allocation4], 0  ;;  %s11230_s30 = smov [#allocation5]   ;;  %s10998_s13 = scalar_lea.hbm %s11534_s1, 98304 }
   0x6   :  { %s35_s10 = sshll.u32 %s11230_s30, 4  ;;  %p10999_p0 = scmp.ne.s32.totalorder %s11534_s1, %s10998_s13  ;;  %s36_s10 = int_to_ptr.vmem [resolvable:$true] %s35_s10 }
   0x7   :  { %p11002_p1 = scmp.lt.u32.totalorder %s10998_s13, %s11534_s1 }
   0x9   :  { %p11004_p2 = pnand %p11002_p1, %p10999_p0 }
   0xb   :  { %11007 = shalt.err (!%p11004_p2)
}
   0xc   :  { %s11008_s18 = scalar_lea.vmem %s36_s10, 98304  ;;  %p11013_p4 = scmp.lt.s32.totalorder %s36_s10, %s36_s10 }
   0xd   :  { %p11009_p3 = scmp.ne.s32.totalorder %s36_s10, %s11008_s18  ;;  %p11014_p5 = scmp.lt.s32.totalorder %s11008_s18, %s11008_s18 }
   0xf   :  { %p11015_p6 = por %p11014_p5, %p11013_p4 }
  0x11   :  { %p11016_p7 = pnand %p11015_p6, %p11009_p3 }
  0x13   :  { %11019 = shalt.err (!%p11016_p7)
}
  0x14   :  { %s11231_s19 = smov 256   ;;  %s11232_s20 = smov 16  }
  0x15   :  { %41 = dma.hbm_to_vmem [thread:$0]  %s11534_s1, 98304, %s36_s10, [#allocation6], %s11231_s19, %s11231_s19, %s11232_s20  }
  0x16   :  { %s11233_s23 = smov [#allocation8]   ;;  %s11234_s25 = smov [#allocation11]  }
  0x17   :  { %s57_s24 = sshll.u32 %s11233_s23, 4  ;;  %s79_s26 = sshll.u32 %s11234_s25, 4  ;;  %s58_s24 = int_to_ptr.vmem [resolvable:$true] %s57_s24  ;;  %s80_s26 = int_to_ptr.vmem [resolvable:$true] %s79_s26 }
  0x18   :  { %s11020_s29 = scalar_lea.hbm %s11536_s3, 16384 }
  0x19   :  { %p11021_p8 = scmp.ne.s32.totalorder %s11536_s3, %s11020_s29  ;;  %p11024_p9 = scmp.lt.u32.totalorder %s11020_s29, %s11536_s3 }
  0x1b   :  { %p11026_p10 = pnand %p11024_p9, %p11021_p8 }
  0x1d   :  { %11029 = shalt.err (!%p11026_p10)
}
  0x1e   :  { %s11030_s1 = scalar_lea.vmem %s58_s24, 16384  ;;  %p11035_p12 = scmp.lt.s32.totalorder %s58_s24, %s58_s24 }
  0x1f   :  { %p11031_p11 = scmp.ne.s32.totalorder %s58_s24, %s11030_s1  ;;  %p11036_p13 = scmp.lt.s32.totalorder %s11030_s1, %s11030_s1 }
  0x21   :  { %p11037_p0 = por %p11036_p13, %p11035_p12 }
  0x23   :  { %p11038_p1 = pnand %p11037_p0, %p11031_p11 }
  0x25   :  { %11041 = shalt.err (!%p11038_p1)
}
  0x26   :  { %63 = dma.hbm_to_vmem [thread:$0]  %s11536_s3, 16384, %s58_s24, [#allocation9], %s11231_s19, %s11231_s19, %s11232_s20  }
  0x27   :  { %s11042_s17 = scalar_lea.hbm %s11538_s5, 16384 }
  0x28   :  { %p11043_p2 = scmp.ne.s32.totalorder %s11538_s5, %s11042_s17  ;;  %p11046_p3 = scmp.lt.u32.totalorder %s11042_s17, %s11538_s5 }
  0x2a   :  { %p11048_p4 = pnand %p11046_p3, %p11043_p2 }
  0x2c   :  { %11051 = shalt.err (!%p11048_p4)
}
  0x2d   :  { %s11052_s25 = scalar_lea.vmem %s80_s26, 16384  ;;  %p11057_p6 = scmp.lt.s32.totalorder %s80_s26, %s80_s26 }
  0x2e   :  { %p11053_p5 = scmp.ne.s32.totalorder %s80_s26, %s11052_s25  ;;  %p11058_p7 = scmp.lt.s32.totalorder %s11052_s25, %s11052_s25 }
  0x30   :  { %p11059_p8 = por %p11058_p7, %p11057_p6 }
  0x32   :  { %p11060_p9 = pnand %p11059_p8, %p11053_p5 }
  0x34   :  { %11063 = shalt.err (!%p11060_p9)
}
  0x35   :  { %85 = dma.hbm_to_vmem [thread:$0]  %s11538_s5, 16384, %s80_s26, [#allocation12], %s11231_s19, %s11231_s19, %s11232_s20  }
  0x36   :  { %s11235_s27 = smov [#allocation14]   ;;  %s11064_s11 = scalar_lea.hbm %s11540_s7, 4096 }
  0x37   :  { %s101_s28 = sshll.u32 %s11235_s27, 4  ;;  %p11065_p10 = scmp.ne.s32.totalorder %s11540_s7, %s11064_s11  ;;  %s102_s28 = int_to_ptr.vmem [resolvable:$true] %s101_s28 }
  0x38   :  { %p11068_p11 = scmp.lt.u32.totalorder %s11064_s11, %s11540_s7 }
  0x3a   :  { %p11070_p12 = pnand %p11068_p11, %p11065_p10 }
  0x3c   :  { %11073 = shalt.err (!%p11070_p12)
}
  0x3d   :  { %s11074_s14 = scalar_lea.vmem %s102_s28, 4096  ;;  %p11079_p0 = scmp.lt.s32.totalorder %s102_s28, %s102_s28 }
  0x3e   :  { %p11075_p13 = scmp.ne.s32.totalorder %s102_s28, %s11074_s14  ;;  %p11080_p1 = scmp.lt.s32.totalorder %s11074_s14, %s11074_s14 }
  0x40   :  { %p11081_p2 = por %p11080_p1, %p11079_p0 }
  0x42   :  { %p11082_p3 = pnand %p11081_p2, %p11075_p13 }
  0x44   :  { %11085 = shalt.err (!%p11082_p3)
}
  0x45   :  { %s11236_s5 = smov 64   ;;  %s11237_s19 = smov 4  }
  0x46   :  { %107 = dma.hbm_to_vmem [thread:$0]  %s11540_s7, 4096, %s102_s28, [#allocation15], %s11236_s5, %s11236_s5, %s11237_s19  }
  0x47   :  { %s11238_s15 = smov [#allocation2]   ;;  %s11239_s17 = smov [#allocation7]  }
  0x48   :  { %s26_s16 = sshll.u32 %s11238_s15, 4  ;;  %s48_s18 = sshll.u32 %s11239_s17, 4  ;;  %s27_s16 = int_to_ptr.vmem [resolvable:$true] %s26_s16  ;;  %s49_s18 = int_to_ptr.vmem [resolvable:$true] %s48_s18 }
  0x49   :  { %s11086_s23 = scalar_lea.hbm %s11533_s0, 1536 }
  0x4a   :  { %p11087_p4 = scmp.ne.s32.totalorder %s11533_s0, %s11086_s23  ;;  %p11090_p5 = scmp.lt.u32.totalorder %s11086_s23, %s11533_s0 }
  0x4c   :  { %p11092_p6 = pnand %p11090_p5, %p11087_p4 }
  0x4e   :  { %11095 = shalt.err (!%p11092_p6)
}
  0x4f   :  { %s11096_s7 = scalar_lea.vmem %s27_s16, 1536  ;;  %p11101_p8 = scmp.lt.s32.totalorder %s27_s16, %s27_s16 }
  0x50   :  { %p11097_p7 = scmp.ne.s32.totalorder %s27_s16, %s11096_s7  ;;  %p11102_p9 = scmp.lt.s32.totalorder %s11096_s7, %s11096_s7 }
  0x52   :  { %p11103_p10 = por %p11102_p9, %p11101_p8 }
  0x54   :  { %p11104_p11 = pnand %p11103_p10, %p11097_p7 }
  0x56   :  { %11107 = shalt.err (!%p11104_p11)
}
  0x57   :  { %29 = dma.hbm_to_vmem [thread:$0]  %s11533_s0, 1536, %s27_s16, [#allocation3]  }
  0x58   :  { %s11108_s12 = scalar_lea.hbm %s11535_s2, 64 }
  0x59   :  { %p11109_p12 = scmp.ne.s32.totalorder %s11535_s2, %s11108_s12  ;;  %p11112_p13 = scmp.lt.u32.totalorder %s11108_s12, %s11535_s2 }
  0x5b   :  { %p11114_p0 = pnand %p11112_p13, %p11109_p12 }
  0x5d   :  { %11117 = shalt.err (!%p11114_p0)
}
  0x5e   :  { %s11118_s5 = scalar_lea.vmem %s49_s18, 64  ;;  %p11123_p2 = scmp.lt.s32.totalorder %s49_s18, %s49_s18 }
  0x5f   :  { %p11119_p1 = scmp.ne.s32.totalorder %s49_s18, %s11118_s5  ;;  %p11124_p3 = scmp.lt.s32.totalorder %s11118_s5, %s11118_s5 }
  0x61   :  { %p11125_p4 = por %p11124_p3, %p11123_p2 }
  0x63   :  { %p11126_p5 = pnand %p11125_p4, %p11119_p1 }
  0x65   :  { %11129 = shalt.err (!%p11126_p5)
}
  0x66   :  { %51 = dma.hbm_to_vmem [thread:$0]  %s11535_s2, 64, %s49_s18, [#allocation6]  }
  0x67   :  { %s11240_s20 = smov [#allocation10]   ;;  %s11241_s15 = smov [#allocation13]  }
  0x68   :  { %s70_s26 = sshll.u32 %s11240_s20, 4  ;;  %s92_s16 = sshll.u32 %s11241_s15, 4  ;;  %s71_s26 = int_to_ptr.vmem [resolvable:$true] %s70_s26  ;;  %s93_s16 = int_to_ptr.vmem [resolvable:$true] %s92_s16 }
  0x69   :  { %s11130_s22 = scalar_lea.hbm %s11537_s4, 64 }
  0x6a   :  { %p11131_p6 = scmp.ne.s32.totalorder %s11537_s4, %s11130_s22  ;;  %p11134_p7 = scmp.lt.u32.totalorder %s11130_s22, %s11537_s4 }
  0x6c   :  { %p11136_p8 = pnand %p11134_p7, %p11131_p6 }
  0x6e   :  { %11139 = shalt.err (!%p11136_p8)
}
  0x6f   :  { %s11140_s2 = scalar_lea.vmem %s71_s26, 64  ;;  %p11145_p10 = scmp.lt.s32.totalorder %s71_s26, %s71_s26 }
  0x70   :  { %p11141_p9 = scmp.ne.s32.totalorder %s71_s26, %s11140_s2  ;;  %p11146_p11 = scmp.lt.s32.totalorder %s11140_s2, %s11140_s2 }
  0x72   :  { %p11147_p12 = por %p11146_p11, %p11145_p10 }
  0x74   :  { %p11148_p13 = pnand %p11147_p12, %p11141_p9 }
  0x76   :  { %11151 = shalt.err (!%p11148_p13)
}
  0x77   :  { %73 = dma.hbm_to_vmem [thread:$0]  %s11537_s4, 64, %s71_s26, [#allocation9]  }
  0x78   :  { %s11152_s29 = scalar_lea.hbm %s11539_s6, 64 }
  0x79   :  { %p11153_p0 = scmp.ne.s32.totalorder %s11539_s6, %s11152_s29  ;;  %p11156_p1 = scmp.lt.u32.totalorder %s11152_s29, %s11539_s6 }
  0x7b   :  { %p11158_p2 = pnand %p11156_p1, %p11153_p0 }
  0x7d   :  { %11161 = shalt.err (!%p11158_p2)
}
  0x7e   :  { %s11162_s1 = scalar_lea.vmem %s93_s16, 64  ;;  %p11167_p4 = scmp.lt.s32.totalorder %s93_s16, %s93_s16 }
  0x7f   :  { %p11163_p3 = scmp.ne.s32.totalorder %s93_s16, %s11162_s1  ;;  %p11168_p5 = scmp.lt.s32.totalorder %s11162_s1, %s11162_s1 }
  0x81   :  { %p11169_p6 = por %p11168_p5, %p11167_p4 }
  0x83   :  { %p11170_p7 = pnand %p11169_p6, %p11163_p3 }
  0x85   :  { %11173 = shalt.err (!%p11170_p7)
}
  0x86   :  { %95 = dma.hbm_to_vmem [thread:$0]  %s11539_s6, 64, %s93_s16, [#allocation12]  }
  0x87   :  { %s11242_s14 = smov [#allocation16]   ;;  %s11174_s20 = scalar_lea.hbm %s11541_s8, 16 }
  0x88   :  { %s114_s5 = sshll.u32 %s11242_s14, 4  ;;  %p11175_p8 = scmp.ne.s32.totalorder %s11541_s8, %s11174_s20  ;;  %s115_s5 = int_to_ptr.vmem [resolvable:$true] %s114_s5 }
  0x89   :  { %p11178_p9 = scmp.lt.u32.totalorder %s11174_s20, %s11541_s8 }
  0x8b   :  { %p11180_p10 = pnand %p11178_p9, %p11175_p8 }
  0x8d   :  { %11183 = shalt.err (!%p11180_p10)
}
  0x8e   :  { %s11184_s22 = scalar_lea.vmem %s115_s5, 16  ;;  %s11188_s6 = scalar_lea.vmem %s115_s5, 32 }
  0x8f   :  { %p11185_p11 = scmp.ne.s32.totalorder %s115_s5, %s11184_s22  ;;  %p11189_p12 = scmp.lt.s32.totalorder %s115_s5, %s115_s5 }
  0x90   :  { %p11190_p13 = scmp.lt.s32.totalorder %s11188_s6, %s11184_s22 }
  0x92   :  { %p11191_p0 = por %p11190_p13, %p11189_p12 }
  0x94   :  { %p11192_p1 = pnand %p11191_p0, %p11185_p11 }
  0x96   :  { %11195 = shalt.err (!%p11192_p1)
}
  0x97   :  { %117 = dma.hbm_to_vmem [thread:$0]  %s11541_s8, 16, %s115_s5, [#allocation15]  }
  0x98   :  { %11218 = dma.done.wait [#allocation3], 1536  }
  0x99   :  { %11219 = vsyncadd [#allocation3], 4294965760 }
  0x9a   :  { %11220 = dma.done.wait [#allocation6], 98368  }
  0x9b   :  { %11221 = vsyncadd [#allocation6], 4294868928 }
  0x9c   :  { %11222 = dma.done.wait [#allocation9], 16448  }
  0x9d   :  { %11223 = vsyncadd [#allocation9], 4294950848 }
  0x9e   :  { %11224 = dma.done.wait [#allocation12], 16448  }
  0x9f   :  { %11225 = vsyncadd [#allocation12], 4294950848 }
  0xa0   :  { %11226 = dma.done.wait [#allocation15], 4112  }
  0xa1   :  { %11227 = vsyncadd [#allocation15], 4294963184  ;;  %v9406_v0 = vld [vmem:[#allocation5 + $0x4] ss:$16 sps:$4 sm:$0xff]   ;;  %v9408_v1 = vld [vmem:[#allocation5 + $0xc] ss:$16 sps:$4 sm:$0xff]  }
  0xa2   :  { %4872 = vmatprep.subr.bf16.mxu0 %v9406_v0  ;;  %v9410_v2 = vld [vmem:[#allocation5] ss:$16 sps:$4 sm:$0xff]   ;;  %v9411_v3 = vld [vmem:[#allocation5 + $0x8] ss:$16 sps:$4 sm:$0xff]   ;;  %5364 = vmatprep.subr.bf16.mxu1 %v9408_v1  ;;  %v9412_v4 = vld [vmem:[#allocation5 + $0x24] ss:$16 sps:$4 sm:$0xff]  }
  0xa3   :  { %4873 = vmatpush1.bf16.msra.mxu0 %v9410_v2  ;;  %5365 = vmatpush1.bf16.msra.mxu1 %v9411_v3  ;;  %v9414_v5 = vld [vmem:[#allocation5 + $0x2c] ss:$16 sps:$4 sm:$0xff]   ;;  %v9416_v6 = vld [vmem:[#allocation5 + $0x20] ss:$16 sps:$4 sm:$0xff]   ;;  %v9417_v7 = vld [vmem:[#allocation5 + $0x28] ss:$16 sps:$4 sm:$0xff]  }
  0xa4   :  { %4874 = vmatprep.subr.bf16.mxu0 %v9412_v4  ;;  %5366 = vmatprep.subr.bf16.mxu1 %v9414_v5  ;;  %v9418_v8 = vld [vmem:[#allocation5 + $0x44] ss:$16 sps:$4 sm:$0xff]   ;;  %v9420_v9 = vld [vmem:[#allocation5 + $0x4c] ss:$16 sps:$4 sm:$0xff]   ;;  %v9422_v10 = vld [vmem:[#allocation5 + $0x40] ss:$16 sps:$4 sm:$0xff]  }
  0xa5   :  { %v9423_v11 = vld [vmem:[#allocation5 + $0x48] ss:$16 sps:$4 sm:$0xff]   ;;  %v9424_v12 = vld [vmem:[#allocation5 + $0x64] ss:$16 sps:$4 sm:$0xff]   ;;  %v9426_v13 = vld [vmem:[#allocation5 + $0x6c] ss:$16 sps:$4 sm:$0xff]  }
  0xa6   :  { %v9428_v14 = vld [vmem:[#allocation5 + $0x60] ss:$16 sps:$4 sm:$0xff]   ;;  %v9429_v15 = vld [vmem:[#allocation5 + $0x68] ss:$16 sps:$4 sm:$0xff]   ;;  %v9430_v16 = vld [vmem:[#allocation5 + $0x84] ss:$16 sps:$4 sm:$0xff]  }
  0xa7   :  { %4875 = vmatpush1.bf16.msra.mxu0 %v9416_v6  ;;  %5367 = vmatpush1.bf16.msra.mxu1 %v9417_v7  ;;  %v9432_v17 = vld [vmem:[#allocation5 + $0x8c] ss:$16 sps:$4 sm:$0xff]   ;;  %v9434_v18 = vld [vmem:[#allocation5 + $0x80] ss:$16 sps:$4 sm:$0xff]   ;;  %v9435_v19 = vld [vmem:[#allocation5 + $0x88] ss:$16 sps:$4 sm:$0xff]  }
  0xa8   :  { %4876 = vmatprep.subr.bf16.mxu0 %v9418_v8  ;;  %5368 = vmatprep.subr.bf16.mxu1 %v9420_v9  ;;  %v9436_v20 = vld [vmem:[#allocation5 + $0xa4] ss:$16 sps:$4 sm:$0xff]   ;;  %v9438_v21 = vld [vmem:[#allocation5 + $0xac] ss:$16 sps:$4 sm:$0xff]   ;;  %v9440_v22 = vld [vmem:[#allocation5 + $0xa0] ss:$16 sps:$4 sm:$0xff]  }
  0xa9   :  { %v9441_v23 = vld [vmem:[#allocation5 + $0xa8] ss:$16 sps:$4 sm:$0xff]   ;;  %v9442_v24 = vld [vmem:[#allocation5 + $0xc4] ss:$16 sps:$4 sm:$0xff]   ;;  %v9444_v25 = vld [vmem:[#allocation5 + $0xcc] ss:$16 sps:$4 sm:$0xff]  }
  0xaa   :  { %v9446_v26 = vld [vmem:[#allocation5 + $0xc0] ss:$16 sps:$4 sm:$0xff]   ;;  %v9447_v27 = vld [vmem:[#allocation5 + $0xc8] ss:$16 sps:$4 sm:$0xff]   ;;  %v9448_v28 = vld [vmem:[#allocation5 + $0xe4] ss:$16 sps:$4 sm:$0xff]  }
  0xab   :  { %4877 = vmatpush1.bf16.msra.mxu0 %v9422_v10  ;;  %5369 = vmatpush1.bf16.msra.mxu1 %v9423_v11  ;;  %v9450_v29 = vld [vmem:[#allocation5 + $0xec] ss:$16 sps:$4 sm:$0xff]   ;;  %v9452_v30 = vld [vmem:[#allocation5 + $0xe0] ss:$16 sps:$4 sm:$0xff]   ;;  %v9453_v31 = vld [vmem:[#allocation5 + $0xe8] ss:$16 sps:$4 sm:$0xff]  }
  0xac   :  { %4878 = vmatprep.subr.bf16.mxu0 %v9424_v12  ;;  %5370 = vmatprep.subr.bf16.mxu1 %v9426_v13  ;;  %v9454_v32 = vld [vmem:[#allocation5 + $0x104] ss:$16 sps:$4 sm:$0xff]   ;;  %v9456_v33 = vld [vmem:[#allocation5 + $0x10c] ss:$16 sps:$4 sm:$0xff]   ;;  %v9458_v34 = vld [vmem:[#allocation5 + $0x100] ss:$16 sps:$4 sm:$0xff]  }
  0xad   :  { %v9459_v35 = vld [vmem:[#allocation5 + $0x108] ss:$16 sps:$4 sm:$0xff]   ;;  %v9460_v36 = vld [vmem:[#allocation5 + $0x124] ss:$16 sps:$4 sm:$0xff]   ;;  %v9462_v37 = vld [vmem:[#allocation5 + $0x12c] ss:$16 sps:$4 sm:$0xff]  }
  0xae   :  { %v9464_v38 = vld [vmem:[#allocation5 + $0x120] ss:$16 sps:$4 sm:$0xff]   ;;  %v9465_v39 = vld [vmem:[#allocation5 + $0x128] ss:$16 sps:$4 sm:$0xff]   ;;  %v9466_v40 = vld [vmem:[#allocation5 + $0x144] ss:$16 sps:$4 sm:$0xff]  }
  0xaf   :  { %4879 = vmatpush1.bf16.msra.mxu0 %v9428_v14  ;;  %5371 = vmatpush1.bf16.msra.mxu1 %v9429_v15  ;;  %v9468_v41 = vld [vmem:[#allocation5 + $0x14c] ss:$16 sps:$4 sm:$0xff]   ;;  %v9470_v42 = vld [vmem:[#allocation5 + $0x140] ss:$16 sps:$4 sm:$0xff]   ;;  %v9471_v43 = vld [vmem:[#allocation5 + $0x148] ss:$16 sps:$4 sm:$0xff]  }
  0xb0   :  { %4880 = vmatprep.subr.bf16.mxu0 %v9430_v16  ;;  %5372 = vmatprep.subr.bf16.mxu1 %v9432_v17  ;;  %v9472_v44 = vld [vmem:[#allocation5 + $0x164] ss:$16 sps:$4 sm:$0xff]   ;;  %v9474_v45 = vld [vmem:[#allocation5 + $0x16c] ss:$16 sps:$4 sm:$0xff]   ;;  %v9476_v47 = vld [vmem:[#allocation5 + $0x160] ss:$16 sps:$4 sm:$0xff]  }
  0xb1   :  { %v146_v46 = vld [vmem:[#allocation2] sm:$0xff]  ;;  %v9477_v49 = vld [vmem:[#allocation5 + $0x168] ss:$16 sps:$4 sm:$0xff]   ;;  %v9480_v51 = vld [vmem:[#allocation5 + $0x18c] ss:$16 sps:$4 sm:$0xff]   ;;  %s11243_s8 = smov [#allocation17]  }
  0xb2   :  { %v8152_v48 = vcombine.high %v146_v46, %v146_v46  ;;  %v9478_v50 = vld [vmem:[#allocation5 + $0x184] ss:$16 sps:$4 sm:$0xff]   ;;  %v9482_v52 = vld [vmem:[#allocation5 + $0x180] ss:$16 sps:$4 sm:$0xff]   ;;  %v9483_v53 = vld [vmem:[#allocation5 + $0x188] ss:$16 sps:$4 sm:$0xff]   ;;  %v8151_v4 = vcombine.low %v146_v46, %v146_v46 }
  0xb3   :  { %4881 = vmatpush1.bf16.msra.mxu0 %v9434_v18  ;;  %5373 = vmatpush1.bf16.msra.mxu1 %v9435_v19  ;;  %v9484_v54 = vld [vmem:[#allocation5 + $0x1a4] ss:$16 sps:$4 sm:$0xff]   ;;  %v9486_v55 = vld [vmem:[#allocation5 + $0x1ac] ss:$16 sps:$4 sm:$0xff]   ;;  %v9488_v56 = vld [vmem:[#allocation5 + $0x1a0] ss:$16 sps:$4 sm:$0xff]  }
  0xb4   :  { %4882 = vmatprep.subr.bf16.mxu0 %v9436_v20  ;;  %5374 = vmatprep.subr.bf16.mxu1 %v9438_v21  ;;  %v9489_v57 = vld [vmem:[#allocation5 + $0x1a8] ss:$16 sps:$4 sm:$0xff]   ;;  %v9490_v58 = vld [vmem:[#allocation5 + $0x1c4] ss:$16 sps:$4 sm:$0xff]   ;;  %v9492_v59 = vld [vmem:[#allocation5 + $0x1cc] ss:$16 sps:$4 sm:$0xff]  }
  0xb5   :  { %4904 = vmatprep.mubr.bf16.mxu0 %v8152_v48  ;;  %5396 = vmatprep.mubr.bf16.mxu1 %v8152_v48  ;;  %v9494_v60 = vld [vmem:[#allocation5 + $0x1c0] ss:$16 sps:$4 sm:$0xff]   ;;  %v9495_v61 = vld [vmem:[#allocation5 + $0x1c8] ss:$16 sps:$4 sm:$0xff]   ;;  %v9496_v62 = vld [vmem:[#allocation5 + $0x1e4] ss:$16 sps:$4 sm:$0xff]  }
  0xb6   :  { %v9498_v63 = vld [vmem:[#allocation5 + $0x1ec] ss:$16 sps:$4 sm:$0xff]   ;;  %v9500_v0 = vld [vmem:[#allocation5 + $0x1e0] ss:$16 sps:$4 sm:$0xff]   ;;  %v9501_v1 = vld [vmem:[#allocation5 + $0x1e8] ss:$16 sps:$4 sm:$0xff]  }
  0xb7   :  { %4883 = vmatpush1.bf16.msra.mxu0 %v9440_v22  ;;  %5375 = vmatpush1.bf16.msra.mxu1 %v9441_v23  ;;  %v9506_v2 = vld [vmem:[#allocation5 + $0x204] ss:$16 sps:$4 sm:$0xff]   ;;  %v9509_v3 = vld [vmem:[#allocation5 + $0x20c] ss:$16 sps:$4 sm:$0xff]   ;;  %v9504_v5 = vld [vmem:[#allocation5 + $0x200] ss:$16 sps:$4 sm:$0xff]  }
  0xb8   :  { %4884 = vmatprep.subr.bf16.mxu0 %v9442_v24  ;;  %5376 = vmatprep.subr.bf16.mxu1 %v9444_v25  ;;  %v9507_v6 = vld [vmem:[#allocation5 + $0x208] ss:$16 sps:$4 sm:$0xff]   ;;  %v9512_v7 = vld [vmem:[#allocation5 + $0x224] ss:$16 sps:$4 sm:$0xff]   ;;  %v9515_v8 = vld [vmem:[#allocation5 + $0x22c] ss:$16 sps:$4 sm:$0xff]  }
  0xb9   :  { %v9510_v9 = vld [vmem:[#allocation5 + $0x220] ss:$16 sps:$4 sm:$0xff]   ;;  %v9513_v10 = vld [vmem:[#allocation5 + $0x228] ss:$16 sps:$4 sm:$0xff]   ;;  %v9518_v11 = vld [vmem:[#allocation5 + $0x244] ss:$16 sps:$4 sm:$0xff]  }
  0xba   :  { %v9521_v12 = vld [vmem:[#allocation5 + $0x24c] ss:$16 sps:$4 sm:$0xff]   ;;  %v9516_v13 = vld [vmem:[#allocation5 + $0x240] ss:$16 sps:$4 sm:$0xff]   ;;  %v9519_v14 = vld [vmem:[#allocation5 + $0x248] ss:$16 sps:$4 sm:$0xff]  }
  0xbb   :  { %4885 = vmatpush1.bf16.msra.mxu0 %v9446_v26  ;;  %5377 = vmatpush1.bf16.msra.mxu1 %v9447_v27  ;;  %v9524_v15 = vld [vmem:[#allocation5 + $0x264] ss:$16 sps:$4 sm:$0xff]   ;;  %v9527_v16 = vld [vmem:[#allocation5 + $0x26c] ss:$16 sps:$4 sm:$0xff]   ;;  %v9522_v17 = vld [vmem:[#allocation5 + $0x260] ss:$16 sps:$4 sm:$0xff]  }
  0xbc   :  { %4886 = vmatprep.subr.bf16.mxu0 %v9448_v28  ;;  %5378 = vmatprep.subr.bf16.mxu1 %v9450_v29  ;;  %v9525_v18 = vld [vmem:[#allocation5 + $0x268] ss:$16 sps:$4 sm:$0xff]   ;;  %v9530_v19 = vld [vmem:[#allocation5 + $0x284] ss:$16 sps:$4 sm:$0xff]   ;;  %v9533_v20 = vld [vmem:[#allocation5 + $0x28c] ss:$16 sps:$4 sm:$0xff]  }
  0xbd   :  { %v9528_v21 = vld [vmem:[#allocation5 + $0x280] ss:$16 sps:$4 sm:$0xff]   ;;  %v9531_v22 = vld [vmem:[#allocation5 + $0x288] ss:$16 sps:$4 sm:$0xff]   ;;  %v9536_v23 = vld [vmem:[#allocation5 + $0x2a4] ss:$16 sps:$4 sm:$0xff]  }
  0xbe   :  { %v9539_v24 = vld [vmem:[#allocation5 + $0x2ac] ss:$16 sps:$4 sm:$0xff]   ;;  %v9534_v25 = vld [vmem:[#allocation5 + $0x2a0] ss:$16 sps:$4 sm:$0xff]   ;;  %v9537_v26 = vld [vmem:[#allocation5 + $0x2a8] ss:$16 sps:$4 sm:$0xff]  }
  0xbf   :  { %4887 = vmatpush1.bf16.msra.mxu0 %v9452_v30  ;;  %5379 = vmatpush1.bf16.msra.mxu1 %v9453_v31  ;;  %v9542_v27 = vld [vmem:[#allocation5 + $0x2c4] ss:$16 sps:$4 sm:$0xff]   ;;  %v9545_v28 = vld [vmem:[#allocation5 + $0x2cc] ss:$16 sps:$4 sm:$0xff]   ;;  %v9540_v31 = vld [vmem:[#allocation5 + $0x2c0] ss:$16 sps:$4 sm:$0xff]  }
  0xc0   :  { %4888 = vmatprep.subr.bf16.mxu0 %v9454_v32  ;;  %5380 = vmatprep.subr.bf16.mxu1 %v9456_v33  ;;  %v11411_v29 = vld [vmem:[#allocation2 + $0x8] sm:$0xff]  ;;  %v9548_v33 = vld [vmem:[#allocation5 + $0x2e4] ss:$16 sps:$4 sm:$0xff]   ;;  %s8138_s25 = sshll.u32 %s11243_s8, 4  ;;  %s8139_s25 = int_to_ptr.vmem [resolvable:$true] %s8138_s25 }
  0xc1   :  { %v8154_v30 = vcombine.high %v11411_v29, %v11411_v29  ;;  %v9543_v32 = vld [vmem:[#allocation5 + $0x2c8] ss:$16 sps:$4 sm:$0xff]   ;;  %v9569_v46 = vld [vmem:[#allocation5 + $0x34c] ss:$16 sps:$4 sm:$0xff]   ;;  %s11196_s3 = scalar_lea.vmem %s8139_s25, 128  ;;  %p11201_p3 = scmp.lt.s32.totalorder %s8139_s25, %s8139_s25 }
  0xc2   :  { %v9567_v48 = vld [vmem:[#allocation5 + $0x348] ss:$16 sps:$4 sm:$0xff]   ;;  %p11197_p2 = scmp.ne.s32.totalorder %s8139_s25, %s11196_s3  ;;  %p11202_p4 = scmp.lt.s32.totalorder %s11196_s3, %s11196_s3 }
  0xc3   :  { %4889 = vmatpush1.bf16.msra.mxu0 %v9458_v34  ;;  %5381 = vmatpush1.bf16.msra.mxu1 %v9459_v35  ;;  %v9551_v34 = vld [vmem:[#allocation5 + $0x2ec] ss:$16 sps:$4 sm:$0xff]   ;;  %v9546_v35 = vld [vmem:[#allocation5 + $0x2e0] ss:$16 sps:$4 sm:$0xff]  }
  0xc4   :  { %4890 = vmatprep.subr.bf16.mxu0 %v9460_v36  ;;  %5382 = vmatprep.subr.bf16.mxu1 %v9462_v37  ;;  %v9549_v36 = vld [vmem:[#allocation5 + $0x2e8] ss:$16 sps:$4 sm:$0xff]   ;;  %v9554_v37 = vld [vmem:[#allocation5 + $0x304] ss:$16 sps:$4 sm:$0xff]   ;;  %p11203_p5 = por %p11202_p4, %p11201_p3 }
  0xc6   :  { %p11204_p6 = pnand %p11203_p5, %p11197_p2 }
  0xc7   :  { %4891 = vmatpush1.bf16.msra.mxu0 %v9464_v38  ;;  %5383 = vmatpush1.bf16.msra.mxu1 %v9465_v39  ;;  %v9557_v38 = vld [vmem:[#allocation5 + $0x30c] ss:$16 sps:$4 sm:$0xff]   ;;  %v9552_v39 = vld [vmem:[#allocation5 + $0x300] ss:$16 sps:$4 sm:$0xff]  }
  0xc8   :  { %4892 = vmatprep.subr.bf16.mxu0 %v9466_v40  ;;  %5384 = vmatprep.subr.bf16.mxu1 %v9468_v41  ;;  %v9555_v40 = vld [vmem:[#allocation5 + $0x308] ss:$16 sps:$4 sm:$0xff]   ;;  %v9560_v41 = vld [vmem:[#allocation5 + $0x324] ss:$16 sps:$4 sm:$0xff]  }
  0xcb   :  { %4893 = vmatpush1.bf16.msra.mxu0 %v9470_v42  ;;  %5385 = vmatpush1.bf16.msra.mxu1 %v9471_v43  ;;  %v9563_v42 = vld [vmem:[#allocation5 + $0x32c] ss:$16 sps:$4 sm:$0xff]   ;;  %v9558_v43 = vld [vmem:[#allocation5 + $0x320] ss:$16 sps:$4 sm:$0xff]  }
  0xcc   :  { %4894 = vmatprep.subr.bf16.mxu0 %v9472_v44  ;;  %5386 = vmatprep.subr.bf16.mxu1 %v9474_v45  ;;  %v9561_v44 = vld [vmem:[#allocation5 + $0x328] ss:$16 sps:$4 sm:$0xff]   ;;  %v9566_v45 = vld [vmem:[#allocation5 + $0x344] ss:$16 sps:$4 sm:$0xff]  }
  0xcf   :  { %4895 = vmatpush1.bf16.msra.mxu0 %v9476_v47  ;;  %5387 = vmatpush1.bf16.msra.mxu1 %v9477_v49  ;;  %v9564_v47 = vld [vmem:[#allocation5 + $0x340] ss:$16 sps:$4 sm:$0xff]   ;;  %v9572_v49 = vld [vmem:[#allocation5 + $0x364] ss:$16 sps:$4 sm:$0xff]  }
  0xd0   :  { %4896 = vmatprep.subr.bf16.mxu0 %v9478_v50  ;;  %5388 = vmatprep.subr.bf16.mxu1 %v9480_v51  ;;  %v9575_v50 = vld [vmem:[#allocation5 + $0x36c] ss:$16 sps:$4 sm:$0xff]   ;;  %v9570_v51 = vld [vmem:[#allocation5 + $0x360] ss:$16 sps:$4 sm:$0xff]  }
  0xd3   :  { %4897 = vmatpush1.bf16.msra.mxu0 %v9482_v52  ;;  %5389 = vmatpush1.bf16.msra.mxu1 %v9483_v53  ;;  %v9573_v52 = vld [vmem:[#allocation5 + $0x368] ss:$16 sps:$4 sm:$0xff]   ;;  %v9578_v53 = vld [vmem:[#allocation5 + $0x384] ss:$16 sps:$4 sm:$0xff]  }
  0xd4   :  { %4898 = vmatprep.subr.bf16.mxu0 %v9484_v54  ;;  %5390 = vmatprep.subr.bf16.mxu1 %v9486_v55  ;;  %v9581_v54 = vld [vmem:[#allocation5 + $0x38c] ss:$16 sps:$4 sm:$0xff]   ;;  %v9576_v55 = vld [vmem:[#allocation5 + $0x380] ss:$16 sps:$4 sm:$0xff]  }
  0xd7   :  { %4899 = vmatpush1.bf16.msra.mxu0 %v9488_v56  ;;  %5391 = vmatpush1.bf16.msra.mxu1 %v9489_v57  ;;  %v9579_v56 = vld [vmem:[#allocation5 + $0x388] ss:$16 sps:$4 sm:$0xff]   ;;  %v9584_v57 = vld [vmem:[#allocation5 + $0x3a4] ss:$16 sps:$4 sm:$0xff]  }
  0xd8   :  { %4900 = vmatprep.subr.bf16.mxu0 %v9490_v58  ;;  %5392 = vmatprep.subr.bf16.mxu1 %v9492_v59  ;;  %v9587_v58 = vld [vmem:[#allocation5 + $0x3ac] ss:$16 sps:$4 sm:$0xff]   ;;  %v9582_v59 = vld [vmem:[#allocation5 + $0x3a0] ss:$16 sps:$4 sm:$0xff]  }
  0xdb   :  { %4901 = vmatpush1.bf16.msra.mxu0 %v9494_v60  ;;  %5393 = vmatpush1.bf16.msra.mxu1 %v9495_v61  ;;  %v9585_v60 = vld [vmem:[#allocation5 + $0x3a8] ss:$16 sps:$4 sm:$0xff]   ;;  %v9590_v61 = vld [vmem:[#allocation5 + $0x3c4] ss:$16 sps:$4 sm:$0xff]  }
  0xdc   :  { %4902 = vmatprep.subr.bf16.mxu0 %v9496_v62  ;;  %5394 = vmatprep.subr.bf16.mxu1 %v9498_v63  ;;  %v9593_v62 = vld [vmem:[#allocation5 + $0x3cc] ss:$16 sps:$4 sm:$0xff]   ;;  %v9588_v63 = vld [vmem:[#allocation5 + $0x3c0] ss:$16 sps:$4 sm:$0xff]  }
  0xdf   :  { %4903 = vmatpush1.bf16.msra.mxu0 %v9500_v0  ;;  %5395 = vmatpush1.bf16.msra.mxu1 %v9501_v1  ;;  %v9591_v0 = vld [vmem:[#allocation5 + $0x3c8] ss:$16 sps:$4 sm:$0xff]   ;;  %v9596_v1 = vld [vmem:[#allocation5 + $0x3e4] ss:$16 sps:$4 sm:$0xff]  }
  0xe0   :  { %4913 = vmatprep.subr.bf16.mxu0 %v9506_v2  ;;  %5405 = vmatprep.subr.bf16.mxu1 %v9509_v3  ;;  %v9599_v2 = vld [vmem:[#allocation5 + $0x3ec] ss:$16 sps:$4 sm:$0xff]   ;;  %v9594_v3 = vld [vmem:[#allocation5 + $0x3e0] ss:$16 sps:$4 sm:$0xff]  }
  0xe2   :  { %4905 = vmatmul.mubr.bf16.vlgmr.msra.gmra.mrb[0].mxu0 %v8151_v4  ;;  %5397 = vmatmul.mubr.bf16.vlgmr.msra.gmra.mrb[0].mxu1 %v8151_v4  ;;  %v9597_v4 = vld [vmem:[#allocation5 + $0x3e8] ss:$16 sps:$4 sm:$0xff]  }
  0xe3   :  { %4914 = vmatpush1.bf16.msra.mxu0 %v9504_v5  ;;  %5406 = vmatpush1.bf16.msra.mxu1 %v9507_v6  ;;  %v9604_v5 = vld [vmem:[#allocation5 + $0x404] ss:$16 sps:$4 sm:$0xff]   ;;  %v9607_v6 = vld [vmem:[#allocation5 + $0x40c] ss:$16 sps:$4 sm:$0xff]  }
  0xe4   :  { %4915 = vmatprep.subr.bf16.mxu0 %v9512_v7  ;;  %5407 = vmatprep.subr.bf16.mxu1 %v9515_v8  ;;  %v8153_v7 = vcombine.low %v11411_v29, %v11411_v29  ;;  %v9602_v8 = vld [vmem:[#allocation5 + $0x400] ss:$16 sps:$4 sm:$0xff]   ;;  %v9637_v29 = vld [vmem:[#allocation5 + $0x4ac] ss:$16 sps:$4 sm:$0xff]  }
  0xe5   :  { %4945 = vmatprep.mubr.bf16.mxu0 %v8154_v30  ;;  %5437 = vmatprep.mubr.bf16.mxu1 %v8154_v30  ;;  %v9632_v30 = vld [vmem:[#allocation5 + $0x4a0] ss:$16 sps:$4 sm:$0xff]  }
  0xe7   :  { %4916 = vmatpush1.bf16.msra.mxu0 %v9510_v9  ;;  %5408 = vmatpush1.bf16.msra.mxu1 %v9513_v10  ;;  %v9605_v9 = vld [vmem:[#allocation5 + $0x408] ss:$16 sps:$4 sm:$0xff]   ;;  %v9610_v10 = vld [vmem:[#allocation5 + $0x424] ss:$16 sps:$4 sm:$0xff]  }
  0xe8   :  { %4917 = vmatprep.subr.bf16.mxu0 %v9518_v11  ;;  %5409 = vmatprep.subr.bf16.mxu1 %v9521_v12  ;;  %v11417_v11 = vld [vmem:[#allocation2 + $0x10] sm:$0xff]  ;;  %v9613_v12 = vld [vmem:[#allocation5 + $0x42c] ss:$16 sps:$4 sm:$0xff]  }
  0xeb   :  { %4918 = vmatpush1.bf16.msra.mxu0 %v9516_v13  ;;  %5410 = vmatpush1.bf16.msra.mxu1 %v9519_v14  ;;  %v8156_v13 = vcombine.high %v11417_v11, %v11417_v11  ;;  %v9608_v14 = vld [vmem:[#allocation5 + $0x420] ss:$16 sps:$4 sm:$0xff]  }
  0xec   :  { %4919 = vmatprep.subr.bf16.mxu0 %v9524_v15  ;;  %5411 = vmatprep.subr.bf16.mxu1 %v9527_v16  ;;  %v9611_v15 = vld [vmem:[#allocation5 + $0x428] ss:$16 sps:$4 sm:$0xff]   ;;  %v9616_v16 = vld [vmem:[#allocation5 + $0x444] ss:$16 sps:$4 sm:$0xff]  }
  0xef   :  { %4920 = vmatpush1.bf16.msra.mxu0 %v9522_v17  ;;  %5412 = vmatpush1.bf16.msra.mxu1 %v9525_v18  ;;  %v9619_v17 = vld [vmem:[#allocation5 + $0x44c] ss:$16 sps:$4 sm:$0xff]   ;;  %v9614_v18 = vld [vmem:[#allocation5 + $0x440] ss:$16 sps:$4 sm:$0xff]  }
  0xf0   :  { %4921 = vmatprep.subr.bf16.mxu0 %v9530_v19  ;;  %5413 = vmatprep.subr.bf16.mxu1 %v9533_v20  ;;  %v9617_v19 = vld [vmem:[#allocation5 + $0x448] ss:$16 sps:$4 sm:$0xff]   ;;  %v9622_v20 = vld [vmem:[#allocation5 + $0x464] ss:$16 sps:$4 sm:$0xff]  }
  0xf3   :  { %4922 = vmatpush1.bf16.msra.mxu0 %v9528_v21  ;;  %5414 = vmatpush1.bf16.msra.mxu1 %v9531_v22  ;;  %v9625_v21 = vld [vmem:[#allocation5 + $0x46c] ss:$16 sps:$4 sm:$0xff]   ;;  %v9620_v22 = vld [vmem:[#allocation5 + $0x460] ss:$16 sps:$4 sm:$0xff]  }
  0xf4   :  { %4923 = vmatprep.subr.bf16.mxu0 %v9536_v23  ;;  %5415 = vmatprep.subr.bf16.mxu1 %v9539_v24  ;;  %v9623_v23 = vld [vmem:[#allocation5 + $0x468] ss:$16 sps:$4 sm:$0xff]   ;;  %v9628_v24 = vld [vmem:[#allocation5 + $0x484] ss:$16 sps:$4 sm:$0xff]  }
  0xf7   :  { %4924 = vmatpush1.bf16.msra.mxu0 %v9534_v25  ;;  %5416 = vmatpush1.bf16.msra.mxu1 %v9537_v26  ;;  %v9631_v25 = vld [vmem:[#allocation5 + $0x48c] ss:$16 sps:$4 sm:$0xff]   ;;  %v9626_v26 = vld [vmem:[#allocation5 + $0x480] ss:$16 sps:$4 sm:$0xff]  }
  0xf8   :  { %4925 = vmatprep.subr.bf16.mxu0 %v9542_v27  ;;  %5417 = vmatprep.subr.bf16.mxu1 %v9545_v28  ;;  %v9629_v27 = vld [vmem:[#allocation5 + $0x488] ss:$16 sps:$4 sm:$0xff]   ;;  %v9634_v28 = vld [vmem:[#allocation5 + $0x4a4] ss:$16 sps:$4 sm:$0xff]  }
  0xfb   :  { %4926 = vmatpush1.bf16.msra.mxu0 %v9540_v31  ;;  %5418 = vmatpush1.bf16.msra.mxu1 %v9543_v32  ;;  %v9635_v31 = vld [vmem:[#allocation5 + $0x4a8] ss:$16 sps:$4 sm:$0xff]   ;;  %v9640_v32 = vld [vmem:[#allocation5 + $0x4c4] ss:$16 sps:$4 sm:$0xff]  }
  0xfc   :  { %4927 = vmatprep.subr.bf16.mxu0 %v9548_v33  ;;  %5419 = vmatprep.subr.bf16.mxu1 %v9551_v34  ;;  %v9643_v33 = vld [vmem:[#allocation5 + $0x4cc] ss:$16 sps:$4 sm:$0xff]   ;;  %v9638_v34 = vld [vmem:[#allocation5 + $0x4c0] ss:$16 sps:$4 sm:$0xff]  }
  0xff   :  { %4928 = vmatpush1.bf16.msra.mxu0 %v9546_v35  ;;  %5420 = vmatpush1.bf16.msra.mxu1 %v9549_v36  ;;  %v9641_v35 = vld [vmem:[#allocation5 + $0x4c8] ss:$16 sps:$4 sm:$0xff]   ;;  %v9646_v36 = vld [vmem:[#allocation5 + $0x4e4] ss:$16 sps:$4 sm:$0xff]  }
 0x100   :  { %4929 = vmatprep.subr.bf16.mxu0 %v9554_v37  ;;  %5421 = vmatprep.subr.bf16.mxu1 %v9557_v38  ;;  %v9649_v37 = vld [vmem:[#allocation5 + $0x4ec] ss:$16 sps:$4 sm:$0xff]   ;;  %v9644_v38 = vld [vmem:[#allocation5 + $0x4e0] ss:$16 sps:$4 sm:$0xff]  }
 0x103   :  { %4930 = vmatpush1.bf16.msra.mxu0 %v9552_v39  ;;  %5422 = vmatpush1.bf16.msra.mxu1 %v9555_v40  ;;  %v9647_v39 = vld [vmem:[#allocation5 + $0x4e8] ss:$16 sps:$4 sm:$0xff]   ;;  %v9652_v40 = vld [vmem:[#allocation5 + $0x504] ss:$16 sps:$4 sm:$0xff]  }
 0x104   :  { %4931 = vmatprep.subr.bf16.mxu0 %v9560_v41  ;;  %5423 = vmatprep.subr.bf16.mxu1 %v9563_v42  ;;  %v9655_v41 = vld [vmem:[#allocation5 + $0x50c] ss:$16 sps:$4 sm:$0xff]   ;;  %v9650_v42 = vld [vmem:[#allocation5 + $0x500] ss:$16 sps:$4 sm:$0xff]  }
 0x107   :  { %4932 = vmatpush1.bf16.msra.mxu0 %v9558_v43  ;;  %5424 = vmatpush1.bf16.msra.mxu1 %v9561_v44  ;;  %v9653_v43 = vld [vmem:[#allocation5 + $0x508] ss:$16 sps:$4 sm:$0xff]   ;;  %v9658_v44 = vld [vmem:[#allocation5 + $0x524] ss:$16 sps:$4 sm:$0xff]  }
 0x108   :  { %4933 = vmatprep.subr.bf16.mxu0 %v9566_v45  ;;  %5425 = vmatprep.subr.bf16.mxu1 %v9569_v46  ;;  %v9661_v45 = vld [vmem:[#allocation5 + $0x52c] ss:$16 sps:$4 sm:$0xff]   ;;  %v9656_v46 = vld [vmem:[#allocation5 + $0x520] ss:$16 sps:$4 sm:$0xff]  }
 0x10b   :  { %4934 = vmatpush1.bf16.msra.mxu0 %v9564_v47  ;;  %5426 = vmatpush1.bf16.msra.mxu1 %v9567_v48  ;;  %v9659_v47 = vld [vmem:[#allocation5 + $0x528] ss:$16 sps:$4 sm:$0xff]   ;;  %v9664_v48 = vld [vmem:[#allocation5 + $0x544] ss:$16 sps:$4 sm:$0xff]  }
 0x10c   :  { %4935 = vmatprep.subr.bf16.mxu0 %v9572_v49  ;;  %5427 = vmatprep.subr.bf16.mxu1 %v9575_v50  ;;  %v9667_v49 = vld [vmem:[#allocation5 + $0x54c] ss:$16 sps:$4 sm:$0xff]   ;;  %v9662_v50 = vld [vmem:[#allocation5 + $0x540] ss:$16 sps:$4 sm:$0xff]  }
 0x10f   :  { %4936 = vmatpush1.bf16.msra.mxu0 %v9570_v51  ;;  %5428 = vmatpush1.bf16.msra.mxu1 %v9573_v52  ;;  %v9665_v51 = vld [vmem:[#allocation5 + $0x548] ss:$16 sps:$4 sm:$0xff]   ;;  %v9670_v52 = vld [vmem:[#allocation5 + $0x564] ss:$16 sps:$4 sm:$0xff]  }
 0x110   :  { %4937 = vmatprep.subr.bf16.mxu0 %v9578_v53  ;;  %5429 = vmatprep.subr.bf16.mxu1 %v9581_v54  ;;  %v9673_v53 = vld [vmem:[#allocation5 + $0x56c] ss:$16 sps:$4 sm:$0xff]   ;;  %v9668_v54 = vld [vmem:[#allocation5 + $0x560] ss:$16 sps:$4 sm:$0xff]  }
 0x113   :  { %4938 = vmatpush1.bf16.msra.mxu0 %v9576_v55  ;;  %5430 = vmatpush1.bf16.msra.mxu1 %v9579_v56  ;;  %v9671_v55 = vld [vmem:[#allocation5 + $0x568] ss:$16 sps:$4 sm:$0xff]   ;;  %v9676_v56 = vld [vmem:[#allocation5 + $0x584] ss:$16 sps:$4 sm:$0xff]  }
 0x114   :  { %4939 = vmatprep.subr.bf16.mxu0 %v9584_v57  ;;  %5431 = vmatprep.subr.bf16.mxu1 %v9587_v58  ;;  %v9679_v57 = vld [vmem:[#allocation5 + $0x58c] ss:$16 sps:$4 sm:$0xff]   ;;  %v9674_v58 = vld [vmem:[#allocation5 + $0x580] ss:$16 sps:$4 sm:$0xff]  }
 0x117   :  { %4940 = vmatpush1.bf16.msra.mxu0 %v9582_v59  ;;  %5432 = vmatpush1.bf16.msra.mxu1 %v9585_v60  ;;  %v9677_v59 = vld [vmem:[#allocation5 + $0x588] ss:$16 sps:$4 sm:$0xff]   ;;  %v9682_v60 = vld [vmem:[#allocation5 + $0x5a4] ss:$16 sps:$4 sm:$0xff]  }
 0x118   :  { %4941 = vmatprep.subr.bf16.mxu0 %v9590_v61  ;;  %5433 = vmatprep.subr.bf16.mxu1 %v9593_v62  ;;  %v9685_v61 = vld [vmem:[#allocation5 + $0x5ac] ss:$16 sps:$4 sm:$0xff]   ;;  %v9680_v62 = vld [vmem:[#allocation5 + $0x5a0] ss:$16 sps:$4 sm:$0xff]  }
 0x11b   :  { %4942 = vmatpush1.bf16.msra.mxu0 %v9588_v63  ;;  %5434 = vmatpush1.bf16.msra.mxu1 %v9591_v0  ;;  %v9683_v63 = vld [vmem:[#allocation5 + $0x5a8] ss:$16 sps:$4 sm:$0xff]   ;;  %v9688_v0 = vld [vmem:[#allocation5 + $0x5c4] ss:$16 sps:$4 sm:$0xff]  }
 0x11c   :  { %4943 = vmatprep.subr.bf16.mxu0 %v9596_v1  ;;  %5435 = vmatprep.subr.bf16.mxu1 %v9599_v2  ;;  %v9691_v1 = vld [vmem:[#allocation5 + $0x5cc] ss:$16 sps:$4 sm:$0xff]   ;;  %v9686_v2 = vld [vmem:[#allocation5 + $0x5c0] ss:$16 sps:$4 sm:$0xff]  }
 0x11f   :  { %4944 = vmatpush1.bf16.msra.mxu0 %v9594_v3  ;;  %5436 = vmatpush1.bf16.msra.mxu1 %v9597_v4  ;;  %v9689_v3 = vld [vmem:[#allocation5 + $0x5c8] ss:$16 sps:$4 sm:$0xff]   ;;  %v9694_v4 = vld [vmem:[#allocation5 + $0x5e4] ss:$16 sps:$4 sm:$0xff]  }
 0x120   :  { %4954 = vmatprep.subr.bf16.mxu0 %v9604_v5  ;;  %5446 = vmatprep.subr.bf16.mxu1 %v9607_v6  ;;  %v9697_v5 = vld [vmem:[#allocation5 + $0x5ec] ss:$16 sps:$4 sm:$0xff]   ;;  %v9692_v6 = vld [vmem:[#allocation5 + $0x5e0] ss:$16 sps:$4 sm:$0xff]  }
 0x122   :  { %4946 = vmatmul.mubr.bf16.vlgmr.msra.gmra.mrb[0].mxu0 %v8153_v7  ;;  %5438 = vmatmul.mubr.bf16.vlgmr.msra.gmra.mrb[0].mxu1 %v8153_v7  ;;  %v9695_v7 = vld [vmem:[#allocation5 + $0x5e8] ss:$16 sps:$4 sm:$0xff]  }
 0x123   :  { %4955 = vmatpush1.bf16.msra.mxu0 %v9602_v8  ;;  %5447 = vmatpush1.bf16.msra.mxu1 %v9605_v9  ;;  %v9702_v8 = vld [vmem:[#allocation5 + $0x604] ss:$16 sps:$4 sm:$0xff]   ;;  %v9705_v9 = vld [vmem:[#allocation5 + $0x60c] ss:$16 sps:$4 sm:$0xff]  }
 0x124   :  { %4956 = vmatprep.subr.bf16.mxu0 %v9610_v10  ;;  %5448 = vmatprep.subr.bf16.mxu1 %v9613_v12  ;;  %v9700_v10 = vld [vmem:[#allocation5 + $0x600] ss:$16 sps:$4 sm:$0xff]   ;;  %v8155_v12 = vcombine.low %v11417_v11, %v11417_v11  ;;  %v9717_v11 = vld [vmem:[#allocation5 + $0x64c] ss:$16 sps:$4 sm:$0xff]  }
 0x125   :  { %4986 = vmatprep.mubr.bf16.mxu0 %v8156_v13  ;;  %5478 = vmatprep.mubr.bf16.mxu1 %v8156_v13  ;;  %v9703_v13 = vld [vmem:[#allocation5 + $0x608] ss:$16 sps:$4 sm:$0xff]  }
 0x127   :  { %4957 = vmatpush1.bf16.msra.mxu0 %v9608_v14  ;;  %5449 = vmatpush1.bf16.msra.mxu1 %v9611_v15  ;;  %v11423_v14 = vld [vmem:[#allocation2 + $0x18] sm:$0xff]  ;;  %v9708_v15 = vld [vmem:[#allocation5 + $0x624] ss:$16 sps:$4 sm:$0xff]  }
 0x128   :  { %4958 = vmatprep.subr.bf16.mxu0 %v9616_v16  ;;  %5450 = vmatprep.subr.bf16.mxu1 %v9619_v17  ;;  %v9711_v16 = vld [vmem:[#allocation5 + $0x62c] ss:$16 sps:$4 sm:$0xff]   ;;  %v8158_v17 = vcombine.high %v11423_v14, %v11423_v14 }
 0x12b   :  { %4959 = vmatpush1.bf16.msra.mxu0 %v9614_v18  ;;  %5451 = vmatpush1.bf16.msra.mxu1 %v9617_v19  ;;  %v9706_v18 = vld [vmem:[#allocation5 + $0x620] ss:$16 sps:$4 sm:$0xff]   ;;  %v9709_v19 = vld [vmem:[#allocation5 + $0x628] ss:$16 sps:$4 sm:$0xff]  }
 0x12c   :  { %4960 = vmatprep.subr.bf16.mxu0 %v9622_v20  ;;  %5452 = vmatprep.subr.bf16.mxu1 %v9625_v21  ;;  %v9714_v20 = vld [vmem:[#allocation5 + $0x644] ss:$16 sps:$4 sm:$0xff]   ;;  %v9712_v21 = vld [vmem:[#allocation5 + $0x640] ss:$16 sps:$4 sm:$0xff]  }
 0x12f   :  { %4961 = vmatpush1.bf16.msra.mxu0 %v9620_v22  ;;  %5453 = vmatpush1.bf16.msra.mxu1 %v9623_v23  ;;  %v9715_v22 = vld [vmem:[#allocation5 + $0x648] ss:$16 sps:$4 sm:$0xff]   ;;  %v9720_v23 = vld [vmem:[#allocation5 + $0x664] ss:$16 sps:$4 sm:$0xff]  }
 0x130   :  { %4962 = vmatprep.subr.bf16.mxu0 %v9628_v24  ;;  %5454 = vmatprep.subr.bf16.mxu1 %v9631_v25  ;;  %v9723_v24 = vld [vmem:[#allocation5 + $0x66c] ss:$16 sps:$4 sm:$0xff]   ;;  %v9718_v25 = vld [vmem:[#allocation5 + $0x660] ss:$16 sps:$4 sm:$0xff]  }
 0x133   :  { %4963 = vmatpush1.bf16.msra.mxu0 %v9626_v26  ;;  %5455 = vmatpush1.bf16.msra.mxu1 %v9629_v27  ;;  %v9721_v26 = vld [vmem:[#allocation5 + $0x668] ss:$16 sps:$4 sm:$0xff]   ;;  %v9726_v27 = vld [vmem:[#allocation5 + $0x684] ss:$16 sps:$4 sm:$0xff]  }
 0x134   :  { %4964 = vmatprep.subr.bf16.mxu0 %v9634_v28  ;;  %5456 = vmatprep.subr.bf16.mxu1 %v9637_v29  ;;  %v9729_v28 = vld [vmem:[#allocation5 + $0x68c] ss:$16 sps:$4 sm:$0xff]   ;;  %v9724_v29 = vld [vmem:[#allocation5 + $0x680] ss:$16 sps:$4 sm:$0xff]  }
 0x137   :  { %4965 = vmatpush1.bf16.msra.mxu0 %v9632_v30  ;;  %5457 = vmatpush1.bf16.msra.mxu1 %v9635_v31  ;;  %v9727_v30 = vld [vmem:[#allocation5 + $0x688] ss:$16 sps:$4 sm:$0xff]   ;;  %v9732_v31 = vld [vmem:[#allocation5 + $0x6a4] ss:$16 sps:$4 sm:$0xff]  }
 0x138   :  { %4966 = vmatprep.subr.bf16.mxu0 %v9640_v32  ;;  %5458 = vmatprep.subr.bf16.mxu1 %v9643_v33  ;;  %v9735_v32 = vld [vmem:[#allocation5 + $0x6ac] ss:$16 sps:$4 sm:$0xff]   ;;  %v9730_v33 = vld [vmem:[#allocation5 + $0x6a0] ss:$16 sps:$4 sm:$0xff]  }
 0x13b   :  { %4967 = vmatpush1.bf16.msra.mxu0 %v9638_v34  ;;  %5459 = vmatpush1.bf16.msra.mxu1 %v9641_v35  ;;  %v9733_v34 = vld [vmem:[#allocation5 + $0x6a8] ss:$16 sps:$4 sm:$0xff]   ;;  %v9738_v35 = vld [vmem:[#allocation5 + $0x6c4] ss:$16 sps:$4 sm:$0xff]  }
 0x13c   :  { %4968 = vmatprep.subr.bf16.mxu0 %v9646_v36  ;;  %5460 = vmatprep.subr.bf16.mxu1 %v9649_v37  ;;  %v9741_v36 = vld [vmem:[#allocation5 + $0x6cc] ss:$16 sps:$4 sm:$0xff]   ;;  %v9736_v37 = vld [vmem:[#allocation5 + $0x6c0] ss:$16 sps:$4 sm:$0xff]  }
 0x13f   :  { %4969 = vmatpush1.bf16.msra.mxu0 %v9644_v38  ;;  %5461 = vmatpush1.bf16.msra.mxu1 %v9647_v39  ;;  %v9739_v38 = vld [vmem:[#allocation5 + $0x6c8] ss:$16 sps:$4 sm:$0xff]   ;;  %v9744_v39 = vld [vmem:[#allocation5 + $0x6e4] ss:$16 sps:$4 sm:$0xff]  }
 0x140   :  { %4970 = vmatprep.subr.bf16.mxu0 %v9652_v40  ;;  %5462 = vmatprep.subr.bf16.mxu1 %v9655_v41  ;;  %v9747_v40 = vld [vmem:[#allocation5 + $0x6ec] ss:$16 sps:$4 sm:$0xff]   ;;  %v9742_v41 = vld [vmem:[#allocation5 + $0x6e0] ss:$16 sps:$4 sm:$0xff]  }
 0x143   :  { %4971 = vmatpush1.bf16.msra.mxu0 %v9650_v42  ;;  %5463 = vmatpush1.bf16.msra.mxu1 %v9653_v43  ;;  %v9745_v42 = vld [vmem:[#allocation5 + $0x6e8] ss:$16 sps:$4 sm:$0xff]   ;;  %v9750_v43 = vld [vmem:[#allocation5 + $0x704] ss:$16 sps:$4 sm:$0xff]  }
 0x144   :  { %4972 = vmatprep.subr.bf16.mxu0 %v9658_v44  ;;  %5464 = vmatprep.subr.bf16.mxu1 %v9661_v45  ;;  %v9753_v44 = vld [vmem:[#allocation5 + $0x70c] ss:$16 sps:$4 sm:$0xff]   ;;  %v9748_v45 = vld [vmem:[#allocation5 + $0x700] ss:$16 sps:$4 sm:$0xff]  }
 0x147   :  { %4973 = vmatpush1.bf16.msra.mxu0 %v9656_v46  ;;  %5465 = vmatpush1.bf16.msra.mxu1 %v9659_v47  ;;  %v9751_v46 = vld [vmem:[#allocation5 + $0x708] ss:$16 sps:$4 sm:$0xff]   ;;  %v9756_v47 = vld [vmem:[#allocation5 + $0x724] ss:$16 sps:$4 sm:$0xff]  }
 0x148   :  { %4974 = vmatprep.subr.bf16.mxu0 %v9664_v48  ;;  %5466 = vmatprep.subr.bf16.mxu1 %v9667_v49  ;;  %v9759_v48 = vld [vmem:[#allocation5 + $0x72c] ss:$16 sps:$4 sm:$0xff]   ;;  %v9754_v49 = vld [vmem:[#allocation5 + $0x720] ss:$16 sps:$4 sm:$0xff]  }
 0x14b   :  { %4975 = vmatpush1.bf16.msra.mxu0 %v9662_v50  ;;  %5467 = vmatpush1.bf16.msra.mxu1 %v9665_v51  ;;  %v9757_v50 = vld [vmem:[#allocation5 + $0x728] ss:$16 sps:$4 sm:$0xff]   ;;  %v9762_v51 = vld [vmem:[#allocation5 + $0x744] ss:$16 sps:$4 sm:$0xff]  }
 0x14c   :  { %4976 = vmatprep.subr.bf16.mxu0 %v9670_v52  ;;  %5468 = vmatprep.subr.bf16.mxu1 %v9673_v53  ;;  %v9765_v52 = vld [vmem:[#allocation5 + $0x74c] ss:$16 sps:$4 sm:$0xff]   ;;  %v9760_v53 = vld [vmem:[#allocation5 + $0x740] ss:$16 sps:$4 sm:$0xff]  }
 0x14f   :  { %4977 = vmatpush1.bf16.msra.mxu0 %v9668_v54  ;;  %5469 = vmatpush1.bf16.msra.mxu1 %v9671_v55  ;;  %v9763_v54 = vld [vmem:[#allocation5 + $0x748] ss:$16 sps:$4 sm:$0xff]   ;;  %v9768_v55 = vld [vmem:[#allocation5 + $0x764] ss:$16 sps:$4 sm:$0xff]  }
 0x150   :  { %4978 = vmatprep.subr.bf16.mxu0 %v9676_v56  ;;  %5470 = vmatprep.subr.bf16.mxu1 %v9679_v57  ;;  %v9771_v56 = vld [vmem:[#allocation5 + $0x76c] ss:$16 sps:$4 sm:$0xff]   ;;  %v9766_v57 = vld [vmem:[#allocation5 + $0x760] ss:$16 sps:$4 sm:$0xff]  }
 0x153   :  { %4979 = vmatpush1.bf16.msra.mxu0 %v9674_v58  ;;  %5471 = vmatpush1.bf16.msra.mxu1 %v9677_v59  ;;  %v9769_v58 = vld [vmem:[#allocation5 + $0x768] ss:$16 sps:$4 sm:$0xff]   ;;  %v9774_v59 = vld [vmem:[#allocation5 + $0x784] ss:$16 sps:$4 sm:$0xff]  }
 0x154   :  { %4980 = vmatprep.subr.bf16.mxu0 %v9682_v60  ;;  %5472 = vmatprep.subr.bf16.mxu1 %v9685_v61  ;;  %v9777_v60 = vld [vmem:[#allocation5 + $0x78c] ss:$16 sps:$4 sm:$0xff]   ;;  %v9772_v61 = vld [vmem:[#allocation5 + $0x780] ss:$16 sps:$4 sm:$0xff]  }
 0x157   :  { %4981 = vmatpush1.bf16.msra.mxu0 %v9680_v62  ;;  %5473 = vmatpush1.bf16.msra.mxu1 %v9683_v63  ;;  %v9775_v62 = vld [vmem:[#allocation5 + $0x788] ss:$16 sps:$4 sm:$0xff]   ;;  %v9780_v63 = vld [vmem:[#allocation5 + $0x7a4] ss:$16 sps:$4 sm:$0xff]  }
 0x158   :  { %4982 = vmatprep.subr.bf16.mxu0 %v9688_v0  ;;  %5474 = vmatprep.subr.bf16.mxu1 %v9691_v1  ;;  %v9783_v0 = vld [vmem:[#allocation5 + $0x7ac] ss:$16 sps:$4 sm:$0xff]   ;;  %v9778_v1 = vld [vmem:[#allocation5 + $0x7a0] ss:$16 sps:$4 sm:$0xff]  }
 0x15b   :  { %4983 = vmatpush1.bf16.msra.mxu0 %v9686_v2  ;;  %5475 = vmatpush1.bf16.msra.mxu1 %v9689_v3  ;;  %v9781_v2 = vld [vmem:[#allocation5 + $0x7a8] ss:$16 sps:$4 sm:$0xff]   ;;  %v9786_v3 = vld [vmem:[#allocation5 + $0x7c4] ss:$16 sps:$4 sm:$0xff]  }
 0x15c   :  { %4984 = vmatprep.subr.bf16.mxu0 %v9694_v4  ;;  %5476 = vmatprep.subr.bf16.mxu1 %v9697_v5  ;;  %v9789_v4 = vld [vmem:[#allocation5 + $0x7cc] ss:$16 sps:$4 sm:$0xff]   ;;  %v9784_v5 = vld [vmem:[#allocation5 + $0x7c0] ss:$16 sps:$4 sm:$0xff]  }
 0x15f   :  { %4985 = vmatpush1.bf16.msra.mxu0 %v9692_v6  ;;  %5477 = vmatpush1.bf16.msra.mxu1 %v9695_v7  ;;  %v9787_v6 = vld [vmem:[#allocation5 + $0x7c8] ss:$16 sps:$4 sm:$0xff]   ;;  %v9792_v7 = vld [vmem:[#allocation5 + $0x7e4] ss:$16 sps:$4 sm:$0xff]  }
 0x160   :  { %4995 = vmatprep.subr.bf16.mxu0 %v9702_v8  ;;  %5487 = vmatprep.subr.bf16.mxu1 %v9705_v9  ;;  %v9795_v8 = vld [vmem:[#allocation5 + $0x7ec] ss:$16 sps:$4 sm:$0xff]   ;;  %v9790_v9 = vld [vmem:[#allocation5 + $0x7e0] ss:$16 sps:$4 sm:$0xff]  }
 0x162   :  { %4987 = vmatmul.mubr.bf16.vlgmr.msra.gmra.mrb[0].mxu0 %v8155_v12  ;;  %5479 = vmatmul.mubr.bf16.vlgmr.msra.gmra.mrb[0].mxu1 %v8155_v12  ;;  %v9800_v12 = vld [vmem:[#allocation5 + $0x804] ss:$16 sps:$4 sm:$0xff]  }
 0x163   :  { %4996 = vmatpush1.bf16.msra.mxu0 %v9700_v10  ;;  %5488 = vmatpush1.bf16.msra.mxu1 %v9703_v13  ;;  %v9793_v10 = vld [vmem:[#allocation5 + $0x7e8] ss:$16 sps:$4 sm:$0xff]   ;;  %v9803_v13 = vld [vmem:[#allocation5 + $0x80c] ss:$16 sps:$4 sm:$0xff]  }
 0x164   :  { %4997 = vmatprep.subr.bf16.mxu0 %v9708_v15  ;;  %5489 = vmatprep.subr.bf16.mxu1 %v9711_v16  ;;  %v9798_v15 = vld [vmem:[#allocation5 + $0x800] ss:$16 sps:$4 sm:$0xff]   ;;  %v8157_v16 = vcombine.low %v11423_v14, %v11423_v14  ;;  %v9812_v14 = vld [vmem:[#allocation5 + $0x844] ss:$16 sps:$4 sm:$0xff]  }
 0x165   :  { %5027 = vmatprep.mubr.bf16.mxu0 %v8158_v17  ;;  %5519 = vmatprep.mubr.bf16.mxu1 %v8158_v17  ;;  %v11429_v17 = vld [vmem:[#allocation2 + $0x20] sm:$0xff] }
 0x167   :  { %4998 = vmatpush1.bf16.msra.mxu0 %v9706_v18  ;;  %5490 = vmatpush1.bf16.msra.mxu1 %v9709_v19  ;;  %v9801_v18 = vld [vmem:[#allocation5 + $0x808] ss:$16 sps:$4 sm:$0xff]   ;;  %v9806_v19 = vld [vmem:[#allocation5 + $0x824] ss:$16 sps:$4 sm:$0xff]  }
 0x168   :  { %4999 = vmatprep.subr.bf16.mxu0 %v9714_v20  ;;  %5491 = vmatprep.subr.bf16.mxu1 %v9717_v11  ;;  %v9809_v20 = vld [vmem:[#allocation5 + $0x82c] ss:$16 sps:$4 sm:$0xff]   ;;  %v8160_v11 = vcombine.high %v11429_v17, %v11429_v17 }
 0x16b   :  { %5000 = vmatpush1.bf16.msra.mxu0 %v9712_v21  ;;  %5492 = vmatpush1.bf16.msra.mxu1 %v9715_v22  ;;  %v9804_v21 = vld [vmem:[#allocation5 + $0x820] ss:$16 sps:$4 sm:$0xff]   ;;  %v9807_v22 = vld [vmem:[#allocation5 + $0x828] ss:$16 sps:$4 sm:$0xff]  }
 0x16c   :  { %5001 = vmatprep.subr.bf16.mxu0 %v9720_v23  ;;  %5493 = vmatprep.subr.bf16.mxu1 %v9723_v24  ;;  %v9815_v23 = vld [vmem:[#allocation5 + $0x84c] ss:$16 sps:$4 sm:$0xff]   ;;  %v9810_v24 = vld [vmem:[#allocation5 + $0x840] ss:$16 sps:$4 sm:$0xff]  }
 0x16f   :  { %5002 = vmatpush1.bf16.msra.mxu0 %v9718_v25  ;;  %5494 = vmatpush1.bf16.msra.mxu1 %v9721_v26  ;;  %v9813_v25 = vld [vmem:[#allocation5 + $0x848] ss:$16 sps:$4 sm:$0xff]   ;;  %v9818_v26 = vld [vmem:[#allocation5 + $0x864] ss:$16 sps:$4 sm:$0xff]  }
 0x170   :  { %5003 = vmatprep.subr.bf16.mxu0 %v9726_v27  ;;  %5495 = vmatprep.subr.bf16.mxu1 %v9729_v28  ;;  %v9821_v27 = vld [vmem:[#allocation5 + $0x86c] ss:$16 sps:$4 sm:$0xff]   ;;  %v9816_v28 = vld [vmem:[#allocation5 + $0x860] ss:$16 sps:$4 sm:$0xff]  }
 0x173   :  { %5004 = vmatpush1.bf16.msra.mxu0 %v9724_v29  ;;  %5496 = vmatpush1.bf16.msra.mxu1 %v9727_v30  ;;  %v9819_v29 = vld [vmem:[#allocation5 + $0x868] ss:$16 sps:$4 sm:$0xff]   ;;  %v9824_v30 = vld [vmem:[#allocation5 + $0x884] ss:$16 sps:$4 sm:$0xff]  }
 0x174   :  { %5005 = vmatprep.subr.bf16.mxu0 %v9732_v31  ;;  %5497 = vmatprep.subr.bf16.mxu1 %v9735_v32  ;;  %v9827_v31 = vld [vmem:[#allocation5 + $0x88c] ss:$16 sps:$4 sm:$0xff]   ;;  %v9822_v32 = vld [vmem:[#allocation5 + $0x880] ss:$16 sps:$4 sm:$0xff]  }
 0x177   :  { %5006 = vmatpush1.bf16.msra.mxu0 %v9730_v33  ;;  %5498 = vmatpush1.bf16.msra.mxu1 %v9733_v34  ;;  %v9825_v33 = vld [vmem:[#allocation5 + $0x888] ss:$16 sps:$4 sm:$0xff]   ;;  %v9830_v34 = vld [vmem:[#allocation5 + $0x8a4] ss:$16 sps:$4 sm:$0xff]  }
 0x178   :  { %5007 = vmatprep.subr.bf16.mxu0 %v9738_v35  ;;  %5499 = vmatprep.subr.bf16.mxu1 %v9741_v36  ;;  %v9833_v35 = vld [vmem:[#allocation5 + $0x8ac] ss:$16 sps:$4 sm:$0xff]   ;;  %v9828_v36 = vld [vmem:[#allocation5 + $0x8a0] ss:$16 sps:$4 sm:$0xff]  }
 0x17b   :  { %5008 = vmatpush1.bf16.msra.mxu0 %v9736_v37  ;;  %5500 = vmatpush1.bf16.msra.mxu1 %v9739_v38  ;;  %v9831_v37 = vld [vmem:[#allocation5 + $0x8a8] ss:$16 sps:$4 sm:$0xff]   ;;  %v9836_v38 = vld [vmem:[#allocation5 + $0x8c4] ss:$16 sps:$4 sm:$0xff]  }
 0x17c   :  { %5009 = vmatprep.subr.bf16.mxu0 %v9744_v39  ;;  %5501 = vmatprep.subr.bf16.mxu1 %v9747_v40  ;;  %v9839_v39 = vld [vmem:[#allocation5 + $0x8cc] ss:$16 sps:$4 sm:$0xff]   ;;  %v9834_v40 = vld [vmem:[#allocation5 + $0x8c0] ss:$16 sps:$4 sm:$0xff]  }
 0x17f   :  { %5010 = vmatpush1.bf16.msra.mxu0 %v9742_v41  ;;  %5502 = vmatpush1.bf16.msra.mxu1 %v9745_v42  ;;  %v9837_v41 = vld [vmem:[#allocation5 + $0x8c8] ss:$16 sps:$4 sm:$0xff]   ;;  %v9842_v42 = vld [vmem:[#allocation5 + $0x8e4] ss:$16 sps:$4 sm:$0xff]  }
 0x180   :  { %5011 = vmatprep.subr.bf16.mxu0 %v9750_v43  ;;  %5503 = vmatprep.subr.bf16.mxu1 %v9753_v44  ;;  %v9845_v43 = vld [vmem:[#allocation5 + $0x8ec] ss:$16 sps:$4 sm:$0xff]   ;;  %v9840_v44 = vld [vmem:[#allocation5 + $0x8e0] ss:$16 sps:$4 sm:$0xff]  }
 0x183   :  { %5012 = vmatpush1.bf16.msra.mxu0 %v9748_v45  ;;  %5504 = vmatpush1.bf16.msra.mxu1 %v9751_v46  ;;  %v9843_v45 = vld [vmem:[#allocation5 + $0x8e8] ss:$16 sps:$4 sm:$0xff]   ;;  %v9848_v46 = vld [vmem:[#allocation5 + $0x904] ss:$16 sps:$4 sm:$0xff]  }
 0x184   :  { %5013 = vmatprep.subr.bf16.mxu0 %v9756_v47  ;;  %5505 = vmatprep.subr.bf16.mxu1 %v9759_v48  ;;  %v9851_v47 = vld [vmem:[#allocation5 + $0x90c] ss:$16 sps:$4 sm:$0xff]   ;;  %v9846_v48 = vld [vmem:[#allocation5 + $0x900] ss:$16 sps:$4 sm:$0xff]  }
 0x187   :  { %5014 = vmatpush1.bf16.msra.mxu0 %v9754_v49  ;;  %5506 = vmatpush1.bf16.msra.mxu1 %v9757_v50  ;;  %v9849_v49 = vld [vmem:[#allocation5 + $0x908] ss:$16 sps:$4 sm:$0xff]   ;;  %v9854_v50 = vld [vmem:[#allocation5 + $0x924] ss:$16 sps:$4 sm:$0xff]  }
 0x188   :  { %5015 = vmatprep.subr.bf16.mxu0 %v9762_v51  ;;  %5507 = vmatprep.subr.bf16.mxu1 %v9765_v52  ;;  %v9857_v51 = vld [vmem:[#allocation5 + $0x92c] ss:$16 sps:$4 sm:$0xff]   ;;  %v9852_v52 = vld [vmem:[#allocation5 + $0x920] ss:$16 sps:$4 sm:$0xff]  }
 0x18b   :  { %5016 = vmatpush1.bf16.msra.mxu0 %v9760_v53  ;;  %5508 = vmatpush1.bf16.msra.mxu1 %v9763_v54  ;;  %v9855_v53 = vld [vmem:[#allocation5 + $0x928] ss:$16 sps:$4 sm:$0xff]   ;;  %v9860_v54 = vld [vmem:[#allocation5 + $0x944] ss:$16 sps:$4 sm:$0xff]  }
 0x18c   :  { %5017 = vmatprep.subr.bf16.mxu0 %v9768_v55  ;;  %5509 = vmatprep.subr.bf16.mxu1 %v9771_v56  ;;  %v9863_v55 = vld [vmem:[#allocation5 + $0x94c] ss:$16 sps:$4 sm:$0xff]   ;;  %v9858_v56 = vld [vmem:[#allocation5 + $0x940] ss:$16 sps:$4 sm:$0xff]  }
 0x18f   :  { %5018 = vmatpush1.bf16.msra.mxu0 %v9766_v57  ;;  %5510 = vmatpush1.bf16.msra.mxu1 %v9769_v58  ;;  %v9861_v57 = vld [vmem:[#allocation5 + $0x948] ss:$16 sps:$4 sm:$0xff]   ;;  %v9866_v58 = vld [vmem:[#allocation5 + $0x964] ss:$16 sps:$4 sm:$0xff]  }
 0x190   :  { %5019 = vmatprep.subr.bf16.mxu0 %v9774_v59  ;;  %5511 = vmatprep.subr.bf16.mxu1 %v9777_v60  ;;  %v9869_v59 = vld [vmem:[#allocation5 + $0x96c] ss:$16 sps:$4 sm:$0xff]   ;;  %v9864_v60 = vld [vmem:[#allocation5 + $0x960] ss:$16 sps:$4 sm:$0xff]  }
 0x193   :  { %5020 = vmatpush1.bf16.msra.mxu0 %v9772_v61  ;;  %5512 = vmatpush1.bf16.msra.mxu1 %v9775_v62  ;;  %v9867_v61 = vld [vmem:[#allocation5 + $0x968] ss:$16 sps:$4 sm:$0xff]   ;;  %v9872_v62 = vld [vmem:[#allocation5 + $0x984] ss:$16 sps:$4 sm:$0xff]  }
 0x194   :  { %5021 = vmatprep.subr.bf16.mxu0 %v9780_v63  ;;  %5513 = vmatprep.subr.bf16.mxu1 %v9783_v0  ;;  %v9875_v63 = vld [vmem:[#allocation5 + $0x98c] ss:$16 sps:$4 sm:$0xff]   ;;  %v9870_v0 = vld [vmem:[#allocation5 + $0x980] ss:$16 sps:$4 sm:$0xff]  }
 0x197   :  { %5022 = vmatpush1.bf16.msra.mxu0 %v9778_v1  ;;  %5514 = vmatpush1.bf16.msra.mxu1 %v9781_v2  ;;  %v9873_v1 = vld [vmem:[#allocation5 + $0x988] ss:$16 sps:$4 sm:$0xff]   ;;  %v9878_v2 = vld [vmem:[#allocation5 + $0x9a4] ss:$16 sps:$4 sm:$0xff]  }
 0x198   :  { %5023 = vmatprep.subr.bf16.mxu0 %v9786_v3  ;;  %5515 = vmatprep.subr.bf16.mxu1 %v9789_v4  ;;  %v9881_v3 = vld [vmem:[#allocation5 + $0x9ac] ss:$16 sps:$4 sm:$0xff]   ;;  %v9876_v4 = vld [vmem:[#allocation5 + $0x9a0] ss:$16 sps:$4 sm:$0xff]  }
 0x19b   :  { %5024 = vmatpush1.bf16.msra.mxu0 %v9784_v5  ;;  %5516 = vmatpush1.bf16.msra.mxu1 %v9787_v6  ;;  %v9879_v5 = vld [vmem:[#allocation5 + $0x9a8] ss:$16 sps:$4 sm:$0xff]   ;;  %v9884_v6 = vld [vmem:[#allocation5 + $0x9c4] ss:$16 sps:$4 sm:$0xff]  }
 0x19c   :  { %5025 = vmatprep.subr.bf16.mxu0 %v9792_v7  ;;  %5517 = vmatprep.subr.bf16.mxu1 %v9795_v8  ;;  %v9887_v7 = vld [vmem:[#allocation5 + $0x9cc] ss:$16 sps:$4 sm:$0xff]   ;;  %v9882_v8 = vld [vmem:[#allocation5 + $0x9c0] ss:$16 sps:$4 sm:$0xff]  }
 0x19f   :  { %5026 = vmatpush1.bf16.msra.mxu0 %v9790_v9  ;;  %5518 = vmatpush1.bf16.msra.mxu1 %v9793_v10  ;;  %v9885_v9 = vld [vmem:[#allocation5 + $0x9c8] ss:$16 sps:$4 sm:$0xff]   ;;  %v9890_v10 = vld [vmem:[#allocation5 + $0x9e4] ss:$16 sps:$4 sm:$0xff]  }
 0x1a0   :  { %5036 = vmatprep.subr.bf16.mxu0 %v9800_v12  ;;  %5528 = vmatprep.subr.bf16.mxu1 %v9803_v13  ;;  %v9893_v12 = vld [vmem:[#allocation5 + $0x9ec] ss:$16 sps:$4 sm:$0xff]   ;;  %v9888_v13 = vld [vmem:[#allocation5 + $0x9e0] ss:$16 sps:$4 sm:$0xff]  }
 0x1a2   :  { %5028 = vmatmul.mubr.bf16.vlgmr.msra.gmra.mrb[0].mxu0 %v8157_v16  ;;  %5520 = vmatmul.mubr.bf16.vlgmr.msra.gmra.mrb[0].mxu1 %v8157_v16  ;;  %v9898_v16 = vld [vmem:[#allocation5 + $0xa04] ss:$16 sps:$4 sm:$0xff]  }
 0x1a3   :  { %5037 = vmatpush1.bf16.msra.mxu0 %v9798_v15  ;;  %5529 = vmatpush1.bf16.msra.mxu1 %v9801_v18  ;;  %v9891_v15 = vld [vmem:[#allocation5 + $0x9e8] ss:$16 sps:$4 sm:$0xff]   ;;  %v9901_v18 = vld [vmem:[#allocation5 + $0xa0c] ss:$16 sps:$4 sm:$0xff]  }
 0x1a4   :  { %5038 = vmatprep.subr.bf16.mxu0 %v9806_v19  ;;  %5530 = vmatprep.subr.bf16.mxu1 %v9809_v20  ;;  %v11433_v19 = vld [vmem:[#allocation2 + $0x28] sm:$0xff]  ;;  %v8159_v20 = vcombine.low %v11429_v17, %v11429_v17  ;;  %v9910_v17 = vld [vmem:[#allocation5 + $0xa44] ss:$16 sps:$4 sm:$0xff]  }
 0x1a5   :  { %5068 = vmatprep.mubr.bf16.mxu0 %v8160_v11  ;;  %5560 = vmatprep.mubr.bf16.mxu1 %v8160_v11  ;;  %v9896_v11 = vld [vmem:[#allocation5 + $0xa00] ss:$16 sps:$4 sm:$0xff]  }
 0x1a7   :  { %5039 = vmatpush1.bf16.msra.mxu0 %v9804_v21  ;;  %5531 = vmatpush1.bf16.msra.mxu1 %v9807_v22  ;;  %v9899_v21 = vld [vmem:[#allocation5 + $0xa08] ss:$16 sps:$4 sm:$0xff]   ;;  %v9904_v22 = vld [vmem:[#allocation5 + $0xa24] ss:$16 sps:$4 sm:$0xff]  }
 0x1a8   :  { %5040 = vmatprep.subr.bf16.mxu0 %v9812_v14  ;;  %5532 = vmatprep.subr.bf16.mxu1 %v9815_v23  ;;  %v9907_v14 = vld [vmem:[#allocation5 + $0xa2c] ss:$16 sps:$4 sm:$0xff]   ;;  %v8162_v23 = vcombine.high %v11433_v19, %v11433_v19 }
 0x1ab   :  { %5041 = vmatpush1.bf16.msra.mxu0 %v9810_v24  ;;  %5533 = vmatpush1.bf16.msra.mxu1 %v9813_v25  ;;  %v9902_v24 = vld [vmem:[#allocation5 + $0xa20] ss:$16 sps:$4 sm:$0xff]   ;;  %v9905_v25 = vld [vmem:[#allocation5 + $0xa28] ss:$16 sps:$4 sm:$0xff]  }
 0x1ac   :  { %5042 = vmatprep.subr.bf16.mxu0 %v9818_v26  ;;  %5534 = vmatprep.subr.bf16.mxu1 %v9821_v27  ;;  %v9913_v26 = vld [vmem:[#allocation5 + $0xa4c] ss:$16 sps:$4 sm:$0xff]   ;;  %v9908_v27 = vld [vmem:[#allocation5 + $0xa40] ss:$16 sps:$4 sm:$0xff]  }
 0x1af   :  { %5043 = vmatpush1.bf16.msra.mxu0 %v9816_v28  ;;  %5535 = vmatpush1.bf16.msra.mxu1 %v9819_v29  ;;  %v9911_v28 = vld [vmem:[#allocation5 + $0xa48] ss:$16 sps:$4 sm:$0xff]   ;;  %v9916_v29 = vld [vmem:[#allocation5 + $0xa64] ss:$16 sps:$4 sm:$0xff]  }
 0x1b0   :  { %5044 = vmatprep.subr.bf16.mxu0 %v9824_v30  ;;  %5536 = vmatprep.subr.bf16.mxu1 %v9827_v31  ;;  %v9919_v30 = vld [vmem:[#allocation5 + $0xa6c] ss:$16 sps:$4 sm:$0xff]   ;;  %v9914_v31 = vld [vmem:[#allocation5 + $0xa60] ss:$16 sps:$4 sm:$0xff]  }
 0x1b3   :  { %5045 = vmatpush1.bf16.msra.mxu0 %v9822_v32  ;;  %5537 = vmatpush1.bf16.msra.mxu1 %v9825_v33  ;;  %v9917_v32 = vld [vmem:[#allocation5 + $0xa68] ss:$16 sps:$4 sm:$0xff]   ;;  %v9922_v33 = vld [vmem:[#allocation5 + $0xa84] ss:$16 sps:$4 sm:$0xff]  }
 0x1b4   :  { %5046 = vmatprep.subr.bf16.mxu0 %v9830_v34  ;;  %5538 = vmatprep.subr.bf16.mxu1 %v9833_v35  ;;  %v9925_v34 = vld [vmem:[#allocation5 + $0xa8c] ss:$16 sps:$4 sm:$0xff]   ;;  %v9920_v35 = vld [vmem:[#allocation5 + $0xa80] ss:$16 sps:$4 sm:$0xff]  }
 0x1b7   :  { %5047 = vmatpush1.bf16.msra.mxu0 %v9828_v36  ;;  %5539 = vmatpush1.bf16.msra.mxu1 %v9831_v37  ;;  %v9923_v36 = vld [vmem:[#allocation5 + $0xa88] ss:$16 sps:$4 sm:$0xff]   ;;  %v9928_v37 = vld [vmem:[#allocation5 + $0xaa4] ss:$16 sps:$4 sm:$0xff]  }
 0x1b8   :  { %5048 = vmatprep.subr.bf16.mxu0 %v9836_v38  ;;  %5540 = vmatprep.subr.bf16.mxu1 %v9839_v39  ;;  %v9931_v38 = vld [vmem:[#allocation5 + $0xaac] ss:$16 sps:$4 sm:$0xff]   ;;  %v9926_v39 = vld [vmem:[#allocation5 + $0xaa0] ss:$16 sps:$4 sm:$0xff]  }
 0x1bb   :  { %5049 = vmatpush1.bf16.msra.mxu0 %v9834_v40  ;;  %5541 = vmatpush1.bf16.msra.mxu1 %v9837_v41  ;;  %v9929_v40 = vld [vmem:[#allocation5 + $0xaa8] ss:$16 sps:$4 sm:$0xff]   ;;  %v9934_v41 = vld [vmem:[#allocation5 + $0xac4] ss:$16 sps:$4 sm:$0xff]  }
 0x1bc   :  { %5050 = vmatprep.subr.bf16.mxu0 %v9842_v42  ;;  %5542 = vmatprep.subr.bf16.mxu1 %v9845_v43  ;;  %v9937_v42 = vld [vmem:[#allocation5 + $0xacc] ss:$16 sps:$4 sm:$0xff]   ;;  %v9932_v43 = vld [vmem:[#allocation5 + $0xac0] ss:$16 sps:$4 sm:$0xff]  }
 0x1bf   :  { %5051 = vmatpush1.bf16.msra.mxu0 %v9840_v44  ;;  %5543 = vmatpush1.bf16.msra.mxu1 %v9843_v45  ;;  %v9935_v44 = vld [vmem:[#allocation5 + $0xac8] ss:$16 sps:$4 sm:$0xff]   ;;  %v9940_v45 = vld [vmem:[#allocation5 + $0xae4] ss:$16 sps:$4 sm:$0xff]  }
 0x1c0   :  { %5052 = vmatprep.subr.bf16.mxu0 %v9848_v46  ;;  %5544 = vmatprep.subr.bf16.mxu1 %v9851_v47  ;;  %v9943_v46 = vld [vmem:[#allocation5 + $0xaec] ss:$16 sps:$4 sm:$0xff]   ;;  %v9938_v47 = vld [vmem:[#allocation5 + $0xae0] ss:$16 sps:$4 sm:$0xff]  }
 0x1c3   :  { %5053 = vmatpush1.bf16.msra.mxu0 %v9846_v48  ;;  %5545 = vmatpush1.bf16.msra.mxu1 %v9849_v49  ;;  %v9941_v48 = vld [vmem:[#allocation5 + $0xae8] ss:$16 sps:$4 sm:$0xff]   ;;  %v9946_v49 = vld [vmem:[#allocation5 + $0xb04] ss:$16 sps:$4 sm:$0xff]  }
 0x1c4   :  { %5054 = vmatprep.subr.bf16.mxu0 %v9854_v50  ;;  %5546 = vmatprep.subr.bf16.mxu1 %v9857_v51  ;;  %v9949_v50 = vld [vmem:[#allocation5 + $0xb0c] ss:$16 sps:$4 sm:$0xff]   ;;  %v9944_v51 = vld [vmem:[#allocation5 + $0xb00] ss:$16 sps:$4 sm:$0xff]  }
 0x1c7   :  { %5055 = vmatpush1.bf16.msra.mxu0 %v9852_v52  ;;  %5547 = vmatpush1.bf16.msra.mxu1 %v9855_v53  ;;  %v9947_v52 = vld [vmem:[#allocation5 + $0xb08] ss:$16 sps:$4 sm:$0xff]   ;;  %v9952_v53 = vld [vmem:[#allocation5 + $0xb24] ss:$16 sps:$4 sm:$0xff]  }
 0x1c8   :  { %5056 = vmatprep.subr.bf16.mxu0 %v9860_v54  ;;  %5548 = vmatprep.subr.bf16.mxu1 %v9863_v55  ;;  %v9955_v54 = vld [vmem:[#allocation5 + $0xb2c] ss:$16 sps:$4 sm:$0xff]   ;;  %v9950_v55 = vld [vmem:[#allocation5 + $0xb20] ss:$16 sps:$4 sm:$0xff]  }
 0x1cb   :  { %5057 = vmatpush1.bf16.msra.mxu0 %v9858_v56  ;;  %5549 = vmatpush1.bf16.msra.mxu1 %v9861_v57  ;;  %v9953_v56 = vld [vmem:[#allocation5 + $0xb28] ss:$16 sps:$4 sm:$0xff]   ;;  %v9958_v57 = vld [vmem:[#allocation5 + $0xb44] ss:$16 sps:$4 sm:$0xff]  }
 0x1cc   :  { %5058 = vmatprep.subr.bf16.mxu0 %v9866_v58  ;;  %5550 = vmatprep.subr.bf16.mxu1 %v9869_v59  ;;  %v9961_v58 = vld [vmem:[#allocation5 + $0xb4c] ss:$16 sps:$4 sm:$0xff]   ;;  %v9956_v59 = vld [vmem:[#allocation5 + $0xb40] ss:$16 sps:$4 sm:$0xff]  }
 0x1cf   :  { %5059 = vmatpush1.bf16.msra.mxu0 %v9864_v60  ;;  %5551 = vmatpush1.bf16.msra.mxu1 %v9867_v61  ;;  %v9959_v60 = vld [vmem:[#allocation5 + $0xb48] ss:$16 sps:$4 sm:$0xff]   ;;  %v9964_v61 = vld [vmem:[#allocation5 + $0xb64] ss:$16 sps:$4 sm:$0xff]  }
 0x1d0   :  { %5060 = vmatprep.subr.bf16.mxu0 %v9872_v62  ;;  %5552 = vmatprep.subr.bf16.mxu1 %v9875_v63  ;;  %v9967_v62 = vld [vmem:[#allocation5 + $0xb6c] ss:$16 sps:$4 sm:$0xff]   ;;  %v9962_v63 = vld [vmem:[#allocation5 + $0xb60] ss:$16 sps:$4 sm:$0xff]  }
 0x1d3   :  { %5061 = vmatpush1.bf16.msra.mxu0 %v9870_v0  ;;  %5553 = vmatpush1.bf16.msra.mxu1 %v9873_v1  ;;  %v9965_v0 = vld [vmem:[#allocation5 + $0xb68] ss:$16 sps:$4 sm:$0xff]   ;;  %v9970_v1 = vld [vmem:[#allocation5 + $0xb84] ss:$16 sps:$4 sm:$0xff]  }
 0x1d4   :  { %5062 = vmatprep.subr.bf16.mxu0 %v9878_v2  ;;  %5554 = vmatprep.subr.bf16.mxu1 %v9881_v3  ;;  %v9973_v2 = vld [vmem:[#allocation5 + $0xb8c] ss:$16 sps:$4 sm:$0xff]   ;;  %v9968_v3 = vld [vmem:[#allocation5 + $0xb80] ss:$16 sps:$4 sm:$0xff]  }
 0x1d7   :  { %5063 = vmatpush1.bf16.msra.mxu0 %v9876_v4  ;;  %5555 = vmatpush1.bf16.msra.mxu1 %v9879_v5  ;;  %v9971_v4 = vld [vmem:[#allocation5 + $0xb88] ss:$16 sps:$4 sm:$0xff]   ;;  %v9976_v5 = vld [vmem:[#allocation5 + $0xba4] ss:$16 sps:$4 sm:$0xff]  }
 0x1d8   :  { %5064 = vmatprep.subr.bf16.mxu0 %v9884_v6  ;;  %5556 = vmatprep.subr.bf16.mxu1 %v9887_v7  ;;  %v9979_v6 = vld [vmem:[#allocation5 + $0xbac] ss:$16 sps:$4 sm:$0xff]   ;;  %v9974_v7 = vld [vmem:[#allocation5 + $0xba0] ss:$16 sps:$4 sm:$0xff]  }
 0x1db   :  { %5065 = vmatpush1.bf16.msra.mxu0 %v9882_v8  ;;  %5557 = vmatpush1.bf16.msra.mxu1 %v9885_v9  ;;  %v9977_v8 = vld [vmem:[#allocation5 + $0xba8] ss:$16 sps:$4 sm:$0xff]   ;;  %v9982_v9 = vld [vmem:[#allocation5 + $0xbc4] ss:$16 sps:$4 sm:$0xff]  }
 0x1dc   :  { %5066 = vmatprep.subr.bf16.mxu0 %v9890_v10  ;;  %5558 = vmatprep.subr.bf16.mxu1 %v9893_v12  ;;  %v9985_v10 = vld [vmem:[#allocation5 + $0xbcc] ss:$16 sps:$4 sm:$0xff]   ;;  %v9980_v12 = vld [vmem:[#allocation5 + $0xbc0] ss:$16 sps:$4 sm:$0xff]  }
 0x1df   :  { %5067 = vmatpush1.bf16.msra.mxu0 %v9888_v13  ;;  %5559 = vmatpush1.bf16.msra.mxu1 %v9891_v15  ;;  %v9983_v13 = vld [vmem:[#allocation5 + $0xbc8] ss:$16 sps:$4 sm:$0xff]   ;;  %v9988_v15 = vld [vmem:[#allocation5 + $0xbe4] ss:$16 sps:$4 sm:$0xff]  }
 0x1e0   :  { %5077 = vmatprep.subr.bf16.mxu0 %v9898_v16  ;;  %5569 = vmatprep.subr.bf16.mxu1 %v9901_v18  ;;  %v9991_v16 = vld [vmem:[#allocation5 + $0xbec] ss:$16 sps:$4 sm:$0xff]   ;;  %v9986_v18 = vld [vmem:[#allocation5 + $0xbe0] ss:$16 sps:$4 sm:$0xff]  }
 0x1e2   :  { %5069 = vmatmul.mubr.bf16.vlgmr.msra.gmra.mrb[0].mxu0 %v8159_v20  ;;  %5561 = vmatmul.mubr.bf16.vlgmr.msra.gmra.mrb[0].mxu1 %v8159_v20  ;;  %v9989_v20 = vld [vmem:[#allocation5 + $0xbe8] ss:$16 sps:$4 sm:$0xff]  }
 0x1e3   :  { %5078 = vmatpush1.bf16.msra.mxu0 %v9896_v11  ;;  %5570 = vmatpush1.bf16.msra.mxu1 %v9899_v21  ;;  %v9996_v11 = vld [vmem:[#allocation5 + $0xc04] ss:$16 sps:$4 sm:$0xff]   ;;  %v9999_v21 = vld [vmem:[#allocation5 + $0xc0c] ss:$16 sps:$4 sm:$0xff]  }
 0x1e4   :  { %5079 = vmatprep.subr.bf16.mxu0 %v9904_v22  ;;  %5571 = vmatprep.subr.bf16.mxu1 %v9907_v14  ;;  %v11439_v22 = vld [vmem:[#allocation2 + $0x30] sm:$0xff]  ;;  %v8161_v14 = vcombine.low %v11433_v19, %v11433_v19 }
 0x1e5   :  { %5109 = vmatprep.mubr.bf16.mxu0 %v8162_v23  ;;  %5601 = vmatprep.mubr.bf16.mxu1 %v8162_v23  ;;  %v9994_v23 = vld [vmem:[#allocation5 + $0xc00] ss:$16 sps:$4 sm:$0xff]   ;;  %v10008_v19 = vld [vmem:[#allocation5 + $0xc44] ss:$16 sps:$4 sm:$0xff]  }
 0x1e7   :  { %5080 = vmatpush1.bf16.msra.mxu0 %v9902_v24  ;;  %5572 = vmatpush1.bf16.msra.mxu1 %v9905_v25  ;;  %v9997_v24 = vld [vmem:[#allocation5 + $0xc08] ss:$16 sps:$4 sm:$0xff]   ;;  %v10002_v25 = vld [vmem:[#allocation5 + $0xc24] ss:$16 sps:$4 sm:$0xff]  }
 0x1e8   :  { %5081 = vmatprep.subr.bf16.mxu0 %v9910_v17  ;;  %5573 = vmatprep.subr.bf16.mxu1 %v9913_v26  ;;  %v10005_v17 = vld [vmem:[#allocation5 + $0xc2c] ss:$16 sps:$4 sm:$0xff]   ;;  %v8164_v26 = vcombine.high %v11439_v22, %v11439_v22 }
 0x1eb   :  { %5082 = vmatpush1.bf16.msra.mxu0 %v9908_v27  ;;  %5574 = vmatpush1.bf16.msra.mxu1 %v9911_v28  ;;  %v10000_v27 = vld [vmem:[#allocation5 + $0xc20] ss:$16 sps:$4 sm:$0xff]   ;;  %v10003_v28 = vld [vmem:[#allocation5 + $0xc28] ss:$16 sps:$4 sm:$0xff]  }
 0x1ec   :  { %5083 = vmatprep.subr.bf16.mxu0 %v9916_v29  ;;  %5575 = vmatprep.subr.bf16.mxu1 %v9919_v30  ;;  %v10011_v29 = vld [vmem:[#allocation5 + $0xc4c] ss:$16 sps:$4 sm:$0xff]   ;;  %v10006_v30 = vld [vmem:[#allocation5 + $0xc40] ss:$16 sps:$4 sm:$0xff]  }
 0x1ef   :  { %5084 = vmatpush1.bf16.msra.mxu0 %v9914_v31  ;;  %5576 = vmatpush1.bf16.msra.mxu1 %v9917_v32  ;;  %v10009_v31 = vld [vmem:[#allocation5 + $0xc48] ss:$16 sps:$4 sm:$0xff]   ;;  %v10014_v32 = vld [vmem:[#allocation5 + $0xc64] ss:$16 sps:$4 sm:$0xff]  }
 0x1f0   :  { %5085 = vmatprep.subr.bf16.mxu0 %v9922_v33  ;;  %5577 = vmatprep.subr.bf16.mxu1 %v9925_v34  ;;  %v10017_v33 = vld [vmem:[#allocation5 + $0xc6c] ss:$16 sps:$4 sm:$0xff]   ;;  %v10012_v34 = vld [vmem:[#allocation5 + $0xc60] ss:$16 sps:$4 sm:$0xff]  }
 0x1f3   :  { %5086 = vmatpush1.bf16.msra.mxu0 %v9920_v35  ;;  %5578 = vmatpush1.bf16.msra.mxu1 %v9923_v36  ;;  %v10015_v35 = vld [vmem:[#allocation5 + $0xc68] ss:$16 sps:$4 sm:$0xff]   ;;  %v10020_v36 = vld [vmem:[#allocation5 + $0xc84] ss:$16 sps:$4 sm:$0xff]  }
 0x1f4   :  { %5087 = vmatprep.subr.bf16.mxu0 %v9928_v37  ;;  %5579 = vmatprep.subr.bf16.mxu1 %v9931_v38  ;;  %v10023_v37 = vld [vmem:[#allocation5 + $0xc8c] ss:$16 sps:$4 sm:$0xff]   ;;  %v10018_v38 = vld [vmem:[#allocation5 + $0xc80] ss:$16 sps:$4 sm:$0xff]  }
 0x1f7   :  { %5088 = vmatpush1.bf16.msra.mxu0 %v9926_v39  ;;  %5580 = vmatpush1.bf16.msra.mxu1 %v9929_v40  ;;  %v10021_v39 = vld [vmem:[#allocation5 + $0xc88] ss:$16 sps:$4 sm:$0xff]   ;;  %v10026_v40 = vld [vmem:[#allocation5 + $0xca4] ss:$16 sps:$4 sm:$0xff]  }
 0x1f8   :  { %5089 = vmatprep.subr.bf16.mxu0 %v9934_v41  ;;  %5581 = vmatprep.subr.bf16.mxu1 %v9937_v42  ;;  %v10029_v41 = vld [vmem:[#allocation5 + $0xcac] ss:$16 sps:$4 sm:$0xff]   ;;  %v10024_v42 = vld [vmem:[#allocation5 + $0xca0] ss:$16 sps:$4 sm:$0xff]  }
 0x1fb   :  { %5090 = vmatpush1.bf16.msra.mxu0 %v9932_v43  ;;  %5582 = vmatpush1.bf16.msra.mxu1 %v9935_v44  ;;  %v10027_v43 = vld [vmem:[#allocation5 + $0xca8] ss:$16 sps:$4 sm:$0xff]   ;;  %v10032_v44 = vld [vmem:[#allocation5 + $0xcc4] ss:$16 sps:$4 sm:$0xff]  }
 0x1fc   :  { %5091 = vmatprep.subr.bf16.mxu0 %v9940_v45  ;;  %5583 = vmatprep.subr.bf16.mxu1 %v9943_v46  ;;  %v10035_v45 = vld [vmem:[#allocation5 + $0xccc] ss:$16 sps:$4 sm:$0xff]   ;;  %v10030_v46 = vld [vmem:[#allocation5 + $0xcc0] ss:$16 sps:$4 sm:$0xff]  }
 0x1ff   :  { %5092 = vmatpush1.bf16.msra.mxu0 %v9938_v47  ;;  %5584 = vmatpush1.bf16.msra.mxu1 %v9941_v48  ;;  %v10033_v47 = vld [vmem:[#allocation5 + $0xcc8] ss:$16 sps:$4 sm:$0xff]   ;;  %v10038_v48 = vld [vmem:[#allocation5 + $0xce4] ss:$16 sps:$4 sm:$0xff]  }
 0x200   :  { %5093 = vmatprep.subr.bf16.mxu0 %v9946_v49  ;;  %5585 = vmatprep.subr.bf16.mxu1 %v9949_v50  ;;  %v10041_v49 = vld [vmem:[#allocation5 + $0xcec] ss:$16 sps:$4 sm:$0xff]   ;;  %v10036_v50 = vld [vmem:[#allocation5 + $0xce0] ss:$16 sps:$4 sm:$0xff]  }
 0x203   :  { %5094 = vmatpush1.bf16.msra.mxu0 %v9944_v51  ;;  %5586 = vmatpush1.bf16.msra.mxu1 %v9947_v52  ;;  %v10039_v51 = vld [vmem:[#allocation5 + $0xce8] ss:$16 sps:$4 sm:$0xff]   ;;  %v10044_v52 = vld [vmem:[#allocation5 + $0xd04] ss:$16 sps:$4 sm:$0xff]  }
 0x204   :  { %5095 = vmatprep.subr.bf16.mxu0 %v9952_v53  ;;  %5587 = vmatprep.subr.bf16.mxu1 %v9955_v54  ;;  %v10047_v53 = vld [vmem:[#allocation5 + $0xd0c] ss:$16 sps:$4 sm:$0xff]   ;;  %v10042_v54 = vld [vmem:[#allocation5 + $0xd00] ss:$16 sps:$4 sm:$0xff]  }
 0x207   :  { %5096 = vmatpush1.bf16.msra.mxu0 %v9950_v55  ;;  %5588 = vmatpush1.bf16.msra.mxu1 %v9953_v56  ;;  %v10045_v55 = vld [vmem:[#allocation5 + $0xd08] ss:$16 sps:$4 sm:$0xff]   ;;  %v10050_v56 = vld [vmem:[#allocation5 + $0xd24] ss:$16 sps:$4 sm:$0xff]  }
 0x208   :  { %5097 = vmatprep.subr.bf16.mxu0 %v9958_v57  ;;  %5589 = vmatprep.subr.bf16.mxu1 %v9961_v58  ;;  %v10053_v57 = vld [vmem:[#allocation5 + $0xd2c] ss:$16 sps:$4 sm:$0xff]   ;;  %v10048_v58 = vld [vmem:[#allocation5 + $0xd20] ss:$16 sps:$4 sm:$0xff]  }
 0x20b   :  { %5098 = vmatpush1.bf16.msra.mxu0 %v9956_v59  ;;  %5590 = vmatpush1.bf16.msra.mxu1 %v9959_v60  ;;  %v10051_v59 = vld [vmem:[#allocation5 + $0xd28] ss:$16 sps:$4 sm:$0xff]   ;;  %v10056_v60 = vld [vmem:[#allocation5 + $0xd44] ss:$16 sps:$4 sm:$0xff]  }
 0x20c   :  { %5099 = vmatprep.subr.bf16.mxu0 %v9964_v61  ;;  %5591 = vmatprep.subr.bf16.mxu1 %v9967_v62  ;;  %v10059_v61 = vld [vmem:[#allocation5 + $0xd4c] ss:$16 sps:$4 sm:$0xff]   ;;  %v10054_v62 = vld [vmem:[#allocation5 + $0xd40] ss:$16 sps:$4 sm:$0xff]  }
 0x20f   :  { %5100 = vmatpush1.bf16.msra.mxu0 %v9962_v63  ;;  %5592 = vmatpush1.bf16.msra.mxu1 %v9965_v0  ;;  %v10057_v63 = vld [vmem:[#allocation5 + $0xd48] ss:$16 sps:$4 sm:$0xff]   ;;  %v10062_v0 = vld [vmem:[#allocation5 + $0xd64] ss:$16 sps:$4 sm:$0xff]  }
 0x210   :  { %5101 = vmatprep.subr.bf16.mxu0 %v9970_v1  ;;  %5593 = vmatprep.subr.bf16.mxu1 %v9973_v2  ;;  %v10065_v1 = vld [vmem:[#allocation5 + $0xd6c] ss:$16 sps:$4 sm:$0xff]   ;;  %v10060_v2 = vld [vmem:[#allocation5 + $0xd60] ss:$16 sps:$4 sm:$0xff]  }
 0x213   :  { %5102 = vmatpush1.bf16.msra.mxu0 %v9968_v3  ;;  %5594 = vmatpush1.bf16.msra.mxu1 %v9971_v4  ;;  %v10063_v3 = vld [vmem:[#allocation5 + $0xd68] ss:$16 sps:$4 sm:$0xff]   ;;  %v10068_v4 = vld [vmem:[#allocation5 + $0xd84] ss:$16 sps:$4 sm:$0xff]  }
 0x214   :  { %5103 = vmatprep.subr.bf16.mxu0 %v9976_v5  ;;  %5595 = vmatprep.subr.bf16.mxu1 %v9979_v6  ;;  %v10071_v5 = vld [vmem:[#allocation5 + $0xd8c] ss:$16 sps:$4 sm:$0xff]   ;;  %v10066_v6 = vld [vmem:[#allocation5 + $0xd80] ss:$16 sps:$4 sm:$0xff]  }
 0x217   :  { %5104 = vmatpush1.bf16.msra.mxu0 %v9974_v7  ;;  %5596 = vmatpush1.bf16.msra.mxu1 %v9977_v8  ;;  %v10069_v7 = vld [vmem:[#allocation5 + $0xd88] ss:$16 sps:$4 sm:$0xff]   ;;  %v10074_v8 = vld [vmem:[#allocation5 + $0xda4] ss:$16 sps:$4 sm:$0xff]  }
 0x218   :  { %5105 = vmatprep.subr.bf16.mxu0 %v9982_v9  ;;  %5597 = vmatprep.subr.bf16.mxu1 %v9985_v10  ;;  %v10077_v9 = vld [vmem:[#allocation5 + $0xdac] ss:$16 sps:$4 sm:$0xff]   ;;  %v10072_v10 = vld [vmem:[#allocation5 + $0xda0] ss:$16 sps:$4 sm:$0xff]  }
 0x21b   :  { %5106 = vmatpush1.bf16.msra.mxu0 %v9980_v12  ;;  %5598 = vmatpush1.bf16.msra.mxu1 %v9983_v13  ;;  %v10075_v12 = vld [vmem:[#allocation5 + $0xda8] ss:$16 sps:$4 sm:$0xff]   ;;  %v10080_v13 = vld [vmem:[#allocation5 + $0xdc4] ss:$16 sps:$4 sm:$0xff]  }
 0x21c   :  { %5107 = vmatprep.subr.bf16.mxu0 %v9988_v15  ;;  %5599 = vmatprep.subr.bf16.mxu1 %v9991_v16  ;;  %v10083_v15 = vld [vmem:[#allocation5 + $0xdcc] ss:$16 sps:$4 sm:$0xff]   ;;  %v10078_v16 = vld [vmem:[#allocation5 + $0xdc0] ss:$16 sps:$4 sm:$0xff]  }
 0x21f   :  { %5108 = vmatpush1.bf16.msra.mxu0 %v9986_v18  ;;  %5600 = vmatpush1.bf16.msra.mxu1 %v9989_v20  ;;  %v10081_v18 = vld [vmem:[#allocation5 + $0xdc8] ss:$16 sps:$4 sm:$0xff]   ;;  %v10086_v20 = vld [vmem:[#allocation5 + $0xde4] ss:$16 sps:$4 sm:$0xff]  }
 0x220   :  { %5118 = vmatprep.subr.bf16.mxu0 %v9996_v11  ;;  %5610 = vmatprep.subr.bf16.mxu1 %v9999_v21  ;;  %v10089_v11 = vld [vmem:[#allocation5 + $0xdec] ss:$16 sps:$4 sm:$0xff]   ;;  %v10084_v21 = vld [vmem:[#allocation5 + $0xde0] ss:$16 sps:$4 sm:$0xff]  }
 0x222   :  { %5110 = vmatmul.mubr.bf16.vlgmr.msra.gmra.mrb[0].mxu0 %v8161_v14  ;;  %5602 = vmatmul.mubr.bf16.vlgmr.msra.gmra.mrb[0].mxu1 %v8161_v14  ;;  %v10087_v14 = vld [vmem:[#allocation5 + $0xde8] ss:$16 sps:$4 sm:$0xff]  }
 0x223   :  { %5119 = vmatpush1.bf16.msra.mxu0 %v9994_v23  ;;  %5611 = vmatpush1.bf16.msra.mxu1 %v9997_v24  ;;  %v10094_v23 = vld [vmem:[#allocation5 + $0xe04] ss:$16 sps:$4 sm:$0xff]   ;;  %v10097_v24 = vld [vmem:[#allocation5 + $0xe0c] ss:$16 sps:$4 sm:$0xff]  }
 0x224   :  { %5120 = vmatprep.subr.bf16.mxu0 %v10002_v25  ;;  %5612 = vmatprep.subr.bf16.mxu1 %v10005_v17  ;;  %v11445_v25 = vld [vmem:[#allocation2 + $0x38] sm:$0xff]  ;;  %v8163_v17 = vcombine.low %v11439_v22, %v11439_v22  ;;  %v10106_v22 = vld [vmem:[#allocation5 + $0xe44] ss:$16 sps:$4 sm:$0xff]  }
 0x225   :  { %5150 = vmatprep.mubr.bf16.mxu0 %v8164_v26  ;;  %5642 = vmatprep.mubr.bf16.mxu1 %v8164_v26  ;;  %v10092_v26 = vld [vmem:[#allocation5 + $0xe00] ss:$16 sps:$4 sm:$0xff]  }
 0x227   :  { %5121 = vmatpush1.bf16.msra.mxu0 %v10000_v27  ;;  %5613 = vmatpush1.bf16.msra.mxu1 %v10003_v28  ;;  %v10095_v27 = vld [vmem:[#allocation5 + $0xe08] ss:$16 sps:$4 sm:$0xff]   ;;  %v10100_v28 = vld [vmem:[#allocation5 + $0xe24] ss:$16 sps:$4 sm:$0xff]  }
 0x228   :  { %5122 = vmatprep.subr.bf16.mxu0 %v10008_v19  ;;  %5614 = vmatprep.subr.bf16.mxu1 %v10011_v29  ;;  %v10103_v19 = vld [vmem:[#allocation5 + $0xe2c] ss:$16 sps:$4 sm:$0xff]   ;;  %v8166_v29 = vcombine.high %v11445_v25, %v11445_v25 }
 0x22b   :  { %5123 = vmatpush1.bf16.msra.mxu0 %v10006_v30  ;;  %5615 = vmatpush1.bf16.msra.mxu1 %v10009_v31  ;;  %v10098_v30 = vld [vmem:[#allocation5 + $0xe20] ss:$16 sps:$4 sm:$0xff]   ;;  %v10101_v31 = vld [vmem:[#allocation5 + $0xe28] ss:$16 sps:$4 sm:$0xff]  }
 0x22c   :  { %5124 = vmatprep.subr.bf16.mxu0 %v10014_v32  ;;  %5616 = vmatprep.subr.bf16.mxu1 %v10017_v33  ;;  %v10109_v32 = vld [vmem:[#allocation5 + $0xe4c] ss:$16 sps:$4 sm:$0xff]   ;;  %v10104_v33 = vld [vmem:[#allocation5 + $0xe40] ss:$16 sps:$4 sm:$0xff]  }
 0x22f   :  { %5125 = vmatpush1.bf16.msra.mxu0 %v10012_v34  ;;  %5617 = vmatpush1.bf16.msra.mxu1 %v10015_v35  ;;  %v10107_v34 = vld [vmem:[#allocation5 + $0xe48] ss:$16 sps:$4 sm:$0xff]   ;;  %v10112_v35 = vld [vmem:[#allocation5 + $0xe64] ss:$16 sps:$4 sm:$0xff]  }
 0x230   :  { %5126 = vmatprep.subr.bf16.mxu0 %v10020_v36  ;;  %5618 = vmatprep.subr.bf16.mxu1 %v10023_v37  ;;  %v10115_v36 = vld [vmem:[#allocation5 + $0xe6c] ss:$16 sps:$4 sm:$0xff]   ;;  %v10110_v37 = vld [vmem:[#allocation5 + $0xe60] ss:$16 sps:$4 sm:$0xff]  }
 0x233   :  { %5127 = vmatpush1.bf16.msra.mxu0 %v10018_v38  ;;  %5619 = vmatpush1.bf16.msra.mxu1 %v10021_v39  ;;  %v10113_v38 = vld [vmem:[#allocation5 + $0xe68] ss:$16 sps:$4 sm:$0xff]   ;;  %v10118_v39 = vld [vmem:[#allocation5 + $0xe84] ss:$16 sps:$4 sm:$0xff]  }
 0x234   :  { %5128 = vmatprep.subr.bf16.mxu0 %v10026_v40  ;;  %5620 = vmatprep.subr.bf16.mxu1 %v10029_v41  ;;  %v10121_v40 = vld [vmem:[#allocation5 + $0xe8c] ss:$16 sps:$4 sm:$0xff]   ;;  %v10116_v41 = vld [vmem:[#allocation5 + $0xe80] ss:$16 sps:$4 sm:$0xff]  }
 0x237   :  { %5129 = vmatpush1.bf16.msra.mxu0 %v10024_v42  ;;  %5621 = vmatpush1.bf16.msra.mxu1 %v10027_v43  ;;  %v10119_v42 = vld [vmem:[#allocation5 + $0xe88] ss:$16 sps:$4 sm:$0xff]   ;;  %v10124_v43 = vld [vmem:[#allocation5 + $0xea4] ss:$16 sps:$4 sm:$0xff]  }
 0x238   :  { %5130 = vmatprep.subr.bf16.mxu0 %v10032_v44  ;;  %5622 = vmatprep.subr.bf16.mxu1 %v10035_v45  ;;  %v10127_v44 = vld [vmem:[#allocation5 + $0xeac] ss:$16 sps:$4 sm:$0xff]   ;;  %v10122_v45 = vld [vmem:[#allocation5 + $0xea0] ss:$16 sps:$4 sm:$0xff]  }
 0x23b   :  { %5131 = vmatpush1.bf16.msra.mxu0 %v10030_v46  ;;  %5623 = vmatpush1.bf16.msra.mxu1 %v10033_v47  ;;  %v10125_v46 = vld [vmem:[#allocation5 + $0xea8] ss:$16 sps:$4 sm:$0xff]   ;;  %v10130_v47 = vld [vmem:[#allocation5 + $0xec4] ss:$16 sps:$4 sm:$0xff]  }
 0x23c   :  { %5132 = vmatprep.subr.bf16.mxu0 %v10038_v48  ;;  %5624 = vmatprep.subr.bf16.mxu1 %v10041_v49  ;;  %v10133_v48 = vld [vmem:[#allocation5 + $0xecc] ss:$16 sps:$4 sm:$0xff]   ;;  %v10128_v49 = vld [vmem:[#allocation5 + $0xec0] ss:$16 sps:$4 sm:$0xff]  }
 0x23f   :  { %5133 = vmatpush1.bf16.msra.mxu0 %v10036_v50  ;;  %5625 = vmatpush1.bf16.msra.mxu1 %v10039_v51  ;;  %v10131_v50 = vld [vmem:[#allocation5 + $0xec8] ss:$16 sps:$4 sm:$0xff]   ;;  %v10136_v51 = vld [vmem:[#allocation5 + $0xee4] ss:$16 sps:$4 sm:$0xff]  }
 0x240   :  { %5134 = vmatprep.subr.bf16.mxu0 %v10044_v52  ;;  %5626 = vmatprep.subr.bf16.mxu1 %v10047_v53  ;;  %v10139_v52 = vld [vmem:[#allocation5 + $0xeec] ss:$16 sps:$4 sm:$0xff]   ;;  %v10134_v53 = vld [vmem:[#allocation5 + $0xee0] ss:$16 sps:$4 sm:$0xff]  }
 0x243   :  { %5135 = vmatpush1.bf16.msra.mxu0 %v10042_v54  ;;  %5627 = vmatpush1.bf16.msra.mxu1 %v10045_v55  ;;  %v10137_v54 = vld [vmem:[#allocation5 + $0xee8] ss:$16 sps:$4 sm:$0xff]   ;;  %v10142_v55 = vld [vmem:[#allocation5 + $0xf04] ss:$16 sps:$4 sm:$0xff]  }
 0x244   :  { %5136 = vmatprep.subr.bf16.mxu0 %v10050_v56  ;;  %5628 = vmatprep.subr.bf16.mxu1 %v10053_v57  ;;  %v10145_v56 = vld [vmem:[#allocation5 + $0xf0c] ss:$16 sps:$4 sm:$0xff]   ;;  %v10140_v57 = vld [vmem:[#allocation5 + $0xf00] ss:$16 sps:$4 sm:$0xff]  }
 0x247   :  { %5137 = vmatpush1.bf16.msra.mxu0 %v10048_v58  ;;  %5629 = vmatpush1.bf16.msra.mxu1 %v10051_v59  ;;  %v10143_v58 = vld [vmem:[#allocation5 + $0xf08] ss:$16 sps:$4 sm:$0xff]   ;;  %v10148_v59 = vld [vmem:[#allocation5 + $0xf24] ss:$16 sps:$4 sm:$0xff]  }
 0x248   :  { %5138 = vmatprep.subr.bf16.mxu0 %v10056_v60  ;;  %5630 = vmatprep.subr.bf16.mxu1 %v10059_v61  ;;  %v10151_v60 = vld [vmem:[#allocation5 + $0xf2c] ss:$16 sps:$4 sm:$0xff]   ;;  %v10146_v61 = vld [vmem:[#allocation5 + $0xf20] ss:$16 sps:$4 sm:$0xff]  }
 0x24b   :  { %5139 = vmatpush1.bf16.msra.mxu0 %v10054_v62  ;;  %5631 = vmatpush1.bf16.msra.mxu1 %v10057_v63  ;;  %v10149_v62 = vld [vmem:[#allocation5 + $0xf28] ss:$16 sps:$4 sm:$0xff]   ;;  %v10154_v63 = vld [vmem:[#allocation5 + $0xf44] ss:$16 sps:$4 sm:$0xff]  }
 0x24c   :  { %5140 = vmatprep.subr.bf16.mxu0 %v10062_v0  ;;  %5632 = vmatprep.subr.bf16.mxu1 %v10065_v1  ;;  %v10157_v0 = vld [vmem:[#allocation5 + $0xf4c] ss:$16 sps:$4 sm:$0xff]   ;;  %v10152_v1 = vld [vmem:[#allocation5 + $0xf40] ss:$16 sps:$4 sm:$0xff]  }
 0x24f   :  { %5141 = vmatpush1.bf16.msra.mxu0 %v10060_v2  ;;  %5633 = vmatpush1.bf16.msra.mxu1 %v10063_v3  ;;  %v10155_v2 = vld [vmem:[#allocation5 + $0xf48] ss:$16 sps:$4 sm:$0xff]   ;;  %v10160_v3 = vld [vmem:[#allocation5 + $0xf64] ss:$16 sps:$4 sm:$0xff]  }
 0x250   :  { %5142 = vmatprep.subr.bf16.mxu0 %v10068_v4  ;;  %5634 = vmatprep.subr.bf16.mxu1 %v10071_v5  ;;  %v10163_v4 = vld [vmem:[#allocation5 + $0xf6c] ss:$16 sps:$4 sm:$0xff]   ;;  %v10158_v5 = vld [vmem:[#allocation5 + $0xf60] ss:$16 sps:$4 sm:$0xff]  }
 0x253   :  { %5143 = vmatpush1.bf16.msra.mxu0 %v10066_v6  ;;  %5635 = vmatpush1.bf16.msra.mxu1 %v10069_v7  ;;  %v10161_v6 = vld [vmem:[#allocation5 + $0xf68] ss:$16 sps:$4 sm:$0xff]   ;;  %v10166_v7 = vld [vmem:[#allocation5 + $0xf84] ss:$16 sps:$4 sm:$0xff]  }
 0x254   :  { %5144 = vmatprep.subr.bf16.mxu0 %v10074_v8  ;;  %5636 = vmatprep.subr.bf16.mxu1 %v10077_v9  ;;  %v10169_v8 = vld [vmem:[#allocation5 + $0xf8c] ss:$16 sps:$4 sm:$0xff]   ;;  %v10164_v9 = vld [vmem:[#allocation5 + $0xf80] ss:$16 sps:$4 sm:$0xff]  }
 0x257   :  { %5145 = vmatpush1.bf16.msra.mxu0 %v10072_v10  ;;  %5637 = vmatpush1.bf16.msra.mxu1 %v10075_v12  ;;  %v10167_v10 = vld [vmem:[#allocation5 + $0xf88] ss:$16 sps:$4 sm:$0xff]   ;;  %v10172_v12 = vld [vmem:[#allocation5 + $0xfa4] ss:$16 sps:$4 sm:$0xff]  }
 0x258   :  { %5146 = vmatprep.subr.bf16.mxu0 %v10080_v13  ;;  %5638 = vmatprep.subr.bf16.mxu1 %v10083_v15  ;;  %v10175_v13 = vld [vmem:[#allocation5 + $0xfac] ss:$16 sps:$4 sm:$0xff]   ;;  %v10170_v15 = vld [vmem:[#allocation5 + $0xfa0] ss:$16 sps:$4 sm:$0xff]  }
 0x25b   :  { %5147 = vmatpush1.bf16.msra.mxu0 %v10078_v16  ;;  %5639 = vmatpush1.bf16.msra.mxu1 %v10081_v18  ;;  %v10173_v16 = vld [vmem:[#allocation5 + $0xfa8] ss:$16 sps:$4 sm:$0xff]   ;;  %v10178_v18 = vld [vmem:[#allocation5 + $0xfc4] ss:$16 sps:$4 sm:$0xff]  }
 0x25c   :  { %5148 = vmatprep.subr.bf16.mxu0 %v10086_v20  ;;  %5640 = vmatprep.subr.bf16.mxu1 %v10089_v11  ;;  %v10181_v20 = vld [vmem:[#allocation5 + $0xfcc] ss:$16 sps:$4 sm:$0xff]   ;;  %v10176_v11 = vld [vmem:[#allocation5 + $0xfc0] ss:$16 sps:$4 sm:$0xff]  }
 0x25f   :  { %5149 = vmatpush1.bf16.msra.mxu0 %v10084_v21  ;;  %5641 = vmatpush1.bf16.msra.mxu1 %v10087_v14  ;;  %v10179_v21 = vld [vmem:[#allocation5 + $0xfc8] ss:$16 sps:$4 sm:$0xff]   ;;  %v10184_v14 = vld [vmem:[#allocation5 + $0xfe4] ss:$16 sps:$4 sm:$0xff]  }
 0x260   :  { %5159 = vmatprep.subr.bf16.mxu0 %v10094_v23  ;;  %5651 = vmatprep.subr.bf16.mxu1 %v10097_v24  ;;  %v10187_v23 = vld [vmem:[#allocation5 + $0xfec] ss:$16 sps:$4 sm:$0xff]   ;;  %v10182_v24 = vld [vmem:[#allocation5 + $0xfe0] ss:$16 sps:$4 sm:$0xff]  }
 0x262   :  { %5151 = vmatmul.mubr.bf16.vlgmr.msra.gmra.mrb[0].mxu0 %v8163_v17  ;;  %5643 = vmatmul.mubr.bf16.vlgmr.msra.gmra.mrb[0].mxu1 %v8163_v17  ;;  %v10185_v17 = vld [vmem:[#allocation5 + $0xfe8] ss:$16 sps:$4 sm:$0xff]  }
 0x263   :  { %5160 = vmatpush1.bf16.msra.mxu0 %v10092_v26  ;;  %5652 = vmatpush1.bf16.msra.mxu1 %v10095_v27  ;;  %v10192_v26 = vld [vmem:[#allocation5 + $0x1004] ss:$16 sps:$4 sm:$0xff]   ;;  %v10195_v27 = vld [vmem:[#allocation5 + $0x100c] ss:$16 sps:$4 sm:$0xff]  }
 0x264   :  { %5161 = vmatprep.subr.bf16.mxu0 %v10100_v28  ;;  %5653 = vmatprep.subr.bf16.mxu1 %v10103_v19  ;;  %v11451_v28 = vld [vmem:[#allocation2 + $0x40] sm:$0xff]  ;;  %v8165_v19 = vcombine.low %v11445_v25, %v11445_v25 }
 0x265   :  { %5191 = vmatprep.mubr.bf16.mxu0 %v8166_v29  ;;  %5683 = vmatprep.mubr.bf16.mxu1 %v8166_v29  ;;  %v10190_v29 = vld [vmem:[#allocation5 + $0x1000] ss:$16 sps:$4 sm:$0xff]   ;;  %v10204_v25 = vld [vmem:[#allocation5 + $0x1044] ss:$16 sps:$4 sm:$0xff]  }
 0x267   :  { %5162 = vmatpush1.bf16.msra.mxu0 %v10098_v30  ;;  %5654 = vmatpush1.bf16.msra.mxu1 %v10101_v31  ;;  %v10193_v30 = vld [vmem:[#allocation5 + $0x1008] ss:$16 sps:$4 sm:$0xff]   ;;  %v10198_v31 = vld [vmem:[#allocation5 + $0x1024] ss:$16 sps:$4 sm:$0xff]  }
 0x268   :  { %5163 = vmatprep.subr.bf16.mxu0 %v10106_v22  ;;  %5655 = vmatprep.subr.bf16.mxu1 %v10109_v32  ;;  %v10201_v22 = vld [vmem:[#allocation5 + $0x102c] ss:$16 sps:$4 sm:$0xff]   ;;  %v8168_v32 = vcombine.high %v11451_v28, %v11451_v28 }
 0x26b   :  { %5164 = vmatpush1.bf16.msra.mxu0 %v10104_v33  ;;  %5656 = vmatpush1.bf16.msra.mxu1 %v10107_v34  ;;  %v10196_v33 = vld [vmem:[#allocation5 + $0x1020] ss:$16 sps:$4 sm:$0xff]   ;;  %v10199_v34 = vld [vmem:[#allocation5 + $0x1028] ss:$16 sps:$4 sm:$0xff]  }
 0x26c   :  { %5165 = vmatprep.subr.bf16.mxu0 %v10112_v35  ;;  %5657 = vmatprep.subr.bf16.mxu1 %v10115_v36  ;;  %v10207_v35 = vld [vmem:[#allocation5 + $0x104c] ss:$16 sps:$4 sm:$0xff]   ;;  %v10202_v36 = vld [vmem:[#allocation5 + $0x1040] ss:$16 sps:$4 sm:$0xff]  }
 0x26f   :  { %5166 = vmatpush1.bf16.msra.mxu0 %v10110_v37  ;;  %5658 = vmatpush1.bf16.msra.mxu1 %v10113_v38  ;;  %v10205_v37 = vld [vmem:[#allocation5 + $0x1048] ss:$16 sps:$4 sm:$0xff]   ;;  %v10210_v38 = vld [vmem:[#allocation5 + $0x1064] ss:$16 sps:$4 sm:$0xff]  }
 0x270   :  { %5167 = vmatprep.subr.bf16.mxu0 %v10118_v39  ;;  %5659 = vmatprep.subr.bf16.mxu1 %v10121_v40  ;;  %v10213_v39 = vld [vmem:[#allocation5 + $0x106c] ss:$16 sps:$4 sm:$0xff]   ;;  %v10208_v40 = vld [vmem:[#allocation5 + $0x1060] ss:$16 sps:$4 sm:$0xff]  }
 0x273   :  { %5168 = vmatpush1.bf16.msra.mxu0 %v10116_v41  ;;  %5660 = vmatpush1.bf16.msra.mxu1 %v10119_v42  ;;  %v10211_v41 = vld [vmem:[#allocation5 + $0x1068] ss:$16 sps:$4 sm:$0xff]   ;;  %v10216_v42 = vld [vmem:[#allocation5 + $0x1084] ss:$16 sps:$4 sm:$0xff]  }
 0x274   :  { %5169 = vmatprep.subr.bf16.mxu0 %v10124_v43  ;;  %5661 = vmatprep.subr.bf16.mxu1 %v10127_v44  ;;  %v10219_v43 = vld [vmem:[#allocation5 + $0x108c] ss:$16 sps:$4 sm:$0xff]   ;;  %v10214_v44 = vld [vmem:[#allocation5 + $0x1080] ss:$16 sps:$4 sm:$0xff]  }
 0x277   :  { %5170 = vmatpush1.bf16.msra.mxu0 %v10122_v45  ;;  %5662 = vmatpush1.bf16.msra.mxu1 %v10125_v46  ;;  %v10217_v45 = vld [vmem:[#allocation5 + $0x1088] ss:$16 sps:$4 sm:$0xff]   ;;  %v10222_v46 = vld [vmem:[#allocation5 + $0x10a4] ss:$16 sps:$4 sm:$0xff]  }
 0x278   :  { %5171 = vmatprep.subr.bf16.mxu0 %v10130_v47  ;;  %5663 = vmatprep.subr.bf16.mxu1 %v10133_v48  ;;  %v10225_v47 = vld [vmem:[#allocation5 + $0x10ac] ss:$16 sps:$4 sm:$0xff]   ;;  %v10220_v48 = vld [vmem:[#allocation5 + $0x10a0] ss:$16 sps:$4 sm:$0xff]  }
 0x27b   :  { %5172 = vmatpush1.bf16.msra.mxu0 %v10128_v49  ;;  %5664 = vmatpush1.bf16.msra.mxu1 %v10131_v50  ;;  %v10223_v49 = vld [vmem:[#allocation5 + $0x10a8] ss:$16 sps:$4 sm:$0xff]   ;;  %v10228_v50 = vld [vmem:[#allocation5 + $0x10c4] ss:$16 sps:$4 sm:$0xff]  }
 0x27c   :  { %5173 = vmatprep.subr.bf16.mxu0 %v10136_v51  ;;  %5665 = vmatprep.subr.bf16.mxu1 %v10139_v52  ;;  %v10231_v51 = vld [vmem:[#allocation5 + $0x10cc] ss:$16 sps:$4 sm:$0xff]   ;;  %v10226_v52 = vld [vmem:[#allocation5 + $0x10c0] ss:$16 sps:$4 sm:$0xff]  }
 0x27f   :  { %5174 = vmatpush1.bf16.msra.mxu0 %v10134_v53  ;;  %5666 = vmatpush1.bf16.msra.mxu1 %v10137_v54  ;;  %v10229_v53 = vld [vmem:[#allocation5 + $0x10c8] ss:$16 sps:$4 sm:$0xff]   ;;  %v10234_v54 = vld [vmem:[#allocation5 + $0x10e4] ss:$16 sps:$4 sm:$0xff]  }
 0x280   :  { %5175 = vmatprep.subr.bf16.mxu0 %v10142_v55  ;;  %5667 = vmatprep.subr.bf16.mxu1 %v10145_v56  ;;  %v10237_v55 = vld [vmem:[#allocation5 + $0x10ec] ss:$16 sps:$4 sm:$0xff]   ;;  %v10232_v56 = vld [vmem:[#allocation5 + $0x10e0] ss:$16 sps:$4 sm:$0xff]  }
 0x283   :  { %5176 = vmatpush1.bf16.msra.mxu0 %v10140_v57  ;;  %5668 = vmatpush1.bf16.msra.mxu1 %v10143_v58  ;;  %v10235_v57 = vld [vmem:[#allocation5 + $0x10e8] ss:$16 sps:$4 sm:$0xff]   ;;  %v10240_v58 = vld [vmem:[#allocation5 + $0x1104] ss:$16 sps:$4 sm:$0xff]  }
 0x284   :  { %5177 = vmatprep.subr.bf16.mxu0 %v10148_v59  ;;  %5669 = vmatprep.subr.bf16.mxu1 %v10151_v60  ;;  %v10243_v59 = vld [vmem:[#allocation5 + $0x110c] ss:$16 sps:$4 sm:$0xff]   ;;  %v10238_v60 = vld [vmem:[#allocation5 + $0x1100] ss:$16 sps:$4 sm:$0xff]  }
 0x287   :  { %5178 = vmatpush1.bf16.msra.mxu0 %v10146_v61  ;;  %5670 = vmatpush1.bf16.msra.mxu1 %v10149_v62  ;;  %v10241_v61 = vld [vmem:[#allocation5 + $0x1108] ss:$16 sps:$4 sm:$0xff]   ;;  %v10246_v62 = vld [vmem:[#allocation5 + $0x1124] ss:$16 sps:$4 sm:$0xff]  }
 0x288   :  { %5179 = vmatprep.subr.bf16.mxu0 %v10154_v63  ;;  %5671 = vmatprep.subr.bf16.mxu1 %v10157_v0  ;;  %v10249_v63 = vld [vmem:[#allocation5 + $0x112c] ss:$16 sps:$4 sm:$0xff]   ;;  %v10244_v0 = vld [vmem:[#allocation5 + $0x1120] ss:$16 sps:$4 sm:$0xff]  }
 0x28b   :  { %5180 = vmatpush1.bf16.msra.mxu0 %v10152_v1  ;;  %5672 = vmatpush1.bf16.msra.mxu1 %v10155_v2  ;;  %v10247_v1 = vld [vmem:[#allocation5 + $0x1128] ss:$16 sps:$4 sm:$0xff]   ;;  %v10252_v2 = vld [vmem:[#allocation5 + $0x1144] ss:$16 sps:$4 sm:$0xff]  }
 0x28c   :  { %5181 = vmatprep.subr.bf16.mxu0 %v10160_v3  ;;  %5673 = vmatprep.subr.bf16.mxu1 %v10163_v4  ;;  %v10255_v3 = vld [vmem:[#allocation5 + $0x114c] ss:$16 sps:$4 sm:$0xff]   ;;  %v10250_v4 = vld [vmem:[#allocation5 + $0x1140] ss:$16 sps:$4 sm:$0xff]  }
 0x28f   :  { %5182 = vmatpush1.bf16.msra.mxu0 %v10158_v5  ;;  %5674 = vmatpush1.bf16.msra.mxu1 %v10161_v6  ;;  %v10253_v5 = vld [vmem:[#allocation5 + $0x1148] ss:$16 sps:$4 sm:$0xff]   ;;  %v10258_v6 = vld [vmem:[#allocation5 + $0x1164] ss:$16 sps:$4 sm:$0xff]  }
 0x290   :  { %5183 = vmatprep.subr.bf16.mxu0 %v10166_v7  ;;  %5675 = vmatprep.subr.bf16.mxu1 %v10169_v8  ;;  %v10261_v7 = vld [vmem:[#allocation5 + $0x116c] ss:$16 sps:$4 sm:$0xff]   ;;  %v10256_v8 = vld [vmem:[#allocation5 + $0x1160] ss:$16 sps:$4 sm:$0xff]  }
 0x293   :  { %5184 = vmatpush1.bf16.msra.mxu0 %v10164_v9  ;;  %5676 = vmatpush1.bf16.msra.mxu1 %v10167_v10  ;;  %v10259_v9 = vld [vmem:[#allocation5 + $0x1168] ss:$16 sps:$4 sm:$0xff]   ;;  %v10264_v10 = vld [vmem:[#allocation5 + $0x1184] ss:$16 sps:$4 sm:$0xff]  }
 0x294   :  { %5185 = vmatprep.subr.bf16.mxu0 %v10172_v12  ;;  %5677 = vmatprep.subr.bf16.mxu1 %v10175_v13  ;;  %v10267_v12 = vld [vmem:[#allocation5 + $0x118c] ss:$16 sps:$4 sm:$0xff]   ;;  %v10262_v13 = vld [vmem:[#allocation5 + $0x1180] ss:$16 sps:$4 sm:$0xff]  }
 0x297   :  { %5186 = vmatpush1.bf16.msra.mxu0 %v10170_v15  ;;  %5678 = vmatpush1.bf16.msra.mxu1 %v10173_v16  ;;  %v10265_v15 = vld [vmem:[#allocation5 + $0x1188] ss:$16 sps:$4 sm:$0xff]   ;;  %v10270_v16 = vld [vmem:[#allocation5 + $0x11a4] ss:$16 sps:$4 sm:$0xff]  }
 0x298   :  { %5187 = vmatprep.subr.bf16.mxu0 %v10178_v18  ;;  %5679 = vmatprep.subr.bf16.mxu1 %v10181_v20  ;;  %v10273_v18 = vld [vmem:[#allocation5 + $0x11ac] ss:$16 sps:$4 sm:$0xff]   ;;  %v10268_v20 = vld [vmem:[#allocation5 + $0x11a0] ss:$16 sps:$4 sm:$0xff]  }
 0x29b   :  { %5188 = vmatpush1.bf16.msra.mxu0 %v10176_v11  ;;  %5680 = vmatpush1.bf16.msra.mxu1 %v10179_v21  ;;  %v10271_v11 = vld [vmem:[#allocation5 + $0x11a8] ss:$16 sps:$4 sm:$0xff]   ;;  %v10276_v21 = vld [vmem:[#allocation5 + $0x11c4] ss:$16 sps:$4 sm:$0xff]  }
 0x29c   :  { %5189 = vmatprep.subr.bf16.mxu0 %v10184_v14  ;;  %5681 = vmatprep.subr.bf16.mxu1 %v10187_v23  ;;  %v10279_v14 = vld [vmem:[#allocation5 + $0x11cc] ss:$16 sps:$4 sm:$0xff]   ;;  %v10274_v23 = vld [vmem:[#allocation5 + $0x11c0] ss:$16 sps:$4 sm:$0xff]  }
 0x29f   :  { %5190 = vmatpush1.bf16.msra.mxu0 %v10182_v24  ;;  %5682 = vmatpush1.bf16.msra.mxu1 %v10185_v17  ;;  %v10277_v24 = vld [vmem:[#allocation5 + $0x11c8] ss:$16 sps:$4 sm:$0xff]   ;;  %v10282_v17 = vld [vmem:[#allocation5 + $0x11e4] ss:$16 sps:$4 sm:$0xff]  }
 0x2a0   :  { %5200 = vmatprep.subr.bf16.mxu0 %v10192_v26  ;;  %5692 = vmatprep.subr.bf16.mxu1 %v10195_v27  ;;  %v10285_v26 = vld [vmem:[#allocation5 + $0x11ec] ss:$16 sps:$4 sm:$0xff]   ;;  %v10280_v27 = vld [vmem:[#allocation5 + $0x11e0] ss:$16 sps:$4 sm:$0xff]  }
 0x2a2   :  { %5192 = vmatmul.mubr.bf16.vlgmr.msra.gmra.mrb[0].mxu0 %v8165_v19  ;;  %5684 = vmatmul.mubr.bf16.vlgmr.msra.gmra.mrb[0].mxu1 %v8165_v19  ;;  %v10283_v19 = vld [vmem:[#allocation5 + $0x11e8] ss:$16 sps:$4 sm:$0xff]  }
 0x2a3   :  { %5201 = vmatpush1.bf16.msra.mxu0 %v10190_v29  ;;  %5693 = vmatpush1.bf16.msra.mxu1 %v10193_v30  ;;  %v10290_v29 = vld [vmem:[#allocation5 + $0x1204] ss:$16 sps:$4 sm:$0xff]   ;;  %v10293_v30 = vld [vmem:[#allocation5 + $0x120c] ss:$16 sps:$4 sm:$0xff]  }
 0x2a4   :  { %5202 = vmatprep.subr.bf16.mxu0 %v10198_v31  ;;  %5694 = vmatprep.subr.bf16.mxu1 %v10201_v22  ;;  %v11457_v31 = vld [vmem:[#allocation2 + $0x48] sm:$0xff]  ;;  %v8167_v22 = vcombine.low %v11451_v28, %v11451_v28  ;;  %v10302_v28 = vld [vmem:[#allocation5 + $0x1244] ss:$16 sps:$4 sm:$0xff]  }
 0x2a5   :  { %5232 = vmatprep.mubr.bf16.mxu0 %v8168_v32  ;;  %5724 = vmatprep.mubr.bf16.mxu1 %v8168_v32  ;;  %v10288_v32 = vld [vmem:[#allocation5 + $0x1200] ss:$16 sps:$4 sm:$0xff]  }
 0x2a7   :  { %5203 = vmatpush1.bf16.msra.mxu0 %v10196_v33  ;;  %5695 = vmatpush1.bf16.msra.mxu1 %v10199_v34  ;;  %v10291_v33 = vld [vmem:[#allocation5 + $0x1208] ss:$16 sps:$4 sm:$0xff]   ;;  %v10296_v34 = vld [vmem:[#allocation5 + $0x1224] ss:$16 sps:$4 sm:$0xff]  }
 0x2a8   :  { %5204 = vmatprep.subr.bf16.mxu0 %v10204_v25  ;;  %5696 = vmatprep.subr.bf16.mxu1 %v10207_v35  ;;  %v10299_v25 = vld [vmem:[#allocation5 + $0x122c] ss:$16 sps:$4 sm:$0xff]   ;;  %v8170_v35 = vcombine.high %v11457_v31, %v11457_v31 }
 0x2ab   :  { %5205 = vmatpush1.bf16.msra.mxu0 %v10202_v36  ;;  %5697 = vmatpush1.bf16.msra.mxu1 %v10205_v37  ;;  %v10294_v36 = vld [vmem:[#allocation5 + $0x1220] ss:$16 sps:$4 sm:$0xff]   ;;  %v10297_v37 = vld [vmem:[#allocation5 + $0x1228] ss:$16 sps:$4 sm:$0xff]  }
 0x2ac   :  { %5206 = vmatprep.subr.bf16.mxu0 %v10210_v38  ;;  %5698 = vmatprep.subr.bf16.mxu1 %v10213_v39  ;;  %v10305_v38 = vld [vmem:[#allocation5 + $0x124c] ss:$16 sps:$4 sm:$0xff]   ;;  %v10300_v39 = vld [vmem:[#allocation5 + $0x1240] ss:$16 sps:$4 sm:$0xff]  }
 0x2af   :  { %5207 = vmatpush1.bf16.msra.mxu0 %v10208_v40  ;;  %5699 = vmatpush1.bf16.msra.mxu1 %v10211_v41  ;;  %v10303_v40 = vld [vmem:[#allocation5 + $0x1248] ss:$16 sps:$4 sm:$0xff]   ;;  %v10308_v41 = vld [vmem:[#allocation5 + $0x1264] ss:$16 sps:$4 sm:$0xff]  }
 0x2b0   :  { %5208 = vmatprep.subr.bf16.mxu0 %v10216_v42  ;;  %5700 = vmatprep.subr.bf16.mxu1 %v10219_v43  ;;  %v10311_v42 = vld [vmem:[#allocation5 + $0x126c] ss:$16 sps:$4 sm:$0xff]   ;;  %v10306_v43 = vld [vmem:[#allocation5 + $0x1260] ss:$16 sps:$4 sm:$0xff]  }
 0x2b3   :  { %5209 = vmatpush1.bf16.msra.mxu0 %v10214_v44  ;;  %5701 = vmatpush1.bf16.msra.mxu1 %v10217_v45  ;;  %v10309_v44 = vld [vmem:[#allocation5 + $0x1268] ss:$16 sps:$4 sm:$0xff]   ;;  %v10314_v45 = vld [vmem:[#allocation5 + $0x1284] ss:$16 sps:$4 sm:$0xff]  }
 0x2b4   :  { %5210 = vmatprep.subr.bf16.mxu0 %v10222_v46  ;;  %5702 = vmatprep.subr.bf16.mxu1 %v10225_v47  ;;  %v10317_v46 = vld [vmem:[#allocation5 + $0x128c] ss:$16 sps:$4 sm:$0xff]   ;;  %v10312_v47 = vld [vmem:[#allocation5 + $0x1280] ss:$16 sps:$4 sm:$0xff]  }
 0x2b7   :  { %5211 = vmatpush1.bf16.msra.mxu0 %v10220_v48  ;;  %5703 = vmatpush1.bf16.msra.mxu1 %v10223_v49  ;;  %v10315_v48 = vld [vmem:[#allocation5 + $0x1288] ss:$16 sps:$4 sm:$0xff]   ;;  %v10320_v49 = vld [vmem:[#allocation5 + $0x12a4] ss:$16 sps:$4 sm:$0xff]  }
 0x2b8   :  { %5212 = vmatprep.subr.bf16.mxu0 %v10228_v50  ;;  %5704 = vmatprep.subr.bf16.mxu1 %v10231_v51  ;;  %v10323_v50 = vld [vmem:[#allocation5 + $0x12ac] ss:$16 sps:$4 sm:$0xff]   ;;  %v10318_v51 = vld [vmem:[#allocation5 + $0x12a0] ss:$16 sps:$4 sm:$0xff]  }
 0x2bb   :  { %5213 = vmatpush1.bf16.msra.mxu0 %v10226_v52  ;;  %5705 = vmatpush1.bf16.msra.mxu1 %v10229_v53  ;;  %v10321_v52 = vld [vmem:[#allocation5 + $0x12a8] ss:$16 sps:$4 sm:$0xff]   ;;  %v10326_v53 = vld [vmem:[#allocation5 + $0x12c4] ss:$16 sps:$4 sm:$0xff]  }
 0x2bc   :  { %5214 = vmatprep.subr.bf16.mxu0 %v10234_v54  ;;  %5706 = vmatprep.subr.bf16.mxu1 %v10237_v55  ;;  %v10329_v54 = vld [vmem:[#allocation5 + $0x12cc] ss:$16 sps:$4 sm:$0xff]   ;;  %v10324_v55 = vld [vmem:[#allocation5 + $0x12c0] ss:$16 sps:$4 sm:$0xff]  }
 0x2bf   :  { %5215 = vmatpush1.bf16.msra.mxu0 %v10232_v56  ;;  %5707 = vmatpush1.bf16.msra.mxu1 %v10235_v57  ;;  %v10327_v56 = vld [vmem:[#allocation5 + $0x12c8] ss:$16 sps:$4 sm:$0xff]   ;;  %v10332_v57 = vld [vmem:[#allocation5 + $0x12e4] ss:$16 sps:$4 sm:$0xff]  }
 0x2c0   :  { %5216 = vmatprep.subr.bf16.mxu0 %v10240_v58  ;;  %5708 = vmatprep.subr.bf16.mxu1 %v10243_v59  ;;  %v10335_v58 = vld [vmem:[#allocation5 + $0x12ec] ss:$16 sps:$4 sm:$0xff]   ;;  %v10330_v59 = vld [vmem:[#allocation5 + $0x12e0] ss:$16 sps:$4 sm:$0xff]  }
 0x2c3   :  { %5217 = vmatpush1.bf16.msra.mxu0 %v10238_v60  ;;  %5709 = vmatpush1.bf16.msra.mxu1 %v10241_v61  ;;  %v10333_v60 = vld [vmem:[#allocation5 + $0x12e8] ss:$16 sps:$4 sm:$0xff]   ;;  %v10338_v61 = vld [vmem:[#allocation5 + $0x1304] ss:$16 sps:$4 sm:$0xff]  }
 0x2c4   :  { %5218 = vmatprep.subr.bf16.mxu0 %v10246_v62  ;;  %5710 = vmatprep.subr.bf16.mxu1 %v10249_v63  ;;  %v10341_v62 = vld [vmem:[#allocation5 + $0x130c] ss:$16 sps:$4 sm:$0xff]   ;;  %v10336_v63 = vld [vmem:[#allocation5 + $0x1300] ss:$16 sps:$4 sm:$0xff]  }
 0x2c7   :  { %5219 = vmatpush1.bf16.msra.mxu0 %v10244_v0  ;;  %5711 = vmatpush1.bf16.msra.mxu1 %v10247_v1  ;;  %v10339_v0 = vld [vmem:[#allocation5 + $0x1308] ss:$16 sps:$4 sm:$0xff]   ;;  %v10344_v1 = vld [vmem:[#allocation5 + $0x1324] ss:$16 sps:$4 sm:$0xff]  }
 0x2c8   :  { %5220 = vmatprep.subr.bf16.mxu0 %v10252_v2  ;;  %5712 = vmatprep.subr.bf16.mxu1 %v10255_v3  ;;  %v10347_v2 = vld [vmem:[#allocation5 + $0x132c] ss:$16 sps:$4 sm:$0xff]   ;;  %v10342_v3 = vld [vmem:[#allocation5 + $0x1320] ss:$16 sps:$4 sm:$0xff]  }
 0x2cb   :  { %5221 = vmatpush1.bf16.msra.mxu0 %v10250_v4  ;;  %5713 = vmatpush1.bf16.msra.mxu1 %v10253_v5  ;;  %v10345_v4 = vld [vmem:[#allocation5 + $0x1328] ss:$16 sps:$4 sm:$0xff]   ;;  %v10350_v5 = vld [vmem:[#allocation5 + $0x1344] ss:$16 sps:$4 sm:$0xff]  }
 0x2cc   :  { %5222 = vmatprep.subr.bf16.mxu0 %v10258_v6  ;;  %5714 = vmatprep.subr.bf16.mxu1 %v10261_v7  ;;  %v10353_v6 = vld [vmem:[#allocation5 + $0x134c] ss:$16 sps:$4 sm:$0xff]   ;;  %v10348_v7 = vld [vmem:[#allocation5 + $0x1340] ss:$16 sps:$4 sm:$0xff]  }
 0x2cf   :  { %5223 = vmatpush1.bf16.msra.mxu0 %v10256_v8  ;;  %5715 = vmatpush1.bf16.msra.mxu1 %v10259_v9  ;;  %v10351_v8 = vld [vmem:[#allocation5 + $0x1348] ss:$16 sps:$4 sm:$0xff]   ;;  %v10356_v9 = vld [vmem:[#allocation5 + $0x1364] ss:$16 sps:$4 sm:$0xff]  }
 0x2d0   :  { %5224 = vmatprep.subr.bf16.mxu0 %v10264_v10  ;;  %5716 = vmatprep.subr.bf16.mxu1 %v10267_v12  ;;  %v10359_v10 = vld [vmem:[#allocation5 + $0x136c] ss:$16 sps:$4 sm:$0xff]   ;;  %v10354_v12 = vld [vmem:[#allocation5 + $0x1360] ss:$16 sps:$4 sm:$0xff]  }
 0x2d3   :  { %5225 = vmatpush1.bf16.msra.mxu0 %v10262_v13  ;;  %5717 = vmatpush1.bf16.msra.mxu1 %v10265_v15  ;;  %v10357_v13 = vld [vmem:[#allocation5 + $0x1368] ss:$16 sps:$4 sm:$0xff]   ;;  %v10362_v15 = vld [vmem:[#allocation5 + $0x1384] ss:$16 sps:$4 sm:$0xff]  }
 0x2d4   :  { %5226 = vmatprep.subr.bf16.mxu0 %v10270_v16  ;;  %5718 = vmatprep.subr.bf16.mxu1 %v10273_v18  ;;  %v10365_v16 = vld [vmem:[#allocation5 + $0x138c] ss:$16 sps:$4 sm:$0xff]   ;;  %v10360_v18 = vld [vmem:[#allocation5 + $0x1380] ss:$16 sps:$4 sm:$0xff]  }
 0x2d7   :  { %5227 = vmatpush1.bf16.msra.mxu0 %v10268_v20  ;;  %5719 = vmatpush1.bf16.msra.mxu1 %v10271_v11  ;;  %v10363_v20 = vld [vmem:[#allocation5 + $0x1388] ss:$16 sps:$4 sm:$0xff]   ;;  %v10368_v11 = vld [vmem:[#allocation5 + $0x13a4] ss:$16 sps:$4 sm:$0xff]  }
 0x2d8   :  { %5228 = vmatprep.subr.bf16.mxu0 %v10276_v21  ;;  %5720 = vmatprep.subr.bf16.mxu1 %v10279_v14  ;;  %v10371_v21 = vld [vmem:[#allocation5 + $0x13ac] ss:$16 sps:$4 sm:$0xff]   ;;  %v10366_v14 = vld [vmem:[#allocation5 + $0x13a0] ss:$16 sps:$4 sm:$0xff]  }
 0x2db   :  { %5229 = vmatpush1.bf16.msra.mxu0 %v10274_v23  ;;  %5721 = vmatpush1.bf16.msra.mxu1 %v10277_v24  ;;  %v10369_v23 = vld [vmem:[#allocation5 + $0x13a8] ss:$16 sps:$4 sm:$0xff]   ;;  %v10374_v24 = vld [vmem:[#allocation5 + $0x13c4] ss:$16 sps:$4 sm:$0xff]  }
 0x2dc   :  { %5230 = vmatprep.subr.bf16.mxu0 %v10282_v17  ;;  %5722 = vmatprep.subr.bf16.mxu1 %v10285_v26  ;;  %v10377_v17 = vld [vmem:[#allocation5 + $0x13cc] ss:$16 sps:$4 sm:$0xff]   ;;  %v10372_v26 = vld [vmem:[#allocation5 + $0x13c0] ss:$16 sps:$4 sm:$0xff]  }
 0x2df   :  { %5231 = vmatpush1.bf16.msra.mxu0 %v10280_v27  ;;  %5723 = vmatpush1.bf16.msra.mxu1 %v10283_v19  ;;  %v10375_v27 = vld [vmem:[#allocation5 + $0x13c8] ss:$16 sps:$4 sm:$0xff]   ;;  %v10380_v19 = vld [vmem:[#allocation5 + $0x13e4] ss:$16 sps:$4 sm:$0xff]  }
 0x2e0   :  { %5241 = vmatprep.subr.bf16.mxu0 %v10290_v29  ;;  %5733 = vmatprep.subr.bf16.mxu1 %v10293_v30  ;;  %v10383_v29 = vld [vmem:[#allocation5 + $0x13ec] ss:$16 sps:$4 sm:$0xff]   ;;  %v10378_v30 = vld [vmem:[#allocation5 + $0x13e0] ss:$16 sps:$4 sm:$0xff]  }
 0x2e2   :  { %5233 = vmatmul.mubr.bf16.vlgmr.msra.gmra.mrb[0].mxu0 %v8167_v22  ;;  %5725 = vmatmul.mubr.bf16.vlgmr.msra.gmra.mrb[0].mxu1 %v8167_v22  ;;  %v10381_v22 = vld [vmem:[#allocation5 + $0x13e8] ss:$16 sps:$4 sm:$0xff]  }
 0x2e3   :  { %5242 = vmatpush1.bf16.msra.mxu0 %v10288_v32  ;;  %5734 = vmatpush1.bf16.msra.mxu1 %v10291_v33  ;;  %v10388_v32 = vld [vmem:[#allocation5 + $0x1404] ss:$16 sps:$4 sm:$0xff]   ;;  %v10391_v33 = vld [vmem:[#allocation5 + $0x140c] ss:$16 sps:$4 sm:$0xff]  }
 0x2e4   :  { %5243 = vmatprep.subr.bf16.mxu0 %v10296_v34  ;;  %5735 = vmatprep.subr.bf16.mxu1 %v10299_v25  ;;  %v8169_v34 = vcombine.low %v11457_v31, %v11457_v31  ;;  %v11465_v25 = vld [vmem:[#allocation2 + $0x50] sm:$0xff] }
 0x2e5   :  { %5273 = vmatprep.mubr.bf16.mxu0 %v8170_v35  ;;  %5765 = vmatprep.mubr.bf16.mxu1 %v8170_v35  ;;  %v10386_v35 = vld [vmem:[#allocation5 + $0x1400] ss:$16 sps:$4 sm:$0xff]   ;;  %v10400_v31 = vld [vmem:[#allocation5 + $0x1444] ss:$16 sps:$4 sm:$0xff]  }
 0x2e7   :  { %5244 = vmatpush1.bf16.msra.mxu0 %v10294_v36  ;;  %5736 = vmatpush1.bf16.msra.mxu1 %v10297_v37  ;;  %v10389_v36 = vld [vmem:[#allocation5 + $0x1408] ss:$16 sps:$4 sm:$0xff]   ;;  %v10394_v37 = vld [vmem:[#allocation5 + $0x1424] ss:$16 sps:$4 sm:$0xff]  }
 0x2e8   :  { %5245 = vmatprep.subr.bf16.mxu0 %v10302_v28  ;;  %5737 = vmatprep.subr.bf16.mxu1 %v10305_v38  ;;  %v10397_v28 = vld [vmem:[#allocation5 + $0x142c] ss:$16 sps:$4 sm:$0xff]   ;;  %v8172_v38 = vcombine.high %v11465_v25, %v11465_v25 }
 0x2eb   :  { %5246 = vmatpush1.bf16.msra.mxu0 %v10300_v39  ;;  %5738 = vmatpush1.bf16.msra.mxu1 %v10303_v40  ;;  %v10392_v39 = vld [vmem:[#allocation5 + $0x1420] ss:$16 sps:$4 sm:$0xff]   ;;  %v10395_v40 = vld [vmem:[#allocation5 + $0x1428] ss:$16 sps:$4 sm:$0xff]  }
 0x2ec   :  { %5247 = vmatprep.subr.bf16.mxu0 %v10308_v41  ;;  %5739 = vmatprep.subr.bf16.mxu1 %v10311_v42  ;;  %v10403_v41 = vld [vmem:[#allocation5 + $0x144c] ss:$16 sps:$4 sm:$0xff]   ;;  %v10398_v42 = vld [vmem:[#allocation5 + $0x1440] ss:$16 sps:$4 sm:$0xff]  }
 0x2ef   :  { %5248 = vmatpush1.bf16.msra.mxu0 %v10306_v43  ;;  %5740 = vmatpush1.bf16.msra.mxu1 %v10309_v44  ;;  %v10401_v43 = vld [vmem:[#allocation5 + $0x1448] ss:$16 sps:$4 sm:$0xff]   ;;  %v10406_v44 = vld [vmem:[#allocation5 + $0x1464] ss:$16 sps:$4 sm:$0xff]  }
 0x2f0   :  { %5249 = vmatprep.subr.bf16.mxu0 %v10314_v45  ;;  %5741 = vmatprep.subr.bf16.mxu1 %v10317_v46  ;;  %v10409_v45 = vld [vmem:[#allocation5 + $0x146c] ss:$16 sps:$4 sm:$0xff]   ;;  %v10404_v46 = vld [vmem:[#allocation5 + $0x1460] ss:$16 sps:$4 sm:$0xff]  }
 0x2f3   :  { %5250 = vmatpush1.bf16.msra.mxu0 %v10312_v47  ;;  %5742 = vmatpush1.bf16.msra.mxu1 %v10315_v48  ;;  %v10407_v47 = vld [vmem:[#allocation5 + $0x1468] ss:$16 sps:$4 sm:$0xff]   ;;  %v10412_v48 = vld [vmem:[#allocation5 + $0x1484] ss:$16 sps:$4 sm:$0xff]  }
 0x2f4   :  { %5251 = vmatprep.subr.bf16.mxu0 %v10320_v49  ;;  %5743 = vmatprep.subr.bf16.mxu1 %v10323_v50  ;;  %v10415_v49 = vld [vmem:[#allocation5 + $0x148c] ss:$16 sps:$4 sm:$0xff]   ;;  %v10410_v50 = vld [vmem:[#allocation5 + $0x1480] ss:$16 sps:$4 sm:$0xff]  }
 0x2f7   :  { %5252 = vmatpush1.bf16.msra.mxu0 %v10318_v51  ;;  %5744 = vmatpush1.bf16.msra.mxu1 %v10321_v52  ;;  %v10413_v51 = vld [vmem:[#allocation5 + $0x1488] ss:$16 sps:$4 sm:$0xff]   ;;  %v10418_v52 = vld [vmem:[#allocation5 + $0x14a4] ss:$16 sps:$4 sm:$0xff]  }
 0x2f8   :  { %5253 = vmatprep.subr.bf16.mxu0 %v10326_v53  ;;  %5745 = vmatprep.subr.bf16.mxu1 %v10329_v54  ;;  %v10421_v53 = vld [vmem:[#allocation5 + $0x14ac] ss:$16 sps:$4 sm:$0xff]   ;;  %v10416_v54 = vld [vmem:[#allocation5 + $0x14a0] ss:$16 sps:$4 sm:$0xff]  }
 0x2fb   :  { %5254 = vmatpush1.bf16.msra.mxu0 %v10324_v55  ;;  %5746 = vmatpush1.bf16.msra.mxu1 %v10327_v56  ;;  %v10419_v55 = vld [vmem:[#allocation5 + $0x14a8] ss:$16 sps:$4 sm:$0xff]   ;;  %v10424_v56 = vld [vmem:[#allocation5 + $0x14c4] ss:$16 sps:$4 sm:$0xff]  }
 0x2fc   :  { %5255 = vmatprep.subr.bf16.mxu0 %v10332_v57  ;;  %5747 = vmatprep.subr.bf16.mxu1 %v10335_v58  ;;  %v10427_v57 = vld [vmem:[#allocation5 + $0x14cc] ss:$16 sps:$4 sm:$0xff]   ;;  %v10422_v58 = vld [vmem:[#allocation5 + $0x14c0] ss:$16 sps:$4 sm:$0xff]  }
 0x2ff   :  { %5256 = vmatpush1.bf16.msra.mxu0 %v10330_v59  ;;  %5748 = vmatpush1.bf16.msra.mxu1 %v10333_v60  ;;  %v10425_v59 = vld [vmem:[#allocation5 + $0x14c8] ss:$16 sps:$4 sm:$0xff]   ;;  %v10430_v60 = vld [vmem:[#allocation5 + $0x14e4] ss:$16 sps:$4 sm:$0xff]  }
 0x300   :  { %5257 = vmatprep.subr.bf16.mxu0 %v10338_v61  ;;  %5749 = vmatprep.subr.bf16.mxu1 %v10341_v62  ;;  %v10433_v61 = vld [vmem:[#allocation5 + $0x14ec] ss:$16 sps:$4 sm:$0xff]   ;;  %v10428_v62 = vld [vmem:[#allocation5 + $0x14e0] ss:$16 sps:$4 sm:$0xff]  }
 0x303   :  { %5258 = vmatpush1.bf16.msra.mxu0 %v10336_v63  ;;  %5750 = vmatpush1.bf16.msra.mxu1 %v10339_v0  ;;  %v10431_v63 = vld [vmem:[#allocation5 + $0x14e8] ss:$16 sps:$4 sm:$0xff]   ;;  %v10436_v0 = vld [vmem:[#allocation5 + $0x1504] ss:$16 sps:$4 sm:$0xff]  }
 0x304   :  { %5259 = vmatprep.subr.bf16.mxu0 %v10344_v1  ;;  %5751 = vmatprep.subr.bf16.mxu1 %v10347_v2  ;;  %v10439_v1 = vld [vmem:[#allocation5 + $0x150c] ss:$16 sps:$4 sm:$0xff]   ;;  %v10434_v2 = vld [vmem:[#allocation5 + $0x1500] ss:$16 sps:$4 sm:$0xff]  }
 0x307   :  { %5260 = vmatpush1.bf16.msra.mxu0 %v10342_v3  ;;  %5752 = vmatpush1.bf16.msra.mxu1 %v10345_v4  ;;  %v10437_v3 = vld [vmem:[#allocation5 + $0x1508] ss:$16 sps:$4 sm:$0xff]   ;;  %v10442_v4 = vld [vmem:[#allocation5 + $0x1524] ss:$16 sps:$4 sm:$0xff]  }
 0x308   :  { %5261 = vmatprep.subr.bf16.mxu0 %v10350_v5  ;;  %5753 = vmatprep.subr.bf16.mxu1 %v10353_v6  ;;  %v10445_v5 = vld [vmem:[#allocation5 + $0x152c] ss:$16 sps:$4 sm:$0xff]   ;;  %v10440_v6 = vld [vmem:[#allocation5 + $0x1520] ss:$16 sps:$4 sm:$0xff]  }
 0x30b   :  { %5262 = vmatpush1.bf16.msra.mxu0 %v10348_v7  ;;  %5754 = vmatpush1.bf16.msra.mxu1 %v10351_v8  ;;  %v10443_v7 = vld [vmem:[#allocation5 + $0x1528] ss:$16 sps:$4 sm:$0xff]   ;;  %v10448_v8 = vld [vmem:[#allocation5 + $0x1544] ss:$16 sps:$4 sm:$0xff]  }
 0x30c   :  { %5263 = vmatprep.subr.bf16.mxu0 %v10356_v9  ;;  %5755 = vmatprep.subr.bf16.mxu1 %v10359_v10  ;;  %v10451_v9 = vld [vmem:[#allocation5 + $0x154c] ss:$16 sps:$4 sm:$0xff]   ;;  %v10446_v10 = vld [vmem:[#allocation5 + $0x1540] ss:$16 sps:$4 sm:$0xff]  }
 0x30f   :  { %5264 = vmatpush1.bf16.msra.mxu0 %v10354_v12  ;;  %5756 = vmatpush1.bf16.msra.mxu1 %v10357_v13  ;;  %v10449_v12 = vld [vmem:[#allocation5 + $0x1548] ss:$16 sps:$4 sm:$0xff]   ;;  %v10454_v13 = vld [vmem:[#allocation5 + $0x1564] ss:$16 sps:$4 sm:$0xff]  }
 0x310   :  { %5265 = vmatprep.subr.bf16.mxu0 %v10362_v15  ;;  %5757 = vmatprep.subr.bf16.mxu1 %v10365_v16  ;;  %v10457_v15 = vld [vmem:[#allocation5 + $0x156c] ss:$16 sps:$4 sm:$0xff]   ;;  %v10452_v16 = vld [vmem:[#allocation5 + $0x1560] ss:$16 sps:$4 sm:$0xff]  }
 0x313   :  { %5266 = vmatpush1.bf16.msra.mxu0 %v10360_v18  ;;  %5758 = vmatpush1.bf16.msra.mxu1 %v10363_v20  ;;  %v10455_v18 = vld [vmem:[#allocation5 + $0x1568] ss:$16 sps:$4 sm:$0xff]   ;;  %v10460_v20 = vld [vmem:[#allocation5 + $0x1584] ss:$16 sps:$4 sm:$0xff]  }
 0x314   :  { %5267 = vmatprep.subr.bf16.mxu0 %v10368_v11  ;;  %5759 = vmatprep.subr.bf16.mxu1 %v10371_v21  ;;  %v10463_v11 = vld [vmem:[#allocation5 + $0x158c] ss:$16 sps:$4 sm:$0xff]   ;;  %v10458_v21 = vld [vmem:[#allocation5 + $0x1580] ss:$16 sps:$4 sm:$0xff]  }
 0x317   :  { %5268 = vmatpush1.bf16.msra.mxu0 %v10366_v14  ;;  %5760 = vmatpush1.bf16.msra.mxu1 %v10369_v23  ;;  %v10461_v14 = vld [vmem:[#allocation5 + $0x1588] ss:$16 sps:$4 sm:$0xff]   ;;  %v10466_v23 = vld [vmem:[#allocation5 + $0x15a4] ss:$16 sps:$4 sm:$0xff]  }
 0x318   :  { %5269 = vmatprep.subr.bf16.mxu0 %v10374_v24  ;;  %5761 = vmatprep.subr.bf16.mxu1 %v10377_v17  ;;  %v10469_v24 = vld [vmem:[#allocation5 + $0x15ac] ss:$16 sps:$4 sm:$0xff]   ;;  %v10464_v17 = vld [vmem:[#allocation5 + $0x15a0] ss:$16 sps:$4 sm:$0xff]  }
 0x31b   :  { %5270 = vmatpush1.bf16.msra.mxu0 %v10372_v26  ;;  %5762 = vmatpush1.bf16.msra.mxu1 %v10375_v27  ;;  %v10467_v26 = vld [vmem:[#allocation5 + $0x15a8] ss:$16 sps:$4 sm:$0xff]   ;;  %v10472_v27 = vld [vmem:[#allocation5 + $0x15c4] ss:$16 sps:$4 sm:$0xff]  }
 0x31c   :  { %5271 = vmatprep.subr.bf16.mxu0 %v10380_v19  ;;  %5763 = vmatprep.subr.bf16.mxu1 %v10383_v29  ;;  %v10475_v19 = vld [vmem:[#allocation5 + $0x15cc] ss:$16 sps:$4 sm:$0xff]   ;;  %v10470_v29 = vld [vmem:[#allocation5 + $0x15c0] ss:$16 sps:$4 sm:$0xff]  }
 0x31f   :  { %5272 = vmatpush1.bf16.msra.mxu0 %v10378_v30  ;;  %5764 = vmatpush1.bf16.msra.mxu1 %v10381_v22  ;;  %v10473_v30 = vld [vmem:[#allocation5 + $0x15c8] ss:$16 sps:$4 sm:$0xff]   ;;  %v10478_v22 = vld [vmem:[#allocation5 + $0x15e4] ss:$16 sps:$4 sm:$0xff]  }
 0x320   :  { %5282 = vmatprep.subr.bf16.mxu0 %v10388_v32  ;;  %5774 = vmatprep.subr.bf16.mxu1 %v10391_v33  ;;  %v10481_v32 = vld [vmem:[#allocation5 + $0x15ec] ss:$16 sps:$4 sm:$0xff]   ;;  %v10476_v33 = vld [vmem:[#allocation5 + $0x15e0] ss:$16 sps:$4 sm:$0xff]  }
 0x322   :  { %5274 = vmatmul.mubr.bf16.vlgmr.msra.gmra.mrb[0].mxu0 %v8169_v34  ;;  %5766 = vmatmul.mubr.bf16.vlgmr.msra.gmra.mrb[0].mxu1 %v8169_v34  ;;  %v10479_v34 = vld [vmem:[#allocation5 + $0x15e8] ss:$16 sps:$4 sm:$0xff]  }
 0x323   :  { %5283 = vmatpush1.bf16.msra.mxu0 %v10386_v35  ;;  %5775 = vmatpush1.bf16.msra.mxu1 %v10389_v36  ;;  %v10486_v35 = vld [vmem:[#allocation5 + $0x1604] ss:$16 sps:$4 sm:$0xff]   ;;  %v10489_v36 = vld [vmem:[#allocation5 + $0x160c] ss:$16 sps:$4 sm:$0xff]  }
 0x324   :  { %5284 = vmatprep.subr.bf16.mxu0 %v10394_v37  ;;  %5776 = vmatprep.subr.bf16.mxu1 %v10397_v28  ;;  %v8171_v37 = vcombine.low %v11465_v25, %v11465_v25  ;;  %v11471_v28 = vld [vmem:[#allocation2 + $0x58] sm:$0xff]  ;;  %v10498_v25 = vld [vmem:[#allocation5 + $0x1644] ss:$16 sps:$4 sm:$0xff]  }
 0x325   :  { %5314 = vmatprep.mubr.bf16.mxu0 %v8172_v38  ;;  %5806 = vmatprep.mubr.bf16.mxu1 %v8172_v38  ;;  %v10484_v38 = vld [vmem:[#allocation5 + $0x1600] ss:$16 sps:$4 sm:$0xff]  }
 0x327   :  { %5285 = vmatpush1.bf16.msra.mxu0 %v10392_v39  ;;  %5777 = vmatpush1.bf16.msra.mxu1 %v10395_v40  ;;  %v10487_v39 = vld [vmem:[#allocation5 + $0x1608] ss:$16 sps:$4 sm:$0xff]   ;;  %v10492_v40 = vld [vmem:[#allocation5 + $0x1624] ss:$16 sps:$4 sm:$0xff]  }
 0x328   :  { %5286 = vmatprep.subr.bf16.mxu0 %v10400_v31  ;;  %5778 = vmatprep.subr.bf16.mxu1 %v10403_v41  ;;  %v10495_v31 = vld [vmem:[#allocation5 + $0x162c] ss:$16 sps:$4 sm:$0xff]   ;;  %v8174_v41 = vcombine.high %v11471_v28, %v11471_v28 }
 0x32b   :  { %5287 = vmatpush1.bf16.msra.mxu0 %v10398_v42  ;;  %5779 = vmatpush1.bf16.msra.mxu1 %v10401_v43  ;;  %v10490_v42 = vld [vmem:[#allocation5 + $0x1620] ss:$16 sps:$4 sm:$0xff]   ;;  %v10493_v43 = vld [vmem:[#allocation5 + $0x1628] ss:$16 sps:$4 sm:$0xff]  }
 0x32c   :  { %5288 = vmatprep.subr.bf16.mxu0 %v10406_v44  ;;  %5780 = vmatprep.subr.bf16.mxu1 %v10409_v45  ;;  %v10501_v44 = vld [vmem:[#allocation5 + $0x164c] ss:$16 sps:$4 sm:$0xff]   ;;  %v10496_v45 = vld [vmem:[#allocation5 + $0x1640] ss:$16 sps:$4 sm:$0xff]  }
 0x32f   :  { %5289 = vmatpush1.bf16.msra.mxu0 %v10404_v46  ;;  %5781 = vmatpush1.bf16.msra.mxu1 %v10407_v47  ;;  %v10499_v46 = vld [vmem:[#allocation5 + $0x1648] ss:$16 sps:$4 sm:$0xff]   ;;  %v10504_v47 = vld [vmem:[#allocation5 + $0x1664] ss:$16 sps:$4 sm:$0xff]  }
 0x330   :  { %5290 = vmatprep.subr.bf16.mxu0 %v10412_v48  ;;  %5782 = vmatprep.subr.bf16.mxu1 %v10415_v49  ;;  %v10507_v48 = vld [vmem:[#allocation5 + $0x166c] ss:$16 sps:$4 sm:$0xff]   ;;  %v10502_v49 = vld [vmem:[#allocation5 + $0x1660] ss:$16 sps:$4 sm:$0xff]  }
 0x333   :  { %5291 = vmatpush1.bf16.msra.mxu0 %v10410_v50  ;;  %5783 = vmatpush1.bf16.msra.mxu1 %v10413_v51  ;;  %v10505_v50 = vld [vmem:[#allocation5 + $0x1668] ss:$16 sps:$4 sm:$0xff]   ;;  %v10510_v51 = vld [vmem:[#allocation5 + $0x1684] ss:$16 sps:$4 sm:$0xff]  }
 0x334   :  { %5292 = vmatprep.subr.bf16.mxu0 %v10418_v52  ;;  %5784 = vmatprep.subr.bf16.mxu1 %v10421_v53  ;;  %v10513_v52 = vld [vmem:[#allocation5 + $0x168c] ss:$16 sps:$4 sm:$0xff]   ;;  %v10508_v53 = vld [vmem:[#allocation5 + $0x1680] ss:$16 sps:$4 sm:$0xff]  }
 0x337   :  { %5293 = vmatpush1.bf16.msra.mxu0 %v10416_v54  ;;  %5785 = vmatpush1.bf16.msra.mxu1 %v10419_v55  ;;  %v10511_v54 = vld [vmem:[#allocation5 + $0x1688] ss:$16 sps:$4 sm:$0xff]   ;;  %v10516_v55 = vld [vmem:[#allocation5 + $0x16a4] ss:$16 sps:$4 sm:$0xff]  }
 0x338   :  { %5294 = vmatprep.subr.bf16.mxu0 %v10424_v56  ;;  %5786 = vmatprep.subr.bf16.mxu1 %v10427_v57  ;;  %v10519_v56 = vld [vmem:[#allocation5 + $0x16ac] ss:$16 sps:$4 sm:$0xff]   ;;  %v10514_v57 = vld [vmem:[#allocation5 + $0x16a0] ss:$16 sps:$4 sm:$0xff]  }
 0x33b   :  { %5295 = vmatpush1.bf16.msra.mxu0 %v10422_v58  ;;  %5787 = vmatpush1.bf16.msra.mxu1 %v10425_v59  ;;  %v10517_v58 = vld [vmem:[#allocation5 + $0x16a8] ss:$16 sps:$4 sm:$0xff]   ;;  %v10522_v59 = vld [vmem:[#allocation5 + $0x16c4] ss:$16 sps:$4 sm:$0xff]  }
 0x33c   :  { %5296 = vmatprep.subr.bf16.mxu0 %v10430_v60  ;;  %5788 = vmatprep.subr.bf16.mxu1 %v10433_v61  ;;  %v10525_v60 = vld [vmem:[#allocation5 + $0x16cc] ss:$16 sps:$4 sm:$0xff]   ;;  %v10520_v61 = vld [vmem:[#allocation5 + $0x16c0] ss:$16 sps:$4 sm:$0xff]  }
 0x33f   :  { %5297 = vmatpush1.bf16.msra.mxu0 %v10428_v62  ;;  %5789 = vmatpush1.bf16.msra.mxu1 %v10431_v63  ;;  %v10523_v62 = vld [vmem:[#allocation5 + $0x16c8] ss:$16 sps:$4 sm:$0xff]   ;;  %v10528_v63 = vld [vmem:[#allocation5 + $0x16e4] ss:$16 sps:$4 sm:$0xff]  }
 0x340   :  { %5298 = vmatprep.subr.bf16.mxu0 %v10436_v0  ;;  %5790 = vmatprep.subr.bf16.mxu1 %v10439_v1  ;;  %v10531_v0 = vld [vmem:[#allocation5 + $0x16ec] ss:$16 sps:$4 sm:$0xff]   ;;  %v10526_v1 = vld [vmem:[#allocation5 + $0x16e0] ss:$16 sps:$4 sm:$0xff]  }
 0x343   :  { %5299 = vmatpush1.bf16.msra.mxu0 %v10434_v2  ;;  %5791 = vmatpush1.bf16.msra.mxu1 %v10437_v3  ;;  %v10529_v2 = vld [vmem:[#allocation5 + $0x16e8] ss:$16 sps:$4 sm:$0xff]   ;;  %v10534_v3 = vld [vmem:[#allocation5 + $0x1704] ss:$16 sps:$4 sm:$0xff]  }
 0x344   :  { %5300 = vmatprep.subr.bf16.mxu0 %v10442_v4  ;;  %5792 = vmatprep.subr.bf16.mxu1 %v10445_v5  ;;  %v10537_v4 = vld [vmem:[#allocation5 + $0x170c] ss:$16 sps:$4 sm:$0xff]   ;;  %v10532_v5 = vld [vmem:[#allocation5 + $0x1700] ss:$16 sps:$4 sm:$0xff]  }
 0x347   :  { %5301 = vmatpush1.bf16.msra.mxu0 %v10440_v6  ;;  %5793 = vmatpush1.bf16.msra.mxu1 %v10443_v7  ;;  %v10535_v6 = vld [vmem:[#allocation5 + $0x1708] ss:$16 sps:$4 sm:$0xff]   ;;  %v10540_v7 = vld [vmem:[#allocation5 + $0x1724] ss:$16 sps:$4 sm:$0xff]  }
 0x348   :  { %5302 = vmatprep.subr.bf16.mxu0 %v10448_v8  ;;  %5794 = vmatprep.subr.bf16.mxu1 %v10451_v9  ;;  %v10543_v8 = vld [vmem:[#allocation5 + $0x172c] ss:$16 sps:$4 sm:$0xff]   ;;  %v10538_v9 = vld [vmem:[#allocation5 + $0x1720] ss:$16 sps:$4 sm:$0xff]  }
 0x34b   :  { %5303 = vmatpush1.bf16.msra.mxu0 %v10446_v10  ;;  %5795 = vmatpush1.bf16.msra.mxu1 %v10449_v12  ;;  %v10541_v10 = vld [vmem:[#allocation5 + $0x1728] ss:$16 sps:$4 sm:$0xff]   ;;  %v10546_v12 = vld [vmem:[#allocation5 + $0x1744] ss:$16 sps:$4 sm:$0xff]  }
 0x34c   :  { %5304 = vmatprep.subr.bf16.mxu0 %v10454_v13  ;;  %5796 = vmatprep.subr.bf16.mxu1 %v10457_v15  ;;  %v10549_v13 = vld [vmem:[#allocation5 + $0x174c] ss:$16 sps:$4 sm:$0xff]   ;;  %v10544_v15 = vld [vmem:[#allocation5 + $0x1740] ss:$16 sps:$4 sm:$0xff]  }
 0x34f   :  { %5305 = vmatpush1.bf16.msra.mxu0 %v10452_v16  ;;  %5797 = vmatpush1.bf16.msra.mxu1 %v10455_v18  ;;  %v10547_v16 = vld [vmem:[#allocation5 + $0x1748] ss:$16 sps:$4 sm:$0xff]   ;;  %v10552_v18 = vld [vmem:[#allocation5 + $0x1764] ss:$16 sps:$4 sm:$0xff]  }
 0x350   :  { %5306 = vmatprep.subr.bf16.mxu0 %v10460_v20  ;;  %5798 = vmatprep.subr.bf16.mxu1 %v10463_v11  ;;  %v10555_v20 = vld [vmem:[#allocation5 + $0x176c] ss:$16 sps:$4 sm:$0xff]   ;;  %v10550_v11 = vld [vmem:[#allocation5 + $0x1760] ss:$16 sps:$4 sm:$0xff]  }
 0x353   :  { %5307 = vmatpush1.bf16.msra.mxu0 %v10458_v21  ;;  %5799 = vmatpush1.bf16.msra.mxu1 %v10461_v14  ;;  %v10553_v21 = vld [vmem:[#allocation5 + $0x1768] ss:$16 sps:$4 sm:$0xff]   ;;  %v10558_v14 = vld [vmem:[#allocation5 + $0x1784] ss:$16 sps:$4 sm:$0xff]  }
 0x354   :  { %5308 = vmatprep.subr.bf16.mxu0 %v10466_v23  ;;  %5800 = vmatprep.subr.bf16.mxu1 %v10469_v24  ;;  %v10561_v23 = vld [vmem:[#allocation5 + $0x178c] ss:$16 sps:$4 sm:$0xff]   ;;  %v10556_v24 = vld [vmem:[#allocation5 + $0x1780] ss:$16 sps:$4 sm:$0xff]  }
 0x357   :  { %5309 = vmatpush1.bf16.msra.mxu0 %v10464_v17  ;;  %5801 = vmatpush1.bf16.msra.mxu1 %v10467_v26  ;;  %v10559_v17 = vld [vmem:[#allocation5 + $0x1788] ss:$16 sps:$4 sm:$0xff]   ;;  %v10564_v26 = vld [vmem:[#allocation5 + $0x17a4] ss:$16 sps:$4 sm:$0xff]  }
 0x358   :  { %5310 = vmatprep.subr.bf16.mxu0 %v10472_v27  ;;  %5802 = vmatprep.subr.bf16.mxu1 %v10475_v19  ;;  %v10567_v27 = vld [vmem:[#allocation5 + $0x17ac] ss:$16 sps:$4 sm:$0xff]   ;;  %v10562_v19 = vld [vmem:[#allocation5 + $0x17a0] ss:$16 sps:$4 sm:$0xff]  }
 0x35b   :  { %5311 = vmatpush1.bf16.msra.mxu0 %v10470_v29  ;;  %5803 = vmatpush1.bf16.msra.mxu1 %v10473_v30  ;;  %v10565_v29 = vld [vmem:[#allocation5 + $0x17a8] ss:$16 sps:$4 sm:$0xff]   ;;  %v10570_v30 = vld [vmem:[#allocation5 + $0x17c4] ss:$16 sps:$4 sm:$0xff]  }
 0x35c   :  { %5312 = vmatprep.subr.bf16.mxu0 %v10478_v22  ;;  %5804 = vmatprep.subr.bf16.mxu1 %v10481_v32  ;;  %v10573_v22 = vld [vmem:[#allocation5 + $0x17cc] ss:$16 sps:$4 sm:$0xff]   ;;  %v10568_v32 = vld [vmem:[#allocation5 + $0x17c0] ss:$16 sps:$4 sm:$0xff]  }
 0x35f   :  { %5313 = vmatpush1.bf16.msra.mxu0 %v10476_v33  ;;  %5805 = vmatpush1.bf16.msra.mxu1 %v10479_v34  ;;  %v10571_v33 = vld [vmem:[#allocation5 + $0x17c8] ss:$16 sps:$4 sm:$0xff]   ;;  %v10576_v34 = vld [vmem:[#allocation5 + $0x17e4] ss:$16 sps:$4 sm:$0xff]  }
 0x360   :  { %5323 = vmatprep.subr.bf16.mxu0 %v10486_v35  ;;  %5815 = vmatprep.subr.bf16.mxu1 %v10489_v36  ;;  %v10579_v35 = vld [vmem:[#allocation5 + $0x17ec] ss:$16 sps:$4 sm:$0xff]   ;;  %v10574_v36 = vld [vmem:[#allocation5 + $0x17e0] ss:$16 sps:$4 sm:$0xff]  }
 0x362   :  { %5315 = vmatmul.mubr.bf16.vlgmr.msra.gmra.mrb[0].mxu0 %v8171_v37  ;;  %5807 = vmatmul.mubr.bf16.vlgmr.msra.gmra.mrb[0].mxu1 %v8171_v37  ;;  %v10577_v37 = vld [vmem:[#allocation5 + $0x17e8] ss:$16 sps:$4 sm:$0xff]  }
 0x363   :  { %5324 = vmatpush1.bf16.msra.mxu0 %v10484_v38  ;;  %5816 = vmatpush1.bf16.msra.mxu1 %v10487_v39  ;;  %v10584_v38 = vld [vmem:[#allocation8 + $0x4] ss:$16 sps:$4 sm:$0xff]   ;;  %v10587_v39 = vld [vmem:[#allocation8 + $0xc] ss:$16 sps:$4 sm:$0xff]  }
 0x364   :  { %5325 = vmatprep.subr.bf16.mxu0 %v10492_v40  ;;  %5817 = vmatprep.subr.bf16.mxu1 %v10495_v31  ;;  %v8173_v40 = vcombine.low %v11471_v28, %v11471_v28  ;;  %v10582_v31 = vld [vmem:[#allocation8] ss:$16 sps:$4 sm:$0xff]  }
 0x365   :  { %5355 = vmatprep.mubr.bf16.mxu0 %v8174_v41  ;;  %5847 = vmatprep.mubr.bf16.mxu1 %v8174_v41  ;;  %v10585_v41 = vld [vmem:[#allocation8 + $0x8] ss:$16 sps:$4 sm:$0xff]   ;;  %v10594_v28 = vld [vmem:[#allocation8 + $0x40] ss:$16 sps:$4 sm:$0xff]  }
 0x367   :  { %5326 = vmatpush1.bf16.msra.mxu0 %v10490_v42  ;;  %5818 = vmatpush1.bf16.msra.mxu1 %v10493_v43  ;;  %v10590_v42 = vld [vmem:[#allocation8 + $0x24] ss:$16 sps:$4 sm:$0xff]   ;;  %v10593_v43 = vld [vmem:[#allocation8 + $0x2c] ss:$16 sps:$4 sm:$0xff]  }
 0x368   :  { %5327 = vmatprep.subr.bf16.mxu0 %v10498_v25  ;;  %5819 = vmatprep.subr.bf16.mxu1 %v10501_v44  ;;  %v10588_v25 = vld [vmem:[#allocation8 + $0x20] ss:$16 sps:$4 sm:$0xff]   ;;  %v10591_v44 = vld [vmem:[#allocation8 + $0x28] ss:$16 sps:$4 sm:$0xff]  }
 0x36b   :  { %5328 = vmatpush1.bf16.msra.mxu0 %v10496_v45  ;;  %5820 = vmatpush1.bf16.msra.mxu1 %v10499_v46  ;;  %v10596_v45 = vld [vmem:[#allocation8 + $0x44] ss:$16 sps:$4 sm:$0xff]   ;;  %v10599_v46 = vld [vmem:[#allocation8 + $0x4c] ss:$16 sps:$4 sm:$0xff]  }
 0x36c   :  { %5329 = vmatprep.subr.bf16.mxu0 %v10504_v47  ;;  %5821 = vmatprep.subr.bf16.mxu1 %v10507_v48  ;;  %v10597_v47 = vld [vmem:[#allocation8 + $0x48] ss:$16 sps:$4 sm:$0xff]   ;;  %v10602_v48 = vld [vmem:[#allocation8 + $0x64] ss:$16 sps:$4 sm:$0xff]  }
 0x36f   :  { %5330 = vmatpush1.bf16.msra.mxu0 %v10502_v49  ;;  %5822 = vmatpush1.bf16.msra.mxu1 %v10505_v50  ;;  %v10605_v49 = vld [vmem:[#allocation8 + $0x6c] ss:$16 sps:$4 sm:$0xff]   ;;  %v10600_v50 = vld [vmem:[#allocation8 + $0x60] ss:$16 sps:$4 sm:$0xff]  }
 0x370   :  { %5331 = vmatprep.subr.bf16.mxu0 %v10510_v51  ;;  %5823 = vmatprep.subr.bf16.mxu1 %v10513_v52  ;;  %v10603_v51 = vld [vmem:[#allocation8 + $0x68] ss:$16 sps:$4 sm:$0xff]   ;;  %v10608_v52 = vld [vmem:[#allocation8 + $0x84] ss:$16 sps:$4 sm:$0xff]  }
 0x373   :  { %5332 = vmatpush1.bf16.msra.mxu0 %v10508_v53  ;;  %5824 = vmatpush1.bf16.msra.mxu1 %v10511_v54  ;;  %v10611_v53 = vld [vmem:[#allocation8 + $0x8c] ss:$16 sps:$4 sm:$0xff]   ;;  %v10606_v54 = vld [vmem:[#allocation8 + $0x80] ss:$16 sps:$4 sm:$0xff]  }
 0x374   :  { %5333 = vmatprep.subr.bf16.mxu0 %v10516_v55  ;;  %5825 = vmatprep.subr.bf16.mxu1 %v10519_v56  ;;  %v10609_v55 = vld [vmem:[#allocation8 + $0x88] ss:$16 sps:$4 sm:$0xff]   ;;  %v10614_v56 = vld [vmem:[#allocation8 + $0xa4] ss:$16 sps:$4 sm:$0xff]  }
 0x377   :  { %5334 = vmatpush1.bf16.msra.mxu0 %v10514_v57  ;;  %5826 = vmatpush1.bf16.msra.mxu1 %v10517_v58  ;;  %v10617_v57 = vld [vmem:[#allocation8 + $0xac] ss:$16 sps:$4 sm:$0xff]   ;;  %v10612_v58 = vld [vmem:[#allocation8 + $0xa0] ss:$16 sps:$4 sm:$0xff]  }
 0x378   :  { %5335 = vmatprep.subr.bf16.mxu0 %v10522_v59  ;;  %5827 = vmatprep.subr.bf16.mxu1 %v10525_v60  ;;  %v10615_v59 = vld [vmem:[#allocation8 + $0xa8] ss:$16 sps:$4 sm:$0xff]   ;;  %v10620_v60 = vld [vmem:[#allocation8 + $0xc4] ss:$16 sps:$4 sm:$0xff]  }
 0x37b   :  { %5336 = vmatpush1.bf16.msra.mxu0 %v10520_v61  ;;  %5828 = vmatpush1.bf16.msra.mxu1 %v10523_v62  ;;  %v10623_v61 = vld [vmem:[#allocation8 + $0xcc] ss:$16 sps:$4 sm:$0xff]   ;;  %v10618_v62 = vld [vmem:[#allocation8 + $0xc0] ss:$16 sps:$4 sm:$0xff]  }
 0x37c   :  { %5337 = vmatprep.subr.bf16.mxu0 %v10528_v63  ;;  %5829 = vmatprep.subr.bf16.mxu1 %v10531_v0  ;;  %v10621_v63 = vld [vmem:[#allocation8 + $0xc8] ss:$16 sps:$4 sm:$0xff]   ;;  %v10626_v0 = vld [vmem:[#allocation8 + $0xe4] ss:$16 sps:$4 sm:$0xff]  }
 0x37f   :  { %5338 = vmatpush1.bf16.msra.mxu0 %v10526_v1  ;;  %5830 = vmatpush1.bf16.msra.mxu1 %v10529_v2  ;;  %v10629_v1 = vld [vmem:[#allocation8 + $0xec] ss:$16 sps:$4 sm:$0xff]   ;;  %v10624_v2 = vld [vmem:[#allocation8 + $0xe0] ss:$16 sps:$4 sm:$0xff]  }
 0x380   :  { %5339 = vmatprep.subr.bf16.mxu0 %v10534_v3  ;;  %5831 = vmatprep.subr.bf16.mxu1 %v10537_v4  ;;  %v10627_v3 = vld [vmem:[#allocation8 + $0xe8] ss:$16 sps:$4 sm:$0xff]   ;;  %v10632_v4 = vld [vmem:[#allocation8 + $0x104] ss:$16 sps:$4 sm:$0xff]  }
 0x383   :  { %5340 = vmatpush1.bf16.msra.mxu0 %v10532_v5  ;;  %5832 = vmatpush1.bf16.msra.mxu1 %v10535_v6  ;;  %v10635_v5 = vld [vmem:[#allocation8 + $0x10c] ss:$16 sps:$4 sm:$0xff]   ;;  %v10630_v6 = vld [vmem:[#allocation8 + $0x100] ss:$16 sps:$4 sm:$0xff]  }
 0x384   :  { %5341 = vmatprep.subr.bf16.mxu0 %v10540_v7  ;;  %5833 = vmatprep.subr.bf16.mxu1 %v10543_v8  ;;  %v10633_v7 = vld [vmem:[#allocation8 + $0x108] ss:$16 sps:$4 sm:$0xff]   ;;  %v10638_v8 = vld [vmem:[#allocation8 + $0x124] ss:$16 sps:$4 sm:$0xff]  }
 0x387   :  { %5342 = vmatpush1.bf16.msra.mxu0 %v10538_v9  ;;  %5834 = vmatpush1.bf16.msra.mxu1 %v10541_v10  ;;  %v10641_v9 = vld [vmem:[#allocation8 + $0x12c] ss:$16 sps:$4 sm:$0xff]   ;;  %v10636_v10 = vld [vmem:[#allocation8 + $0x120] ss:$16 sps:$4 sm:$0xff]  }
 0x388   :  { %5343 = vmatprep.subr.bf16.mxu0 %v10546_v12  ;;  %5835 = vmatprep.subr.bf16.mxu1 %v10549_v13  ;;  %v10639_v12 = vld [vmem:[#allocation8 + $0x128] ss:$16 sps:$4 sm:$0xff]   ;;  %v10644_v13 = vld [vmem:[#allocation8 + $0x144] ss:$16 sps:$4 sm:$0xff]  }
 0x38b   :  { %5344 = vmatpush1.bf16.msra.mxu0 %v10544_v15  ;;  %5836 = vmatpush1.bf16.msra.mxu1 %v10547_v16  ;;  %v10647_v15 = vld [vmem:[#allocation8 + $0x14c] ss:$16 sps:$4 sm:$0xff]   ;;  %v10642_v16 = vld [vmem:[#allocation8 + $0x140] ss:$16 sps:$4 sm:$0xff]  }
 0x38c   :  { %5345 = vmatprep.subr.bf16.mxu0 %v10552_v18  ;;  %5837 = vmatprep.subr.bf16.mxu1 %v10555_v20  ;;  %v10645_v18 = vld [vmem:[#allocation8 + $0x148] ss:$16 sps:$4 sm:$0xff]   ;;  %v10650_v20 = vld [vmem:[#allocation8 + $0x164] ss:$16 sps:$4 sm:$0xff]  }
 0x38f   :  { %5346 = vmatpush1.bf16.msra.mxu0 %v10550_v11  ;;  %5838 = vmatpush1.bf16.msra.mxu1 %v10553_v21  ;;  %v10653_v11 = vld [vmem:[#allocation8 + $0x16c] ss:$16 sps:$4 sm:$0xff]   ;;  %v10648_v21 = vld [vmem:[#allocation8 + $0x160] ss:$16 sps:$4 sm:$0xff]  }
 0x390   :  { %5347 = vmatprep.subr.bf16.mxu0 %v10558_v14  ;;  %5839 = vmatprep.subr.bf16.mxu1 %v10561_v23  ;;  %v10651_v14 = vld [vmem:[#allocation8 + $0x168] ss:$16 sps:$4 sm:$0xff]   ;;  %v10656_v23 = vld [vmem:[#allocation8 + $0x184] ss:$16 sps:$4 sm:$0xff]  }
 0x393   :  { %5348 = vmatpush1.bf16.msra.mxu0 %v10556_v24  ;;  %5840 = vmatpush1.bf16.msra.mxu1 %v10559_v17  ;;  %v10659_v24 = vld [vmem:[#allocation8 + $0x18c] ss:$16 sps:$4 sm:$0xff]   ;;  %v10654_v17 = vld [vmem:[#allocation8 + $0x180] ss:$16 sps:$4 sm:$0xff]  }
 0x394   :  { %5349 = vmatprep.subr.bf16.mxu0 %v10564_v26  ;;  %5841 = vmatprep.subr.bf16.mxu1 %v10567_v27  ;;  %v10657_v26 = vld [vmem:[#allocation8 + $0x188] ss:$16 sps:$4 sm:$0xff]   ;;  %v10662_v27 = vld [vmem:[#allocation8 + $0x1a4] ss:$16 sps:$4 sm:$0xff]  }
 0x397   :  { %5350 = vmatpush1.bf16.msra.mxu0 %v10562_v19  ;;  %5842 = vmatpush1.bf16.msra.mxu1 %v10565_v29  ;;  %v10665_v19 = vld [vmem:[#allocation8 + $0x1ac] ss:$16 sps:$4 sm:$0xff]   ;;  %v10660_v29 = vld [vmem:[#allocation8 + $0x1a0] ss:$16 sps:$4 sm:$0xff]  }
 0x398   :  { %5351 = vmatprep.subr.bf16.mxu0 %v10570_v30  ;;  %5843 = vmatprep.subr.bf16.mxu1 %v10573_v22  ;;  %v10663_v30 = vld [vmem:[#allocation8 + $0x1a8] ss:$16 sps:$4 sm:$0xff]   ;;  %v10668_v22 = vld [vmem:[#allocation8 + $0x1c4] ss:$16 sps:$4 sm:$0xff]  }
 0x39b   :  { %5352 = vmatpush1.bf16.msra.mxu0 %v10568_v32  ;;  %5844 = vmatpush1.bf16.msra.mxu1 %v10571_v33  ;;  %v10671_v32 = vld [vmem:[#allocation8 + $0x1cc] ss:$16 sps:$4 sm:$0xff]   ;;  %v10666_v33 = vld [vmem:[#allocation8 + $0x1c0] ss:$16 sps:$4 sm:$0xff]  }
 0x39c   :  { %5353 = vmatprep.subr.bf16.mxu0 %v10576_v34  ;;  %5845 = vmatprep.subr.bf16.mxu1 %v10579_v35  ;;  %v10669_v34 = vld [vmem:[#allocation8 + $0x1c8] ss:$16 sps:$4 sm:$0xff]   ;;  %v10674_v35 = vld [vmem:[#allocation8 + $0x1e4] ss:$16 sps:$4 sm:$0xff]  }
 0x39f   :  { %5354 = vmatpush1.bf16.msra.mxu0 %v10574_v36  ;;  %5846 = vmatpush1.bf16.msra.mxu1 %v10577_v37  ;;  %v10677_v36 = vld [vmem:[#allocation8 + $0x1ec] ss:$16 sps:$4 sm:$0xff]   ;;  %v10672_v37 = vld [vmem:[#allocation8 + $0x1e0] ss:$16 sps:$4 sm:$0xff]  }
 0x3a0   :  { %6654 = vmatprep.subr.bf16.mxu0 %v10584_v38  ;;  %6736 = vmatprep.subr.bf16.mxu1 %v10587_v39  ;;  %v10675_v38 = vld [vmem:[#allocation8 + $0x1e8] ss:$16 sps:$4 sm:$0xff]   ;;  %v10680_v39 = vld [vmem:[#allocation8 + $0x204] ss:$16 sps:$4 sm:$0xff]  }
 0x3a2   :  { %5356 = vmatmul.mubr.bf16.vlgmr.msra.gmra.mrb[0].mxu0 %v8173_v40  ;;  %5848 = vmatmul.mubr.bf16.vlgmr.msra.gmra.mrb[0].mxu1 %v8173_v40  ;;  %v10683_v40 = vld [vmem:[#allocation8 + $0x20c] ss:$16 sps:$4 sm:$0xff]  }
 0x3a3   :  { %6655 = vmatpush1.bf16.msra.mxu0 %v10582_v31  ;;  %6737 = vmatpush1.bf16.msra.mxu1 %v10585_v41  ;;  %v928_v31 = vlaneseq }
 0x3a4   :  { %6656 = vmatprep.subr.bf16.mxu0 %v10590_v42  ;;  %6738 = vmatprep.subr.bf16.mxu1 %v10593_v43  ;;  %v11482_v43 = vld [vmem:[#allocation7] sm:$0xf] }
 0x3a5   :  { %v11477_v41 = vshrl.u32 %v928_v31, 7  ;;  %v10740_v31 = vld [vmem:[#allocation8 + $0x344] ss:$16 sps:$4 sm:$0xff]  }
 0x3a7   :  { %6657 = vmatpush1.bf16.msra.mxu0 %v10588_v25  ;;  %6739 = vmatpush1.bf16.msra.mxu1 %v10591_v44  ;;  %v11480_v42 = vsub.s32 0, %v11477_v41  ;;  %v11485_v25 = vsub.s32 1, %v11477_v41  ;;  %v11488_v44 = vsub.s32 3, %v11477_v41 }
 0x3a8   :  { %6658 = vmatprep.subr.bf16.mxu0 %v10596_v45  ;;  %6740 = vmatprep.subr.bf16.mxu1 %v10599_v46 }
 0x3a9   :  { %v931_v45 = vrot.slane %v11482_v43, %v11480_v42  ;;  %v935_v46 = vrot.slane %v11482_v43, %v11485_v25 }
 0x3ab   :  { %6659 = vmatpush1.bf16.msra.mxu0 %v10594_v28  ;;  %6741 = vmatpush1.bf16.msra.mxu1 %v10597_v47  ;;  %v943_v28 = vrot.slane %v11482_v43, %v11488_v44 }
 0x3ac   :  { %6660 = vmatprep.subr.bf16.mxu0 %v10602_v48  ;;  %6742 = vmatprep.subr.bf16.mxu1 %v10605_v49 }
 0x3af   :  { %6661 = vmatpush1.bf16.msra.mxu0 %v10600_v50  ;;  %6743 = vmatpush1.bf16.msra.mxu1 %v10603_v51 }
 0x3b0   :  { %6662 = vmatprep.subr.bf16.mxu0 %v10608_v52  ;;  %6744 = vmatprep.subr.bf16.mxu1 %v10611_v53 }
 0x3b3   :  { %6663 = vmatpush1.bf16.msra.mxu0 %v10606_v54  ;;  %6745 = vmatpush1.bf16.msra.mxu1 %v10609_v55 }
 0x3b4   :  { %6664 = vmatprep.subr.bf16.mxu0 %v10614_v56  ;;  %6746 = vmatprep.subr.bf16.mxu1 %v10617_v57 }
 0x3b7   :  { %6665 = vmatpush1.bf16.msra.mxu0 %v10612_v58  ;;  %6747 = vmatpush1.bf16.msra.mxu1 %v10615_v59 }
 0x3b8   :  { %6666 = vmatprep.subr.bf16.mxu0 %v10620_v60  ;;  %6748 = vmatprep.subr.bf16.mxu1 %v10623_v61 }
 0x3bb   :  { %6667 = vmatpush1.bf16.msra.mxu0 %v10618_v62  ;;  %6749 = vmatpush1.bf16.msra.mxu1 %v10621_v63  ;;  %v10678_v62 = vld [vmem:[#allocation8 + $0x200] ss:$16 sps:$4 sm:$0xff]   ;;  %v10681_v63 = vld [vmem:[#allocation8 + $0x208] ss:$16 sps:$4 sm:$0xff]  }
 0x3bc   :  { %6668 = vmatprep.subr.bf16.mxu0 %v10626_v0  ;;  %6750 = vmatprep.subr.bf16.mxu1 %v10629_v1  ;;  %v10686_v1 = vld [vmem:[#allocation8 + $0x224] ss:$16 sps:$4 sm:$0xff]  }
 0x3bf   :  { %6669 = vmatpush1.bf16.msra.mxu0 %v10624_v2  ;;  %6751 = vmatpush1.bf16.msra.mxu1 %v10627_v3  ;;  %v10689_v2 = vld [vmem:[#allocation8 + $0x22c] ss:$16 sps:$4 sm:$0xff]  }
 0x3c0   :  { %6670 = vmatprep.subr.bf16.mxu0 %v10632_v4  ;;  %6752 = vmatprep.subr.bf16.mxu1 %v10635_v5  ;;  %v10684_v4 = vld [vmem:[#allocation8 + $0x220] ss:$16 sps:$4 sm:$0xff]   ;;  %v10687_v5 = vld [vmem:[#allocation8 + $0x228] ss:$16 sps:$4 sm:$0xff]  }
 0x3c3   :  { %6671 = vmatpush1.bf16.msra.mxu0 %v10630_v6  ;;  %6753 = vmatpush1.bf16.msra.mxu1 %v10633_v7  ;;  %v10692_v6 = vld [vmem:[#allocation8 + $0x244] ss:$16 sps:$4 sm:$0xff]   ;;  %v10695_v7 = vld [vmem:[#allocation8 + $0x24c] ss:$16 sps:$4 sm:$0xff]  }
 0x3c4   :  { %6672 = vmatprep.subr.bf16.mxu0 %v10638_v8  ;;  %6754 = vmatprep.subr.bf16.mxu1 %v10641_v9  ;;  %v10690_v8 = vld [vmem:[#allocation8 + $0x240] ss:$16 sps:$4 sm:$0xff]   ;;  %v10693_v9 = vld [vmem:[#allocation8 + $0x248] ss:$16 sps:$4 sm:$0xff]  }
 0x3c7   :  { %6673 = vmatpush1.bf16.msra.mxu0 %v10636_v10  ;;  %6755 = vmatpush1.bf16.msra.mxu1 %v10639_v12  ;;  %v10698_v10 = vld [vmem:[#allocation8 + $0x264] ss:$16 sps:$4 sm:$0xff]   ;;  %v10701_v12 = vld [vmem:[#allocation8 + $0x26c] ss:$16 sps:$4 sm:$0xff]  }
 0x3c8   :  { %6674 = vmatprep.subr.bf16.mxu0 %v10644_v13  ;;  %6756 = vmatprep.subr.bf16.mxu1 %v10647_v15  ;;  %v10696_v13 = vld [vmem:[#allocation8 + $0x260] ss:$16 sps:$4 sm:$0xff]   ;;  %v10699_v15 = vld [vmem:[#allocation8 + $0x268] ss:$16 sps:$4 sm:$0xff]  }
 0x3cb   :  { %6675 = vmatpush1.bf16.msra.mxu0 %v10642_v16  ;;  %6757 = vmatpush1.bf16.msra.mxu1 %v10645_v18  ;;  %v10704_v16 = vld [vmem:[#allocation8 + $0x284] ss:$16 sps:$4 sm:$0xff]   ;;  %v10707_v18 = vld [vmem:[#allocation8 + $0x28c] ss:$16 sps:$4 sm:$0xff]  }
 0x3cc   :  { %6676 = vmatprep.subr.bf16.mxu0 %v10650_v20  ;;  %6758 = vmatprep.subr.bf16.mxu1 %v10653_v11  ;;  %v10702_v20 = vld [vmem:[#allocation8 + $0x280] ss:$16 sps:$4 sm:$0xff]   ;;  %v10705_v11 = vld [vmem:[#allocation8 + $0x288] ss:$16 sps:$4 sm:$0xff]  }
 0x3cf   :  { %6677 = vmatpush1.bf16.msra.mxu0 %v10648_v21  ;;  %6759 = vmatpush1.bf16.msra.mxu1 %v10651_v14  ;;  %v10710_v21 = vld [vmem:[#allocation8 + $0x2a4] ss:$16 sps:$4 sm:$0xff]   ;;  %v10713_v14 = vld [vmem:[#allocation8 + $0x2ac] ss:$16 sps:$4 sm:$0xff]  }
 0x3d0   :  { %6678 = vmatprep.subr.bf16.mxu0 %v10656_v23  ;;  %6760 = vmatprep.subr.bf16.mxu1 %v10659_v24  ;;  %v10708_v23 = vld [vmem:[#allocation8 + $0x2a0] ss:$16 sps:$4 sm:$0xff]   ;;  %v10711_v24 = vld [vmem:[#allocation8 + $0x2a8] ss:$16 sps:$4 sm:$0xff]  }
 0x3d3   :  { %6679 = vmatpush1.bf16.msra.mxu0 %v10654_v17  ;;  %6761 = vmatpush1.bf16.msra.mxu1 %v10657_v26  ;;  %v10716_v17 = vld [vmem:[#allocation8 + $0x2c4] ss:$16 sps:$4 sm:$0xff]   ;;  %v10719_v26 = vld [vmem:[#allocation8 + $0x2cc] ss:$16 sps:$4 sm:$0xff]  }
 0x3d4   :  { %6680 = vmatprep.subr.bf16.mxu0 %v10662_v27  ;;  %6762 = vmatprep.subr.bf16.mxu1 %v10665_v19  ;;  %v10714_v27 = vld [vmem:[#allocation8 + $0x2c0] ss:$16 sps:$4 sm:$0xff]   ;;  %v10717_v19 = vld [vmem:[#allocation8 + $0x2c8] ss:$16 sps:$4 sm:$0xff]  }
 0x3d7   :  { %6681 = vmatpush1.bf16.msra.mxu0 %v10660_v29  ;;  %6763 = vmatpush1.bf16.msra.mxu1 %v10663_v30  ;;  %v10722_v29 = vld [vmem:[#allocation8 + $0x2e4] ss:$16 sps:$4 sm:$0xff]   ;;  %v10725_v30 = vld [vmem:[#allocation8 + $0x2ec] ss:$16 sps:$4 sm:$0xff]  }
 0x3d8   :  { %6682 = vmatprep.subr.bf16.mxu0 %v10668_v22  ;;  %6764 = vmatprep.subr.bf16.mxu1 %v10671_v32  ;;  %v10720_v22 = vld [vmem:[#allocation8 + $0x2e0] ss:$16 sps:$4 sm:$0xff]   ;;  %v10723_v32 = vld [vmem:[#allocation8 + $0x2e8] ss:$16 sps:$4 sm:$0xff]  }
 0x3db   :  { %6683 = vmatpush1.bf16.msra.mxu0 %v10666_v33  ;;  %6765 = vmatpush1.bf16.msra.mxu1 %v10669_v34  ;;  %v10728_v33 = vld [vmem:[#allocation8 + $0x304] ss:$16 sps:$4 sm:$0xff]   ;;  %v10731_v34 = vld [vmem:[#allocation8 + $0x30c] ss:$16 sps:$4 sm:$0xff]  }
 0x3dc   :  { %6684 = vmatprep.subr.bf16.mxu0 %v10674_v35  ;;  %6766 = vmatprep.subr.bf16.mxu1 %v10677_v36  ;;  %v10726_v35 = vld [vmem:[#allocation8 + $0x300] ss:$16 sps:$4 sm:$0xff]   ;;  %v10729_v36 = vld [vmem:[#allocation8 + $0x308] ss:$16 sps:$4 sm:$0xff]  }
 0x3df   :  { %6685 = vmatpush1.bf16.msra.mxu0 %v10672_v37  ;;  %6767 = vmatpush1.bf16.msra.mxu1 %v10675_v38  ;;  %v10734_v37 = vld [vmem:[#allocation8 + $0x324] ss:$16 sps:$4 sm:$0xff]   ;;  %v10737_v38 = vld [vmem:[#allocation8 + $0x32c] ss:$16 sps:$4 sm:$0xff]  }
 0x3e0   :  { %6695 = vmatprep.subr.bf16.mxu0 %v10680_v39  ;;  %6777 = vmatprep.subr.bf16.mxu1 %v10683_v40  ;;  %v10732_v39 = vld [vmem:[#allocation8 + $0x320] ss:$16 sps:$4 sm:$0xff]   ;;  %v10735_v40 = vld [vmem:[#allocation8 + $0x328] ss:$16 sps:$4 sm:$0xff]  }
 0x475   :  { %v5357_v47 = vpop.f32.mrb[0].mxu0  ;;  %v11496_v48 = vpop.f32.mrb[0].mxu1 }
 0x476   :  { %v9276_v49 = vadd.f32 %v5357_v47, %v931_v45  ;;  %v5359_v50 = vpop.f32.mrb[1].mxu0  ;;  %v5851_v51 = vpop.f32.mrb[1].mxu1  ;;  %v10743_v45 = vld [vmem:[#allocation8 + $0x34c] ss:$16 sps:$4 sm:$0xff]   ;;  %v10746_v47 = vld [vmem:[#allocation8 + $0x364] ss:$16 sps:$4 sm:$0xff]  }
 0x477   :  { %v9277_v52 = vadd.f32 %v5359_v50, %v935_v46  ;;  %v9279_v53 = vadd.f32 %v5851_v51, %v943_v28  ;;  %v5361_v54 = vpop.f32.mrb[2].mxu0  ;;  %v5853_v55 = vpop.f32.mrb[2].mxu1  ;;  %v10738_v46 = vld [vmem:[#allocation8 + $0x340] ss:$16 sps:$4 sm:$0xff]   ;;  %v10741_v28 = vld [vmem:[#allocation8 + $0x348] ss:$16 sps:$4 sm:$0xff]  }
 0x478   :  { %v5856_v56 = vmax.f32 %v9276_v49, 0.0  ;;  %v5362_v57 = vpop.f32.mrb[3].mxu0  ;;  %v5854_v58 = vpop.f32.mrb[3].mxu1  ;;  %v10749_v49 = vld [vmem:[#allocation8 + $0x36c] ss:$16 sps:$4 sm:$0xff]  }
 0x479   :  { %v5857_v59 = vmax.f32 %v9277_v52, 0.0  ;;  %v5859_v60 = vmax.f32 %v9279_v53, 0.0  ;;  %v10744_v50 = vld [vmem:[#allocation8 + $0x360] ss:$16 sps:$4 sm:$0xff]   ;;  %v10747_v51 = vld [vmem:[#allocation8 + $0x368] ss:$16 sps:$4 sm:$0xff]  }
 0x47a   :  { %v5860_v0 = vpack.c.bf16 %v5856_v56, %v5856_v56  ;;  %v10752_v52 = vld [vmem:[#allocation8 + $0x384] ss:$16 sps:$4 sm:$0xff]   ;;  %v10755_v53 = vld [vmem:[#allocation8 + $0x38c] ss:$16 sps:$4 sm:$0xff]   ;;  %v10750_v54 = vld [vmem:[#allocation8 + $0x380] ss:$16 sps:$4 sm:$0xff]  }
 0x47b   :  { %v5861_v61 = vpack.c.bf16 %v5857_v59, %v5857_v59  ;;  %v5863_v3 = vpack.c.bf16 %v5859_v60, %v5859_v60  ;;  %v10753_v55 = vld [vmem:[#allocation8 + $0x388] ss:$16 sps:$4 sm:$0xff]   ;;  %v11499_v56 = vsub.s32 2, %v11477_v41  ;;  %v10758_v57 = vld [vmem:[#allocation8 + $0x3a4] ss:$16 sps:$4 sm:$0xff]  }
 0x47c   :  { %v10761_v58 = vld [vmem:[#allocation8 + $0x3ac] ss:$16 sps:$4 sm:$0xff]   ;;  %v10756_v59 = vld [vmem:[#allocation8 + $0x3a0] ss:$16 sps:$4 sm:$0xff]   ;;  %v10759_v60 = vld [vmem:[#allocation8 + $0x3a8] ss:$16 sps:$4 sm:$0xff]  }
 0x47d   :  { %6686 = vmatprep.mubr.bf16.mxu0 %v5861_v61  ;;  %6768 = vmatprep.mubr.bf16.mxu1 %v5861_v61  ;;  %v939_v61 = vrot.slane %v11482_v43, %v11499_v56  ;;  %v10765_v41 = vld [vmem:[#allocation8 + $0x3c8] ss:$16 sps:$4 sm:$0xff]  }
 0x47e   :  { %6687 = vmatmul.mubr.bf16.vlgmr.msra.gmra.mrb[4].mxu0 %v5860_v0  ;;  %6769 = vmatmul.mubr.bf16.vlgmr.msra.gmra.mrb[4].mxu1 %v5860_v0  ;;  %v10762_v0 = vld [vmem:[#allocation8 + $0x3c0] ss:$16 sps:$4 sm:$0xff]   ;;  %v10776_v43 = vld [vmem:[#allocation11 + $0x4] ss:$16 sps:$4 sm:$0xff]  }
 0x47f   :  { %6696 = vmatpush1.bf16.msra.mxu0 %v10678_v62  ;;  %6778 = vmatpush1.bf16.msra.mxu1 %v10681_v63  ;;  %v10764_v62 = vld [vmem:[#allocation8 + $0x3c4] ss:$16 sps:$4 sm:$0xff]   ;;  %v10767_v63 = vld [vmem:[#allocation8 + $0x3cc] ss:$16 sps:$4 sm:$0xff]  }
 0x480   :  { %6727 = vmatprep.mubr.bf16.mxu0 %v5863_v3  ;;  %6809 = vmatprep.mubr.bf16.mxu1 %v5863_v3  ;;  %v10773_v3 = vld [vmem:[#allocation8 + $0x3ec] ss:$16 sps:$4 sm:$0xff]  }
 0x481   :  { %6697 = vmatprep.subr.bf16.mxu0 %v10686_v1  ;;  %6779 = vmatprep.subr.bf16.mxu1 %v10689_v2  ;;  %v9278_v1 = vadd.f32 %v11496_v48, %v939_v61  ;;  %v10770_v2 = vld [vmem:[#allocation8 + $0x3e4] ss:$16 sps:$4 sm:$0xff]   ;;  %v10782_v48 = vld [vmem:[#allocation11 + $0x24] ss:$16 sps:$4 sm:$0xff]  }
 0x482   :  { %v10848_v61 = vld [vmem:[#allocation11 + $0x184] ss:$16 sps:$4 sm:$0xff]  }
 0x483   :  { %6698 = vmatpush1.bf16.msra.mxu0 %v10684_v4  ;;  %6780 = vmatpush1.bf16.msra.mxu1 %v10687_v5  ;;  %v10768_v4 = vld [vmem:[#allocation8 + $0x3e0] ss:$16 sps:$4 sm:$0xff]   ;;  %v10771_v5 = vld [vmem:[#allocation8 + $0x3e8] ss:$16 sps:$4 sm:$0xff]  }
 0x484   :  { %6699 = vmatprep.subr.bf16.mxu0 %v10692_v6  ;;  %6781 = vmatprep.subr.bf16.mxu1 %v10695_v7  ;;  %v5858_v6 = vmax.f32 %v9278_v1, 0.0  ;;  %v10779_v7 = vld [vmem:[#allocation11 + $0xc] ss:$16 sps:$4 sm:$0xff]  }
 0x485   :  { %v10857_v1 = vld [vmem:[#allocation11 + $0x1ac] ss:$16 sps:$4 sm:$0xff]  }
 0x487   :  { %6700 = vmatpush1.bf16.msra.mxu0 %v10690_v8  ;;  %6782 = vmatpush1.bf16.msra.mxu1 %v10693_v9  ;;  %v10774_v8 = vld [vmem:[#allocation11] ss:$16 sps:$4 sm:$0xff]   ;;  %v10777_v9 = vld [vmem:[#allocation11 + $0x8] ss:$16 sps:$4 sm:$0xff]  }
 0x488   :  { %6701 = vmatprep.subr.bf16.mxu0 %v10698_v10  ;;  %6783 = vmatprep.subr.bf16.mxu1 %v10701_v12  ;;  %v5862_v10 = vpack.c.bf16 %v5858_v6, %v5858_v6  ;;  %v10785_v12 = vld [vmem:[#allocation11 + $0x2c] ss:$16 sps:$4 sm:$0xff]   ;;  %v10858_v6 = vld [vmem:[#allocation11 + $0x1c0] ss:$16 sps:$4 sm:$0xff]  }
 0x48b   :  { %6702 = vmatpush1.bf16.msra.mxu0 %v10696_v13  ;;  %6784 = vmatpush1.bf16.msra.mxu1 %v10699_v15  ;;  %v10780_v13 = vld [vmem:[#allocation11 + $0x20] ss:$16 sps:$4 sm:$0xff]   ;;  %v10783_v15 = vld [vmem:[#allocation11 + $0x28] ss:$16 sps:$4 sm:$0xff]  }
 0x48c   :  { %6703 = vmatprep.subr.bf16.mxu0 %v10704_v16  ;;  %6785 = vmatprep.subr.bf16.mxu1 %v10707_v18  ;;  %v10788_v16 = vld [vmem:[#allocation11 + $0x44] ss:$16 sps:$4 sm:$0xff]   ;;  %v10791_v18 = vld [vmem:[#allocation11 + $0x4c] ss:$16 sps:$4 sm:$0xff]  }
 0x48f   :  { %6704 = vmatpush1.bf16.msra.mxu0 %v10702_v20  ;;  %6786 = vmatpush1.bf16.msra.mxu1 %v10705_v11  ;;  %v10786_v20 = vld [vmem:[#allocation11 + $0x40] ss:$16 sps:$4 sm:$0xff]   ;;  %v10789_v11 = vld [vmem:[#allocation11 + $0x48] ss:$16 sps:$4 sm:$0xff]  }
 0x490   :  { %6705 = vmatprep.subr.bf16.mxu0 %v10710_v21  ;;  %6787 = vmatprep.subr.bf16.mxu1 %v10713_v14  ;;  %v10794_v21 = vld [vmem:[#allocation11 + $0x64] ss:$16 sps:$4 sm:$0xff]   ;;  %v10797_v14 = vld [vmem:[#allocation11 + $0x6c] ss:$16 sps:$4 sm:$0xff]  }
 0x493   :  { %6706 = vmatpush1.bf16.msra.mxu0 %v10708_v23  ;;  %6788 = vmatpush1.bf16.msra.mxu1 %v10711_v24  ;;  %v10792_v23 = vld [vmem:[#allocation11 + $0x60] ss:$16 sps:$4 sm:$0xff]   ;;  %v10795_v24 = vld [vmem:[#allocation11 + $0x68] ss:$16 sps:$4 sm:$0xff]  }
 0x494   :  { %6707 = vmatprep.subr.bf16.mxu0 %v10716_v17  ;;  %6789 = vmatprep.subr.bf16.mxu1 %v10719_v26  ;;  %v10800_v17 = vld [vmem:[#allocation11 + $0x84] ss:$16 sps:$4 sm:$0xff]   ;;  %v10803_v26 = vld [vmem:[#allocation11 + $0x8c] ss:$16 sps:$4 sm:$0xff]  }
 0x497   :  { %6708 = vmatpush1.bf16.msra.mxu0 %v10714_v27  ;;  %6790 = vmatpush1.bf16.msra.mxu1 %v10717_v19  ;;  %v10798_v27 = vld [vmem:[#allocation11 + $0x80] ss:$16 sps:$4 sm:$0xff]   ;;  %v10801_v19 = vld [vmem:[#allocation11 + $0x88] ss:$16 sps:$4 sm:$0xff]  }
 0x498   :  { %6709 = vmatprep.subr.bf16.mxu0 %v10722_v29  ;;  %6791 = vmatprep.subr.bf16.mxu1 %v10725_v30  ;;  %v10806_v29 = vld [vmem:[#allocation11 + $0xa4] ss:$16 sps:$4 sm:$0xff]   ;;  %v10809_v30 = vld [vmem:[#allocation11 + $0xac] ss:$16 sps:$4 sm:$0xff]  }
 0x49b   :  { %6710 = vmatpush1.bf16.msra.mxu0 %v10720_v22  ;;  %6792 = vmatpush1.bf16.msra.mxu1 %v10723_v32  ;;  %v10804_v22 = vld [vmem:[#allocation11 + $0xa0] ss:$16 sps:$4 sm:$0xff]   ;;  %v10807_v32 = vld [vmem:[#allocation11 + $0xa8] ss:$16 sps:$4 sm:$0xff]  }
 0x49c   :  { %6711 = vmatprep.subr.bf16.mxu0 %v10728_v33  ;;  %6793 = vmatprep.subr.bf16.mxu1 %v10731_v34  ;;  %v10812_v33 = vld [vmem:[#allocation11 + $0xc4] ss:$16 sps:$4 sm:$0xff]   ;;  %v10815_v34 = vld [vmem:[#allocation11 + $0xcc] ss:$16 sps:$4 sm:$0xff]  }
 0x49f   :  { %6712 = vmatpush1.bf16.msra.mxu0 %v10726_v35  ;;  %6794 = vmatpush1.bf16.msra.mxu1 %v10729_v36  ;;  %v10810_v35 = vld [vmem:[#allocation11 + $0xc0] ss:$16 sps:$4 sm:$0xff]   ;;  %v10813_v36 = vld [vmem:[#allocation11 + $0xc8] ss:$16 sps:$4 sm:$0xff]  }
 0x4a0   :  { %6713 = vmatprep.subr.bf16.mxu0 %v10734_v37  ;;  %6795 = vmatprep.subr.bf16.mxu1 %v10737_v38  ;;  %v10818_v37 = vld [vmem:[#allocation11 + $0xe4] ss:$16 sps:$4 sm:$0xff]   ;;  %v10821_v38 = vld [vmem:[#allocation11 + $0xec] ss:$16 sps:$4 sm:$0xff]  }
 0x4a3   :  { %6714 = vmatpush1.bf16.msra.mxu0 %v10732_v39  ;;  %6796 = vmatpush1.bf16.msra.mxu1 %v10735_v40  ;;  %v10816_v39 = vld [vmem:[#allocation11 + $0xe0] ss:$16 sps:$4 sm:$0xff]   ;;  %v10819_v40 = vld [vmem:[#allocation11 + $0xe8] ss:$16 sps:$4 sm:$0xff]  }
 0x4a4   :  { %6715 = vmatprep.subr.bf16.mxu0 %v10740_v31  ;;  %6797 = vmatprep.subr.bf16.mxu1 %v10743_v45  ;;  %v10824_v31 = vld [vmem:[#allocation11 + $0x104] ss:$16 sps:$4 sm:$0xff]   ;;  %v10827_v45 = vld [vmem:[#allocation11 + $0x10c] ss:$16 sps:$4 sm:$0xff]  }
 0x4a7   :  { %6716 = vmatpush1.bf16.msra.mxu0 %v10738_v46  ;;  %6798 = vmatpush1.bf16.msra.mxu1 %v10741_v28  ;;  %v10822_v46 = vld [vmem:[#allocation11 + $0x100] ss:$16 sps:$4 sm:$0xff]   ;;  %v10825_v28 = vld [vmem:[#allocation11 + $0x108] ss:$16 sps:$4 sm:$0xff]  }
 0x4a8   :  { %6717 = vmatprep.subr.bf16.mxu0 %v10746_v47  ;;  %6799 = vmatprep.subr.bf16.mxu1 %v10749_v49  ;;  %v10830_v47 = vld [vmem:[#allocation11 + $0x124] ss:$16 sps:$4 sm:$0xff]   ;;  %v10833_v49 = vld [vmem:[#allocation11 + $0x12c] ss:$16 sps:$4 sm:$0xff]  }
 0x4ab   :  { %6718 = vmatpush1.bf16.msra.mxu0 %v10744_v50  ;;  %6800 = vmatpush1.bf16.msra.mxu1 %v10747_v51  ;;  %v10828_v50 = vld [vmem:[#allocation11 + $0x120] ss:$16 sps:$4 sm:$0xff]   ;;  %v10831_v51 = vld [vmem:[#allocation11 + $0x128] ss:$16 sps:$4 sm:$0xff]  }
 0x4ac   :  { %6719 = vmatprep.subr.bf16.mxu0 %v10752_v52  ;;  %6801 = vmatprep.subr.bf16.mxu1 %v10755_v53  ;;  %v10836_v52 = vld [vmem:[#allocation11 + $0x144] ss:$16 sps:$4 sm:$0xff]   ;;  %v10839_v53 = vld [vmem:[#allocation11 + $0x14c] ss:$16 sps:$4 sm:$0xff]  }
 0x4af   :  { %6720 = vmatpush1.bf16.msra.mxu0 %v10750_v54  ;;  %6802 = vmatpush1.bf16.msra.mxu1 %v10753_v55  ;;  %v10834_v54 = vld [vmem:[#allocation11 + $0x140] ss:$16 sps:$4 sm:$0xff]   ;;  %v10837_v55 = vld [vmem:[#allocation11 + $0x148] ss:$16 sps:$4 sm:$0xff]  }
 0x4b0   :  { %6721 = vmatprep.subr.bf16.mxu0 %v10758_v57  ;;  %6803 = vmatprep.subr.bf16.mxu1 %v10761_v58  ;;  %v10842_v57 = vld [vmem:[#allocation11 + $0x164] ss:$16 sps:$4 sm:$0xff]   ;;  %v10845_v58 = vld [vmem:[#allocation11 + $0x16c] ss:$16 sps:$4 sm:$0xff]  }
 0x4b3   :  { %6722 = vmatpush1.bf16.msra.mxu0 %v10756_v59  ;;  %6804 = vmatpush1.bf16.msra.mxu1 %v10759_v60  ;;  %v10840_v59 = vld [vmem:[#allocation11 + $0x160] ss:$16 sps:$4 sm:$0xff]   ;;  %v10843_v60 = vld [vmem:[#allocation11 + $0x168] ss:$16 sps:$4 sm:$0xff]  }
 0x4b4   :  { %6723 = vmatprep.subr.bf16.mxu0 %v10764_v62  ;;  %6805 = vmatprep.subr.bf16.mxu1 %v10767_v63  ;;  %v10851_v62 = vld [vmem:[#allocation11 + $0x18c] ss:$16 sps:$4 sm:$0xff]   ;;  %v10846_v63 = vld [vmem:[#allocation11 + $0x180] ss:$16 sps:$4 sm:$0xff]  }
 0x4b7   :  { %6724 = vmatpush1.bf16.msra.mxu0 %v10762_v0  ;;  %6806 = vmatpush1.bf16.msra.mxu1 %v10765_v41  ;;  %v10849_v0 = vld [vmem:[#allocation11 + $0x188] ss:$16 sps:$4 sm:$0xff]   ;;  %v10854_v41 = vld [vmem:[#allocation11 + $0x1a4] ss:$16 sps:$4 sm:$0xff]  }
 0x4b8   :  { %6725 = vmatprep.subr.bf16.mxu0 %v10770_v2  ;;  %6807 = vmatprep.subr.bf16.mxu1 %v10773_v3  ;;  %v10852_v2 = vld [vmem:[#allocation11 + $0x1a0] ss:$16 sps:$4 sm:$0xff]   ;;  %v10855_v3 = vld [vmem:[#allocation11 + $0x1a8] ss:$16 sps:$4 sm:$0xff]  }
 0x4bb   :  { %6726 = vmatpush1.bf16.msra.mxu0 %v10768_v4  ;;  %6808 = vmatpush1.bf16.msra.mxu1 %v10771_v5  ;;  %v10860_v4 = vld [vmem:[#allocation11 + $0x1c4] ss:$16 sps:$4 sm:$0xff]   ;;  %v10863_v5 = vld [vmem:[#allocation11 + $0x1cc] ss:$16 sps:$4 sm:$0xff]  }
 0x4bc   :  { %7616 = vmatprep.subr.bf16.mxu0 %v10776_v43  ;;  %7698 = vmatprep.subr.bf16.mxu1 %v10779_v7  ;;  %v10861_v43 = vld [vmem:[#allocation11 + $0x1c8] ss:$16 sps:$4 sm:$0xff]   ;;  %v10866_v7 = vld [vmem:[#allocation11 + $0x1e4] ss:$16 sps:$4 sm:$0xff]  }
 0x4be   :  { %6728 = vmatmul.mubr.bf16.vlgmr.msra.gmra.mrb[4].mxu0 %v5862_v10  ;;  %6810 = vmatmul.mubr.bf16.vlgmr.msra.gmra.mrb[4].mxu1 %v5862_v10  ;;  %v10867_v10 = vld [vmem:[#allocation11 + $0x1e8] ss:$16 sps:$4 sm:$0xff]  }
 0x4bf   :  { %7617 = vmatpush1.bf16.msra.mxu0 %v10774_v8  ;;  %7699 = vmatpush1.bf16.msra.mxu1 %v10777_v9  ;;  %v10869_v8 = vld [vmem:[#allocation11 + $0x1ec] ss:$16 sps:$4 sm:$0xff]   ;;  %v10864_v9 = vld [vmem:[#allocation11 + $0x1e0] ss:$16 sps:$4 sm:$0xff]  }
 0x4c0   :  { %7618 = vmatprep.subr.bf16.mxu0 %v10782_v48  ;;  %7700 = vmatprep.subr.bf16.mxu1 %v10785_v12  ;;  %v10872_v48 = vld [vmem:[#allocation11 + $0x204] ss:$16 sps:$4 sm:$0xff]   ;;  %v10875_v12 = vld [vmem:[#allocation11 + $0x20c] ss:$16 sps:$4 sm:$0xff]  }
 0x4c3   :  { %7619 = vmatpush1.bf16.msra.mxu0 %v10780_v13  ;;  %7701 = vmatpush1.bf16.msra.mxu1 %v10783_v15  ;;  %v11504_v13 = vld [vmem:[#allocation10] sm:$0xf] }
 0x4c4   :  { %7620 = vmatprep.subr.bf16.mxu0 %v10788_v16  ;;  %7702 = vmatprep.subr.bf16.mxu1 %v10791_v18  ;;  %v5997_v15 = vrot.slane %v11504_v13, %v11480_v42  ;;  %v6001_v16 = vrot.slane %v11504_v13, %v11485_v25  ;;  %v6009_v18 = vrot.slane %v11504_v13, %v11488_v44 }
 0x4c7   :  { %7621 = vmatpush1.bf16.msra.mxu0 %v10786_v20  ;;  %7703 = vmatpush1.bf16.msra.mxu1 %v10789_v11 }
 0x4c8   :  { %7622 = vmatprep.subr.bf16.mxu0 %v10794_v21  ;;  %7704 = vmatprep.subr.bf16.mxu1 %v10797_v14 }
 0x4cb   :  { %7623 = vmatpush1.bf16.msra.mxu0 %v10792_v23  ;;  %7705 = vmatpush1.bf16.msra.mxu1 %v10795_v24 }
 0x4cc   :  { %7624 = vmatprep.subr.bf16.mxu0 %v10800_v17  ;;  %7706 = vmatprep.subr.bf16.mxu1 %v10803_v26 }
 0x4cf   :  { %7625 = vmatpush1.bf16.msra.mxu0 %v10798_v27  ;;  %7707 = vmatpush1.bf16.msra.mxu1 %v10801_v19 }
 0x4d0   :  { %7626 = vmatprep.subr.bf16.mxu0 %v10806_v29  ;;  %7708 = vmatprep.subr.bf16.mxu1 %v10809_v30 }
 0x4d3   :  { %7627 = vmatpush1.bf16.msra.mxu0 %v10804_v22  ;;  %7709 = vmatpush1.bf16.msra.mxu1 %v10807_v32 }
 0x4d4   :  { %7628 = vmatprep.subr.bf16.mxu0 %v10812_v33  ;;  %7710 = vmatprep.subr.bf16.mxu1 %v10815_v34  ;;  %v10870_v34 = vld [vmem:[#allocation11 + $0x200] ss:$16 sps:$4 sm:$0xff]  }
 0x4d7   :  { %7629 = vmatpush1.bf16.msra.mxu0 %v10810_v35  ;;  %7711 = vmatpush1.bf16.msra.mxu1 %v10813_v36  ;;  %v10873_v35 = vld [vmem:[#allocation11 + $0x208] ss:$16 sps:$4 sm:$0xff]  }
 0x4d8   :  { %7630 = vmatprep.subr.bf16.mxu0 %v10818_v37  ;;  %7712 = vmatprep.subr.bf16.mxu1 %v10821_v38  ;;  %v10878_v37 = vld [vmem:[#allocation11 + $0x224] ss:$16 sps:$4 sm:$0xff]   ;;  %v10881_v38 = vld [vmem:[#allocation11 + $0x22c] ss:$16 sps:$4 sm:$0xff]  }
 0x4db   :  { %7631 = vmatpush1.bf16.msra.mxu0 %v10816_v39  ;;  %7713 = vmatpush1.bf16.msra.mxu1 %v10819_v40  ;;  %v10876_v40 = vld [vmem:[#allocation11 + $0x220] ss:$16 sps:$4 sm:$0xff]  }
 0x4dc   :  { %7632 = vmatprep.subr.bf16.mxu0 %v10824_v31  ;;  %7714 = vmatprep.subr.bf16.mxu1 %v10827_v45  ;;  %v10879_v31 = vld [vmem:[#allocation11 + $0x228] ss:$16 sps:$4 sm:$0xff]   ;;  %v10884_v45 = vld [vmem:[#allocation11 + $0x244] ss:$16 sps:$4 sm:$0xff]  }
 0x4df   :  { %7633 = vmatpush1.bf16.msra.mxu0 %v10822_v46  ;;  %7715 = vmatpush1.bf16.msra.mxu1 %v10825_v28  ;;  %v10887_v46 = vld [vmem:[#allocation11 + $0x24c] ss:$16 sps:$4 sm:$0xff]   ;;  %v10882_v28 = vld [vmem:[#allocation11 + $0x240] ss:$16 sps:$4 sm:$0xff]  }
 0x4e0   :  { %7634 = vmatprep.subr.bf16.mxu0 %v10830_v47  ;;  %7716 = vmatprep.subr.bf16.mxu1 %v10833_v49  ;;  %v10885_v47 = vld [vmem:[#allocation11 + $0x248] ss:$16 sps:$4 sm:$0xff]   ;;  %v10890_v49 = vld [vmem:[#allocation11 + $0x264] ss:$16 sps:$4 sm:$0xff]  }
 0x4e3   :  { %7635 = vmatpush1.bf16.msra.mxu0 %v10828_v50  ;;  %7717 = vmatpush1.bf16.msra.mxu1 %v10831_v51  ;;  %v10893_v50 = vld [vmem:[#allocation11 + $0x26c] ss:$16 sps:$4 sm:$0xff]   ;;  %v10888_v51 = vld [vmem:[#allocation11 + $0x260] ss:$16 sps:$4 sm:$0xff]  }
 0x4e4   :  { %7636 = vmatprep.subr.bf16.mxu0 %v10836_v52  ;;  %7718 = vmatprep.subr.bf16.mxu1 %v10839_v53  ;;  %v10891_v52 = vld [vmem:[#allocation11 + $0x268] ss:$16 sps:$4 sm:$0xff]   ;;  %v10896_v53 = vld [vmem:[#allocation11 + $0x284] ss:$16 sps:$4 sm:$0xff]  }
 0x4e7   :  { %7637 = vmatpush1.bf16.msra.mxu0 %v10834_v54  ;;  %7719 = vmatpush1.bf16.msra.mxu1 %v10837_v55  ;;  %v10899_v54 = vld [vmem:[#allocation11 + $0x28c] ss:$16 sps:$4 sm:$0xff]   ;;  %v10894_v55 = vld [vmem:[#allocation11 + $0x280] ss:$16 sps:$4 sm:$0xff]  }
 0x4e8   :  { %7638 = vmatprep.subr.bf16.mxu0 %v10842_v57  ;;  %7720 = vmatprep.subr.bf16.mxu1 %v10845_v58  ;;  %v10897_v57 = vld [vmem:[#allocation11 + $0x288] ss:$16 sps:$4 sm:$0xff]   ;;  %v10902_v58 = vld [vmem:[#allocation11 + $0x2a4] ss:$16 sps:$4 sm:$0xff]  }
 0x4eb   :  { %7639 = vmatpush1.bf16.msra.mxu0 %v10840_v59  ;;  %7721 = vmatpush1.bf16.msra.mxu1 %v10843_v60  ;;  %v10905_v59 = vld [vmem:[#allocation11 + $0x2ac] ss:$16 sps:$4 sm:$0xff]   ;;  %v10900_v60 = vld [vmem:[#allocation11 + $0x2a0] ss:$16 sps:$4 sm:$0xff]  }
 0x4ec   :  { %7640 = vmatprep.subr.bf16.mxu0 %v10848_v61  ;;  %7722 = vmatprep.subr.bf16.mxu1 %v10851_v62  ;;  %v10903_v61 = vld [vmem:[#allocation11 + $0x2a8] ss:$16 sps:$4 sm:$0xff]   ;;  %v10908_v62 = vld [vmem:[#allocation11 + $0x2c4] ss:$16 sps:$4 sm:$0xff]  }
 0x4ef   :  { %7641 = vmatpush1.bf16.msra.mxu0 %v10846_v63  ;;  %7723 = vmatpush1.bf16.msra.mxu1 %v10849_v0  ;;  %v10911_v63 = vld [vmem:[#allocation11 + $0x2cc] ss:$16 sps:$4 sm:$0xff]   ;;  %v10906_v0 = vld [vmem:[#allocation11 + $0x2c0] ss:$16 sps:$4 sm:$0xff]  }
 0x4f0   :  { %7642 = vmatprep.subr.bf16.mxu0 %v10854_v41  ;;  %7724 = vmatprep.subr.bf16.mxu1 %v10857_v1  ;;  %v10909_v41 = vld [vmem:[#allocation11 + $0x2c8] ss:$16 sps:$4 sm:$0xff]   ;;  %v10914_v1 = vld [vmem:[#allocation11 + $0x2e4] ss:$16 sps:$4 sm:$0xff]  }
 0x4f3   :  { %7643 = vmatpush1.bf16.msra.mxu0 %v10852_v2  ;;  %7725 = vmatpush1.bf16.msra.mxu1 %v10855_v3  ;;  %v10917_v2 = vld [vmem:[#allocation11 + $0x2ec] ss:$16 sps:$4 sm:$0xff]   ;;  %v10912_v3 = vld [vmem:[#allocation11 + $0x2e0] ss:$16 sps:$4 sm:$0xff]  }
 0x4f4   :  { %7644 = vmatprep.subr.bf16.mxu0 %v10860_v4  ;;  %7726 = vmatprep.subr.bf16.mxu1 %v10863_v5  ;;  %v10915_v4 = vld [vmem:[#allocation11 + $0x2e8] ss:$16 sps:$4 sm:$0xff]   ;;  %v10920_v5 = vld [vmem:[#allocation11 + $0x304] ss:$16 sps:$4 sm:$0xff]  }
 0x4f7   :  { %7645 = vmatpush1.bf16.msra.mxu0 %v10858_v6  ;;  %7727 = vmatpush1.bf16.msra.mxu1 %v10861_v43  ;;  %v10923_v6 = vld [vmem:[#allocation11 + $0x30c] ss:$16 sps:$4 sm:$0xff]   ;;  %v10918_v43 = vld [vmem:[#allocation11 + $0x300] ss:$16 sps:$4 sm:$0xff]  }
 0x4f8   :  { %7646 = vmatprep.subr.bf16.mxu0 %v10866_v7  ;;  %7728 = vmatprep.subr.bf16.mxu1 %v10869_v8  ;;  %v10921_v7 = vld [vmem:[#allocation11 + $0x308] ss:$16 sps:$4 sm:$0xff]   ;;  %v10926_v8 = vld [vmem:[#allocation11 + $0x324] ss:$16 sps:$4 sm:$0xff]  }
 0x4fb   :  { %7647 = vmatpush1.bf16.msra.mxu0 %v10864_v9  ;;  %7729 = vmatpush1.bf16.msra.mxu1 %v10867_v10  ;;  %v10929_v9 = vld [vmem:[#allocation11 + $0x32c] ss:$16 sps:$4 sm:$0xff]   ;;  %v10924_v10 = vld [vmem:[#allocation11 + $0x320] ss:$16 sps:$4 sm:$0xff]  }
 0x4fc   :  { %7657 = vmatprep.subr.bf16.mxu0 %v10872_v48  ;;  %7739 = vmatprep.subr.bf16.mxu1 %v10875_v12  ;;  %v10927_v48 = vld [vmem:[#allocation11 + $0x328] ss:$16 sps:$4 sm:$0xff]   ;;  %v10932_v12 = vld [vmem:[#allocation11 + $0x344] ss:$16 sps:$4 sm:$0xff]  }
 0x591   :  { %v6729_v20 = vpop.f32.mrb[4].mxu0  ;;  %v11512_v11 = vpop.f32.mrb[4].mxu1 }
 0x592   :  { %v9280_v21 = vadd.f32 %v6729_v20, %v5997_v15  ;;  %v6731_v14 = vpop.f32.mrb[5].mxu0  ;;  %v6813_v23 = vpop.f32.mrb[5].mxu1  ;;  %v10935_v15 = vld [vmem:[#allocation11 + $0x34c] ss:$16 sps:$4 sm:$0xff]   ;;  %v10938_v20 = vld [vmem:[#allocation11 + $0x364] ss:$16 sps:$4 sm:$0xff]  }
 0x593   :  { %v9281_v24 = vadd.f32 %v6731_v14, %v6001_v16  ;;  %v9283_v17 = vadd.f32 %v6813_v23, %v6009_v18  ;;  %v6733_v26 = vpop.f32.mrb[6].mxu0  ;;  %v6815_v27 = vpop.f32.mrb[6].mxu1  ;;  %v10930_v16 = vld [vmem:[#allocation11 + $0x340] ss:$16 sps:$4 sm:$0xff]   ;;  %v10933_v18 = vld [vmem:[#allocation11 + $0x348] ss:$16 sps:$4 sm:$0xff]  }
 0x594   :  { %v6818_v19 = vmax.f32 %v9280_v21, 0.0  ;;  %v6734_v29 = vpop.f32.mrb[7].mxu0  ;;  %v6816_v30 = vpop.f32.mrb[7].mxu1  ;;  %v10941_v21 = vld [vmem:[#allocation11 + $0x36c] ss:$16 sps:$4 sm:$0xff]  }
 0x595   :  { %v6819_v22 = vmax.f32 %v9281_v24, 0.0  ;;  %v6821_v32 = vmax.f32 %v9283_v17, 0.0  ;;  %v10936_v14 = vld [vmem:[#allocation11 + $0x360] ss:$16 sps:$4 sm:$0xff]   ;;  %v10939_v23 = vld [vmem:[#allocation11 + $0x368] ss:$16 sps:$4 sm:$0xff]  }
 0x596   :  { %v6822_v36 = vpack.c.bf16 %v6818_v19, %v6818_v19  ;;  %v10944_v24 = vld [vmem:[#allocation11 + $0x384] ss:$16 sps:$4 sm:$0xff]   ;;  %v10947_v17 = vld [vmem:[#allocation11 + $0x38c] ss:$16 sps:$4 sm:$0xff]   ;;  %v10942_v26 = vld [vmem:[#allocation11 + $0x380] ss:$16 sps:$4 sm:$0xff]  }
 0x597   :  { %v6823_v33 = vpack.c.bf16 %v6819_v22, %v6819_v22  ;;  %v6825_v39 = vpack.c.bf16 %v6821_v32, %v6821_v32  ;;  %v10945_v27 = vld [vmem:[#allocation11 + $0x388] ss:$16 sps:$4 sm:$0xff]   ;;  %v10950_v19 = vld [vmem:[#allocation11 + $0x3a4] ss:$16 sps:$4 sm:$0xff]   ;;  %v10953_v29 = vld [vmem:[#allocation11 + $0x3ac] ss:$16 sps:$4 sm:$0xff]   ;;  %v6005_v32 = vrot.slane %v11504_v13, %v11499_v56 }
 0x598   :  { %v10948_v30 = vld [vmem:[#allocation11 + $0x3a0] ss:$16 sps:$4 sm:$0xff]   ;;  %v10951_v22 = vld [vmem:[#allocation11 + $0x3a8] ss:$16 sps:$4 sm:$0xff]  }
 0x599   :  { %7648 = vmatprep.mubr.bf16.mxu0 %v6823_v33  ;;  %7730 = vmatprep.mubr.bf16.mxu1 %v6823_v33  ;;  %v10956_v33 = vld [vmem:[#allocation11 + $0x3c4] ss:$16 sps:$4 sm:$0xff]  }
 0x59a   :  { %7649 = vmatmul.mubr.bf16.vlgmr.msra.gmra.mrb[8].mxu0 %v6822_v36  ;;  %7731 = vmatmul.mubr.bf16.vlgmr.msra.gmra.mrb[8].mxu1 %v6822_v36  ;;  %v10957_v36 = vld [vmem:[#allocation11 + $0x3c8] ss:$16 sps:$4 sm:$0xff]  }
 0x59b   :  { %7658 = vmatpush1.bf16.msra.mxu0 %v10870_v34  ;;  %7740 = vmatpush1.bf16.msra.mxu1 %v10873_v35  ;;  %v10959_v34 = vld [vmem:[#allocation11 + $0x3cc] ss:$16 sps:$4 sm:$0xff]   ;;  %v10954_v35 = vld [vmem:[#allocation11 + $0x3c0] ss:$16 sps:$4 sm:$0xff]   ;;  %v10966_v13 = vld [vmem:[#allocation14 + $0x40] sm:$0xff]  }
 0x59c   :  { %7689 = vmatprep.mubr.bf16.mxu0 %v6825_v39  ;;  %7771 = vmatprep.mubr.bf16.mxu1 %v6825_v39  ;;  %v10965_v39 = vld [vmem:[#allocation11 + $0x3ec] ss:$16 sps:$4 sm:$0xff]  }
 0x59d   :  { %7659 = vmatprep.subr.bf16.mxu0 %v10878_v37  ;;  %7741 = vmatprep.subr.bf16.mxu1 %v10881_v38  ;;  %v9282_v37 = vadd.f32 %v11512_v11, %v6005_v32  ;;  %v10962_v38 = vld [vmem:[#allocation11 + $0x3e4] ss:$16 sps:$4 sm:$0xff]   ;;  %v10970_v11 = vld [vmem:[#allocation14 + $0x48] sm:$0xff]  }
 0x59f   :  { %7660 = vmatpush1.bf16.msra.mxu0 %v10876_v40  ;;  %7742 = vmatpush1.bf16.msra.mxu1 %v10879_v31  ;;  %v10960_v40 = vld [vmem:[#allocation11 + $0x3e0] ss:$16 sps:$4 sm:$0xff]   ;;  %v10963_v31 = vld [vmem:[#allocation11 + $0x3e8] ss:$16 sps:$4 sm:$0xff]  }
 0x5a0   :  { %7661 = vmatprep.subr.bf16.mxu0 %v10884_v45  ;;  %7743 = vmatprep.subr.bf16.mxu1 %v10887_v46  ;;  %v6820_v45 = vmax.f32 %v9282_v37, 0.0  ;;  %v10967_v46 = vld [vmem:[#allocation14 + $0xc0] sm:$0xff]  }
 0x5a3   :  { %7662 = vmatpush1.bf16.msra.mxu0 %v10882_v28  ;;  %7744 = vmatpush1.bf16.msra.mxu1 %v10885_v47  ;;  %v10968_v28 = vld [vmem:[#allocation14] sm:$0xff]  }
 0x5a4   :  { %7663 = vmatprep.subr.bf16.mxu0 %v10890_v49  ;;  %7745 = vmatprep.subr.bf16.mxu1 %v10893_v50  ;;  %v10969_v47 = vld [vmem:[#allocation14 + $0x80] sm:$0xff]   ;;  %v6824_v49 = vpack.c.bf16 %v6820_v45, %v6820_v45  ;;  %v10971_v50 = vld [vmem:[#allocation14 + $0xc8] sm:$0xff]  }
 0x5a7   :  { %7664 = vmatpush1.bf16.msra.mxu0 %v10888_v51  ;;  %7746 = vmatpush1.bf16.msra.mxu1 %v10891_v52  ;;  %v10972_v51 = vld [vmem:[#allocation14 + $0x8] sm:$0xff]  }
 0x5a8   :  { %7665 = vmatprep.subr.bf16.mxu0 %v10896_v53  ;;  %7747 = vmatprep.subr.bf16.mxu1 %v10899_v54  ;;  %v10973_v52 = vld [vmem:[#allocation14 + $0x88] sm:$0xff]   ;;  %v10974_v53 = vld [vmem:[#allocation14 + $0x50] sm:$0xff]  }
 0x5a9   :  { %v10975_v54 = vld [vmem:[#allocation14 + $0xd0] sm:$0xff]  }
 0x5ab   :  { %7666 = vmatpush1.bf16.msra.mxu0 %v10894_v55  ;;  %7748 = vmatpush1.bf16.msra.mxu1 %v10897_v57  ;;  %v10976_v55 = vld [vmem:[#allocation14 + $0x10] sm:$0xff]  }
 0x5ac   :  { %7667 = vmatprep.subr.bf16.mxu0 %v10902_v58  ;;  %7749 = vmatprep.subr.bf16.mxu1 %v10905_v59  ;;  %v10977_v57 = vld [vmem:[#allocation14 + $0x90] sm:$0xff]   ;;  %v10978_v58 = vld [vmem:[#allocation14 + $0x58] sm:$0xff]  }
 0x5ad   :  { %v10979_v59 = vld [vmem:[#allocation14 + $0xd8] sm:$0xff]  }
 0x5af   :  { %7668 = vmatpush1.bf16.msra.mxu0 %v10900_v60  ;;  %7750 = vmatpush1.bf16.msra.mxu1 %v10903_v61  ;;  %v10980_v60 = vld [vmem:[#allocation14 + $0x18] sm:$0xff]  }
 0x5b0   :  { %7669 = vmatprep.subr.bf16.mxu0 %v10908_v62  ;;  %7751 = vmatprep.subr.bf16.mxu1 %v10911_v63  ;;  %v10981_v61 = vld [vmem:[#allocation14 + $0x98] sm:$0xff]   ;;  %v10982_v62 = vld [vmem:[#allocation14 + $0x60] sm:$0xff]  }
 0x5b1   :  { %v10983_v63 = vld [vmem:[#allocation14 + $0xe0] sm:$0xff]  }
 0x5b3   :  { %7670 = vmatpush1.bf16.msra.mxu0 %v10906_v0  ;;  %7752 = vmatpush1.bf16.msra.mxu1 %v10909_v41  ;;  %v10984_v0 = vld [vmem:[#allocation14 + $0x20] sm:$0xff]  }
 0x5b4   :  { %7671 = vmatprep.subr.bf16.mxu0 %v10914_v1  ;;  %7753 = vmatprep.subr.bf16.mxu1 %v10917_v2  ;;  %v10985_v41 = vld [vmem:[#allocation14 + $0xa0] sm:$0xff]   ;;  %v10986_v1 = vld [vmem:[#allocation14 + $0x68] sm:$0xff]  }
 0x5b5   :  { %v10987_v2 = vld [vmem:[#allocation14 + $0xe8] sm:$0xff]  }
 0x5b7   :  { %7672 = vmatpush1.bf16.msra.mxu0 %v10912_v3  ;;  %7754 = vmatpush1.bf16.msra.mxu1 %v10915_v4  ;;  %v10988_v3 = vld [vmem:[#allocation14 + $0x28] sm:$0xff]  }
 0x5b8   :  { %7673 = vmatprep.subr.bf16.mxu0 %v10920_v5  ;;  %7755 = vmatprep.subr.bf16.mxu1 %v10923_v6  ;;  %v10989_v4 = vld [vmem:[#allocation14 + $0xa8] sm:$0xff]   ;;  %v10990_v5 = vld [vmem:[#allocation14 + $0x70] sm:$0xff]  }
 0x5b9   :  { %v10991_v6 = vld [vmem:[#allocation14 + $0xf0] sm:$0xff]  }
 0x5bb   :  { %7674 = vmatpush1.bf16.msra.mxu0 %v10918_v43  ;;  %7756 = vmatpush1.bf16.msra.mxu1 %v10921_v7  ;;  %v10992_v43 = vld [vmem:[#allocation14 + $0x30] sm:$0xff]  }
 0x5bc   :  { %7675 = vmatprep.subr.bf16.mxu0 %v10926_v8  ;;  %7757 = vmatprep.subr.bf16.mxu1 %v10929_v9  ;;  %v10993_v7 = vld [vmem:[#allocation14 + $0xb0] sm:$0xff]   ;;  %v10994_v8 = vld [vmem:[#allocation14 + $0x78] sm:$0xff]  }
 0x5bd   :  { %v10995_v9 = vld [vmem:[#allocation14 + $0xf8] sm:$0xff]  }
 0x5bf   :  { %7676 = vmatpush1.bf16.msra.mxu0 %v10924_v10  ;;  %7758 = vmatpush1.bf16.msra.mxu1 %v10927_v48  ;;  %v10996_v10 = vld [vmem:[#allocation14 + $0x38] sm:$0xff]  }
 0x5c0   :  { %7677 = vmatprep.subr.bf16.mxu0 %v10932_v12  ;;  %7759 = vmatprep.subr.bf16.mxu1 %v10935_v15  ;;  %v10997_v48 = vld [vmem:[#allocation14 + $0xb8] sm:$0xff]  }
 0x5c1   :  { %v6954_v12 = vld [vmem:[#allocation13] sm:$0xf] }
 0x5c2   :  { %v6959_v15 = vrot.slane %v6954_v12, %v11480_v42 }
 0x5c3   :  { %7678 = vmatpush1.bf16.msra.mxu0 %v10930_v16  ;;  %7760 = vmatpush1.bf16.msra.mxu1 %v10933_v18  ;;  %v6967_v16 = vrot.slane %v6954_v12, %v11499_v56  ;;  %v6963_v18 = vrot.slane %v6954_v12, %v11485_v25 }
 0x5c4   :  { %7679 = vmatprep.subr.bf16.mxu0 %v10938_v20  ;;  %7761 = vmatprep.subr.bf16.mxu1 %v10941_v21  ;;  %v6971_v20 = vrot.slane %v6954_v12, %v11488_v44 }
 0x5c7   :  { %7680 = vmatpush1.bf16.msra.mxu0 %v10936_v14  ;;  %7762 = vmatpush1.bf16.msra.mxu1 %v10939_v23 }
 0x5c8   :  { %7681 = vmatprep.subr.bf16.mxu0 %v10944_v24  ;;  %7763 = vmatprep.subr.bf16.mxu1 %v10947_v17 }
 0x5cb   :  { %7682 = vmatpush1.bf16.msra.mxu0 %v10942_v26  ;;  %7764 = vmatpush1.bf16.msra.mxu1 %v10945_v27 }
 0x5cc   :  { %7683 = vmatprep.subr.bf16.mxu0 %v10950_v19  ;;  %7765 = vmatprep.subr.bf16.mxu1 %v10953_v29 }
 0x5cf   :  { %7684 = vmatpush1.bf16.msra.mxu0 %v10948_v30  ;;  %7766 = vmatpush1.bf16.msra.mxu1 %v10951_v22 }
 0x5d0   :  { %7685 = vmatprep.subr.bf16.mxu0 %v10956_v33  ;;  %7767 = vmatprep.subr.bf16.mxu1 %v10959_v34 }
 0x5d3   :  { %7686 = vmatpush1.bf16.msra.mxu0 %v10954_v35  ;;  %7768 = vmatpush1.bf16.msra.mxu1 %v10957_v36 }
 0x5d4   :  { %7687 = vmatprep.subr.bf16.mxu0 %v10962_v38  ;;  %7769 = vmatprep.subr.bf16.mxu1 %v10965_v39  ;;  %v9199_v39 = vld [vmem:[#allocation16] ss:$0 sm:$0xff] }
 0x5d7   :  { %7688 = vmatpush1.bf16.msra.mxu0 %v10960_v40  ;;  %7770 = vmatpush1.bf16.msra.mxu1 %v10963_v31 }
 0x5d8   :  { %9232 = vmatprep.subr.bf16.mxu0 %v10966_v13  ;;  %9254 = vmatprep.subr.bf16.mxu1 %v10967_v46 }
 0x5da   :  { %7690 = vmatmul.mubr.bf16.vlgmr.msra.gmra.mrb[8].mxu0 %v6824_v49  ;;  %7772 = vmatmul.mubr.bf16.vlgmr.msra.gmra.mrb[8].mxu1 %v6824_v49 }
 0x5db   :  { %9233 = vmatpush3.bf16.msra.mxu0 %v10968_v28  ;;  %9255 = vmatpush3.bf16.msra.mxu1 %v10969_v47 }
 0x5dc   :  { %9234 = vmatprep.subr.bf16.mxu0 %v10970_v11  ;;  %9256 = vmatprep.subr.bf16.mxu1 %v10971_v50 }
 0x5df   :  { %9235 = vmatpush3.bf16.msra.mxu0 %v10972_v51  ;;  %9257 = vmatpush3.bf16.msra.mxu1 %v10973_v52 }
 0x5e0   :  { %9236 = vmatprep.subr.bf16.mxu0 %v10974_v53  ;;  %9258 = vmatprep.subr.bf16.mxu1 %v10975_v54 }
 0x5e3   :  { %9237 = vmatpush3.bf16.msra.mxu0 %v10976_v55  ;;  %9259 = vmatpush3.bf16.msra.mxu1 %v10977_v57 }
 0x5e4   :  { %9238 = vmatprep.subr.bf16.mxu0 %v10978_v58  ;;  %9260 = vmatprep.subr.bf16.mxu1 %v10979_v59 }
 0x5e7   :  { %9239 = vmatpush3.bf16.msra.mxu0 %v10980_v60  ;;  %9261 = vmatpush3.bf16.msra.mxu1 %v10981_v61 }
 0x5e8   :  { %9240 = vmatprep.subr.bf16.mxu0 %v10982_v62  ;;  %9262 = vmatprep.subr.bf16.mxu1 %v10983_v63 }
 0x5eb   :  { %9241 = vmatpush3.bf16.msra.mxu0 %v10984_v0  ;;  %9263 = vmatpush3.bf16.msra.mxu1 %v10985_v41 }
 0x5ec   :  { %9242 = vmatprep.subr.bf16.mxu0 %v10986_v1  ;;  %9264 = vmatprep.subr.bf16.mxu1 %v10987_v2 }
 0x5ef   :  { %9243 = vmatpush3.bf16.msra.mxu0 %v10988_v3  ;;  %9265 = vmatpush3.bf16.msra.mxu1 %v10989_v4 }
 0x5f0   :  { %9244 = vmatprep.subr.bf16.mxu0 %v10990_v5  ;;  %9266 = vmatprep.subr.bf16.mxu1 %v10991_v6 }
 0x5f3   :  { %9245 = vmatpush3.bf16.msra.mxu0 %v10992_v43  ;;  %9267 = vmatpush3.bf16.msra.mxu1 %v10993_v7 }
 0x5f4   :  { %9246 = vmatprep.subr.bf16.mxu0 %v10994_v8  ;;  %9268 = vmatprep.subr.bf16.mxu1 %v10995_v9 }
 0x5f7   :  { %9247 = vmatpush3.bf16.msra.mxu0 %v10996_v10  ;;  %9269 = vmatpush3.bf16.msra.mxu1 %v10997_v48 }
 0x6ad   :  { %v7691_v21 = vpop.f32.mrb[8].mxu0  ;;  %v7773_v14 = vpop.f32.mrb[8].mxu1 }
 0x6ae   :  { %v9284_v23 = vadd.f32 %v7691_v21, %v6959_v15  ;;  %v9286_v24 = vadd.f32 %v7773_v14, %v6967_v16  ;;  %v7693_v17 = vpop.f32.mrb[9].mxu0  ;;  %v7775_v26 = vpop.f32.mrb[9].mxu1 }
 0x6af   :  { %v9285_v27 = vadd.f32 %v7693_v17, %v6963_v18  ;;  %v9287_v19 = vadd.f32 %v7775_v26, %v6971_v20  ;;  %v7695_v29 = vpop.f32.mrb[10].mxu0  ;;  %v7777_v30 = vpop.f32.mrb[10].mxu1 }
 0x6b0   :  { %v7780_v22 = vmax.f32 %v9284_v23, 0.0  ;;  %v7782_v32 = vmax.f32 %v9286_v24, 0.0  ;;  %v7696_v33 = vpop.f32.mrb[11].mxu0  ;;  %v7778_v42 = vpop.f32.mrb[11].mxu1 }
 0x6b1   :  { %v7781_v34 = vmax.f32 %v9285_v27, 0.0  ;;  %v7783_v56 = vmax.f32 %v9287_v19, 0.0 }
 0x6b2   :  { %v7784_v36 = vpack.c.bf16 %v7780_v22, %v7780_v22  ;;  %v7786_v44 = vpack.c.bf16 %v7782_v32, %v7782_v32 }
 0x6b3   :  { %v7785_v35 = vpack.c.bf16 %v7781_v34, %v7781_v34  ;;  %v7787_v25 = vpack.c.bf16 %v7783_v56, %v7783_v56 }
 0x6b5   :  { %8083 = vmatprep.mubr.bf16.mxu0 %v7785_v35  ;;  %8123 = vmatprep.mubr.bf16.mxu1 %v7787_v25 }
 0x6b6   :  { %8084 = vmatmul.mubr.bf16.vlgmr.msra.gmra.mrb[12].mxu0 %v7784_v36  ;;  %8124 = vmatmul.mubr.bf16.vlgmr.msra.gmra.mrb[12].mxu1 %v7786_v44 }
 0x789   :  { %v9248_v37 = vpop.f32.mrb[12].mxu0  ;;  %v9270_v38 = vpop.f32.mrb[12].mxu1 }
 0x78a   :  { %v9249_v40 = vpop.f32.mrb[13].mxu0  ;;  %v9271_v31 = vpop.f32.mrb[13].mxu1 }
 0x78b   :  { %v9250_v45 = vadd.f32 %v9249_v40, %v9248_v37  ;;  %v9272_v13 = vadd.f32 %v9271_v31, %v9270_v38  ;;  %v9251_v46 = vpop.f32.mrb[14].mxu0  ;;  %v9273_v28 = vpop.f32.mrb[14].mxu1 }
 0x78c   :  { %v9252_v47 = vpop.f32.mrb[15].mxu0  ;;  %v9274_v49 = vpop.f32.mrb[15].mxu1 }
 0x78d   :  { %v8086_v11 = vadd.f32 %v9250_v45, %v9199_v39 }
 0x78f   :  { %v8126_v50 = vadd.f32 %v9272_v13, %v8086_v11 }
 0x791   :  { %8131 = vst [vmem:[#allocation17] sm:$0xff] %v8126_v50 }
 0x792   :  { %11207 = shalt.err (!%p11204_p6)
}
 0x793   :  { %s11208_s18 = scalar_lea.hbm %s11542_s9, 128 }
 0x794   :  { %p11209_p7 = scmp.ne.s32.totalorder %s11542_s9, %s11208_s18  ;;  %p11212_p8 = scmp.lt.u32.totalorder %s11208_s18, %s11542_s9 }
 0x796   :  { %p11214_p9 = pnand %p11212_p8, %p11209_p7 }
 0x798   :  { %11217 = shalt.err (!%p11214_p9)
}
 0x799   :  { %8141 = dma.vmem_to_hbm [thread:$0]  %s8139_s25, 128, %s11542_s9, [#allocation4]  }
 0x79a   :  { %11228 = dma.done.wait [#allocation4], 128  }
 0x79b   :  { %11229 = vsyncadd [#allocation4], 4294967168 }
 0x79c   :  { %8145 = vsyncpa [#allocation3], 1 }
 0x79d   :  { %8146 = vsyncpa [#allocation6], 1 }
 0x79e   :  { %8147 = vsyncpa [#allocation9], 1 }
 0x79f   :  { %8148 = vsyncpa [#allocation12], 1 }
 0x7a0   :  { %8149 = vsyncpa [#allocation15], 1 }
 0x7a1   :  { %8150 = vsyncpa [#allocation4], 1 }

// kernel: tpu_custom_call.1
= control target key start
LH: loop header
LB: loop body
LE: loop exit
PB: predicated region body
PF: predicated region fallthrough
CT: control target
= control target key end

     0   :  { %14 = vsyncpa [#allocation3], 0  ;;  %s11533_s0 = inlined_call_operand.hbm [shape: bf16[8,3072], index: 0, kind: input, shape index: {}]   ;;  %s11534_s1 = inlined_call_operand.hbm [shape: bf16[3072,512], index: 1, kind: input, shape index: {}]   ;;  %s11535_s2 = inlined_call_operand.hbm [shape: f32[1,512], index: 2, kind: input, shape index: {}]   ;;  %s11536_s3 = inlined_call_operand.hbm [shape: bf16[512,512], index: 3, kind: input, shape index: {}]   ;;  %s11537_s4 = inlined_call_operand.hbm [shape: f32[1,512], index: 4, kind: input, shape index: {}]   ;;  %s11538_s5 = inlined_call_operand.hbm [shape: bf16[512,512], index: 5, kind: input, shape index: {}]   ;;  %s11539_s6 = inlined_call_operand.hbm [shape: f32[1,512], index: 6, kind: input, shape index: {}]   ;;  %s11540_s7 = inlined_call_operand.hbm [shape: bf16[512,128], index: 7, kind: input, shape index: {}]   ;;  %s11541_s8 = inlined_call_operand.hbm [shape: f32[1,128], index: 8, kind: input, shape index: {}]   ;;  %s11542_s9 = inlined_call_operand.hbm [shape: f32[8,128], index: 9, kind: output, shape index: {}]  }
   0x1   :  { %15 = vsyncpa [#allocation6], 0 }
   0x2   :  { %16 = vsyncpa [#allocation9], 0 }
   0x3   :  { %17 = vsyncpa [#allocation12], 0 }
   0x4   :  { %18 = vsyncpa [#allocation15], 0 }
   0x5   :  { %19 = vsyncpa [#allocation4], 0  ;;  %s11230_s30 = smov [#allocation5]   ;;  %s10998_s13 = scalar_lea.hbm %s11534_s1, 98304 }
   0x6   :  { %s35_s10 = sshll.u32 %s11230_s30, 4  ;;  %p10999_p0 = scmp.ne.s32.totalorder %s11534_s1, %s10998_s13  ;;  %s36_s10 = int_to_ptr.vmem [resolvable:$true] %s35_s10 }
   0x7   :  { %p11002_p1 = scmp.lt.u32.totalorder %s10998_s13, %s11534_s1 }
   0x9   :  { %p11004_p2 = pnand %p11002_p1, %p10999_p0 }
   0xb   :  { %11007 = shalt.err (!%p11004_p2)
}
   0xc   :  { %s11008_s18 = scalar_lea.vmem %s36_s10, 98304  ;;  %p11013_p4 = scmp.lt.s32.totalorder %s36_s10, %s36_s10 }
   0xd   :  { %p11009_p3 = scmp.ne.s32.totalorder %s36_s10, %s11008_s18  ;;  %p11014_p5 = scmp.lt.s32.totalorder %s11008_s18, %s11008_s18 }
   0xf   :  { %p11015_p6 = por %p11014_p5, %p11013_p4 }
  0x11   :  { %p11016_p7 = pnand %p11015_p6, %p11009_p3 }
  0x13   :  { %11019 = shalt.err (!%p11016_p7)
}
  0x14   :  { %s11231_s19 = smov 256   ;;  %s11232_s20 = smov 16  }
  0x15   :  { %41 = dma.hbm_to_vmem [thread:$0]  %s11534_s1, 98304, %s36_s10, [#allocation6], %s11231_s19, %s11231_s19, %s11232_s20  }
  0x16   :  { %s11233_s23 = smov [#allocation8]   ;;  %s11234_s25 = smov [#allocation11]  }
  0x17   :  { %s57_s24 = sshll.u32 %s11233_s23, 4  ;;  %s79_s26 = sshll.u32 %s11234_s25, 4  ;;  %s58_s24 = int_to_ptr.vmem [resolvable:$true] %s57_s24  ;;  %s80_s26 = int_to_ptr.vmem [resolvable:$true] %s79_s26 }
  0x18   :  { %s11020_s29 = scalar_lea.hbm %s11536_s3, 16384 }
  0x19   :  { %p11021_p8 = scmp.ne.s32.totalorder %s11536_s3, %s11020_s29  ;;  %p11024_p9 = scmp.lt.u32.totalorder %s11020_s29, %s11536_s3 }
  0x1b   :  { %p11026_p10 = pnand %p11024_p9, %p11021_p8 }
  0x1d   :  { %11029 = shalt.err (!%p11026_p10)
}
  0x1e   :  { %s11030_s1 = scalar_lea.vmem %s58_s24, 16384  ;;  %p11035_p12 = scmp.lt.s32.totalorder %s58_s24, %s58_s24 }
  0x1f   :  { %p11031_p11 = scmp.ne.s32.totalorder %s58_s24, %s11030_s1  ;;  %p11036_p13 = scmp.lt.s32.totalorder %s11030_s1, %s11030_s1 }
  0x21   :  { %p11037_p0 = por %p11036_p13, %p11035_p12 }
  0x23   :  { %p11038_p1 = pnand %p11037_p0, %p11031_p11 }
  0x25   :  { %11041 = shalt.err (!%p11038_p1)
}
  0x26   :  { %63 = dma.hbm_to_vmem [thread:$0]  %s11536_s3, 16384, %s58_s24, [#allocation9], %s11231_s19, %s11231_s19, %s11232_s20  }
  0x27   :  { %s11042_s17 = scalar_lea.hbm %s11538_s5, 16384 }
  0x28   :  { %p11043_p2 = scmp.ne.s32.totalorder %s11538_s5, %s11042_s17  ;;  %p11046_p3 = scmp.lt.u32.totalorder %s11042_s17, %s11538_s5 }
  0x2a   :  { %p11048_p4 = pnand %p11046_p3, %p11043_p2 }
  0x2c   :  { %11051 = shalt.err (!%p11048_p4)
}
  0x2d   :  { %s11052_s25 = scalar_lea.vmem %s80_s26, 16384  ;;  %p11057_p6 = scmp.lt.s32.totalorder %s80_s26, %s80_s26 }
  0x2e   :  { %p11053_p5 = scmp.ne.s32.totalorder %s80_s26, %s11052_s25  ;;  %p11058_p7 = scmp.lt.s32.totalorder %s11052_s25, %s11052_s25 }
  0x30   :  { %p11059_p8 = por %p11058_p7, %p11057_p6 }
  0x32   :  { %p11060_p9 = pnand %p11059_p8, %p11053_p5 }
  0x34   :  { %11063 = shalt.err (!%p11060_p9)
}
  0x35   :  { %85 = dma.hbm_to_vmem [thread:$0]  %s11538_s5, 16384, %s80_s26, [#allocation12], %s11231_s19, %s11231_s19, %s11232_s20  }
  0x36   :  { %s11235_s27 = smov [#allocation14]   ;;  %s11064_s11 = scalar_lea.hbm %s11540_s7, 4096 }
  0x37   :  { %s101_s28 = sshll.u32 %s11235_s27, 4  ;;  %p11065_p10 = scmp.ne.s32.totalorder %s11540_s7, %s11064_s11  ;;  %s102_s28 = int_to_ptr.vmem [resolvable:$true] %s101_s28 }
  0x38   :  { %p11068_p11 = scmp.lt.u32.totalorder %s11064_s11, %s11540_s7 }
  0x3a   :  { %p11070_p12 = pnand %p11068_p11, %p11065_p10 }
  0x3c   :  { %11073 = shalt.err (!%p11070_p12)
}
  0x3d   :  { %s11074_s14 = scalar_lea.vmem %s102_s28, 4096  ;;  %p11079_p0 = scmp.lt.s32.totalorder %s102_s28, %s102_s28 }
  0x3e   :  { %p11075_p13 = scmp.ne.s32.totalorder %s102_s28, %s11074_s14  ;;  %p11080_p1 = scmp.lt.s32.totalorder %s11074_s14, %s11074_s14 }
  0x40   :  { %p11081_p2 = por %p11080_p1, %p11079_p0 }
  0x42   :  { %p11082_p3 = pnand %p11081_p2, %p11075_p13 }
  0x44   :  { %11085 = shalt.err (!%p11082_p3)
}
  0x45   :  { %s11236_s5 = smov 64   ;;  %s11237_s19 = smov 4  }
  0x46   :  { %107 = dma.hbm_to_vmem [thread:$0]  %s11540_s7, 4096, %s102_s28, [#allocation15], %s11236_s5, %s11236_s5, %s11237_s19  }
  0x47   :  { %s11238_s15 = smov [#allocation2]   ;;  %s11239_s17 = smov [#allocation7]  }
  0x48   :  { %s26_s16 = sshll.u32 %s11238_s15, 4  ;;  %s48_s18 = sshll.u32 %s11239_s17, 4  ;;  %s27_s16 = int_to_ptr.vmem [resolvable:$true] %s26_s16  ;;  %s49_s18 = int_to_ptr.vmem [resolvable:$true] %s48_s18 }
  0x49   :  { %s11086_s23 = scalar_lea.hbm %s11533_s0, 1536 }
  0x4a   :  { %p11087_p4 = scmp.ne.s32.totalorder %s11533_s0, %s11086_s23  ;;  %p11090_p5 = scmp.lt.u32.totalorder %s11086_s23, %s11533_s0 }
  0x4c   :  { %p11092_p6 = pnand %p11090_p5, %p11087_p4 }
  0x4e   :  { %11095 = shalt.err (!%p11092_p6)
}
  0x4f   :  { %s11096_s7 = scalar_lea.vmem %s27_s16, 1536  ;;  %p11101_p8 = scmp.lt.s32.totalorder %s27_s16, %s27_s16 }
  0x50   :  { %p11097_p7 = scmp.ne.s32.totalorder %s27_s16, %s11096_s7  ;;  %p11102_p9 = scmp.lt.s32.totalorder %s11096_s7, %s11096_s7 }
  0x52   :  { %p11103_p10 = por %p11102_p9, %p11101_p8 }
  0x54   :  { %p11104_p11 = pnand %p11103_p10, %p11097_p7 }
  0x56   :  { %11107 = shalt.err (!%p11104_p11)
}
  0x57   :  { %29 = dma.hbm_to_vmem [thread:$0]  %s11533_s0, 1536, %s27_s16, [#allocation3]  }
  0x58   :  { %s11108_s12 = scalar_lea.hbm %s11535_s2, 64 }
  0x59   :  { %p11109_p12 = scmp.ne.s32.totalorder %s11535_s2, %s11108_s12  ;;  %p11112_p13 = scmp.lt.u32.totalorder %s11108_s12, %s11535_s2 }
  0x5b   :  { %p11114_p0 = pnand %p11112_p13, %p11109_p12 }
  0x5d   :  { %11117 = shalt.err (!%p11114_p0)
}
  0x5e   :  { %s11118_s5 = scalar_lea.vmem %s49_s18, 64  ;;  %p11123_p2 = scmp.lt.s32.totalorder %s49_s18, %s49_s18 }
  0x5f   :  { %p11119_p1 = scmp.ne.s32.totalorder %s49_s18, %s11118_s5  ;;  %p11124_p3 = scmp.lt.s32.totalorder %s11118_s5, %s11118_s5 }
  0x61   :  { %p11125_p4 = por %p11124_p3, %p11123_p2 }
  0x63   :  { %p11126_p5 = pnand %p11125_p4, %p11119_p1 }
  0x65   :  { %11129 = shalt.err (!%p11126_p5)
}
  0x66   :  { %51 = dma.hbm_to_vmem [thread:$0]  %s11535_s2, 64, %s49_s18, [#allocation6]  }
  0x67   :  { %s11240_s20 = smov [#allocation10]   ;;  %s11241_s15 = smov [#allocation13]  }
  0x68   :  { %s70_s26 = sshll.u32 %s11240_s20, 4  ;;  %s92_s16 = sshll.u32 %s11241_s15, 4  ;;  %s71_s26 = int_to_ptr.vmem [resolvable:$true] %s70_s26  ;;  %s93_s16 = int_to_ptr.vmem [resolvable:$true] %s92_s16 }
  0x69   :  { %s11130_s22 = scalar_lea.hbm %s11537_s4, 64 }
  0x6a   :  { %p11131_p6 = scmp.ne.s32.totalorder %s11537_s4, %s11130_s22  ;;  %p11134_p7 = scmp.lt.u32.totalorder %s11130_s22, %s11537_s4 }
  0x6c   :  { %p11136_p8 = pnand %p11134_p7, %p11131_p6 }
  0x6e   :  { %11139 = shalt.err (!%p11136_p8)
}
  0x6f   :  { %s11140_s2 = scalar_lea.vmem %s71_s26, 64  ;;  %p11145_p10 = scmp.lt.s32.totalorder %s71_s26, %s71_s26 }
  0x70   :  { %p11141_p9 = scmp.ne.s32.totalorder %s71_s26, %s11140_s2  ;;  %p11146_p11 = scmp.lt.s32.totalorder %s11140_s2, %s11140_s2 }
  0x72   :  { %p11147_p12 = por %p11146_p11, %p11145_p10 }
  0x74   :  { %p11148_p13 = pnand %p11147_p12, %p11141_p9 }
  0x76   :  { %11151 = shalt.err (!%p11148_p13)
}
  0x77   :  { %73 = dma.hbm_to_vmem [thread:$0]  %s11537_s4, 64, %s71_s26, [#allocation9]  }
  0x78   :  { %s11152_s29 = scalar_lea.hbm %s11539_s6, 64 }
  0x79   :  { %p11153_p0 = scmp.ne.s32.totalorder %s11539_s6, %s11152_s29  ;;  %p11156_p1 = scmp.lt.u32.totalorder %s11152_s29, %s11539_s6 }
  0x7b   :  { %p11158_p2 = pnand %p11156_p1, %p11153_p0 }
  0x7d   :  { %11161 = shalt.err (!%p11158_p2)
}
  0x7e   :  { %s11162_s1 = scalar_lea.vmem %s93_s16, 64  ;;  %p11167_p4 = scmp.lt.s32.totalorder %s93_s16, %s93_s16 }
  0x7f   :  { %p11163_p3 = scmp.ne.s32.totalorder %s93_s16, %s11162_s1  ;;  %p11168_p5 = scmp.lt.s32.totalorder %s11162_s1, %s11162_s1 }
  0x81   :  { %p11169_p6 = por %p11168_p5, %p11167_p4 }
  0x83   :  { %p11170_p7 = pnand %p11169_p6, %p11163_p3 }
  0x85   :  { %11173 = shalt.err (!%p11170_p7)
}
  0x86   :  { %95 = dma.hbm_to_vmem [thread:$0]  %s11539_s6, 64, %s93_s16, [#allocation12]  }
  0x87   :  { %s11242_s14 = smov [#allocation16]   ;;  %s11174_s20 = scalar_lea.hbm %s11541_s8, 16 }
  0x88   :  { %s114_s5 = sshll.u32 %s11242_s14, 4  ;;  %p11175_p8 = scmp.ne.s32.totalorder %s11541_s8, %s11174_s20  ;;  %s115_s5 = int_to_ptr.vmem [resolvable:$true] %s114_s5 }
  0x89   :  { %p11178_p9 = scmp.lt.u32.totalorder %s11174_s20, %s11541_s8 }
  0x8b   :  { %p11180_p10 = pnand %p11178_p9, %p11175_p8 }
  0x8d   :  { %11183 = shalt.err (!%p11180_p10)
}
  0x8e   :  { %s11184_s22 = scalar_lea.vmem %s115_s5, 16  ;;  %s11188_s6 = scalar_lea.vmem %s115_s5, 32 }
  0x8f   :  { %p11185_p11 = scmp.ne.s32.totalorder %s115_s5, %s11184_s22  ;;  %p11189_p12 = scmp.lt.s32.totalorder %s115_s5, %s115_s5 }
  0x90   :  { %p11190_p13 = scmp.lt.s32.totalorder %s11188_s6, %s11184_s22 }
  0x92   :  { %p11191_p0 = por %p11190_p13, %p11189_p12 }
  0x94   :  { %p11192_p1 = pnand %p11191_p0, %p11185_p11 }
  0x96   :  { %11195 = shalt.err (!%p11192_p1)
}
  0x97   :  { %117 = dma.hbm_to_vmem [thread:$0]  %s11541_s8, 16, %s115_s5, [#allocation15]  }
  0x98   :  { %11218 = dma.done.wait [#allocation3], 1536  }
  0x99   :  { %11219 = vsyncadd [#allocation3], 4294965760 }
  0x9a   :  { %11220 = dma.done.wait [#allocation6], 98368  }
  0x9b   :  { %11221 = vsyncadd [#allocation6], 4294868928 }
  0x9c   :  { %11222 = dma.done.wait [#allocation9], 16448  }
  0x9d   :  { %11223 = vsyncadd [#allocation9], 4294950848 }
  0x9e   :  { %11224 = dma.done.wait [#allocation12], 16448  }
  0x9f   :  { %11225 = vsyncadd [#allocation12], 4294950848 }
  0xa0   :  { %11226 = dma.done.wait [#allocation15], 4112  }
  0xa1   :  { %11227 = vsyncadd [#allocation15], 4294963184  ;;  %v9406_v0 = vld [vmem:[#allocation5 + $0x4] ss:$16 sps:$4 sm:$0xff]   ;;  %v9408_v1 = vld [vmem:[#allocation5 + $0xc] ss:$16 sps:$4 sm:$0xff]  }
  0xa2   :  { %4872 = vmatprep.subr.bf16.mxu0 %v9406_v0  ;;  %v9410_v2 = vld [vmem:[#allocation5] ss:$16 sps:$4 sm:$0xff]   ;;  %v9411_v3 = vld [vmem:[#allocation5 + $0x8] ss:$16 sps:$4 sm:$0xff]   ;;  %5364 = vmatprep.subr.bf16.mxu1 %v9408_v1  ;;  %v9412_v4 = vld [vmem:[#allocation5 + $0x24] ss:$16 sps:$4 sm:$0xff]  }
  0xa3   :  { %4873 = vmatpush1.bf16.msra.mxu0 %v9410_v2  ;;  %5365 = vmatpush1.bf16.msra.mxu1 %v9411_v3  ;;  %v9414_v5 = vld [vmem:[#allocation5 + $0x2c] ss:$16 sps:$4 sm:$0xff]   ;;  %v9416_v6 = vld [vmem:[#allocation5 + $0x20] ss:$16 sps:$4 sm:$0xff]   ;;  %v9417_v7 = vld [vmem:[#allocation5 + $0x28] ss:$16 sps:$4 sm:$0xff]  }
  0xa4   :  { %4874 = vmatprep.subr.bf16.mxu0 %v9412_v4  ;;  %5366 = vmatprep.subr.bf16.mxu1 %v9414_v5  ;;  %v9418_v8 = vld [vmem:[#allocation5 + $0x44] ss:$16 sps:$4 sm:$0xff]   ;;  %v9420_v9 = vld [vmem:[#allocation5 + $0x4c] ss:$16 sps:$4 sm:$0xff]   ;;  %v9422_v10 = vld [vmem:[#allocation5 + $0x40] ss:$16 sps:$4 sm:$0xff]  }
  0xa5   :  { %v9423_v11 = vld [vmem:[#allocation5 + $0x48] ss:$16 sps:$4 sm:$0xff]   ;;  %v9424_v12 = vld [vmem:[#allocation5 + $0x64] ss:$16 sps:$4 sm:$0xff]   ;;  %v9426_v13 = vld [vmem:[#allocation5 + $0x6c] ss:$16 sps:$4 sm:$0xff]  }
  0xa6   :  { %v9428_v14 = vld [vmem:[#allocation5 + $0x60] ss:$16 sps:$4 sm:$0xff]   ;;  %v9429_v15 = vld [vmem:[#allocation5 + $0x68] ss:$16 sps:$4 sm:$0xff]   ;;  %v9430_v16 = vld [vmem:[#allocation5 + $0x84] ss:$16 sps:$4 sm:$0xff]  }
  0xa7   :  { %4875 = vmatpush1.bf16.msra.mxu0 %v9416_v6  ;;  %5367 = vmatpush1.bf16.msra.mxu1 %v9417_v7  ;;  %v9432_v17 = vld [vmem:[#allocation5 + $0x8c] ss:$16 sps:$4 sm:$0xff]   ;;  %v9434_v18 = vld [vmem:[#allocation5 + $0x80] ss:$16 sps:$4 sm:$0xff]   ;;  %v9435_v19 = vld [vmem:[#allocation5 + $0x88] ss:$16 sps:$4 sm:$0xff]  }
  0xa8   :  { %4876 = vmatprep.subr.bf16.mxu0 %v9418_v8  ;;  %5368 = vmatprep.subr.bf16.mxu1 %v9420_v9  ;;  %v9436_v20 = vld [vmem:[#allocation5 + $0xa4] ss:$16 sps:$4 sm:$0xff]   ;;  %v9438_v21 = vld [vmem:[#allocation5 + $0xac] ss:$16 sps:$4 sm:$0xff]   ;;  %v9440_v22 = vld [vmem:[#allocation5 + $0xa0] ss:$16 sps:$4 sm:$0xff]  }
  0xa9   :  { %v9441_v23 = vld [vmem:[#allocation5 + $0xa8] ss:$16 sps:$4 sm:$0xff]   ;;  %v9442_v24 = vld [vmem:[#allocation5 + $0xc4] ss:$16 sps:$4 sm:$0xff]   ;;  %v9444_v25 = vld [vmem:[#allocation5 + $0xcc] ss:$16 sps:$4 sm:$0xff]  }
  0xaa   :  { %v9446_v26 = vld [vmem:[#allocation5 + $0xc0] ss:$16 sps:$4 sm:$0xff]   ;;  %v9447_v27 = vld [vmem:[#allocation5 + $0xc8] ss:$16 sps:$4 sm:$0xff]   ;;  %v9448_v28 = vld [vmem:[#allocation5 + $0xe4] ss:$16 sps:$4 sm:$0xff]  }
  0xab   :  { %4877 = vmatpush1.bf16.msra.mxu0 %v9422_v10  ;;  %5369 = vmatpush1.bf16.msra.mxu1 %v9423_v11  ;;  %v9450_v29 = vld [vmem:[#allocation5 + $0xec] ss:$16 sps:$4 sm:$0xff]   ;;  %v9452_v30 = vld [vmem:[#allocation5 + $0xe0] ss:$16 sps:$4 sm:$0xff]   ;;  %v9453_v31 = vld [vmem:[#allocation5 + $0xe8] ss:$16 sps:$4 sm:$0xff]  }
  0xac   :  { %4878 = vmatprep.subr.bf16.mxu0 %v9424_v12  ;;  %5370 = vmatprep.subr.bf16.mxu1 %v9426_v13  ;;  %v9454_v32 = vld [vmem:[#allocation5 + $0x104] ss:$16 sps:$4 sm:$0xff]   ;;  %v9456_v33 = vld [vmem:[#allocation5 + $0x10c] ss:$16 sps:$4 sm:$0xff]   ;;  %v9458_v34 = vld [vmem:[#allocation5 + $0x100] ss:$16 sps:$4 sm:$0xff]  }
  0xad   :  { %v9459_v35 = vld [vmem:[#allocation5 + $0x108] ss:$16 sps:$4 sm:$0xff]   ;;  %v9460_v36 = vld [vmem:[#allocation5 + $0x124] ss:$16 sps:$4 sm:$0xff]   ;;  %v9462_v37 = vld [vmem:[#allocation5 + $0x12c] ss:$16 sps:$4 sm:$0xff]  }
  0xae   :  { %v9464_v38 = vld [vmem:[#allocation5 + $0x120] ss:$16 sps:$4 sm:$0xff]   ;;  %v9465_v39 = vld [vmem:[#allocation5 + $0x128] ss:$16 sps:$4 sm:$0xff]   ;;  %v9466_v40 = vld [vmem:[#allocation5 + $0x144] ss:$16 sps:$4 sm:$0xff]  }
  0xaf   :  { %4879 = vmatpush1.bf16.msra.mxu0 %v9428_v14  ;;  %5371 = vmatpush1.bf16.msra.mxu1 %v9429_v15  ;;  %v9468_v41 = vld [vmem:[#allocation5 + $0x14c] ss:$16 sps:$4 sm:$0xff]   ;;  %v9470_v42 = vld [vmem:[#allocation5 + $0x140] ss:$16 sps:$4 sm:$0xff]   ;;  %v9471_v43 = vld [vmem:[#allocation5 + $0x148] ss:$16 sps:$4 sm:$0xff]  }
  0xb0   :  { %4880 = vmatprep.subr.bf16.mxu0 %v9430_v16  ;;  %5372 = vmatprep.subr.bf16.mxu1 %v9432_v17  ;;  %v9472_v44 = vld [vmem:[#allocation5 + $0x164] ss:$16 sps:$4 sm:$0xff]   ;;  %v9474_v45 = vld [vmem:[#allocation5 + $0x16c] ss:$16 sps:$4 sm:$0xff]   ;;  %v9476_v47 = vld [vmem:[#allocation5 + $0x160] ss:$16 sps:$4 sm:$0xff]  }
  0xb1   :  { %v146_v46 = vld [vmem:[#allocation2] sm:$0xff]  ;;  %v9477_v49 = vld [vmem:[#allocation5 + $0x168] ss:$16 sps:$4 sm:$0xff]   ;;  %v9480_v51 = vld [vmem:[#allocation5 + $0x18c] ss:$16 sps:$4 sm:$0xff]   ;;  %s11243_s8 = smov [#allocation17]  }
  0xb2   :  { %v8152_v48 = vcombine.high %v146_v46, %v146_v46  ;;  %v9478_v50 = vld [vmem:[#allocation5 + $0x184] ss:$16 sps:$4 sm:$0xff]   ;;  %v9482_v52 = vld [vmem:[#allocation5 + $0x180] ss:$16 sps:$4 sm:$0xff]   ;;  %v9483_v53 = vld [vmem:[#allocation5 + $0x188] ss:$16 sps:$4 sm:$0xff]   ;;  %v8151_v4 = vcombine.low %v146_v46, %v146_v46 }
  0xb3   :  { %4881 = vmatpush1.bf16.msra.mxu0 %v9434_v18  ;;  %5373 = vmatpush1.bf16.msra.mxu1 %v9435_v19  ;;  %v9484_v54 = vld [vmem:[#allocation5 + $0x1a4] ss:$16 sps:$4 sm:$0xff]   ;;  %v9486_v55 = vld [vmem:[#allocation5 + $0x1ac] ss:$16 sps:$4 sm:$0xff]   ;;  %v9488_v56 = vld [vmem:[#allocation5 + $0x1a0] ss:$16 sps:$4 sm:$0xff]  }
  0xb4   :  { %4882 = vmatprep.subr.bf16.mxu0 %v9436_v20  ;;  %5374 = vmatprep.subr.bf16.mxu1 %v9438_v21  ;;  %v9489_v57 = vld [vmem:[#allocation5 + $0x1a8] ss:$16 sps:$4 sm:$0xff]   ;;  %v9490_v58 = vld [vmem:[#allocation5 + $0x1c4] ss:$16 sps:$4 sm:$0xff]   ;;  %v9492_v59 = vld [vmem:[#allocation5 + $0x1cc] ss:$16 sps:$4 sm:$0xff]  }
  0xb5   :  { %4904 = vmatprep.mubr.bf16.mxu0 %v8152_v48  ;;  %5396 = vmatprep.mubr.bf16.mxu1 %v8152_v48  ;;  %v9494_v60 = vld [vmem:[#allocation5 + $0x1c0] ss:$16 sps:$4 sm:$0xff]   ;;  %v9495_v61 = vld [vmem:[#allocation5 + $0x1c8] ss:$16 sps:$4 sm:$0xff]   ;;  %v9496_v62 = vld [vmem:[#allocation5 + $0x1e4] ss:$16 sps:$4 sm:$0xff]  }
  0xb6   :  { %v9498_v63 = vld [vmem:[#allocation5 + $0x1ec] ss:$16 sps:$4 sm:$0xff]   ;;  %v9500_v0 = vld [vmem:[#allocation5 + $0x1e0] ss:$16 sps:$4 sm:$0xff]   ;;  %v9501_v1 = vld [vmem:[#allocation5 + $0x1e8] ss:$16 sps:$4 sm:$0xff]  }
  0xb7   :  { %4883 = vmatpush1.bf16.msra.mxu0 %v9440_v22  ;;  %5375 = vmatpush1.bf16.msra.mxu1 %v9441_v23  ;;  %v9506_v2 = vld [vmem:[#allocation5 + $0x204] ss:$16 sps:$4 sm:$0xff]   ;;  %v9509_v3 = vld [vmem:[#allocation5 + $0x20c] ss:$16 sps:$4 sm:$0xff]   ;;  %v9504_v5 = vld [vmem:[#allocation5 + $0x200] ss:$16 sps:$4 sm:$0xff]  }
  0xb8   :  { %4884 = vmatprep.subr.bf16.mxu0 %v9442_v24  ;;  %5376 = vmatprep.subr.bf16.mxu1 %v9444_v25  ;;  %v9507_v6 = vld [vmem:[#allocation5 + $0x208] ss:$16 sps:$4 sm:$0xff]   ;;  %v9512_v7 = vld [vmem:[#allocation5 + $0x224] ss:$16 sps:$4 sm:$0xff]   ;;  %v9515_v8 = vld [vmem:[#allocation5 + $0x22c] ss:$16 sps:$4 sm:$0xff]  }
  0xb9   :  { %v9510_v9 = vld [vmem:[#allocation5 + $0x220] ss:$16 sps:$4 sm:$0xff]   ;;  %v9513_v10 = vld [vmem:[#allocation5 + $0x228] ss:$16 sps:$4 sm:$0xff]   ;;  %v9518_v11 = vld [vmem:[#allocation5 + $0x244] ss:$16 sps:$4 sm:$0xff]  }
  0xba   :  { %v9521_v12 = vld [vmem:[#allocation5 + $0x24c] ss:$16 sps:$4 sm:$0xff]   ;;  %v9516_v13 = vld [vmem:[#allocation5 + $0x240] ss:$16 sps:$4 sm:$0xff]   ;;  %v9519_v14 = vld [vmem:[#allocation5 + $0x248] ss:$16 sps:$4 sm:$0xff]  }
  0xbb   :  { %4885 = vmatpush1.bf16.msra.mxu0 %v9446_v26  ;;  %5377 = vmatpush1.bf16.msra.mxu1 %v9447_v27  ;;  %v9524_v15 = vld [vmem:[#allocation5 + $0x264] ss:$16 sps:$4 sm:$0xff]   ;;  %v9527_v16 = vld [vmem:[#allocation5 + $0x26c] ss:$16 sps:$4 sm:$0xff]   ;;  %v9522_v17 = vld [vmem:[#allocation5 + $0x260] ss:$16 sps:$4 sm:$0xff]  }
  0xbc   :  { %4886 = vmatprep.subr.bf16.mxu0 %v9448_v28  ;;  %5378 = vmatprep.subr.bf16.mxu1 %v9450_v29  ;;  %v9525_v18 = vld [vmem:[#allocation5 + $0x268] ss:$16 sps:$4 sm:$0xff]   ;;  %v9530_v19 = vld [vmem:[#allocation5 + $0x284] ss:$16 sps:$4 sm:$0xff]   ;;  %v9533_v20 = vld [vmem:[#allocation5 + $0x28c] ss:$16 sps:$4 sm:$0xff]  }
  0xbd   :  { %v9528_v21 = vld [vmem:[#allocation5 + $0x280] ss:$16 sps:$4 sm:$0xff]   ;;  %v9531_v22 = vld [vmem:[#allocation5 + $0x288] ss:$16 sps:$4 sm:$0xff]   ;;  %v9536_v23 = vld [vmem:[#allocation5 + $0x2a4] ss:$16 sps:$4 sm:$0xff]  }
  0xbe   :  { %v9539_v24 = vld [vmem:[#allocation5 + $0x2ac] ss:$16 sps:$4 sm:$0xff]   ;;  %v9534_v25 = vld [vmem:[#allocation5 + $0x2a0] ss:$16 sps:$4 sm:$0xff]   ;;  %v9537_v26 = vld [vmem:[#allocation5 + $0x2a8] ss:$16 sps:$4 sm:$0xff]  }
  0xbf   :  { %4887 = vmatpush1.bf16.msra.mxu0 %v9452_v30  ;;  %5379 = vmatpush1.bf16.msra.mxu1 %v9453_v31  ;;  %v9542_v27 = vld [vmem:[#allocation5 + $0x2c4] ss:$16 sps:$4 sm:$0xff]   ;;  %v9545_v28 = vld [vmem:[#allocation5 + $0x2cc] ss:$16 sps:$4 sm:$0xff]   ;;  %v9540_v31 = vld [vmem:[#allocation5 + $0x2c0] ss:$16 sps:$4 sm:$0xff]  }
  0xc0   :  { %4888 = vmatprep.subr.bf16.mxu0 %v9454_v32  ;;  %5380 = vmatprep.subr.bf16.mxu1 %v9456_v33  ;;  %v11411_v29 = vld [vmem:[#allocation2 + $0x8] sm:$0xff]  ;;  %v9548_v33 = vld [vmem:[#allocation5 + $0x2e4] ss:$16 sps:$4 sm:$0xff]   ;;  %s8138_s25 = sshll.u32 %s11243_s8, 4  ;;  %s8139_s25 = int_to_ptr.vmem [resolvable:$true] %s8138_s25 }
  0xc1   :  { %v8154_v30 = vcombine.high %v11411_v29, %v11411_v29  ;;  %v9543_v32 = vld [vmem:[#allocation5 + $0x2c8] ss:$16 sps:$4 sm:$0xff]   ;;  %v9569_v46 = vld [vmem:[#allocation5 + $0x34c] ss:$16 sps:$4 sm:$0xff]   ;;  %s11196_s3 = scalar_lea.vmem %s8139_s25, 128  ;;  %p11201_p3 = scmp.lt.s32.totalorder %s8139_s25, %s8139_s25 }
  0xc2   :  { %v9567_v48 = vld [vmem:[#allocation5 + $0x348] ss:$16 sps:$4 sm:$0xff]   ;;  %p11197_p2 = scmp.ne.s32.totalorder %s8139_s25, %s11196_s3  ;;  %p11202_p4 = scmp.lt.s32.totalorder %s11196_s3, %s11196_s3 }
  0xc3   :  { %4889 = vmatpush1.bf16.msra.mxu0 %v9458_v34  ;;  %5381 = vmatpush1.bf16.msra.mxu1 %v9459_v35  ;;  %v9551_v34 = vld [vmem:[#allocation5 + $0x2ec] ss:$16 sps:$4 sm:$0xff]   ;;  %v9546_v35 = vld [vmem:[#allocation5 + $0x2e0] ss:$16 sps:$4 sm:$0xff]  }
  0xc4   :  { %4890 = vmatprep.subr.bf16.mxu0 %v9460_v36  ;;  %5382 = vmatprep.subr.bf16.mxu1 %v9462_v37  ;;  %v9549_v36 = vld [vmem:[#allocation5 + $0x2e8] ss:$16 sps:$4 sm:$0xff]   ;;  %v9554_v37 = vld [vmem:[#allocation5 + $0x304] ss:$16 sps:$4 sm:$0xff]   ;;  %p11203_p5 = por %p11202_p4, %p11201_p3 }
  0xc6   :  { %p11204_p6 = pnand %p11203_p5, %p11197_p2 }
  0xc7   :  { %4891 = vmatpush1.bf16.msra.mxu0 %v9464_v38  ;;  %5383 = vmatpush1.bf16.msra.mxu1 %v9465_v39  ;;  %v9557_v38 = vld [vmem:[#allocation5 + $0x30c] ss:$16 sps:$4 sm:$0xff]   ;;  %v9552_v39 = vld [vmem:[#allocation5 + $0x300] ss:$16 sps:$4 sm:$0xff]  }
  0xc8   :  { %4892 = vmatprep.subr.bf16.mxu0 %v9466_v40  ;;  %5384 = vmatprep.subr.bf16.mxu1 %v9468_v41  ;;  %v9555_v40 = vld [vmem:[#allocation5 + $0x308] ss:$16 sps:$4 sm:$0xff]   ;;  %v9560_v41 = vld [vmem:[#allocation5 + $0x324] ss:$16 sps:$4 sm:$0xff]  }
  0xcb   :  { %4893 = vmatpush1.bf16.msra.mxu0 %v9470_v42  ;;  %5385 = vmatpush1.bf16.msra.mxu1 %v9471_v43  ;;  %v9563_v42 = vld [vmem:[#allocation5 + $0x32c] ss:$16 sps:$4 sm:$0xff]   ;;  %v9558_v43 = vld [vmem:[#allocation5 + $0x320] ss:$16 sps:$4 sm:$0xff]  }
  0xcc   :  { %4894 = vmatprep.subr.bf16.mxu0 %v9472_v44  ;;  %5386 = vmatprep.subr.bf16.mxu1 %v9474_v45  ;;  %v9561_v44 = vld [vmem:[#allocation5 + $0x328] ss:$16 sps:$4 sm:$0xff]   ;;  %v9566_v45 = vld [vmem:[#allocation5 + $0x344] ss:$16 sps:$4 sm:$0xff]  }
  0xcf   :  { %4895 = vmatpush1.bf16.msra.mxu0 %v9476_v47  ;;  %5387 = vmatpush1.bf16.msra.mxu1 %v9477_v49  ;;  %v9564_v47 = vld [vmem:[#allocation5 + $0x340] ss:$16 sps:$4 sm:$0xff]   ;;  %v9572_v49 = vld [vmem:[#allocation5 + $0x364] ss:$16 sps:$4 sm:$0xff]  }
  0xd0   :  { %4896 = vmatprep.subr.bf16.mxu0 %v9478_v50  ;;  %5388 = vmatprep.subr.bf16.mxu1 %v9480_v51  ;;  %v9575_v50 = vld [vmem:[#allocation5 + $0x36c] ss:$16 sps:$4 sm:$0xff]   ;;  %v9570_v51 = vld [vmem:[#allocation5 + $0x360] ss:$16 sps:$4 sm:$0xff]  }
  0xd3   :  { %4897 = vmatpush1.bf16.msra.mxu0 %v9482_v52  ;;  %5389 = vmatpush1.bf16.msra.mxu1 %v9483_v53  ;;  %v9573_v52 = vld [vmem:[#allocation5 + $0x368] ss:$16 sps:$4 sm:$0xff]   ;;  %v9578_v53 = vld [vmem:[#allocation5 + $0x384] ss:$16 sps:$4 sm:$0xff]  }
  0xd4   :  { %4898 = vmatprep.subr.bf16.mxu0 %v9484_v54  ;;  %5390 = vmatprep.subr.bf16.mxu1 %v9486_v55  ;;  %v9581_v54 = vld [vmem:[#allocation5 + $0x38c] ss:$16 sps:$4 sm:$0xff]   ;;  %v9576_v55 = vld [vmem:[#allocation5 + $0x380] ss:$16 sps:$4 sm:$0xff]  }
  0xd7   :  { %4899 = vmatpush1.bf16.msra.mxu0 %v9488_v56  ;;  %5391 = vmatpush1.bf16.msra.mxu1 %v9489_v57  ;;  %v9579_v56 = vld [vmem:[#allocation5 + $0x388] ss:$16 sps:$4 sm:$0xff]   ;;  %v9584_v57 = vld [vmem:[#allocation5 + $0x3a4] ss:$16 sps:$4 sm:$0xff]  }
  0xd8   :  { %4900 = vmatprep.subr.bf16.mxu0 %v9490_v58  ;;  %5392 = vmatprep.subr.bf16.mxu1 %v9492_v59  ;;  %v9587_v58 = vld [vmem:[#allocation5 + $0x3ac] ss:$16 sps:$4 sm:$0xff]   ;;  %v9582_v59 = vld [vmem:[#allocation5 + $0x3a0] ss:$16 sps:$4 sm:$0xff]  }
  0xdb   :  { %4901 = vmatpush1.bf16.msra.mxu0 %v9494_v60  ;;  %5393 = vmatpush1.bf16.msra.mxu1 %v9495_v61  ;;  %v9585_v60 = vld [vmem:[#allocation5 + $0x3a8] ss:$16 sps:$4 sm:$0xff]   ;;  %v9590_v61 = vld [vmem:[#allocation5 + $0x3c4] ss:$16 sps:$4 sm:$0xff]  }
  0xdc   :  { %4902 = vmatprep.subr.bf16.mxu0 %v9496_v62  ;;  %5394 = vmatprep.subr.bf16.mxu1 %v9498_v63  ;;  %v9593_v62 = vld [vmem:[#allocation5 + $0x3cc] ss:$16 sps:$4 sm:$0xff]   ;;  %v9588_v63 = vld [vmem:[#allocation5 + $0x3c0] ss:$16 sps:$4 sm:$0xff]  }
  0xdf   :  { %4903 = vmatpush1.bf16.msra.mxu0 %v9500_v0  ;;  %5395 = vmatpush1.bf16.msra.mxu1 %v9501_v1  ;;  %v9591_v0 = vld [vmem:[#allocation5 + $0x3c8] ss:$16 sps:$4 sm:$0xff]   ;;  %v9596_v1 = vld [vmem:[#allocation5 + $0x3e4] ss:$16 sps:$4 sm:$0xff]  }
  0xe0   :  { %4913 = vmatprep.subr.bf16.mxu0 %v9506_v2  ;;  %5405 = vmatprep.subr.bf16.mxu1 %v9509_v3  ;;  %v9599_v2 = vld [vmem:[#allocation5 + $0x3ec] ss:$16 sps:$4 sm:$0xff]   ;;  %v9594_v3 = vld [vmem:[#allocation5 + $0x3e0] ss:$16 sps:$4 sm:$0xff]  }
  0xe2   :  { %4905 = vmatmul.mubr.bf16.vlgmr.msra.gmra.mrb[0].mxu0 %v8151_v4  ;;  %5397 = vmatmul.mubr.bf16.vlgmr.msra.gmra.mrb[0].mxu1 %v8151_v4  ;;  %v9597_v4 = vld [vmem:[#allocation5 + $0x3e8] ss:$16 sps:$4 sm:$0xff]  }
  0xe3   :  { %4914 = vmatpush1.bf16.msra.mxu0 %v9504_v5  ;;  %5406 = vmatpush1.bf16.msra.mxu1 %v9507_v6  ;;  %v9604_v5 = vld [vmem:[#allocation5 + $0x404] ss:$16 sps:$4 sm:$0xff]   ;;  %v9607_v6 = vld [vmem:[#allocation5 + $0x40c] ss:$16 sps:$4 sm:$0xff]  }
  0xe4   :  { %4915 = vmatprep.subr.bf16.mxu0 %v9512_v7  ;;  %5407 = vmatprep.subr.bf16.mxu1 %v9515_v8  ;;  %v8153_v7 = vcombine.low %v11411_v29, %v11411_v29  ;;  %v9602_v8 = vld [vmem:[#allocation5 + $0x400] ss:$16 sps:$4 sm:$0xff]   ;;  %v9637_v29 = vld [vmem:[#allocation5 + $0x4ac] ss:$16 sps:$4 sm:$0xff]  }
  0xe5   :  { %4945 = vmatprep.mubr.bf16.mxu0 %v8154_v30  ;;  %5437 = vmatprep.mubr.bf16.mxu1 %v8154_v30  ;;  %v9632_v30 = vld [vmem:[#allocation5 + $0x4a0] ss:$16 sps:$4 sm:$0xff]  }
  0xe7   :  { %4916 = vmatpush1.bf16.msra.mxu0 %v9510_v9  ;;  %5408 = vmatpush1.bf16.msra.mxu1 %v9513_v10  ;;  %v9605_v9 = vld [vmem:[#allocation5 + $0x408] ss:$16 sps:$4 sm:$0xff]   ;;  %v9610_v10 = vld [vmem:[#allocation5 + $0x424] ss:$16 sps:$4 sm:$0xff]  }
  0xe8   :  { %4917 = vmatprep.subr.bf16.mxu0 %v9518_v11  ;;  %5409 = vmatprep.subr.bf16.mxu1 %v9521_v12  ;;  %v11417_v11 = vld [vmem:[#allocation2 + $0x10] sm:$0xff]  ;;  %v9613_v12 = vld [vmem:[#allocation5 + $0x42c] ss:$16 sps:$4 sm:$0xff]  }
  0xeb   :  { %4918 = vmatpush1.bf16.msra.mxu0 %v9516_v13  ;;  %5410 = vmatpush1.bf16.msra.mxu1 %v9519_v14  ;;  %v8156_v13 = vcombine.high %v11417_v11, %v11417_v11  ;;  %v9608_v14 = vld [vmem:[#allocation5 + $0x420] ss:$16 sps:$4 sm:$0xff]  }
  0xec   :  { %4919 = vmatprep.subr.bf16.mxu0 %v9524_v15  ;;  %5411 = vmatprep.subr.bf16.mxu1 %v9527_v16  ;;  %v9611_v15 = vld [vmem:[#allocation5 + $0x428] ss:$16 sps:$4 sm:$0xff]   ;;  %v9616_v16 = vld [vmem:[#allocation5 + $0x444] ss:$16 sps:$4 sm:$0xff]  }
  0xef   :  { %4920 = vmatpush1.bf16.msra.mxu0 %v9522_v17  ;;  %5412 = vmatpush1.bf16.msra.mxu1 %v9525_v18  ;;  %v9619_v17 = vld [vmem:[#allocation5 + $0x44c] ss:$16 sps:$4 sm:$0xff]   ;;  %v9614_v18 = vld [vmem:[#allocation5 + $0x440] ss:$16 sps:$4 sm:$0xff]  }
  0xf0   :  { %4921 = vmatprep.subr.bf16.mxu0 %v9530_v19  ;;  %5413 = vmatprep.subr.bf16.mxu1 %v9533_v20  ;;  %v9617_v19 = vld [vmem:[#allocation5 + $0x448] ss:$16 sps:$4 sm:$0xff]   ;;  %v9622_v20 = vld [vmem:[#allocation5 + $0x464] ss:$16 sps:$4 sm:$0xff]  }
  0xf3   :  { %4922 = vmatpush1.bf16.msra.mxu0 %v9528_v21  ;;  %5414 = vmatpush1.bf16.msra.mxu1 %v9531_v22  ;;  %v9625_v21 = vld [vmem:[#allocation5 + $0x46c] ss:$16 sps:$4 sm:$0xff]   ;;  %v9620_v22 = vld [vmem:[#allocation5 + $0x460] ss:$16 sps:$4 sm:$0xff]  }
  0xf4   :  { %4923 = vmatprep.subr.bf16.mxu0 %v9536_v23  ;;  %5415 = vmatprep.subr.bf16.mxu1 %v9539_v24  ;;  %v9623_v23 = vld [vmem:[#allocation5 + $0x468] ss:$16 sps:$4 sm:$0xff]   ;;  %v9628_v24 = vld [vmem:[#allocation5 + $0x484] ss:$16 sps:$4 sm:$0xff]  }
  0xf7   :  { %4924 = vmatpush1.bf16.msra.mxu0 %v9534_v25  ;;  %5416 = vmatpush1.bf16.msra.mxu1 %v9537_v26  ;;  %v9631_v25 = vld [vmem:[#allocation5 + $0x48c] ss:$16 sps:$4 sm:$0xff]   ;;  %v9626_v26 = vld [vmem:[#allocation5 + $0x480] ss:$16 sps:$4 sm:$0xff]  }
  0xf8   :  { %4925 = vmatprep.subr.bf16.mxu0 %v9542_v27  ;;  %5417 = vmatprep.subr.bf16.mxu1 %v9545_v28  ;;  %v9629_v27 = vld [vmem:[#allocation5 + $0x488] ss:$16 sps:$4 sm:$0xff]   ;;  %v9634_v28 = vld [vmem:[#allocation5 + $0x4a4] ss:$16 sps:$4 sm:$0xff]  }
  0xfb   :  { %4926 = vmatpush1.bf16.msra.mxu0 %v9540_v31  ;;  %5418 = vmatpush1.bf16.msra.mxu1 %v9543_v32  ;;  %v9635_v31 = vld [vmem:[#allocation5 + $0x4a8] ss:$16 sps:$4 sm:$0xff]   ;;  %v9640_v32 = vld [vmem:[#allocation5 + $0x4c4] ss:$16 sps:$4 sm:$0xff]  }
  0xfc   :  { %4927 = vmatprep.subr.bf16.mxu0 %v9548_v33  ;;  %5419 = vmatprep.subr.bf16.mxu1 %v9551_v34  ;;  %v9643_v33 = vld [vmem:[#allocation5 + $0x4cc] ss:$16 sps:$4 sm:$0xff]   ;;  %v9638_v34 = vld [vmem:[#allocation5 + $0x4c0] ss:$16 sps:$4 sm:$0xff]  }
  0xff   :  { %4928 = vmatpush1.bf16.msra.mxu0 %v9546_v35  ;;  %5420 = vmatpush1.bf16.msra.mxu1 %v9549_v36  ;;  %v9641_v35 = vld [vmem:[#allocation5 + $0x4c8] ss:$16 sps:$4 sm:$0xff]   ;;  %v9646_v36 = vld [vmem:[#allocation5 + $0x4e4] ss:$16 sps:$4 sm:$0xff]  }
 0x100   :  { %4929 = vmatprep.subr.bf16.mxu0 %v9554_v37  ;;  %5421 = vmatprep.subr.bf16.mxu1 %v9557_v38  ;;  %v9649_v37 = vld [vmem:[#allocation5 + $0x4ec] ss:$16 sps:$4 sm:$0xff]   ;;  %v9644_v38 = vld [vmem:[#allocation5 + $0x4e0] ss:$16 sps:$4 sm:$0xff]  }
 0x103   :  { %4930 = vmatpush1.bf16.msra.mxu0 %v9552_v39  ;;  %5422 = vmatpush1.bf16.msra.mxu1 %v9555_v40  ;;  %v9647_v39 = vld [vmem:[#allocation5 + $0x4e8] ss:$16 sps:$4 sm:$0xff]   ;;  %v9652_v40 = vld [vmem:[#allocation5 + $0x504] ss:$16 sps:$4 sm:$0xff]  }
 0x104   :  { %4931 = vmatprep.subr.bf16.mxu0 %v9560_v41  ;;  %5423 = vmatprep.subr.bf16.mxu1 %v9563_v42  ;;  %v9655_v41 = vld [vmem:[#allocation5 + $0x50c] ss:$16 sps:$4 sm:$0xff]   ;;  %v9650_v42 = vld [vmem:[#allocation5 + $0x500] ss:$16 sps:$4 sm:$0xff]  }
 0x107   :  { %4932 = vmatpush1.bf16.msra.mxu0 %v9558_v43  ;;  %5424 = vmatpush1.bf16.msra.mxu1 %v9561_v44  ;;  %v9653_v43 = vld [vmem:[#allocation5 + $0x508] ss:$16 sps:$4 sm:$0xff]   ;;  %v9658_v44 = vld [vmem:[#allocation5 + $0x524] ss:$16 sps:$4 sm:$0xff]  }
 0x108   :  { %4933 = vmatprep.subr.bf16.mxu0 %v9566_v45  ;;  %5425 = vmatprep.subr.bf16.mxu1 %v9569_v46  ;;  %v9661_v45 = vld [vmem:[#allocation5 + $0x52c] ss:$16 sps:$4 sm:$0xff]   ;;  %v9656_v46 = vld [vmem:[#allocation5 + $0x520] ss:$16 sps:$4 sm:$0xff]  }
 0x10b   :  { %4934 = vmatpush1.bf16.msra.mxu0 %v9564_v47  ;;  %5426 = vmatpush1.bf16.msra.mxu1 %v9567_v48  ;;  %v9659_v47 = vld [vmem:[#allocation5 + $0x528] ss:$16 sps:$4 sm:$0xff]   ;;  %v9664_v48 = vld [vmem:[#allocation5 + $0x544] ss:$16 sps:$4 sm:$0xff]  }
 0x10c   :  { %4935 = vmatprep.subr.bf16.mxu0 %v9572_v49  ;;  %5427 = vmatprep.subr.bf16.mxu1 %v9575_v50  ;;  %v9667_v49 = vld [vmem:[#allocation5 + $0x54c] ss:$16 sps:$4 sm:$0xff]   ;;  %v9662_v50 = vld [vmem:[#allocation5 + $0x540] ss:$16 sps:$4 sm:$0xff]  }
 0x10f   :  { %4936 = vmatpush1.bf16.msra.mxu0 %v9570_v51  ;;  %5428 = vmatpush1.bf16.msra.mxu1 %v9573_v52  ;;  %v9665_v51 = vld [vmem:[#allocation5 + $0x548] ss:$16 sps:$4 sm:$0xff]   ;;  %v9670_v52 = vld [vmem:[#allocation5 + $0x564] ss:$16 sps:$4 sm:$0xff]  }
 0x110   :  { %4937 = vmatprep.subr.bf16.mxu0 %v9578_v53  ;;  %5429 = vmatprep.subr.bf16.mxu1 %v9581_v54  ;;  %v9673_v53 = vld [vmem:[#allocation5 + $0x56c] ss:$16 sps:$4 sm:$0xff]   ;;  %v9668_v54 = vld [vmem:[#allocation5 + $0x560] ss:$16 sps:$4 sm:$0xff]  }
 0x113   :  { %4938 = vmatpush1.bf16.msra.mxu0 %v9576_v55  ;;  %5430 = vmatpush1.bf16.msra.mxu1 %v9579_v56  ;;  %v9671_v55 = vld [vmem:[#allocation5 + $0x568] ss:$16 sps:$4 sm:$0xff]   ;;  %v9676_v56 = vld [vmem:[#allocation5 + $0x584] ss:$16 sps:$4 sm:$0xff]  }
 0x114   :  { %4939 = vmatprep.subr.bf16.mxu0 %v9584_v57  ;;  %5431 = vmatprep.subr.bf16.mxu1 %v9587_v58  ;;  %v9679_v57 = vld [vmem:[#allocation5 + $0x58c] ss:$16 sps:$4 sm:$0xff]   ;;  %v9674_v58 = vld [vmem:[#allocation5 + $0x580] ss:$16 sps:$4 sm:$0xff]  }
 0x117   :  { %4940 = vmatpush1.bf16.msra.mxu0 %v9582_v59  ;;  %5432 = vmatpush1.bf16.msra.mxu1 %v9585_v60  ;;  %v9677_v59 = vld [vmem:[#allocation5 + $0x588] ss:$16 sps:$4 sm:$0xff]   ;;  %v9682_v60 = vld [vmem:[#allocation5 + $0x5a4] ss:$16 sps:$4 sm:$0xff]  }
 0x118   :  { %4941 = vmatprep.subr.bf16.mxu0 %v9590_v61  ;;  %5433 = vmatprep.subr.bf16.mxu1 %v9593_v62  ;;  %v9685_v61 = vld [vmem:[#allocation5 + $0x5ac] ss:$16 sps:$4 sm:$0xff]   ;;  %v9680_v62 = vld [vmem:[#allocation5 + $0x5a0] ss:$16 sps:$4 sm:$0xff]  }
 0x11b   :  { %4942 = vmatpush1.bf16.msra.mxu0 %v9588_v63  ;;  %5434 = vmatpush1.bf16.msra.mxu1 %v9591_v0  ;;  %v9683_v63 = vld [vmem:[#allocation5 + $0x5a8] ss:$16 sps:$4 sm:$0xff]   ;;  %v9688_v0 = vld [vmem:[#allocation5 + $0x5c4] ss:$16 sps:$4 sm:$0xff]  }
 0x11c   :  { %4943 = vmatprep.subr.bf16.mxu0 %v9596_v1  ;;  %5435 = vmatprep.subr.bf16.mxu1 %v9599_v2  ;;  %v9691_v1 = vld [vmem:[#allocation5 + $0x5cc] ss:$16 sps:$4 sm:$0xff]   ;;  %v9686_v2 = vld [vmem:[#allocation5 + $0x5c0] ss:$16 sps:$4 sm:$0xff]  }
 0x11f   :  { %4944 = vmatpush1.bf16.msra.mxu0 %v9594_v3  ;;  %5436 = vmatpush1.bf16.msra.mxu1 %v9597_v4  ;;  %v9689_v3 = vld [vmem:[#allocation5 + $0x5c8] ss:$16 sps:$4 sm:$0xff]   ;;  %v9694_v4 = vld [vmem:[#allocation5 + $0x5e4] ss:$16 sps:$4 sm:$0xff]  }
 0x120   :  { %4954 = vmatprep.subr.bf16.mxu0 %v9604_v5  ;;  %5446 = vmatprep.subr.bf16.mxu1 %v9607_v6  ;;  %v9697_v5 = vld [vmem:[#allocation5 + $0x5ec] ss:$16 sps:$4 sm:$0xff]   ;;  %v9692_v6 = vld [vmem:[#allocation5 + $0x5e0] ss:$16 sps:$4 sm:$0xff]  }
 0x122   :  { %4946 = vmatmul.mubr.bf16.vlgmr.msra.gmra.mrb[0].mxu0 %v8153_v7  ;;  %5438 = vmatmul.mubr.bf16.vlgmr.msra.gmra.mrb[0].mxu1 %v8153_v7  ;;  %v9695_v7 = vld [vmem:[#allocation5 + $0x5e8] ss:$16 sps:$4 sm:$0xff]  }
 0x123   :  { %4955 = vmatpush1.bf16.msra.mxu0 %v9602_v8  ;;  %5447 = vmatpush1.bf16.msra.mxu1 %v9605_v9  ;;  %v9702_v8 = vld [vmem:[#allocation5 + $0x604] ss:$16 sps:$4 sm:$0xff]   ;;  %v9705_v9 = vld [vmem:[#allocation5 + $0x60c] ss:$16 sps:$4 sm:$0xff]  }
 0x124   :  { %4956 = vmatprep.subr.bf16.mxu0 %v9610_v10  ;;  %5448 = vmatprep.subr.bf16.mxu1 %v9613_v12  ;;  %v9700_v10 = vld [vmem:[#allocation5 + $0x600] ss:$16 sps:$4 sm:$0xff]   ;;  %v8155_v12 = vcombine.low %v11417_v11, %v11417_v11  ;;  %v9717_v11 = vld [vmem:[#allocation5 + $0x64c] ss:$16 sps:$4 sm:$0xff]  }
 0x125   :  { %4986 = vmatprep.mubr.bf16.mxu0 %v8156_v13  ;;  %5478 = vmatprep.mubr.bf16.mxu1 %v8156_v13  ;;  %v9703_v13 = vld [vmem:[#allocation5 + $0x608] ss:$16 sps:$4 sm:$0xff]  }
 0x127   :  { %4957 = vmatpush1.bf16.msra.mxu0 %v9608_v14  ;;  %5449 = vmatpush1.bf16.msra.mxu1 %v9611_v15  ;;  %v11423_v14 = vld [vmem:[#allocation2 + $0x18] sm:$0xff]  ;;  %v9708_v15 = vld [vmem:[#allocation5 + $0x624] ss:$16 sps:$4 sm:$0xff]  }
 0x128   :  { %4958 = vmatprep.subr.bf16.mxu0 %v9616_v16  ;;  %5450 = vmatprep.subr.bf16.mxu1 %v9619_v17  ;;  %v9711_v16 = vld [vmem:[#allocation5 + $0x62c] ss:$16 sps:$4 sm:$0xff]   ;;  %v8158_v17 = vcombine.high %v11423_v14, %v11423_v14 }
 0x12b   :  { %4959 = vmatpush1.bf16.msra.mxu0 %v9614_v18  ;;  %5451 = vmatpush1.bf16.msra.mxu1 %v9617_v19  ;;  %v9706_v18 = vld [vmem:[#allocation5 + $0x620] ss:$16 sps:$4 sm:$0xff]   ;;  %v9709_v19 = vld [vmem:[#allocation5 + $0x628] ss:$16 sps:$4 sm:$0xff]  }
 0x12c   :  { %4960 = vmatprep.subr.bf16.mxu0 %v9622_v20  ;;  %5452 = vmatprep.subr.bf16.mxu1 %v9625_v21  ;;  %v9714_v20 = vld [vmem:[#allocation5 + $0x644] ss:$16 sps:$4 sm:$0xff]   ;;  %v9712_v21 = vld [vmem:[#allocation5 + $0x640] ss:$16 sps:$4 sm:$0xff]  }
 0x12f   :  { %4961 = vmatpush1.bf16.msra.mxu0 %v9620_v22  ;;  %5453 = vmatpush1.bf16.msra.mxu1 %v9623_v23  ;;  %v9715_v22 = vld [vmem:[#allocation5 + $0x648] ss:$16 sps:$4 sm:$0xff]   ;;  %v9720_v23 = vld [vmem:[#allocation5 + $0x664] ss:$16 sps:$4 sm:$0xff]  }
 0x130   :  { %4962 = vmatprep.subr.bf16.mxu0 %v9628_v24  ;;  %5454 = vmatprep.subr.bf16.mxu1 %v9631_v25  ;;  %v9723_v24 = vld [vmem:[#allocation5 + $0x66c] ss:$16 sps:$4 sm:$0xff]   ;;  %v9718_v25 = vld [vmem:[#allocation5 + $0x660] ss:$16 sps:$4 sm:$0xff]  }
 0x133   :  { %4963 = vmatpush1.bf16.msra.mxu0 %v9626_v26  ;;  %5455 = vmatpush1.bf16.msra.mxu1 %v9629_v27  ;;  %v9721_v26 = vld [vmem:[#allocation5 + $0x668] ss:$16 sps:$4 sm:$0xff]   ;;  %v9726_v27 = vld [vmem:[#allocation5 + $0x684] ss:$16 sps:$4 sm:$0xff]  }
 0x134   :  { %4964 = vmatprep.subr.bf16.mxu0 %v9634_v28  ;;  %5456 = vmatprep.subr.bf16.mxu1 %v9637_v29  ;;  %v9729_v28 = vld [vmem:[#allocation5 + $0x68c] ss:$16 sps:$4 sm:$0xff]   ;;  %v9724_v29 = vld [vmem:[#allocation5 + $0x680] ss:$16 sps:$4 sm:$0xff]  }
 0x137   :  { %4965 = vmatpush1.bf16.msra.mxu0 %v9632_v30  ;;  %5457 = vmatpush1.bf16.msra.mxu1 %v9635_v31  ;;  %v9727_v30 = vld [vmem:[#allocation5 + $0x688] ss:$16 sps:$4 sm:$0xff]   ;;  %v9732_v31 = vld [vmem:[#allocation5 + $0x6a4] ss:$16 sps:$4 sm:$0xff]  }
 0x138   :  { %4966 = vmatprep.subr.bf16.mxu0 %v9640_v32  ;;  %5458 = vmatprep.subr.bf16.mxu1 %v9643_v33  ;;  %v9735_v32 = vld [vmem:[#allocation5 + $0x6ac] ss:$16 sps:$4 sm:$0xff]   ;;  %v9730_v33 = vld [vmem:[#allocation5 + $0x6a0] ss:$16 sps:$4 sm:$0xff]  }
 0x13b   :  { %4967 = vmatpush1.bf16.msra.mxu0 %v9638_v34  ;;  %5459 = vmatpush1.bf16.msra.mxu1 %v9641_v35  ;;  %v9733_v34 = vld [vmem:[#allocation5 + $0x6a8] ss:$16 sps:$4 sm:$0xff]   ;;  %v9738_v35 = vld [vmem:[#allocation5 + $0x6c4] ss:$16 sps:$4 sm:$0xff]  }
 0x13c   :  { %4968 = vmatprep.subr.bf16.mxu0 %v9646_v36  ;;  %5460 = vmatprep.subr.bf16.mxu1 %v9649_v37  ;;  %v9741_v36 = vld [vmem:[#allocation5 + $0x6cc] ss:$16 sps:$4 sm:$0xff]   ;;  %v9736_v37 = vld [vmem:[#allocation5 + $0x6c0] ss:$16 sps:$4 sm:$0xff]  }
 0x13f   :  { %4969 = vmatpush1.bf16.msra.mxu0 %v9644_v38  ;;  %5461 = vmatpush1.bf16.msra.mxu1 %v9647_v39  ;;  %v9739_v38 = vld [vmem:[#allocation5 + $0x6c8] ss:$16 sps:$4 sm:$0xff]   ;;  %v9744_v39 = vld [vmem:[#allocation5 + $0x6e4] ss:$16 sps:$4 sm:$0xff]  }
 0x140   :  { %4970 = vmatprep.subr.bf16.mxu0 %v9652_v40  ;;  %5462 = vmatprep.subr.bf16.mxu1 %v9655_v41  ;;  %v9747_v40 = vld [vmem:[#allocation5 + $0x6ec] ss:$16 sps:$4 sm:$0xff]   ;;  %v9742_v41 = vld [vmem:[#allocation5 + $0x6e0] ss:$16 sps:$4 sm:$0xff]  }
 0x143   :  { %4971 = vmatpush1.bf16.msra.mxu0 %v9650_v42  ;;  %5463 = vmatpush1.bf16.msra.mxu1 %v9653_v43  ;;  %v9745_v42 = vld [vmem:[#allocation5 + $0x6e8] ss:$16 sps:$4 sm:$0xff]   ;;  %v9750_v43 = vld [vmem:[#allocation5 + $0x704] ss:$16 sps:$4 sm:$0xff]  }
 0x144   :  { %4972 = vmatprep.subr.bf16.mxu0 %v9658_v44  ;;  %5464 = vmatprep.subr.bf16.mxu1 %v9661_v45  ;;  %v9753_v44 = vld [vmem:[#allocation5 + $0x70c] ss:$16 sps:$4 sm:$0xff]   ;;  %v9748_v45 = vld [vmem:[#allocation5 + $0x700] ss:$16 sps:$4 sm:$0xff]  }
 0x147   :  { %4973 = vmatpush1.bf16.msra.mxu0 %v9656_v46  ;;  %5465 = vmatpush1.bf16.msra.mxu1 %v9659_v47  ;;  %v9751_v46 = vld [vmem:[#allocation5 + $0x708] ss:$16 sps:$4 sm:$0xff]   ;;  %v9756_v47 = vld [vmem:[#allocation5 + $0x724] ss:$16 sps:$4 sm:$0xff]  }
 0x148   :  { %4974 = vmatprep.subr.bf16.mxu0 %v9664_v48  ;;  %5466 = vmatprep.subr.bf16.mxu1 %v9667_v49  ;;  %v9759_v48 = vld [vmem:[#allocation5 + $0x72c] ss:$16 sps:$4 sm:$0xff]   ;;  %v9754_v49 = vld [vmem:[#allocation5 + $0x720] ss:$16 sps:$4 sm:$0xff]  }
 0x14b   :  { %4975 = vmatpush1.bf16.msra.mxu0 %v9662_v50  ;;  %5467 = vmatpush1.bf16.msra.mxu1 %v9665_v51  ;;  %v9757_v50 = vld [vmem:[#allocation5 + $0x728] ss:$16 sps:$4 sm:$0xff]   ;;  %v9762_v51 = vld [vmem:[#allocation5 + $0x744] ss:$16 sps:$4 sm:$0xff]  }
 0x14c   :  { %4976 = vmatprep.subr.bf16.mxu0 %v9670_v52  ;;  %5468 = vmatprep.subr.bf16.mxu1 %v9673_v53  ;;  %v9765_v52 = vld [vmem:[#allocation5 + $0x74c] ss:$16 sps:$4 sm:$0xff]   ;;  %v9760_v53 = vld [vmem:[#allocation5 + $0x740] ss:$16 sps:$4 sm:$0xff]  }
 0x14f   :  { %4977 = vmatpush1.bf16.msra.mxu0 %v9668_v54  ;;  %5469 = vmatpush1.bf16.msra.mxu1 %v9671_v55  ;;  %v9763_v54 = vld [vmem:[#allocation5 + $0x748] ss:$16 sps:$4 sm:$0xff]   ;;  %v9768_v55 = vld [vmem:[#allocation5 + $0x764] ss:$16 sps:$4 sm:$0xff]  }
 0x150   :  { %4978 = vmatprep.subr.bf16.mxu0 %v9676_v56  ;;  %5470 = vmatprep.subr.bf16.mxu1 %v9679_v57  ;;  %v9771_v56 = vld [vmem:[#allocation5 + $0x76c] ss:$16 sps:$4 sm:$0xff]   ;;  %v9766_v57 = vld [vmem:[#allocation5 + $0x760] ss:$16 sps:$4 sm:$0xff]  }
 0x153   :  { %4979 = vmatpush1.bf16.msra.mxu0 %v9674_v58  ;;  %5471 = vmatpush1.bf16.msra.mxu1 %v9677_v59  ;;  %v9769_v58 = vld [vmem:[#allocation5 + $0x768] ss:$16 sps:$4 sm:$0xff]   ;;  %v9774_v59 = vld [vmem:[#allocation5 + $0x784] ss:$16 sps:$4 sm:$0xff]  }
 0x154   :  { %4980 = vmatprep.subr.bf16.mxu0 %v9682_v60  ;;  %5472 = vmatprep.subr.bf16.mxu1 %v9685_v61  ;;  %v9777_v60 = vld [vmem:[#allocation5 + $0x78c] ss:$16 sps:$4 sm:$0xff]   ;;  %v9772_v61 = vld [vmem:[#allocation5 + $0x780] ss:$16 sps:$4 sm:$0xff]  }
 0x157   :  { %4981 = vmatpush1.bf16.msra.mxu0 %v9680_v62  ;;  %5473 = vmatpush1.bf16.msra.mxu1 %v9683_v63  ;;  %v9775_v62 = vld [vmem:[#allocation5 + $0x788] ss:$16 sps:$4 sm:$0xff]   ;;  %v9780_v63 = vld [vmem:[#allocation5 + $0x7a4] ss:$16 sps:$4 sm:$0xff]  }
 0x158   :  { %4982 = vmatprep.subr.bf16.mxu0 %v9688_v0  ;;  %5474 = vmatprep.subr.bf16.mxu1 %v9691_v1  ;;  %v9783_v0 = vld [vmem:[#allocation5 + $0x7ac] ss:$16 sps:$4 sm:$0xff]   ;;  %v9778_v1 = vld [vmem:[#allocation5 + $0x7a0] ss:$16 sps:$4 sm:$0xff]  }
 0x15b   :  { %4983 = vmatpush1.bf16.msra.mxu0 %v9686_v2  ;;  %5475 = vmatpush1.bf16.msra.mxu1 %v9689_v3  ;;  %v9781_v2 = vld [vmem:[#allocation5 + $0x7a8] ss:$16 sps:$4 sm:$0xff]   ;;  %v9786_v3 = vld [vmem:[#allocation5 + $0x7c4] ss:$16 sps:$4 sm:$0xff]  }
 0x15c   :  { %4984 = vmatprep.subr.bf16.mxu0 %v9694_v4  ;;  %5476 = vmatprep.subr.bf16.mxu1 %v9697_v5  ;;  %v9789_v4 = vld [vmem:[#allocation5 + $0x7cc] ss:$16 sps:$4 sm:$0xff]   ;;  %v9784_v5 = vld [vmem:[#allocation5 + $0x7c0] ss:$16 sps:$4 sm:$0xff]  }
 0x15f   :  { %4985 = vmatpush1.bf16.msra.mxu0 %v9692_v6  ;;  %5477 = vmatpush1.bf16.msra.mxu1 %v9695_v7  ;;  %v9787_v6 = vld [vmem:[#allocation5 + $0x7c8] ss:$16 sps:$4 sm:$0xff]   ;;  %v9792_v7 = vld [vmem:[#allocation5 + $0x7e4] ss:$16 sps:$4 sm:$0xff]  }
 0x160   :  { %4995 = vmatprep.subr.bf16.mxu0 %v9702_v8  ;;  %5487 = vmatprep.subr.bf16.mxu1 %v9705_v9  ;;  %v9795_v8 = vld [vmem:[#allocation5 + $0x7ec] ss:$16 sps:$4 sm:$0xff]   ;;  %v9790_v9 = vld [vmem:[#allocation5 + $0x7e0] ss:$16 sps:$4 sm:$0xff]  }
 0x162   :  { %4987 = vmatmul.mubr.bf16.vlgmr.msra.gmra.mrb[0].mxu0 %v8155_v12  ;;  %5479 = vmatmul.mubr.bf16.vlgmr.msra.gmra.mrb[0].mxu1 %v8155_v12  ;;  %v9800_v12 = vld [vmem:[#allocation5 + $0x804] ss:$16 sps:$4 sm:$0xff]  }
 0x163   :  { %4996 = vmatpush1.bf16.msra.mxu0 %v9700_v10  ;;  %5488 = vmatpush1.bf16.msra.mxu1 %v9703_v13  ;;  %v9793_v10 = vld [vmem:[#allocation5 + $0x7e8] ss:$16 sps:$4 sm:$0xff]   ;;  %v9803_v13 = vld [vmem:[#allocation5 + $0x80c] ss:$16 sps:$4 sm:$0xff]  }
 0x164   :  { %4997 = vmatprep.subr.bf16.mxu0 %v9708_v15  ;;  %5489 = vmatprep.subr.bf16.mxu1 %v9711_v16  ;;  %v9798_v15 = vld [vmem:[#allocation5 + $0x800] ss:$16 sps:$4 sm:$0xff]   ;;  %v8157_v16 = vcombine.low %v11423_v14, %v11423_v14  ;;  %v9812_v14 = vld [vmem:[#allocation5 + $0x844] ss:$16 sps:$4 sm:$0xff]  }
 0x165   :  { %5027 = vmatprep.mubr.bf16.mxu0 %v8158_v17  ;;  %5519 = vmatprep.mubr.bf16.mxu1 %v8158_v17  ;;  %v11429_v17 = vld [vmem:[#allocation2 + $0x20] sm:$0xff] }
 0x167   :  { %4998 = vmatpush1.bf16.msra.mxu0 %v9706_v18  ;;  %5490 = vmatpush1.bf16.msra.mxu1 %v9709_v19  ;;  %v9801_v18 = vld [vmem:[#allocation5 + $0x808] ss:$16 sps:$4 sm:$0xff]   ;;  %v9806_v19 = vld [vmem:[#allocation5 + $0x824] ss:$16 sps:$4 sm:$0xff]  }
 0x168   :  { %4999 = vmatprep.subr.bf16.mxu0 %v9714_v20  ;;  %5491 = vmatprep.subr.bf16.mxu1 %v9717_v11  ;;  %v9809_v20 = vld [vmem:[#allocation5 + $0x82c] ss:$16 sps:$4 sm:$0xff]   ;;  %v8160_v11 = vcombine.high %v11429_v17, %v11429_v17 }
 0x16b   :  { %5000 = vmatpush1.bf16.msra.mxu0 %v9712_v21  ;;  %5492 = vmatpush1.bf16.msra.mxu1 %v9715_v22  ;;  %v9804_v21 = vld [vmem:[#allocation5 + $0x820] ss:$16 sps:$4 sm:$0xff]   ;;  %v9807_v22 = vld [vmem:[#allocation5 + $0x828] ss:$16 sps:$4 sm:$0xff]  }
 0x16c   :  { %5001 = vmatprep.subr.bf16.mxu0 %v9720_v23  ;;  %5493 = vmatprep.subr.bf16.mxu1 %v9723_v24  ;;  %v9815_v23 = vld [vmem:[#allocation5 + $0x84c] ss:$16 sps:$4 sm:$0xff]   ;;  %v9810_v24 = vld [vmem:[#allocation5 + $0x840] ss:$16 sps:$4 sm:$0xff]  }
 0x16f   :  { %5002 = vmatpush1.bf16.msra.mxu0 %v9718_v25  ;;  %5494 = vmatpush1.bf16.msra.mxu1 %v9721_v26  ;;  %v9813_v25 = vld [vmem:[#allocation5 + $0x848] ss:$16 sps:$4 sm:$0xff]   ;;  %v9818_v26 = vld [vmem:[#allocation5 + $0x864] ss:$16 sps:$4 sm:$0xff]  }
 0x170   :  { %5003 = vmatprep.subr.bf16.mxu0 %v9726_v27  ;;  %5495 = vmatprep.subr.bf16.mxu1 %v9729_v28  ;;  %v9821_v27 = vld [vmem:[#allocation5 + $0x86c] ss:$16 sps:$4 sm:$0xff]   ;;  %v9816_v28 = vld [vmem:[#allocation5 + $0x860] ss:$16 sps:$4 sm:$0xff]  }
 0x173   :  { %5004 = vmatpush1.bf16.msra.mxu0 %v9724_v29  ;;  %5496 = vmatpush1.bf16.msra.mxu1 %v9727_v30  ;;  %v9819_v29 = vld [vmem:[#allocation5 + $0x868] ss:$16 sps:$4 sm:$0xff]   ;;  %v9824_v30 = vld [vmem:[#allocation5 + $0x884] ss:$16 sps:$4 sm:$0xff]  }
 0x174   :  { %5005 = vmatprep.subr.bf16.mxu0 %v9732_v31  ;;  %5497 = vmatprep.subr.bf16.mxu1 %v9735_v32  ;;  %v9827_v31 = vld [vmem:[#allocation5 + $0x88c] ss:$16 sps:$4 sm:$0xff]   ;;  %v9822_v32 = vld [vmem:[#allocation5 + $0x880] ss:$16 sps:$4 sm:$0xff]  }
 0x177   :  { %5006 = vmatpush1.bf16.msra.mxu0 %v9730_v33  ;;  %5498 = vmatpush1.bf16.msra.mxu1 %v9733_v34  ;;  %v9825_v33 = vld [vmem:[#allocation5 + $0x888] ss:$16 sps:$4 sm:$0xff]   ;;  %v9830_v34 = vld [vmem:[#allocation5 + $0x8a4] ss:$16 sps:$4 sm:$0xff]  }
 0x178   :  { %5007 = vmatprep.subr.bf16.mxu0 %v9738_v35  ;;  %5499 = vmatprep.subr.bf16.mxu1 %v9741_v36  ;;  %v9833_v35 = vld [vmem:[#allocation5 + $0x8ac] ss:$16 sps:$4 sm:$0xff]   ;;  %v9828_v36 = vld [vmem:[#allocation5 + $0x8a0] ss:$16 sps:$4 sm:$0xff]  }
 0x17b   :  { %5008 = vmatpush1.bf16.msra.mxu0 %v9736_v37  ;;  %5500 = vmatpush1.bf16.msra.mxu1 %v9739_v38  ;;  %v9831_v37 = vld [vmem:[#allocation5 + $0x8a8] ss:$16 sps:$4 sm:$0xff]   ;;  %v9836_v38 = vld [vmem:[#allocation5 + $0x8c4] ss:$16 sps:$4 sm:$0xff]  }
 0x17c   :  { %5009 = vmatprep.subr.bf16.mxu0 %v9744_v39  ;;  %5501 = vmatprep.subr.bf16.mxu1 %v9747_v40  ;;  %v9839_v39 = vld [vmem:[#allocation5 + $0x8cc] ss:$16 sps:$4 sm:$0xff]   ;;  %v9834_v40 = vld [vmem:[#allocation5 + $0x8c0] ss:$16 sps:$4 sm:$0xff]  }
 0x17f   :  { %5010 = vmatpush1.bf16.msra.mxu0 %v9742_v41  ;;  %5502 = vmatpush1.bf16.msra.mxu1 %v9745_v42  ;;  %v9837_v41 = vld [vmem:[#allocation5 + $0x8c8] ss:$16 sps:$4 sm:$0xff]   ;;  %v9842_v42 = vld [vmem:[#allocation5 + $0x8e4] ss:$16 sps:$4 sm:$0xff]  }
 0x180   :  { %5011 = vmatprep.subr.bf16.mxu0 %v9750_v43  ;;  %5503 = vmatprep.subr.bf16.mxu1 %v9753_v44  ;;  %v9845_v43 = vld [vmem:[#allocation5 + $0x8ec] ss:$16 sps:$4 sm:$0xff]   ;;  %v9840_v44 = vld [vmem:[#allocation5 + $0x8e0] ss:$16 sps:$4 sm:$0xff]  }
 0x183   :  { %5012 = vmatpush1.bf16.msra.mxu0 %v9748_v45  ;;  %5504 = vmatpush1.bf16.msra.mxu1 %v9751_v46  ;;  %v9843_v45 = vld [vmem:[#allocation5 + $0x8e8] ss:$16 sps:$4 sm:$0xff]   ;;  %v9848_v46 = vld [vmem:[#allocation5 + $0x904] ss:$16 sps:$4 sm:$0xff]  }
 0x184   :  { %5013 = vmatprep.subr.bf16.mxu0 %v9756_v47  ;;  %5505 = vmatprep.subr.bf16.mxu1 %v9759_v48  ;;  %v9851_v47 = vld [vmem:[#allocation5 + $0x90c] ss:$16 sps:$4 sm:$0xff]   ;;  %v9846_v48 = vld [vmem:[#allocation5 + $0x900] ss:$16 sps:$4 sm:$0xff]  }
 0x187   :  { %5014 = vmatpush1.bf16.msra.mxu0 %v9754_v49  ;;  %5506 = vmatpush1.bf16.msra.mxu1 %v9757_v50  ;;  %v9849_v49 = vld [vmem:[#allocation5 + $0x908] ss:$16 sps:$4 sm:$0xff]   ;;  %v9854_v50 = vld [vmem:[#allocation5 + $0x924] ss:$16 sps:$4 sm:$0xff]  }
 0x188   :  { %5015 = vmatprep.subr.bf16.mxu0 %v9762_v51  ;;  %5507 = vmatprep.subr.bf16.mxu1 %v9765_v52  ;;  %v9857_v51 = vld [vmem:[#allocation5 + $0x92c] ss:$16 sps:$4 sm:$0xff]   ;;  %v9852_v52 = vld [vmem:[#allocation5 + $0x920] ss:$16 sps:$4 sm:$0xff]  }
 0x18b   :  { %5016 = vmatpush1.bf16.msra.mxu0 %v9760_v53  ;;  %5508 = vmatpush1.bf16.msra.mxu1 %v9763_v54  ;;  %v9855_v53 = vld [vmem:[#allocation5 + $0x928] ss:$16 sps:$4 sm:$0xff]   ;;  %v9860_v54 = vld [vmem:[#allocation5 + $0x944] ss:$16 sps:$4 sm:$0xff]  }
 0x18c   :  { %5017 = vmatprep.subr.bf16.mxu0 %v9768_v55  ;;  %5509 = vmatprep.subr.bf16.mxu1 %v9771_v56  ;;  %v9863_v55 = vld [vmem:[#allocation5 + $0x94c] ss:$16 sps:$4 sm:$0xff]   ;;  %v9858_v56 = vld [vmem:[#allocation5 + $0x940] ss:$16 sps:$4 sm:$0xff]  }
 0x18f   :  { %5018 = vmatpush1.bf16.msra.mxu0 %v9766_v57  ;;  %5510 = vmatpush1.bf16.msra.mxu1 %v9769_v58  ;;  %v9861_v57 = vld [vmem:[#allocation5 + $0x948] ss:$16 sps:$4 sm:$0xff]   ;;  %v9866_v58 = vld [vmem:[#allocation5 + $0x964] ss:$16 sps:$4 sm:$0xff]  }
 0x190   :  { %5019 = vmatprep.subr.bf16.mxu0 %v9774_v59  ;;  %5511 = vmatprep.subr.bf16.mxu1 %v9777_v60  ;;  %v9869_v59 = vld [vmem:[#allocation5 + $0x96c] ss:$16 sps:$4 sm:$0xff]   ;;  %v9864_v60 = vld [vmem:[#allocation5 + $0x960] ss:$16 sps:$4 sm:$0xff]  }
 0x193   :  { %5020 = vmatpush1.bf16.msra.mxu0 %v9772_v61  ;;  %5512 = vmatpush1.bf16.msra.mxu1 %v9775_v62  ;;  %v9867_v61 = vld [vmem:[#allocation5 + $0x968] ss:$16 sps:$4 sm:$0xff]   ;;  %v9872_v62 = vld [vmem:[#allocation5 + $0x984] ss:$16 sps:$4 sm:$0xff]  }
 0x194   :  { %5021 = vmatprep.subr.bf16.mxu0 %v9780_v63  ;;  %5513 = vmatprep.subr.bf16.mxu1 %v9783_v0  ;;  %v9875_v63 = vld [vmem:[#allocation5 + $0x98c] ss:$16 sps:$4 sm:$0xff]   ;;  %v9870_v0 = vld [vmem:[#allocation5 + $0x980] ss:$16 sps:$4 sm:$0xff]  }
 0x197   :  { %5022 = vmatpush1.bf16.msra.mxu0 %v9778_v1  ;;  %5514 = vmatpush1.bf16.msra.mxu1 %v9781_v2  ;;  %v9873_v1 = vld [vmem:[#allocation5 + $0x988] ss:$16 sps:$4 sm:$0xff]   ;;  %v9878_v2 = vld [vmem:[#allocation5 + $0x9a4] ss:$16 sps:$4 sm:$0xff]  }
 0x198   :  { %5023 = vmatprep.subr.bf16.mxu0 %v9786_v3  ;;  %5515 = vmatprep.subr.bf16.mxu1 %v9789_v4  ;;  %v9881_v3 = vld [vmem:[#allocation5 + $0x9ac] ss:$16 sps:$4 sm:$0xff]   ;;  %v9876_v4 = vld [vmem:[#allocation5 + $0x9a0] ss:$16 sps:$4 sm:$0xff]  }
 0x19b   :  { %5024 = vmatpush1.bf16.msra.mxu0 %v9784_v5  ;;  %5516 = vmatpush1.bf16.msra.mxu1 %v9787_v6  ;;  %v9879_v5 = vld [vmem:[#allocation5 + $0x9a8] ss:$16 sps:$4 sm:$0xff]   ;;  %v9884_v6 = vld [vmem:[#allocation5 + $0x9c4] ss:$16 sps:$4 sm:$0xff]  }
 0x19c   :  { %5025 = vmatprep.subr.bf16.mxu0 %v9792_v7  ;;  %5517 = vmatprep.subr.bf16.mxu1 %v9795_v8  ;;  %v9887_v7 = vld [vmem:[#allocation5 + $0x9cc] ss:$16 sps:$4 sm:$0xff]   ;;  %v9882_v8 = vld [vmem:[#allocation5 + $0x9c0] ss:$16 sps:$4 sm:$0xff]  }
 0x19f   :  { %5026 = vmatpush1.bf16.msra.mxu0 %v9790_v9  ;;  %5518 = vmatpush1.bf16.msra.mxu1 %v9793_v10  ;;  %v9885_v9 = vld [vmem:[#allocation5 + $0x9c8] ss:$16 sps:$4 sm:$0xff]   ;;  %v9890_v10 = vld [vmem:[#allocation5 + $0x9e4] ss:$16 sps:$4 sm:$0xff]  }
 0x1a0   :  { %5036 = vmatprep.subr.bf16.mxu0 %v9800_v12  ;;  %5528 = vmatprep.subr.bf16.mxu1 %v9803_v13  ;;  %v9893_v12 = vld [vmem:[#allocation5 + $0x9ec] ss:$16 sps:$4 sm:$0xff]   ;;  %v9888_v13 = vld [vmem:[#allocation5 + $0x9e0] ss:$16 sps:$4 sm:$0xff]  }
 0x1a2   :  { %5028 = vmatmul.mubr.bf16.vlgmr.msra.gmra.mrb[0].mxu0 %v8157_v16  ;;  %5520 = vmatmul.mubr.bf16.vlgmr.msra.gmra.mrb[0].mxu1 %v8157_v16  ;;  %v9898_v16 = vld [vmem:[#allocation5 + $0xa04] ss:$16 sps:$4 sm:$0xff]  }
 0x1a3   :  { %5037 = vmatpush1.bf16.msra.mxu0 %v9798_v15  ;;  %5529 = vmatpush1.bf16.msra.mxu1 %v9801_v18  ;;  %v9891_v15 = vld [vmem:[#allocation5 + $0x9e8] ss:$16 sps:$4 sm:$0xff]   ;;  %v9901_v18 = vld [vmem:[#allocation5 + $0xa0c] ss:$16 sps:$4 sm:$0xff]  }
 0x1a4   :  { %5038 = vmatprep.subr.bf16.mxu0 %v9806_v19  ;;  %5530 = vmatprep.subr.bf16.mxu1 %v9809_v20  ;;  %v11433_v19 = vld [vmem:[#allocation2 + $0x28] sm:$0xff]  ;;  %v8159_v20 = vcombine.low %v11429_v17, %v11429_v17  ;;  %v9910_v17 = vld [vmem:[#allocation5 + $0xa44] ss:$16 sps:$4 sm:$0xff]  }
 0x1a5   :  { %5068 = vmatprep.mubr.bf16.mxu0 %v8160_v11  ;;  %5560 = vmatprep.mubr.bf16.mxu1 %v8160_v11  ;;  %v9896_v11 = vld [vmem:[#allocation5 + $0xa00] ss:$16 sps:$4 sm:$0xff]  }
 0x1a7   :  { %5039 = vmatpush1.bf16.msra.mxu0 %v9804_v21  ;;  %5531 = vmatpush1.bf16.msra.mxu1 %v9807_v22  ;;  %v9899_v21 = vld [vmem:[#allocation5 + $0xa08] ss:$16 sps:$4 sm:$0xff]   ;;  %v9904_v22 = vld [vmem:[#allocation5 + $0xa24] ss:$16 sps:$4 sm:$0xff]  }
 0x1a8   :  { %5040 = vmatprep.subr.bf16.mxu0 %v9812_v14  ;;  %5532 = vmatprep.subr.bf16.mxu1 %v9815_v23  ;;  %v9907_v14 = vld [vmem:[#allocation5 + $0xa2c] ss:$16 sps:$4 sm:$0xff]   ;;  %v8162_v23 = vcombine.high %v11433_v19, %v11433_v19 }
 0x1ab   :  { %5041 = vmatpush1.bf16.msra.mxu0 %v9810_v24  ;;  %5533 = vmatpush1.bf16.msra.mxu1 %v9813_v25  ;;  %v9902_v24 = vld [vmem:[#allocation5 + $0xa20] ss:$16 sps:$4 sm:$0xff]   ;;  %v9905_v25 = vld [vmem:[#allocation5 + $0xa28] ss:$16 sps:$4 sm:$0xff]  }
 0x1ac   :  { %5042 = vmatprep.subr.bf16.mxu0 %v9818_v26  ;;  %5534 = vmatprep.subr.bf16.mxu1 %v9821_v27  ;;  %v9913_v26 = vld [vmem:[#allocation5 + $0xa4c] ss:$16 sps:$4 sm:$0xff]   ;;  %v9908_v27 = vld [vmem:[#allocation5 + $0xa40] ss:$16 sps:$4 sm:$0xff]  }
 0x1af   :  { %5043 = vmatpush1.bf16.msra.mxu0 %v9816_v28  ;;  %5535 = vmatpush1.bf16.msra.mxu1 %v9819_v29  ;;  %v9911_v28 = vld [vmem:[#allocation5 + $0xa48] ss:$16 sps:$4 sm:$0xff]   ;;  %v9916_v29 = vld [vmem:[#allocation5 + $0xa64] ss:$16 sps:$4 sm:$0xff]  }
 0x1b0   :  { %5044 = vmatprep.subr.bf16.mxu0 %v9824_v30  ;;  %5536 = vmatprep.subr.bf16.mxu1 %v9827_v31  ;;  %v9919_v30 = vld [vmem:[#allocation5 + $0xa6c] ss:$16 sps:$4 sm:$0xff]   ;;  %v9914_v31 = vld [vmem:[#allocation5 + $0xa60] ss:$16 sps:$4 sm:$0xff]  }
 0x1b3   :  { %5045 = vmatpush1.bf16.msra.mxu0 %v9822_v32  ;;  %5537 = vmatpush1.bf16.msra.mxu1 %v9825_v33  ;;  %v9917_v32 = vld [vmem:[#allocation5 + $0xa68] ss:$16 sps:$4 sm:$0xff]   ;;  %v9922_v33 = vld [vmem:[#allocation5 + $0xa84] ss:$16 sps:$4 sm:$0xff]  }
 0x1b4   :  { %5046 = vmatprep.subr.bf16.mxu0 %v9830_v34  ;;  %5538 = vmatprep.subr.bf16.mxu1 %v9833_v35  ;;  %v9925_v34 = vld [vmem:[#allocation5 + $0xa8c] ss:$16 sps:$4 sm:$0xff]   ;;  %v9920_v35 = vld [vmem:[#allocation5 + $0xa80] ss:$16 sps:$4 sm:$0xff]  }
 0x1b7   :  { %5047 = vmatpush1.bf16.msra.mxu0 %v9828_v36  ;;  %5539 = vmatpush1.bf16.msra.mxu1 %v9831_v37  ;;  %v9923_v36 = vld [vmem:[#allocation5 + $0xa88] ss:$16 sps:$4 sm:$0xff]   ;;  %v9928_v37 = vld [vmem:[#allocation5 + $0xaa4] ss:$16 sps:$4 sm:$0xff]  }
 0x1b8   :  { %5048 = vmatprep.subr.bf16.mxu0 %v9836_v38  ;;  %5540 = vmatprep.subr.bf16.mxu1 %v9839_v39  ;;  %v9931_v38 = vld [vmem:[#allocation5 + $0xaac] ss:$16 sps:$4 sm:$0xff]   ;;  %v9926_v39 = vld [vmem:[#allocation5 + $0xaa0] ss:$16 sps:$4 sm:$0xff]  }
 0x1bb   :  { %5049 = vmatpush1.bf16.msra.mxu0 %v9834_v40  ;;  %5541 = vmatpush1.bf16.msra.mxu1 %v9837_v41  ;;  %v9929_v40 = vld [vmem:[#allocation5 + $0xaa8] ss:$16 sps:$4 sm:$0xff]   ;;  %v9934_v41 = vld [vmem:[#allocation5 + $0xac4] ss:$16 sps:$4 sm:$0xff]  }
 0x1bc   :  { %5050 = vmatprep.subr.bf16.mxu0 %v9842_v42  ;;  %5542 = vmatprep.subr.bf16.mxu1 %v9845_v43  ;;  %v9937_v42 = vld [vmem:[#allocation5 + $0xacc] ss:$16 sps:$4 sm:$0xff]   ;;  %v9932_v43 = vld [vmem:[#allocation5 + $0xac0] ss:$16 sps:$4 sm:$0xff]  }
 0x1bf   :  { %5051 = vmatpush1.bf16.msra.mxu0 %v9840_v44  ;;  %5543 = vmatpush1.bf16.msra.mxu1 %v9843_v45  ;;  %v9935_v44 = vld [vmem:[#allocation5 + $0xac8] ss:$16 sps:$4 sm:$0xff]   ;;  %v9940_v45 = vld [vmem:[#allocation5 + $0xae4] ss:$16 sps:$4 sm:$0xff]  }
 0x1c0   :  { %5052 = vmatprep.subr.bf16.mxu0 %v9848_v46  ;;  %5544 = vmatprep.subr.bf16.mxu1 %v9851_v47  ;;  %v9943_v46 = vld [vmem:[#allocation5 + $0xaec] ss:$16 sps:$4 sm:$0xff]   ;;  %v9938_v47 = vld [vmem:[#allocation5 + $0xae0] ss:$16 sps:$4 sm:$0xff]  }
 0x1c3   :  { %5053 = vmatpush1.bf16.msra.mxu0 %v9846_v48  ;;  %5545 = vmatpush1.bf16.msra.mxu1 %v9849_v49  ;;  %v9941_v48 = vld [vmem:[#allocation5 + $0xae8] ss:$16 sps:$4 sm:$0xff]   ;;  %v9946_v49 = vld [vmem:[#allocation5 + $0xb04] ss:$16 sps:$4 sm:$0xff]  }
 0x1c4   :  { %5054 = vmatprep.subr.bf16.mxu0 %v9854_v50  ;;  %5546 = vmatprep.subr.bf16.mxu1 %v9857_v51  ;;  %v9949_v50 = vld [vmem:[#allocation5 + $0xb0c] ss:$16 sps:$4 sm:$0xff]   ;;  %v9944_v51 = vld [vmem:[#allocation5 + $0xb00] ss:$16 sps:$4 sm:$0xff]  }
 0x1c7   :  { %5055 = vmatpush1.bf16.msra.mxu0 %v9852_v52  ;;  %5547 = vmatpush1.bf16.msra.mxu1 %v9855_v53  ;;  %v9947_v52 = vld [vmem:[#allocation5 + $0xb08] ss:$16 sps:$4 sm:$0xff]   ;;  %v9952_v53 = vld [vmem:[#allocation5 + $0xb24] ss:$16 sps:$4 sm:$0xff]  }
 0x1c8   :  { %5056 = vmatprep.subr.bf16.mxu0 %v9860_v54  ;;  %5548 = vmatprep.subr.bf16.mxu1 %v9863_v55  ;;  %v9955_v54 = vld [vmem:[#allocation5 + $0xb2c] ss:$16 sps:$4 sm:$0xff]   ;;  %v9950_v55 = vld [vmem:[#allocation5 + $0xb20] ss:$16 sps:$4 sm:$0xff]  }
 0x1cb   :  { %5057 = vmatpush1.bf16.msra.mxu0 %v9858_v56  ;;  %5549 = vmatpush1.bf16.msra.mxu1 %v9861_v57  ;;  %v9953_v56 = vld [vmem:[#allocation5 + $0xb28] ss:$16 sps:$4 sm:$0xff]   ;;  %v9958_v57 = vld [vmem:[#allocation5 + $0xb44] ss:$16 sps:$4 sm:$0xff]  }
 0x1cc   :  { %5058 = vmatprep.subr.bf16.mxu0 %v9866_v58  ;;  %5550 = vmatprep.subr.bf16.mxu1 %v9869_v59  ;;  %v9961_v58 = vld [vmem:[#allocation5 + $0xb4c] ss:$16 sps:$4 sm:$0xff]   ;;  %v9956_v59 = vld [vmem:[#allocation5 + $0xb40] ss:$16 sps:$4 sm:$0xff]  }
 0x1cf   :  { %5059 = vmatpush1.bf16.msra.mxu0 %v9864_v60  ;;  %5551 = vmatpush1.bf16.msra.mxu1 %v9867_v61  ;;  %v9959_v60 = vld [vmem:[#allocation5 + $0xb48] ss:$16 sps:$4 sm:$0xff]   ;;  %v9964_v61 = vld [vmem:[#allocation5 + $0xb64] ss:$16 sps:$4 sm:$0xff]  }
 0x1d0   :  { %5060 = vmatprep.subr.bf16.mxu0 %v9872_v62  ;;  %5552 = vmatprep.subr.bf16.mxu1 %v9875_v63  ;;  %v9967_v62 = vld [vmem:[#allocation5 + $0xb6c] ss:$16 sps:$4 sm:$0xff]   ;;  %v9962_v63 = vld [vmem:[#allocation5 + $0xb60] ss:$16 sps:$4 sm:$0xff]  }
 0x1d3   :  { %5061 = vmatpush1.bf16.msra.mxu0 %v9870_v0  ;;  %5553 = vmatpush1.bf16.msra.mxu1 %v9873_v1  ;;  %v9965_v0 = vld [vmem:[#allocation5 + $0xb68] ss:$16 sps:$4 sm:$0xff]   ;;  %v9970_v1 = vld [vmem:[#allocation5 + $0xb84] ss:$16 sps:$4 sm:$0xff]  }
 0x1d4   :  { %5062 = vmatprep.subr.bf16.mxu0 %v9878_v2  ;;  %5554 = vmatprep.subr.bf16.mxu1 %v9881_v3  ;;  %v9973_v2 = vld [vmem:[#allocation5 + $0xb8c] ss:$16 sps:$4 sm:$0xff]   ;;  %v9968_v3 = vld [vmem:[#allocation5 + $0xb80] ss:$16 sps:$4 sm:$0xff]  }
 0x1d7   :  { %5063 = vmatpush1.bf16.msra.mxu0 %v9876_v4  ;;  %5555 = vmatpush1.bf16.msra.mxu1 %v9879_v5  ;;  %v9971_v4 = vld [vmem:[#allocation5 + $0xb88] ss:$16 sps:$4 sm:$0xff]   ;;  %v9976_v5 = vld [vmem:[#allocation5 + $0xba4] ss:$16 sps:$4 sm:$0xff]  }
 0x1d8   :  { %5064 = vmatprep.subr.bf16.mxu0 %v9884_v6  ;;  %5556 = vmatprep.subr.bf16.mxu1 %v9887_v7  ;;  %v9979_v6 = vld [vmem:[#allocation5 + $0xbac] ss:$16 sps:$4 sm:$0xff]   ;;  %v9974_v7 = vld [vmem:[#allocation5 + $0xba0] ss:$16 sps:$4 sm:$0xff]  }
 0x1db   :  { %5065 = vmatpush1.bf16.msra.mxu0 %v9882_v8  ;;  %5557 = vmatpush1.bf16.msra.mxu1 %v9885_v9  ;;  %v9977_v8 = vld [vmem:[#allocation5 + $0xba8] ss:$16 sps:$4 sm:$0xff]   ;;  %v9982_v9 = vld [vmem:[#allocation5 + $0xbc4] ss:$16 sps:$4 sm:$0xff]  }
 0x1dc   :  { %5066 = vmatprep.subr.bf16.mxu0 %v9890_v10  ;;  %5558 = vmatprep.subr.bf16.mxu1 %v9893_v12  ;;  %v9985_v10 = vld [vmem:[#allocation5 + $0xbcc] ss:$16 sps:$4 sm:$0xff]   ;;  %v9980_v12 = vld [vmem:[#allocation5 + $0xbc0] ss:$16 sps:$4 sm:$0xff]  }
 0x1df   :  { %5067 = vmatpush1.bf16.msra.mxu0 %v9888_v13  ;;  %5559 = vmatpush1.bf16.msra.mxu1 %v9891_v15  ;;  %v9983_v13 = vld [vmem:[#allocation5 + $0xbc8] ss:$16 sps:$4 sm:$0xff]   ;;  %v9988_v15 = vld [vmem:[#allocation5 + $0xbe4] ss:$16 sps:$4 sm:$0xff]  }
 0x1e0   :  { %5077 = vmatprep.subr.bf16.mxu0 %v9898_v16  ;;  %5569 = vmatprep.subr.bf16.mxu1 %v9901_v18  ;;  %v9991_v16 = vld [vmem:[#allocation5 + $0xbec] ss:$16 sps:$4 sm:$0xff]   ;;  %v9986_v18 = vld [vmem:[#allocation5 + $0xbe0] ss:$16 sps:$4 sm:$0xff]  }
 0x1e2   :  { %5069 = vmatmul.mubr.bf16.vlgmr.msra.gmra.mrb[0].mxu0 %v8159_v20  ;;  %5561 = vmatmul.mubr.bf16.vlgmr.msra.gmra.mrb[0].mxu1 %v8159_v20  ;;  %v9989_v20 = vld [vmem:[#allocation5 + $0xbe8] ss:$16 sps:$4 sm:$0xff]  }
 0x1e3   :  { %5078 = vmatpush1.bf16.msra.mxu0 %v9896_v11  ;;  %5570 = vmatpush1.bf16.msra.mxu1 %v9899_v21  ;;  %v9996_v11 = vld [vmem:[#allocation5 + $0xc04] ss:$16 sps:$4 sm:$0xff]   ;;  %v9999_v21 = vld [vmem:[#allocation5 + $0xc0c] ss:$16 sps:$4 sm:$0xff]  }
 0x1e4   :  { %5079 = vmatprep.subr.bf16.mxu0 %v9904_v22  ;;  %5571 = vmatprep.subr.bf16.mxu1 %v9907_v14  ;;  %v11439_v22 = vld [vmem:[#allocation2 + $0x30] sm:$0xff]  ;;  %v8161_v14 = vcombine.low %v11433_v19, %v11433_v19 }
 0x1e5   :  { %5109 = vmatprep.mubr.bf16.mxu0 %v8162_v23  ;;  %5601 = vmatprep.mubr.bf16.mxu1 %v8162_v23  ;;  %v9994_v23 = vld [vmem:[#allocation5 + $0xc00] ss:$16 sps:$4 sm:$0xff]   ;;  %v10008_v19 = vld [vmem:[#allocation5 + $0xc44] ss:$16 sps:$4 sm:$0xff]  }
 0x1e7   :  { %5080 = vmatpush1.bf16.msra.mxu0 %v9902_v24  ;;  %5572 = vmatpush1.bf16.msra.mxu1 %v9905_v25  ;;  %v9997_v24 = vld [vmem:[#allocation5 + $0xc08] ss:$16 sps:$4 sm:$0xff]   ;;  %v10002_v25 = vld [vmem:[#allocation5 + $0xc24] ss:$16 sps:$4 sm:$0xff]  }
 0x1e8   :  { %5081 = vmatprep.subr.bf16.mxu0 %v9910_v17  ;;  %5573 = vmatprep.subr.bf16.mxu1 %v9913_v26  ;;  %v10005_v17 = vld [vmem:[#allocation5 + $0xc2c] ss:$16 sps:$4 sm:$0xff]   ;;  %v8164_v26 = vcombine.high %v11439_v22, %v11439_v22 }
 0x1eb   :  { %5082 = vmatpush1.bf16.msra.mxu0 %v9908_v27  ;;  %5574 = vmatpush1.bf16.msra.mxu1 %v9911_v28  ;;  %v10000_v27 = vld [vmem:[#allocation5 + $0xc20] ss:$16 sps:$4 sm:$0xff]   ;;  %v10003_v28 = vld [vmem:[#allocation5 + $0xc28] ss:$16 sps:$4 sm:$0xff]  }
 0x1ec   :  { %5083 = vmatprep.subr.bf16.mxu0 %v9916_v29  ;;  %5575 = vmatprep.subr.bf16.mxu1 %v9919_v30  ;;  %v10011_v29 = vld [vmem:[#allocation5 + $0xc4c] ss:$16 sps:$4 sm:$0xff]   ;;  %v10006_v30 = vld [vmem:[#allocation5 + $0xc40] ss:$16 sps:$4 sm:$0xff]  }
 0x1ef   :  { %5084 = vmatpush1.bf16.msra.mxu0 %v9914_v31  ;;  %5576 = vmatpush1.bf16.msra.mxu1 %v9917_v32  ;;  %v10009_v31 = vld [vmem:[#allocation5 + $0xc48] ss:$16 sps:$4 sm:$0xff]   ;;  %v10014_v32 = vld [vmem:[#allocation5 + $0xc64] ss:$16 sps:$4 sm:$0xff]  }
 0x1f0   :  { %5085 = vmatprep.subr.bf16.mxu0 %v9922_v33  ;;  %5577 = vmatprep.subr.bf16.mxu1 %v9925_v34  ;;  %v10017_v33 = vld [vmem:[#allocation5 + $0xc6c] ss:$16 sps:$4 sm:$0xff]   ;;  %v10012_v34 = vld [vmem:[#allocation5 + $0xc60] ss:$16 sps:$4 sm:$0xff]  }
 0x1f3   :  { %5086 = vmatpush1.bf16.msra.mxu0 %v9920_v35  ;;  %5578 = vmatpush1.bf16.msra.mxu1 %v9923_v36  ;;  %v10015_v35 = vld [vmem:[#allocation5 + $0xc68] ss:$16 sps:$4 sm:$0xff]   ;;  %v10020_v36 = vld [vmem:[#allocation5 + $0xc84] ss:$16 sps:$4 sm:$0xff]  }
 0x1f4   :  { %5087 = vmatprep.subr.bf16.mxu0 %v9928_v37  ;;  %5579 = vmatprep.subr.bf16.mxu1 %v9931_v38  ;;  %v10023_v37 = vld [vmem:[#allocation5 + $0xc8c] ss:$16 sps:$4 sm:$0xff]   ;;  %v10018_v38 = vld [vmem:[#allocation5 + $0xc80] ss:$16 sps:$4 sm:$0xff]  }
 0x1f7   :  { %5088 = vmatpush1.bf16.msra.mxu0 %v9926_v39  ;;  %5580 = vmatpush1.bf16.msra.mxu1 %v9929_v40  ;;  %v10021_v39 = vld [vmem:[#allocation5 + $0xc88] ss:$16 sps:$4 sm:$0xff]   ;;  %v10026_v40 = vld [vmem:[#allocation5 + $0xca4] ss:$16 sps:$4 sm:$0xff]  }
 0x1f8   :  { %5089 = vmatprep.subr.bf16.mxu0 %v9934_v41  ;;  %5581 = vmatprep.subr.bf16.mxu1 %v9937_v42  ;;  %v10029_v41 = vld [vmem:[#allocation5 + $0xcac] ss:$16 sps:$4 sm:$0xff]   ;;  %v10024_v42 = vld [vmem:[#allocation5 + $0xca0] ss:$16 sps:$4 sm:$0xff]  }
 0x1fb   :  { %5090 = vmatpush1.bf16.msra.mxu0 %v9932_v43  ;;  %5582 = vmatpush1.bf16.msra.mxu1 %v9935_v44  ;;  %v10027_v43 = vld [vmem:[#allocation5 + $0xca8] ss:$16 sps:$4 sm:$0xff]   ;;  %v10032_v44 = vld [vmem:[#allocation5 + $0xcc4] ss:$16 sps:$4 sm:$0xff]  }
 0x1fc   :  { %5091 = vmatprep.subr.bf16.mxu0 %v9940_v45  ;;  %5583 = vmatprep.subr.bf16.mxu1 %v9943_v46  ;;  %v10035_v45 = vld [vmem:[#allocation5 + $0xccc] ss:$16 sps:$4 sm:$0xff]   ;;  %v10030_v46 = vld [vmem:[#allocation5 + $0xcc0] ss:$16 sps:$4 sm:$0xff]  }
 0x1ff   :  { %5092 = vmatpush1.bf16.msra.mxu0 %v9938_v47  ;;  %5584 = vmatpush1.bf16.msra.mxu1 %v9941_v48  ;;  %v10033_v47 = vld [vmem:[#allocation5 + $0xcc8] ss:$16 sps:$4 sm:$0xff]   ;;  %v10038_v48 = vld [vmem:[#allocation5 + $0xce4] ss:$16 sps:$4 sm:$0xff]  }
 0x200   :  { %5093 = vmatprep.subr.bf16.mxu0 %v9946_v49  ;;  %5585 = vmatprep.subr.bf16.mxu1 %v9949_v50  ;;  %v10041_v49 = vld [vmem:[#allocation5 + $0xcec] ss:$16 sps:$4 sm:$0xff]   ;;  %v10036_v50 = vld [vmem:[#allocation5 + $0xce0] ss:$16 sps:$4 sm:$0xff]  }
 0x203   :  { %5094 = vmatpush1.bf16.msra.mxu0 %v9944_v51  ;;  %5586 = vmatpush1.bf16.msra.mxu1 %v9947_v52  ;;  %v10039_v51 = vld [vmem:[#allocation5 + $0xce8] ss:$16 sps:$4 sm:$0xff]   ;;  %v10044_v52 = vld [vmem:[#allocation5 + $0xd04] ss:$16 sps:$4 sm:$0xff]  }
 0x204   :  { %5095 = vmatprep.subr.bf16.mxu0 %v9952_v53  ;;  %5587 = vmatprep.subr.bf16.mxu1 %v9955_v54  ;;  %v10047_v53 = vld [vmem:[#allocation5 + $0xd0c] ss:$16 sps:$4 sm:$0xff]   ;;  %v10042_v54 = vld [vmem:[#allocation5 + $0xd00] ss:$16 sps:$4 sm:$0xff]  }
 0x207   :  { %5096 = vmatpush1.bf16.msra.mxu0 %v9950_v55  ;;  %5588 = vmatpush1.bf16.msra.mxu1 %v9953_v56  ;;  %v10045_v55 = vld [vmem:[#allocation5 + $0xd08] ss:$16 sps:$4 sm:$0xff]   ;;  %v10050_v56 = vld [vmem:[#allocation5 + $0xd24] ss:$16 sps:$4 sm:$0xff]  }
 0x208   :  { %5097 = vmatprep.subr.bf16.mxu0 %v9958_v57  ;;  %5589 = vmatprep.subr.bf16.mxu1 %v9961_v58  ;;  %v10053_v57 = vld [vmem:[#allocation5 + $0xd2c] ss:$16 sps:$4 sm:$0xff]   ;;  %v10048_v58 = vld [vmem:[#allocation5 + $0xd20] ss:$16 sps:$4 sm:$0xff]  }
 0x20b   :  { %5098 = vmatpush1.bf16.msra.mxu0 %v9956_v59  ;;  %5590 = vmatpush1.bf16.msra.mxu1 %v9959_v60  ;;  %v10051_v59 = vld [vmem:[#allocation5 + $0xd28] ss:$16 sps:$4 sm:$0xff]   ;;  %v10056_v60 = vld [vmem:[#allocation5 + $0xd44] ss:$16 sps:$4 sm:$0xff]  }
 0x20c   :  { %5099 = vmatprep.subr.bf16.mxu0 %v9964_v61  ;;  %5591 = vmatprep.subr.bf16.mxu1 %v9967_v62  ;;  %v10059_v61 = vld [vmem:[#allocation5 + $0xd4c] ss:$16 sps:$4 sm:$0xff]   ;;  %v10054_v62 = vld [vmem:[#allocation5 + $0xd40] ss:$16 sps:$4 sm:$0xff]  }
 0x20f   :  { %5100 = vmatpush1.bf16.msra.mxu0 %v9962_v63  ;;  %5592 = vmatpush1.bf16.msra.mxu1 %v9965_v0  ;;  %v10057_v63 = vld [vmem:[#allocation5 + $0xd48] ss:$16 sps:$4 sm:$0xff]   ;;  %v10062_v0 = vld [vmem:[#allocation5 + $0xd64] ss:$16 sps:$4 sm:$0xff]  }
 0x210   :  { %5101 = vmatprep.subr.bf16.mxu0 %v9970_v1  ;;  %5593 = vmatprep.subr.bf16.mxu1 %v9973_v2  ;;  %v10065_v1 = vld [vmem:[#allocation5 + $0xd6c] ss:$16 sps:$4 sm:$0xff]   ;;  %v10060_v2 = vld [vmem:[#allocation5 + $0xd60] ss:$16 sps:$4 sm:$0xff]  }
 0x213   :  { %5102 = vmatpush1.bf16.msra.mxu0 %v9968_v3  ;;  %5594 = vmatpush1.bf16.msra.mxu1 %v9971_v4  ;;  %v10063_v3 = vld [vmem:[#allocation5 + $0xd68] ss:$16 sps:$4 sm:$0xff]   ;;  %v10068_v4 = vld [vmem:[#allocation5 + $0xd84] ss:$16 sps:$4 sm:$0xff]  }
 0x214   :  { %5103 = vmatprep.subr.bf16.mxu0 %v9976_v5  ;;  %5595 = vmatprep.subr.bf16.mxu1 %v9979_v6  ;;  %v10071_v5 = vld [vmem:[#allocation5 + $0xd8c] ss:$16 sps:$4 sm:$0xff]   ;;  %v10066_v6 = vld [vmem:[#allocation5 + $0xd80] ss:$16 sps:$4 sm:$0xff]  }
 0x217   :  { %5104 = vmatpush1.bf16.msra.mxu0 %v9974_v7  ;;  %5596 = vmatpush1.bf16.msra.mxu1 %v9977_v8  ;;  %v10069_v7 = vld [vmem:[#allocation5 + $0xd88] ss:$16 sps:$4 sm:$0xff]   ;;  %v10074_v8 = vld [vmem:[#allocation5 + $0xda4] ss:$16 sps:$4 sm:$0xff]  }
 0x218   :  { %5105 = vmatprep.subr.bf16.mxu0 %v9982_v9  ;;  %5597 = vmatprep.subr.bf16.mxu1 %v9985_v10  ;;  %v10077_v9 = vld [vmem:[#allocation5 + $0xdac] ss:$16 sps:$4 sm:$0xff]   ;;  %v10072_v10 = vld [vmem:[#allocation5 + $0xda0] ss:$16 sps:$4 sm:$0xff]  }
 0x21b   :  { %5106 = vmatpush1.bf16.msra.mxu0 %v9980_v12  ;;  %5598 = vmatpush1.bf16.msra.mxu1 %v9983_v13  ;;  %v10075_v12 = vld [vmem:[#allocation5 + $0xda8] ss:$16 sps:$4 sm:$0xff]   ;;  %v10080_v13 = vld [vmem:[#allocation5 + $0xdc4] ss:$16 sps:$4 sm:$0xff]  }
 0x21c   :  { %5107 = vmatprep.subr.bf16.mxu0 %v9988_v15  ;;  %5599 = vmatprep.subr.bf16.mxu1 %v9991_v16  ;;  %v10083_v15 = vld [vmem:[#allocation5 + $0xdcc] ss:$16 sps:$4 sm:$0xff]   ;;  %v10078_v16 = vld [vmem:[#allocation5 + $0xdc0] ss:$16 sps:$4 sm:$0xff]  }
 0x21f   :  { %5108 = vmatpush1.bf16.msra.mxu0 %v9986_v18  ;;  %5600 = vmatpush1.bf16.msra.mxu1 %v9989_v20  ;;  %v10081_v18 = vld [vmem:[#allocation5 + $0xdc8] ss:$16 sps:$4 sm:$0xff]   ;;  %v10086_v20 = vld [vmem:[#allocation5 + $0xde4] ss:$16 sps:$4 sm:$0xff]  }
 0x220   :  { %5118 = vmatprep.subr.bf16.mxu0 %v9996_v11  ;;  %5610 = vmatprep.subr.bf16.mxu1 %v9999_v21  ;;  %v10089_v11 = vld [vmem:[#allocation5 + $0xdec] ss:$16 sps:$4 sm:$0xff]   ;;  %v10084_v21 = vld [vmem:[#allocation5 + $0xde0] ss:$16 sps:$4 sm:$0xff]  }
 0x222   :  { %5110 = vmatmul.mubr.bf16.vlgmr.msra.gmra.mrb[0].mxu0 %v8161_v14  ;;  %5602 = vmatmul.mubr.bf16.vlgmr.msra.gmra.mrb[0].mxu1 %v8161_v14  ;;  %v10087_v14 = vld [vmem:[#allocation5 + $0xde8] ss:$16 sps:$4 sm:$0xff]  }
 0x223   :  { %5119 = vmatpush1.bf16.msra.mxu0 %v9994_v23  ;;  %5611 = vmatpush1.bf16.msra.mxu1 %v9997_v24  ;;  %v10094_v23 = vld [vmem:[#allocation5 + $0xe04] ss:$16 sps:$4 sm:$0xff]   ;;  %v10097_v24 = vld [vmem:[#allocation5 + $0xe0c] ss:$16 sps:$4 sm:$0xff]  }
 0x224   :  { %5120 = vmatprep.subr.bf16.mxu0 %v10002_v25  ;;  %5612 = vmatprep.subr.bf16.mxu1 %v10005_v17  ;;  %v11445_v25 = vld [vmem:[#allocation2 + $0x38] sm:$0xff]  ;;  %v8163_v17 = vcombine.low %v11439_v22, %v11439_v22  ;;  %v10106_v22 = vld [vmem:[#allocation5 + $0xe44] ss:$16 sps:$4 sm:$0xff]  }
 0x225   :  { %5150 = vmatprep.mubr.bf16.mxu0 %v8164_v26  ;;  %5642 = vmatprep.mubr.bf16.mxu1 %v8164_v26  ;;  %v10092_v26 = vld [vmem:[#allocation5 + $0xe00] ss:$16 sps:$4 sm:$0xff]  }
 0x227   :  { %5121 = vmatpush1.bf16.msra.mxu0 %v10000_v27  ;;  %5613 = vmatpush1.bf16.msra.mxu1 %v10003_v28  ;;  %v10095_v27 = vld [vmem:[#allocation5 + $0xe08] ss:$16 sps:$4 sm:$0xff]   ;;  %v10100_v28 = vld [vmem:[#allocation5 + $0xe24] ss:$16 sps:$4 sm:$0xff]  }
 0x228   :  { %5122 = vmatprep.subr.bf16.mxu0 %v10008_v19  ;;  %5614 = vmatprep.subr.bf16.mxu1 %v10011_v29  ;;  %v10103_v19 = vld [vmem:[#allocation5 + $0xe2c] ss:$16 sps:$4 sm:$0xff]   ;;  %v8166_v29 = vcombine.high %v11445_v25, %v11445_v25 }
 0x22b   :  { %5123 = vmatpush1.bf16.msra.mxu0 %v10006_v30  ;;  %5615 = vmatpush1.bf16.msra.mxu1 %v10009_v31  ;;  %v10098_v30 = vld [vmem:[#allocation5 + $0xe20] ss:$16 sps:$4 sm:$0xff]   ;;  %v10101_v31 = vld [vmem:[#allocation5 + $0xe28] ss:$16 sps:$4 sm:$0xff]  }
 0x22c   :  { %5124 = vmatprep.subr.bf16.mxu0 %v10014_v32  ;;  %5616 = vmatprep.subr.bf16.mxu1 %v10017_v33  ;;  %v10109_v32 = vld [vmem:[#allocation5 + $0xe4c] ss:$16 sps:$4 sm:$0xff]   ;;  %v10104_v33 = vld [vmem:[#allocation5 + $0xe40] ss:$16 sps:$4 sm:$0xff]  }
 0x22f   :  { %5125 = vmatpush1.bf16.msra.mxu0 %v10012_v34  ;;  %5617 = vmatpush1.bf16.msra.mxu1 %v10015_v35  ;;  %v10107_v34 = vld [vmem:[#allocation5 + $0xe48] ss:$16 sps:$4 sm:$0xff]   ;;  %v10112_v35 = vld [vmem:[#allocation5 + $0xe64] ss:$16 sps:$4 sm:$0xff]  }
 0x230   :  { %5126 = vmatprep.subr.bf16.mxu0 %v10020_v36  ;;  %5618 = vmatprep.subr.bf16.mxu1 %v10023_v37  ;;  %v10115_v36 = vld [vmem:[#allocation5 + $0xe6c] ss:$16 sps:$4 sm:$0xff]   ;;  %v10110_v37 = vld [vmem:[#allocation5 + $0xe60] ss:$16 sps:$4 sm:$0xff]  }
 0x233   :  { %5127 = vmatpush1.bf16.msra.mxu0 %v10018_v38  ;;  %5619 = vmatpush1.bf16.msra.mxu1 %v10021_v39  ;;  %v10113_v38 = vld [vmem:[#allocation5 + $0xe68] ss:$16 sps:$4 sm:$0xff]   ;;  %v10118_v39 = vld [vmem:[#allocation5 + $0xe84] ss:$16 sps:$4 sm:$0xff]  }
 0x234   :  { %5128 = vmatprep.subr.bf16.mxu0 %v10026_v40  ;;  %5620 = vmatprep.subr.bf16.mxu1 %v10029_v41  ;;  %v10121_v40 = vld [vmem:[#allocation5 + $0xe8c] ss:$16 sps:$4 sm:$0xff]   ;;  %v10116_v41 = vld [vmem:[#allocation5 + $0xe80] ss:$16 sps:$4 sm:$0xff]  }
 0x237   :  { %5129 = vmatpush1.bf16.msra.mxu0 %v10024_v42  ;;  %5621 = vmatpush1.bf16.msra.mxu1 %v10027_v43  ;;  %v10119_v42 = vld [vmem:[#allocation5 + $0xe88] ss:$16 sps:$4 sm:$0xff]   ;;  %v10124_v43 = vld [vmem:[#allocation5 + $0xea4] ss:$16 sps:$4 sm:$0xff]  }
 0x238   :  { %5130 = vmatprep.subr.bf16.mxu0 %v10032_v44  ;;  %5622 = vmatprep.subr.bf16.mxu1 %v10035_v45  ;;  %v10127_v44 = vld [vmem:[#allocation5 + $0xeac] ss:$16 sps:$4 sm:$0xff]   ;;  %v10122_v45 = vld [vmem:[#allocation5 + $0xea0] ss:$16 sps:$4 sm:$0xff]  }
 0x23b   :  { %5131 = vmatpush1.bf16.msra.mxu0 %v10030_v46  ;;  %5623 = vmatpush1.bf16.msra.mxu1 %v10033_v47  ;;  %v10125_v46 = vld [vmem:[#allocation5 + $0xea8] ss:$16 sps:$4 sm:$0xff]   ;;  %v10130_v47 = vld [vmem:[#allocation5 + $0xec4] ss:$16 sps:$4 sm:$0xff]  }
 0x23c   :  { %5132 = vmatprep.subr.bf16.mxu0 %v10038_v48  ;;  %5624 = vmatprep.subr.bf16.mxu1 %v10041_v49  ;;  %v10133_v48 = vld [vmem:[#allocation5 + $0xecc] ss:$16 sps:$4 sm:$0xff]   ;;  %v10128_v49 = vld [vmem:[#allocation5 + $0xec0] ss:$16 sps:$4 sm:$0xff]  }
 0x23f   :  { %5133 = vmatpush1.bf16.msra.mxu0 %v10036_v50  ;;  %5625 = vmatpush1.bf16.msra.mxu1 %v10039_v51  ;;  %v10131_v50 = vld [vmem:[#allocation5 + $0xec8] ss:$16 sps:$4 sm:$0xff]   ;;  %v10136_v51 = vld [vmem:[#allocation5 + $0xee4] ss:$16 sps:$4 sm:$0xff]  }
 0x240   :  { %5134 = vmatprep.subr.bf16.mxu0 %v10044_v52  ;;  %5626 = vmatprep.subr.bf16.mxu1 %v10047_v53  ;;  %v10139_v52 = vld [vmem:[#allocation5 + $0xeec] ss:$16 sps:$4 sm:$0xff]   ;;  %v10134_v53 = vld [vmem:[#allocation5 + $0xee0] ss:$16 sps:$4 sm:$0xff]  }
 0x243   :  { %5135 = vmatpush1.bf16.msra.mxu0 %v10042_v54  ;;  %5627 = vmatpush1.bf16.msra.mxu1 %v10045_v55  ;;  %v10137_v54 = vld [vmem:[#allocation5 + $0xee8] ss:$16 sps:$4 sm:$0xff]   ;;  %v10142_v55 = vld [vmem:[#allocation5 + $0xf04] ss:$16 sps:$4 sm:$0xff]  }
 0x244   :  { %5136 = vmatprep.subr.bf16.mxu0 %v10050_v56  ;;  %5628 = vmatprep.subr.bf16.mxu1 %v10053_v57  ;;  %v10145_v56 = vld [vmem:[#allocation5 + $0xf0c] ss:$16 sps:$4 sm:$0xff]   ;;  %v10140_v57 = vld [vmem:[#allocation5 + $0xf00] ss:$16 sps:$4 sm:$0xff]  }
 0x247   :  { %5137 = vmatpush1.bf16.msra.mxu0 %v10048_v58  ;;  %5629 = vmatpush1.bf16.msra.mxu1 %v10051_v59  ;;  %v10143_v58 = vld [vmem:[#allocation5 + $0xf08] ss:$16 sps:$4 sm:$0xff]   ;;  %v10148_v59 = vld [vmem:[#allocation5 + $0xf24] ss:$16 sps:$4 sm:$0xff]  }
 0x248   :  { %5138 = vmatprep.subr.bf16.mxu0 %v10056_v60  ;;  %5630 = vmatprep.subr.bf16.mxu1 %v10059_v61  ;;  %v10151_v60 = vld [vmem:[#allocation5 + $0xf2c] ss:$16 sps:$4 sm:$0xff]   ;;  %v10146_v61 = vld [vmem:[#allocation5 + $0xf20] ss:$16 sps:$4 sm:$0xff]  }
 0x24b   :  { %5139 = vmatpush1.bf16.msra.mxu0 %v10054_v62  ;;  %5631 = vmatpush1.bf16.msra.mxu1 %v10057_v63  ;;  %v10149_v62 = vld [vmem:[#allocation5 + $0xf28] ss:$16 sps:$4 sm:$0xff]   ;;  %v10154_v63 = vld [vmem:[#allocation5 + $0xf44] ss:$16 sps:$4 sm:$0xff]  }
 0x24c   :  { %5140 = vmatprep.subr.bf16.mxu0 %v10062_v0  ;;  %5632 = vmatprep.subr.bf16.mxu1 %v10065_v1  ;;  %v10157_v0 = vld [vmem:[#allocation5 + $0xf4c] ss:$16 sps:$4 sm:$0xff]   ;;  %v10152_v1 = vld [vmem:[#allocation5 + $0xf40] ss:$16 sps:$4 sm:$0xff]  }
 0x24f   :  { %5141 = vmatpush1.bf16.msra.mxu0 %v10060_v2  ;;  %5633 = vmatpush1.bf16.msra.mxu1 %v10063_v3  ;;  %v10155_v2 = vld [vmem:[#allocation5 + $0xf48] ss:$16 sps:$4 sm:$0xff]   ;;  %v10160_v3 = vld [vmem:[#allocation5 + $0xf64] ss:$16 sps:$4 sm:$0xff]  }
 0x250   :  { %5142 = vmatprep.subr.bf16.mxu0 %v10068_v4  ;;  %5634 = vmatprep.subr.bf16.mxu1 %v10071_v5  ;;  %v10163_v4 = vld [vmem:[#allocation5 + $0xf6c] ss:$16 sps:$4 sm:$0xff]   ;;  %v10158_v5 = vld [vmem:[#allocation5 + $0xf60] ss:$16 sps:$4 sm:$0xff]  }
 0x253   :  { %5143 = vmatpush1.bf16.msra.mxu0 %v10066_v6  ;;  %5635 = vmatpush1.bf16.msra.mxu1 %v10069_v7  ;;  %v10161_v6 = vld [vmem:[#allocation5 + $0xf68] ss:$16 sps:$4 sm:$0xff]   ;;  %v10166_v7 = vld [vmem:[#allocation5 + $0xf84] ss:$16 sps:$4 sm:$0xff]  }
 0x254   :  { %5144 = vmatprep.subr.bf16.mxu0 %v10074_v8  ;;  %5636 = vmatprep.subr.bf16.mxu1 %v10077_v9  ;;  %v10169_v8 = vld [vmem:[#allocation5 + $0xf8c] ss:$16 sps:$4 sm:$0xff]   ;;  %v10164_v9 = vld [vmem:[#allocation5 + $0xf80] ss:$16 sps:$4 sm:$0xff]  }
 0x257   :  { %5145 = vmatpush1.bf16.msra.mxu0 %v10072_v10  ;;  %5637 = vmatpush1.bf16.msra.mxu1 %v10075_v12  ;;  %v10167_v10 = vld [vmem:[#allocation5 + $0xf88] ss:$16 sps:$4 sm:$0xff]   ;;  %v10172_v12 = vld [vmem:[#allocation5 + $0xfa4] ss:$16 sps:$4 sm:$0xff]  }
 0x258   :  { %5146 = vmatprep.subr.bf16.mxu0 %v10080_v13  ;;  %5638 = vmatprep.subr.bf16.mxu1 %v10083_v15  ;;  %v10175_v13 = vld [vmem:[#allocation5 + $0xfac] ss:$16 sps:$4 sm:$0xff]   ;;  %v10170_v15 = vld [vmem:[#allocation5 + $0xfa0] ss:$16 sps:$4 sm:$0xff]  }
 0x25b   :  { %5147 = vmatpush1.bf16.msra.mxu0 %v10078_v16  ;;  %5639 = vmatpush1.bf16.msra.mxu1 %v10081_v18  ;;  %v10173_v16 = vld [vmem:[#allocation5 + $0xfa8] ss:$16 sps:$4 sm:$0xff]   ;;  %v10178_v18 = vld [vmem:[#allocation5 + $0xfc4] ss:$16 sps:$4 sm:$0xff]  }
 0x25c   :  { %5148 = vmatprep.subr.bf16.mxu0 %v10086_v20  ;;  %5640 = vmatprep.subr.bf16.mxu1 %v10089_v11  ;;  %v10181_v20 = vld [vmem:[#allocation5 + $0xfcc] ss:$16 sps:$4 sm:$0xff]   ;;  %v10176_v11 = vld [vmem:[#allocation5 + $0xfc0] ss:$16 sps:$4 sm:$0xff]  }
 0x25f   :  { %5149 = vmatpush1.bf16.msra.mxu0 %v10084_v21  ;;  %5641 = vmatpush1.bf16.msra.mxu1 %v10087_v14  ;;  %v10179_v21 = vld [vmem:[#allocation5 + $0xfc8] ss:$16 sps:$4 sm:$0xff]   ;;  %v10184_v14 = vld [vmem:[#allocation5 + $0xfe4] ss:$16 sps:$4 sm:$0xff]  }
 0x260   :  { %5159 = vmatprep.subr.bf16.mxu0 %v10094_v23  ;;  %5651 = vmatprep.subr.bf16.mxu1 %v10097_v24  ;;  %v10187_v23 = vld [vmem:[#allocation5 + $0xfec] ss:$16 sps:$4 sm:$0xff]   ;;  %v10182_v24 = vld [vmem:[#allocation5 + $0xfe0] ss:$16 sps:$4 sm:$0xff]  }
 0x262   :  { %5151 = vmatmul.mubr.bf16.vlgmr.msra.gmra.mrb[0].mxu0 %v8163_v17  ;;  %5643 = vmatmul.mubr.bf16.vlgmr.msra.gmra.mrb[0].mxu1 %v8163_v17  ;;  %v10185_v17 = vld [vmem:[#allocation5 + $0xfe8] ss:$16 sps:$4 sm:$0xff]  }
 0x263   :  { %5160 = vmatpush1.bf16.msra.mxu0 %v10092_v26  ;;  %5652 = vmatpush1.bf16.msra.mxu1 %v10095_v27  ;;  %v10192_v26 = vld [vmem:[#allocation5 + $0x1004] ss:$16 sps:$4 sm:$0xff]   ;;  %v10195_v27 = vld [vmem:[#allocation5 + $0x100c] ss:$16 sps:$4 sm:$0xff]  }
 0x264   :  { %5161 = vmatprep.subr.bf16.mxu0 %v10100_v28  ;;  %5653 = vmatprep.subr.bf16.mxu1 %v10103_v19  ;;  %v11451_v28 = vld [vmem:[#allocation2 + $0x40] sm:$0xff]  ;;  %v8165_v19 = vcombine.low %v11445_v25, %v11445_v25 }
 0x265   :  { %5191 = vmatprep.mubr.bf16.mxu0 %v8166_v29  ;;  %5683 = vmatprep.mubr.bf16.mxu1 %v8166_v29  ;;  %v10190_v29 = vld [vmem:[#allocation5 + $0x1000] ss:$16 sps:$4 sm:$0xff]   ;;  %v10204_v25 = vld [vmem:[#allocation5 + $0x1044] ss:$16 sps:$4 sm:$0xff]  }
 0x267   :  { %5162 = vmatpush1.bf16.msra.mxu0 %v10098_v30  ;;  %5654 = vmatpush1.bf16.msra.mxu1 %v10101_v31  ;;  %v10193_v30 = vld [vmem:[#allocation5 + $0x1008] ss:$16 sps:$4 sm:$0xff]   ;;  %v10198_v31 = vld [vmem:[#allocation5 + $0x1024] ss:$16 sps:$4 sm:$0xff]  }
 0x268   :  { %5163 = vmatprep.subr.bf16.mxu0 %v10106_v22  ;;  %5655 = vmatprep.subr.bf16.mxu1 %v10109_v32  ;;  %v10201_v22 = vld [vmem:[#allocation5 + $0x102c] ss:$16 sps:$4 sm:$0xff]   ;;  %v8168_v32 = vcombine.high %v11451_v28, %v11451_v28 }
 0x26b   :  { %5164 = vmatpush1.bf16.msra.mxu0 %v10104_v33  ;;  %5656 = vmatpush1.bf16.msra.mxu1 %v10107_v34  ;;  %v10196_v33 = vld [vmem:[#allocation5 + $0x1020] ss:$16 sps:$4 sm:$0xff]   ;;  %v10199_v34 = vld [vmem:[#allocation5 + $0x1028] ss:$16 sps:$4 sm:$0xff]  }
 0x26c   :  { %5165 = vmatprep.subr.bf16.mxu0 %v10112_v35  ;;  %5657 = vmatprep.subr.bf16.mxu1 %v10115_v36  ;;  %v10207_v35 = vld [vmem:[#allocation5 + $0x104c] ss:$16 sps:$4 sm:$0xff]   ;;  %v10202_v36 = vld [vmem:[#allocation5 + $0x1040] ss:$16 sps:$4 sm:$0xff]  }
 0x26f   :  { %5166 = vmatpush1.bf16.msra.mxu0 %v10110_v37  ;;  %5658 = vmatpush1.bf16.msra.mxu1 %v10113_v38  ;;  %v10205_v37 = vld [vmem:[#allocation5 + $0x1048] ss:$16 sps:$4 sm:$0xff]   ;;  %v10210_v38 = vld [vmem:[#allocation5 + $0x1064] ss:$16 sps:$4 sm:$0xff]  }
 0x270   :  { %5167 = vmatprep.subr.bf16.mxu0 %v10118_v39  ;;  %5659 = vmatprep.subr.bf16.mxu1 %v10121_v40  ;;  %v10213_v39 = vld [vmem:[#allocation5 + $0x106c] ss:$16 sps:$4 sm:$0xff]   ;;  %v10208_v40 = vld [vmem:[#allocation5 + $0x1060] ss:$16 sps:$4 sm:$0xff]  }
 0x273   :  { %5168 = vmatpush1.bf16.msra.mxu0 %v10116_v41  ;;  %5660 = vmatpush1.bf16.msra.mxu1 %v10119_v42  ;;  %v10211_v41 = vld [vmem:[#allocation5 + $0x1068] ss:$16 sps:$4 sm:$0xff]   ;;  %v10216_v42 = vld [vmem:[#allocation5 + $0x1084] ss:$16 sps:$4 sm:$0xff]  }
 0x274   :  { %5169 = vmatprep.subr.bf16.mxu0 %v10124_v43  ;;  %5661 = vmatprep.subr.bf16.mxu1 %v10127_v44  ;;  %v10219_v43 = vld [vmem:[#allocation5 + $0x108c] ss:$16 sps:$4 sm:$0xff]   ;;  %v10214_v44 = vld [vmem:[#allocation5 + $0x1080] ss:$16 sps:$4 sm:$0xff]  }
 0x277   :  { %5170 = vmatpush1.bf16.msra.mxu0 %v10122_v45  ;;  %5662 = vmatpush1.bf16.msra.mxu1 %v10125_v46  ;;  %v10217_v45 = vld [vmem:[#allocation5 + $0x1088] ss:$16 sps:$4 sm:$0xff]   ;;  %v10222_v46 = vld [vmem:[#allocation5 + $0x10a4] ss:$16 sps:$4 sm:$0xff]  }
 0x278   :  { %5171 = vmatprep.subr.bf16.mxu0 %v10130_v47  ;;  %5663 = vmatprep.subr.bf16.mxu1 %v10133_v48  ;;  %v10225_v47 = vld [vmem:[#allocation5 + $0x10ac] ss:$16 sps:$4 sm:$0xff]   ;;  %v10220_v48 = vld [vmem:[#allocation5 + $0x10a0] ss:$16 sps:$4 sm:$0xff]  }
 0x27b   :  { %5172 = vmatpush1.bf16.msra.mxu0 %v10128_v49  ;;  %5664 = vmatpush1.bf16.msra.mxu1 %v10131_v50  ;;  %v10223_v49 = vld [vmem:[#allocation5 + $0x10a8] ss:$16 sps:$4 sm:$0xff]   ;;  %v10228_v50 = vld [vmem:[#allocation5 + $0x10c4] ss:$16 sps:$4 sm:$0xff]  }
 0x27c   :  { %5173 = vmatprep.subr.bf16.mxu0 %v10136_v51  ;;  %5665 = vmatprep.subr.bf16.mxu1 %v10139_v52  ;;  %v10231_v51 = vld [vmem:[#allocation5 + $0x10cc] ss:$16 sps:$4 sm:$0xff]   ;;  %v10226_v52 = vld [vmem:[#allocation5 + $0x10c0] ss:$16 sps:$4 sm:$0xff]  }
 0x27f   :  { %5174 = vmatpush1.bf16.msra.mxu0 %v10134_v53  ;;  %5666 = vmatpush1.bf16.msra.mxu1 %v10137_v54  ;;  %v10229_v53 = vld [vmem:[#allocation5 + $0x10c8] ss:$16 sps:$4 sm:$0xff]   ;;  %v10234_v54 = vld [vmem:[#allocation5 + $0x10e4] ss:$16 sps:$4 sm:$0xff]  }
 0x280   :  { %5175 = vmatprep.subr.bf16.mxu0 %v10142_v55  ;;  %5667 = vmatprep.subr.bf16.mxu1 %v10145_v56  ;;  %v10237_v55 = vld [vmem:[#allocation5 + $0x10ec] ss:$16 sps:$4 sm:$0xff]   ;;  %v10232_v56 = vld [vmem:[#allocation5 + $0x10e0] ss:$16 sps:$4 sm:$0xff]  }
 0x283   :  { %5176 = vmatpush1.bf16.msra.mxu0 %v10140_v57  ;;  %5668 = vmatpush1.bf16.msra.mxu1 %v10143_v58  ;;  %v10235_v57 = vld [vmem:[#allocation5 + $0x10e8] ss:$16 sps:$4 sm:$0xff]   ;;  %v10240_v58 = vld [vmem:[#allocation5 + $0x1104] ss:$16 sps:$4 sm:$0xff]  }
 0x284   :  { %5177 = vmatprep.subr.bf16.mxu0 %v10148_v59  ;;  %5669 = vmatprep.subr.bf16.mxu1 %v10151_v60  ;;  %v10243_v59 = vld [vmem:[#allocation5 + $0x110c] ss:$16 sps:$4 sm:$0xff]   ;;  %v10238_v60 = vld [vmem:[#allocation5 + $0x1100] ss:$16 sps:$4 sm:$0xff]  }
 0x287   :  { %5178 = vmatpush1.bf16.msra.mxu0 %v10146_v61  ;;  %5670 = vmatpush1.bf16.msra.mxu1 %v10149_v62  ;;  %v10241_v61 = vld [vmem:[#allocation5 + $0x1108] ss:$16 sps:$4 sm:$0xff]   ;;  %v10246_v62 = vld [vmem:[#allocation5 + $0x1124] ss:$16 sps:$4 sm:$0xff]  }
 0x288   :  { %5179 = vmatprep.subr.bf16.mxu0 %v10154_v63  ;;  %5671 = vmatprep.subr.bf16.mxu1 %v10157_v0  ;;  %v10249_v63 = vld [vmem:[#allocation5 + $0x112c] ss:$16 sps:$4 sm:$0xff]   ;;  %v10244_v0 = vld [vmem:[#allocation5 + $0x1120] ss:$16 sps:$4 sm:$0xff]  }
 0x28b   :  { %5180 = vmatpush1.bf16.msra.mxu0 %v10152_v1  ;;  %5672 = vmatpush1.bf16.msra.mxu1 %v10155_v2  ;;  %v10247_v1 = vld [vmem:[#allocation5 + $0x1128] ss:$16 sps:$4 sm:$0xff]   ;;  %v10252_v2 = vld [vmem:[#allocation5 + $0x1144] ss:$16 sps:$4 sm:$0xff]  }
 0x28c   :  { %5181 = vmatprep.subr.bf16.mxu0 %v10160_v3  ;;  %5673 = vmatprep.subr.bf16.mxu1 %v10163_v4  ;;  %v10255_v3 = vld [vmem:[#allocation5 + $0x114c] ss:$16 sps:$4 sm:$0xff]   ;;  %v10250_v4 = vld [vmem:[#allocation5 + $0x1140] ss:$16 sps:$4 sm:$0xff]  }
 0x28f   :  { %5182 = vmatpush1.bf16.msra.mxu0 %v10158_v5  ;;  %5674 = vmatpush1.bf16.msra.mxu1 %v10161_v6  ;;  %v10253_v5 = vld [vmem:[#allocation5 + $0x1148] ss:$16 sps:$4 sm:$0xff]   ;;  %v10258_v6 = vld [vmem:[#allocation5 + $0x1164] ss:$16 sps:$4 sm:$0xff]  }
 0x290   :  { %5183 = vmatprep.subr.bf16.mxu0 %v10166_v7  ;;  %5675 = vmatprep.subr.bf16.mxu1 %v10169_v8  ;;  %v10261_v7 = vld [vmem:[#allocation5 + $0x116c] ss:$16 sps:$4 sm:$0xff]   ;;  %v10256_v8 = vld [vmem:[#allocation5 + $0x1160] ss:$16 sps:$4 sm:$0xff]  }
 0x293   :  { %5184 = vmatpush1.bf16.msra.mxu0 %v10164_v9  ;;  %5676 = vmatpush1.bf16.msra.mxu1 %v10167_v10  ;;  %v10259_v9 = vld [vmem:[#allocation5 + $0x1168] ss:$16 sps:$4 sm:$0xff]   ;;  %v10264_v10 = vld [vmem:[#allocation5 + $0x1184] ss:$16 sps:$4 sm:$0xff]  }
 0x294   :  { %5185 = vmatprep.subr.bf16.mxu0 %v10172_v12  ;;  %5677 = vmatprep.subr.bf16.mxu1 %v10175_v13  ;;  %v10267_v12 = vld [vmem:[#allocation5 + $0x118c] ss:$16 sps:$4 sm:$0xff]   ;;  %v10262_v13 = vld [vmem:[#allocation5 + $0x1180] ss:$16 sps:$4 sm:$0xff]  }
 0x297   :  { %5186 = vmatpush1.bf16.msra.mxu0 %v10170_v15  ;;  %5678 = vmatpush1.bf16.msra.mxu1 %v10173_v16  ;;  %v10265_v15 = vld [vmem:[#allocation5 + $0x1188] ss:$16 sps:$4 sm:$0xff]   ;;  %v10270_v16 = vld [vmem:[#allocation5 + $0x11a4] ss:$16 sps:$4 sm:$0xff]  }
 0x298   :  { %5187 = vmatprep.subr.bf16.mxu0 %v10178_v18  ;;  %5679 = vmatprep.subr.bf16.mxu1 %v10181_v20  ;;  %v10273_v18 = vld [vmem:[#allocation5 + $0x11ac] ss:$16 sps:$4 sm:$0xff]   ;;  %v10268_v20 = vld [vmem:[#allocation5 + $0x11a0] ss:$16 sps:$4 sm:$0xff]  }
 0x29b   :  { %5188 = vmatpush1.bf16.msra.mxu0 %v10176_v11  ;;  %5680 = vmatpush1.bf16.msra.mxu1 %v10179_v21  ;;  %v10271_v11 = vld [vmem:[#allocation5 + $0x11a8] ss:$16 sps:$4 sm:$0xff]   ;;  %v10276_v21 = vld [vmem:[#allocation5 + $0x11c4] ss:$16 sps:$4 sm:$0xff]  }
 0x29c   :  { %5189 = vmatprep.subr.bf16.mxu0 %v10184_v14  ;;  %5681 = vmatprep.subr.bf16.mxu1 %v10187_v23  ;;  %v10279_v14 = vld [vmem:[#allocation5 + $0x11cc] ss:$16 sps:$4 sm:$0xff]   ;;  %v10274_v23 = vld [vmem:[#allocation5 + $0x11c0] ss:$16 sps:$4 sm:$0xff]  }
 0x29f   :  { %5190 = vmatpush1.bf16.msra.mxu0 %v10182_v24  ;;  %5682 = vmatpush1.bf16.msra.mxu1 %v10185_v17  ;;  %v10277_v24 = vld [vmem:[#allocation5 + $0x11c8] ss:$16 sps:$4 sm:$0xff]   ;;  %v10282_v17 = vld [vmem:[#allocation5 + $0x11e4] ss:$16 sps:$4 sm:$0xff]  }
 0x2a0   :  { %5200 = vmatprep.subr.bf16.mxu0 %v10192_v26  ;;  %5692 = vmatprep.subr.bf16.mxu1 %v10195_v27  ;;  %v10285_v26 = vld [vmem:[#allocation5 + $0x11ec] ss:$16 sps:$4 sm:$0xff]   ;;  %v10280_v27 = vld [vmem:[#allocation5 + $0x11e0] ss:$16 sps:$4 sm:$0xff]  }
 0x2a2   :  { %5192 = vmatmul.mubr.bf16.vlgmr.msra.gmra.mrb[0].mxu0 %v8165_v19  ;;  %5684 = vmatmul.mubr.bf16.vlgmr.msra.gmra.mrb[0].mxu1 %v8165_v19  ;;  %v10283_v19 = vld [vmem:[#allocation5 + $0x11e8] ss:$16 sps:$4 sm:$0xff]  }
 0x2a3   :  { %5201 = vmatpush1.bf16.msra.mxu0 %v10190_v29  ;;  %5693 = vmatpush1.bf16.msra.mxu1 %v10193_v30  ;;  %v10290_v29 = vld [vmem:[#allocation5 + $0x1204] ss:$16 sps:$4 sm:$0xff]   ;;  %v10293_v30 = vld [vmem:[#allocation5 + $0x120c] ss:$16 sps:$4 sm:$0xff]  }
 0x2a4   :  { %5202 = vmatprep.subr.bf16.mxu0 %v10198_v31  ;;  %5694 = vmatprep.subr.bf16.mxu1 %v10201_v22  ;;  %v11457_v31 = vld [vmem:[#allocation2 + $0x48] sm:$0xff]  ;;  %v8167_v22 = vcombine.low %v11451_v28, %v11451_v28  ;;  %v10302_v28 = vld [vmem:[#allocation5 + $0x1244] ss:$16 sps:$4 sm:$0xff]  }
 0x2a5   :  { %5232 = vmatprep.mubr.bf16.mxu0 %v8168_v32  ;;  %5724 = vmatprep.mubr.bf16.mxu1 %v8168_v32  ;;  %v10288_v32 = vld [vmem:[#allocation5 + $0x1200] ss:$16 sps:$4 sm:$0xff]  }
 0x2a7   :  { %5203 = vmatpush1.bf16.msra.mxu0 %v10196_v33  ;;  %5695 = vmatpush1.bf16.msra.mxu1 %v10199_v34  ;;  %v10291_v33 = vld [vmem:[#allocation5 + $0x1208] ss:$16 sps:$4 sm:$0xff]   ;;  %v10296_v34 = vld [vmem:[#allocation5 + $0x1224] ss:$16 sps:$4 sm:$0xff]  }
 0x2a8   :  { %5204 = vmatprep.subr.bf16.mxu0 %v10204_v25  ;;  %5696 = vmatprep.subr.bf16.mxu1 %v10207_v35  ;;  %v10299_v25 = vld [vmem:[#allocation5 + $0x122c] ss:$16 sps:$4 sm:$0xff]   ;;  %v8170_v35 = vcombine.high %v11457_v31, %v11457_v31 }
 0x2ab   :  { %5205 = vmatpush1.bf16.msra.mxu0 %v10202_v36  ;;  %5697 = vmatpush1.bf16.msra.mxu1 %v10205_v37  ;;  %v10294_v36 = vld [vmem:[#allocation5 + $0x1220] ss:$16 sps:$4 sm:$0xff]   ;;  %v10297_v37 = vld [vmem:[#allocation5 + $0x1228] ss:$16 sps:$4 sm:$0xff]  }
 0x2ac   :  { %5206 = vmatprep.subr.bf16.mxu0 %v10210_v38  ;;  %5698 = vmatprep.subr.bf16.mxu1 %v10213_v39  ;;  %v10305_v38 = vld [vmem:[#allocation5 + $0x124c] ss:$16 sps:$4 sm:$0xff]   ;;  %v10300_v39 = vld [vmem:[#allocation5 + $0x1240] ss:$16 sps:$4 sm:$0xff]  }
 0x2af   :  { %5207 = vmatpush1.bf16.msra.mxu0 %v10208_v40  ;;  %5699 = vmatpush1.bf16.msra.mxu1 %v10211_v41  ;;  %v10303_v40 = vld [vmem:[#allocation5 + $0x1248] ss:$16 sps:$4 sm:$0xff]   ;;  %v10308_v41 = vld [vmem:[#allocation5 + $0x1264] ss:$16 sps:$4 sm:$0xff]  }
 0x2b0   :  { %5208 = vmatprep.subr.bf16.mxu0 %v10216_v42  ;;  %5700 = vmatprep.subr.bf16.mxu1 %v10219_v43  ;;  %v10311_v42 = vld [vmem:[#allocation5 + $0x126c] ss:$16 sps:$4 sm:$0xff]   ;;  %v10306_v43 = vld [vmem:[#allocation5 + $0x1260] ss:$16 sps:$4 sm:$0xff]  }
 0x2b3   :  { %5209 = vmatpush1.bf16.msra.mxu0 %v10214_v44  ;;  %5701 = vmatpush1.bf16.msra.mxu1 %v10217_v45  ;;  %v10309_v44 = vld [vmem:[#allocation5 + $0x1268] ss:$16 sps:$4 sm:$0xff]   ;;  %v10314_v45 = vld [vmem:[#allocation5 + $0x1284] ss:$16 sps:$4 sm:$0xff]  }
 0x2b4   :  { %5210 = vmatprep.subr.bf16.mxu0 %v10222_v46  ;;  %5702 = vmatprep.subr.bf16.mxu1 %v10225_v47  ;;  %v10317_v46 = vld [vmem:[#allocation5 + $0x128c] ss:$16 sps:$4 sm:$0xff]   ;;  %v10312_v47 = vld [vmem:[#allocation5 + $0x1280] ss:$16 sps:$4 sm:$0xff]  }
 0x2b7   :  { %5211 = vmatpush1.bf16.msra.mxu0 %v10220_v48  ;;  %5703 = vmatpush1.bf16.msra.mxu1 %v10223_v49  ;;  %v10315_v48 = vld [vmem:[#allocation5 + $0x1288] ss:$16 sps:$4 sm:$0xff]   ;;  %v10320_v49 = vld [vmem:[#allocation5 + $0x12a4] ss:$16 sps:$4 sm:$0xff]  }
 0x2b8   :  { %5212 = vmatprep.subr.bf16.mxu0 %v10228_v50  ;;  %5704 = vmatprep.subr.bf16.mxu1 %v10231_v51  ;;  %v10323_v50 = vld [vmem:[#allocation5 + $0x12ac] ss:$16 sps:$4 sm:$0xff]   ;;  %v10318_v51 = vld [vmem:[#allocation5 + $0x12a0] ss:$16 sps:$4 sm:$0xff]  }
 0x2bb   :  { %5213 = vmatpush1.bf16.msra.mxu0 %v10226_v52  ;;  %5705 = vmatpush1.bf16.msra.mxu1 %v10229_v53  ;;  %v10321_v52 = vld [vmem:[#allocation5 + $0x12a8] ss:$16 sps:$4 sm:$0xff]   ;;  %v10326_v53 = vld [vmem:[#allocation5 + $0x12c4] ss:$16 sps:$4 sm:$0xff]  }
 0x2bc   :  { %5214 = vmatprep.subr.bf16.mxu0 %v10234_v54  ;;  %5706 = vmatprep.subr.bf16.mxu1 %v10237_v55  ;;  %v10329_v54 = vld [vmem:[#allocation5 + $0x12cc] ss:$16 sps:$4 sm:$0xff]   ;;  %v10324_v55 = vld [vmem:[#allocation5 + $0x12c0] ss:$16 sps:$4 sm:$0xff]  }
 0x2bf   :  { %5215 = vmatpush1.bf16.msra.mxu0 %v10232_v56  ;;  %5707 = vmatpush1.bf16.msra.mxu1 %v10235_v57  ;;  %v10327_v56 = vld [vmem:[#allocation5 + $0x12c8] ss:$16 sps:$4 sm:$0xff]   ;;  %v10332_v57 = vld [vmem:[#allocation5 + $0x12e4] ss:$16 sps:$4 sm:$0xff]  }
 0x2c0   :  { %5216 = vmatprep.subr.bf16.mxu0 %v10240_v58  ;;  %5708 = vmatprep.subr.bf16.mxu1 %v10243_v59  ;;  %v10335_v58 = vld [vmem:[#allocation5 + $0x12ec] ss:$16 sps:$4 sm:$0xff]   ;;  %v10330_v59 = vld [vmem:[#allocation5 + $0x12e0] ss:$16 sps:$4 sm:$0xff]  }
 0x2c3   :  { %5217 = vmatpush1.bf16.msra.mxu0 %v10238_v60  ;;  %5709 = vmatpush1.bf16.msra.mxu1 %v10241_v61  ;;  %v10333_v60 = vld [vmem:[#allocation5 + $0x12e8] ss:$16 sps:$4 sm:$0xff]   ;;  %v10338_v61 = vld [vmem:[#allocation5 + $0x1304] ss:$16 sps:$4 sm:$0xff]  }
 0x2c4   :  { %5218 = vmatprep.subr.bf16.mxu0 %v10246_v62  ;;  %5710 = vmatprep.subr.bf16.mxu1 %v10249_v63  ;;  %v10341_v62 = vld [vmem:[#allocation5 + $0x130c] ss:$16 sps:$4 sm:$0xff]   ;;  %v10336_v63 = vld [vmem:[#allocation5 + $0x1300] ss:$16 sps:$4 sm:$0xff]  }
 0x2c7   :  { %5219 = vmatpush1.bf16.msra.mxu0 %v10244_v0  ;;  %5711 = vmatpush1.bf16.msra.mxu1 %v10247_v1  ;;  %v10339_v0 = vld [vmem:[#allocation5 + $0x1308] ss:$16 sps:$4 sm:$0xff]   ;;  %v10344_v1 = vld [vmem:[#allocation5 + $0x1324] ss:$16 sps:$4 sm:$0xff]  }
 0x2c8   :  { %5220 = vmatprep.subr.bf16.mxu0 %v10252_v2  ;;  %5712 = vmatprep.subr.bf16.mxu1 %v10255_v3  ;;  %v10347_v2 = vld [vmem:[#allocation5 + $0x132c] ss:$16 sps:$4 sm:$0xff]   ;;  %v10342_v3 = vld [vmem:[#allocation5 + $0x1320] ss:$16 sps:$4 sm:$0xff]  }
 0x2cb   :  { %5221 = vmatpush1.bf16.msra.mxu0 %v10250_v4  ;;  %5713 = vmatpush1.bf16.msra.mxu1 %v10253_v5  ;;  %v10345_v4 = vld [vmem:[#allocation5 + $0x1328] ss:$16 sps:$4 sm:$0xff]   ;;  %v10350_v5 = vld [vmem:[#allocation5 + $0x1344] ss:$16 sps:$4 sm:$0xff]  }
 0x2cc   :  { %5222 = vmatprep.subr.bf16.mxu0 %v10258_v6  ;;  %5714 = vmatprep.subr.bf16.mxu1 %v10261_v7  ;;  %v10353_v6 = vld [vmem:[#allocation5 + $0x134c] ss:$16 sps:$4 sm:$0xff]   ;;  %v10348_v7 = vld [vmem:[#allocation5 + $0x1340] ss:$16 sps:$4 sm:$0xff]  }
 0x2cf   :  { %5223 = vmatpush1.bf16.msra.mxu0 %v10256_v8  ;;  %5715 = vmatpush1.bf16.msra.mxu1 %v10259_v9  ;;  %v10351_v8 = vld [vmem:[#allocation5 + $0x1348] ss:$16 sps:$4 sm:$0xff]   ;;  %v10356_v9 = vld [vmem:[#allocation5 + $0x1364] ss:$16 sps:$4 sm:$0xff]  }
 0x2d0   :  { %5224 = vmatprep.subr.bf16.mxu0 %v10264_v10  ;;  %5716 = vmatprep.subr.bf16.mxu1 %v10267_v12  ;;  %v10359_v10 = vld [vmem:[#allocation5 + $0x136c] ss:$16 sps:$4 sm:$0xff]   ;;  %v10354_v12 = vld [vmem:[#allocation5 + $0x1360] ss:$16 sps:$4 sm:$0xff]  }
 0x2d3   :  { %5225 = vmatpush1.bf16.msra.mxu0 %v10262_v13  ;;  %5717 = vmatpush1.bf16.msra.mxu1 %v10265_v15  ;;  %v10357_v13 = vld [vmem:[#allocation5 + $0x1368] ss:$16 sps:$4 sm:$0xff]   ;;  %v10362_v15 = vld [vmem:[#allocation5 + $0x1384] ss:$16 sps:$4 sm:$0xff]  }
 0x2d4   :  { %5226 = vmatprep.subr.bf16.mxu0 %v10270_v16  ;;  %5718 = vmatprep.subr.bf16.mxu1 %v10273_v18  ;;  %v10365_v16 = vld [vmem:[#allocation5 + $0x138c] ss:$16 sps:$4 sm:$0xff]   ;;  %v10360_v18 = vld [vmem:[#allocation5 + $0x1380] ss:$16 sps:$4 sm:$0xff]  }
 0x2d7   :  { %5227 = vmatpush1.bf16.msra.mxu0 %v10268_v20  ;;  %5719 = vmatpush1.bf16.msra.mxu1 %v10271_v11  ;;  %v10363_v20 = vld [vmem:[#allocation5 + $0x1388] ss:$16 sps:$4 sm:$0xff]   ;;  %v10368_v11 = vld [vmem:[#allocation5 + $0x13a4] ss:$16 sps:$4 sm:$0xff]  }
 0x2d8   :  { %5228 = vmatprep.subr.bf16.mxu0 %v10276_v21  ;;  %5720 = vmatprep.subr.bf16.mxu1 %v10279_v14  ;;  %v10371_v21 = vld [vmem:[#allocation5 + $0x13ac] ss:$16 sps:$4 sm:$0xff]   ;;  %v10366_v14 = vld [vmem:[#allocation5 + $0x13a0] ss:$16 sps:$4 sm:$0xff]  }
 0x2db   :  { %5229 = vmatpush1.bf16.msra.mxu0 %v10274_v23  ;;  %5721 = vmatpush1.bf16.msra.mxu1 %v10277_v24  ;;  %v10369_v23 = vld [vmem:[#allocation5 + $0x13a8] ss:$16 sps:$4 sm:$0xff]   ;;  %v10374_v24 = vld [vmem:[#allocation5 + $0x13c4] ss:$16 sps:$4 sm:$0xff]  }
 0x2dc   :  { %5230 = vmatprep.subr.bf16.mxu0 %v10282_v17  ;;  %5722 = vmatprep.subr.bf16.mxu1 %v10285_v26  ;;  %v10377_v17 = vld [vmem:[#allocation5 + $0x13cc] ss:$16 sps:$4 sm:$0xff]   ;;  %v10372_v26 = vld [vmem:[#allocation5 + $0x13c0] ss:$16 sps:$4 sm:$0xff]  }
 0x2df   :  { %5231 = vmatpush1.bf16.msra.mxu0 %v10280_v27  ;;  %5723 = vmatpush1.bf16.msra.mxu1 %v10283_v19  ;;  %v10375_v27 = vld [vmem:[#allocation5 + $0x13c8] ss:$16 sps:$4 sm:$0xff]   ;;  %v10380_v19 = vld [vmem:[#allocation5 + $0x13e4] ss:$16 sps:$4 sm:$0xff]  }
 0x2e0   :  { %5241 = vmatprep.subr.bf16.mxu0 %v10290_v29  ;;  %5733 = vmatprep.subr.bf16.mxu1 %v10293_v30  ;;  %v10383_v29 = vld [vmem:[#allocation5 + $0x13ec] ss:$16 sps:$4 sm:$0xff]   ;;  %v10378_v30 = vld [vmem:[#allocation5 + $0x13e0] ss:$16 sps:$4 sm:$0xff]  }
 0x2e2   :  { %5233 = vmatmul.mubr.bf16.vlgmr.msra.gmra.mrb[0].mxu0 %v8167_v22  ;;  %5725 = vmatmul.mubr.bf16.vlgmr.msra.gmra.mrb[0].mxu1 %v8167_v22  ;;  %v10381_v22 = vld [vmem:[#allocation5 + $0x13e8] ss:$16 sps:$4 sm:$0xff]  }
 0x2e3   :  { %5242 = vmatpush1.bf16.msra.mxu0 %v10288_v32  ;;  %5734 = vmatpush1.bf16.msra.mxu1 %v10291_v33  ;;  %v10388_v32 = vld [vmem:[#allocation5 + $0x1404] ss:$16 sps:$4 sm:$0xff]   ;;  %v10391_v33 = vld [vmem:[#allocation5 + $0x140c] ss:$16 sps:$4 sm:$0xff]  }
 0x2e4   :  { %5243 = vmatprep.subr.bf16.mxu0 %v10296_v34  ;;  %5735 = vmatprep.subr.bf16.mxu1 %v10299_v25  ;;  %v8169_v34 = vcombine.low %v11457_v31, %v11457_v31  ;;  %v11465_v25 = vld [vmem:[#allocation2 + $0x50] sm:$0xff] }
 0x2e5   :  { %5273 = vmatprep.mubr.bf16.mxu0 %v8170_v35  ;;  %5765 = vmatprep.mubr.bf16.mxu1 %v8170_v35  ;;  %v10386_v35 = vld [vmem:[#allocation5 + $0x1400] ss:$16 sps:$4 sm:$0xff]   ;;  %v10400_v31 = vld [vmem:[#allocation5 + $0x1444] ss:$16 sps:$4 sm:$0xff]  }
 0x2e7   :  { %5244 = vmatpush1.bf16.msra.mxu0 %v10294_v36  ;;  %5736 = vmatpush1.bf16.msra.mxu1 %v10297_v37  ;;  %v10389_v36 = vld [vmem:[#allocation5 + $0x1408] ss:$16 sps:$4 sm:$0xff]   ;;  %v10394_v37 = vld [vmem:[#allocation5 + $0x1424] ss:$16 sps:$4 sm:$0xff]  }
 0x2e8   :  { %5245 = vmatprep.subr.bf16.mxu0 %v10302_v28  ;;  %5737 = vmatprep.subr.bf16.mxu1 %v10305_v38  ;;  %v10397_v28 = vld [vmem:[#allocation5 + $0x142c] ss:$16 sps:$4 sm:$0xff]   ;;  %v8172_v38 = vcombine.high %v11465_v25, %v11465_v25 }
 0x2eb   :  { %5246 = vmatpush1.bf16.msra.mxu0 %v10300_v39  ;;  %5738 = vmatpush1.bf16.msra.mxu1 %v10303_v40  ;;  %v10392_v39 = vld [vmem:[#allocation5 + $0x1420] ss:$16 sps:$4 sm:$0xff]   ;;  %v10395_v40 = vld [vmem:[#allocation5 + $0x1428] ss:$16 sps:$4 sm:$0xff]  }
 0x2ec   :  { %5247 = vmatprep.subr.bf16.mxu0 %v10308_v41  ;;  %5739 = vmatprep.subr.bf16.mxu1 %v10311_v42  ;;  %v10403_v41 = vld [vmem:[#allocation5 + $0x144c] ss:$16 sps:$4 sm:$0xff]   ;;  %v10398_v42 = vld [vmem:[#allocation5 + $0x1440] ss:$16 sps:$4 sm:$0xff]  }
 0x2ef   :  { %5248 = vmatpush1.bf16.msra.mxu0 %v10306_v43  ;;  %5740 = vmatpush1.bf16.msra.mxu1 %v10309_v44  ;;  %v10401_v43 = vld [vmem:[#allocation5 + $0x1448] ss:$16 sps:$4 sm:$0xff]   ;;  %v10406_v44 = vld [vmem:[#allocation5 + $0x1464] ss:$16 sps:$4 sm:$0xff]  }
 0x2f0   :  { %5249 = vmatprep.subr.bf16.mxu0 %v10314_v45  ;;  %5741 = vmatprep.subr.bf16.mxu1 %v10317_v46  ;;  %v10409_v45 = vld [vmem:[#allocation5 + $0x146c] ss:$16 sps:$4 sm:$0xff]   ;;  %v10404_v46 = vld [vmem:[#allocation5 + $0x1460] ss:$16 sps:$4 sm:$0xff]  }
 0x2f3   :  { %5250 = vmatpush1.bf16.msra.mxu0 %v10312_v47  ;;  %5742 = vmatpush1.bf16.msra.mxu1 %v10315_v48  ;;  %v10407_v47 = vld [vmem:[#allocation5 + $0x1468] ss:$16 sps:$4 sm:$0xff]   ;;  %v10412_v48 = vld [vmem:[#allocation5 + $0x1484] ss:$16 sps:$4 sm:$0xff]  }
 0x2f4   :  { %5251 = vmatprep.subr.bf16.mxu0 %v10320_v49  ;;  %5743 = vmatprep.subr.bf16.mxu1 %v10323_v50  ;;  %v10415_v49 = vld [vmem:[#allocation5 + $0x148c] ss:$16 sps:$4 sm:$0xff]   ;;  %v10410_v50 = vld [vmem:[#allocation5 + $0x1480] ss:$16 sps:$4 sm:$0xff]  }
 0x2f7   :  { %5252 = vmatpush1.bf16.msra.mxu0 %v10318_v51  ;;  %5744 = vmatpush1.bf16.msra.mxu1 %v10321_v52  ;;  %v10413_v51 = vld [vmem:[#allocation5 + $0x1488] ss:$16 sps:$4 sm:$0xff]   ;;  %v10418_v52 = vld [vmem:[#allocation5 + $0x14a4] ss:$16 sps:$4 sm:$0xff]  }
 0x2f8   :  { %5253 = vmatprep.subr.bf16.mxu0 %v10326_v53  ;;  %5745 = vmatprep.subr.bf16.mxu1 %v10329_v54  ;;  %v10421_v53 = vld [vmem:[#allocation5 + $0x14ac] ss:$16 sps:$4 sm:$0xff]   ;;  %v10416_v54 = vld [vmem:[#allocation5 + $0x14a0] ss:$16 sps:$4 sm:$0xff]  }
 0x2fb   :  { %5254 = vmatpush1.bf16.msra.mxu0 %v10324_v55  ;;  %5746 = vmatpush1.bf16.msra.mxu1 %v10327_v56  ;;  %v10419_v55 = vld [vmem:[#allocation5 + $0x14a8] ss:$16 sps:$4 sm:$0xff]   ;;  %v10424_v56 = vld [vmem:[#allocation5 + $0x14c4] ss:$16 sps:$4 sm:$0xff]  }
 0x2fc   :  { %5255 = vmatprep.subr.bf16.mxu0 %v10332_v57  ;;  %5747 = vmatprep.subr.bf16.mxu1 %v10335_v58  ;;  %v10427_v57 = vld [vmem:[#allocation5 + $0x14cc] ss:$16 sps:$4 sm:$0xff]   ;;  %v10422_v58 = vld [vmem:[#allocation5 + $0x14c0] ss:$16 sps:$4 sm:$0xff]  }
 0x2ff   :  { %5256 = vmatpush1.bf16.msra.mxu0 %v10330_v59  ;;  %5748 = vmatpush1.bf16.msra.mxu1 %v10333_v60  ;;  %v10425_v59 = vld [vmem:[#allocation5 + $0x14c8] ss:$16 sps:$4 sm:$0xff]   ;;  %v10430_v60 = vld [vmem:[#allocation5 + $0x14e4] ss:$16 sps:$4 sm:$0xff]  }
 0x300   :  { %5257 = vmatprep.subr.bf16.mxu0 %v10338_v61  ;;  %5749 = vmatprep.subr.bf16.mxu1 %v10341_v62  ;;  %v10433_v61 = vld [vmem:[#allocation5 + $0x14ec] ss:$16 sps:$4 sm:$0xff]   ;;  %v10428_v62 = vld [vmem:[#allocation5 + $0x14e0] ss:$16 sps:$4 sm:$0xff]  }
 0x303   :  { %5258 = vmatpush1.bf16.msra.mxu0 %v10336_v63  ;;  %5750 = vmatpush1.bf16.msra.mxu1 %v10339_v0  ;;  %v10431_v63 = vld [vmem:[#allocation5 + $0x14e8] ss:$16 sps:$4 sm:$0xff]   ;;  %v10436_v0 = vld [vmem:[#allocation5 + $0x1504] ss:$16 sps:$4 sm:$0xff]  }
 0x304   :  { %5259 = vmatprep.subr.bf16.mxu0 %v10344_v1  ;;  %5751 = vmatprep.subr.bf16.mxu1 %v10347_v2  ;;  %v10439_v1 = vld [vmem:[#allocation5 + $0x150c] ss:$16 sps:$4 sm:$0xff]   ;;  %v10434_v2 = vld [vmem:[#allocation5 + $0x1500] ss:$16 sps:$4 sm:$0xff]  }
 0x307   :  { %5260 = vmatpush1.bf16.msra.mxu0 %v10342_v3  ;;  %5752 = vmatpush1.bf16.msra.mxu1 %v10345_v4  ;;  %v10437_v3 = vld [vmem:[#allocation5 + $0x1508] ss:$16 sps:$4 sm:$0xff]   ;;  %v10442_v4 = vld [vmem:[#allocation5 + $0x1524] ss:$16 sps:$4 sm:$0xff]  }
 0x308   :  { %5261 = vmatprep.subr.bf16.mxu0 %v10350_v5  ;;  %5753 = vmatprep.subr.bf16.mxu1 %v10353_v6  ;;  %v10445_v5 = vld [vmem:[#allocation5 + $0x152c] ss:$16 sps:$4 sm:$0xff]   ;;  %v10440_v6 = vld [vmem:[#allocation5 + $0x1520] ss:$16 sps:$4 sm:$0xff]  }
 0x30b   :  { %5262 = vmatpush1.bf16.msra.mxu0 %v10348_v7  ;;  %5754 = vmatpush1.bf16.msra.mxu1 %v10351_v8  ;;  %v10443_v7 = vld [vmem:[#allocation5 + $0x1528] ss:$16 sps:$4 sm:$0xff]   ;;  %v10448_v8 = vld [vmem:[#allocation5 + $0x1544] ss:$16 sps:$4 sm:$0xff]  }
 0x30c   :  { %5263 = vmatprep.subr.bf16.mxu0 %v10356_v9  ;;  %5755 = vmatprep.subr.bf16.mxu1 %v10359_v10  ;;  %v10451_v9 = vld [vmem:[#allocation5 + $0x154c] ss:$16 sps:$4 sm:$0xff]   ;;  %v10446_v10 = vld [vmem:[#allocation5 + $0x1540] ss:$16 sps:$4 sm:$0xff]  }
 0x30f   :  { %5264 = vmatpush1.bf16.msra.mxu0 %v10354_v12  ;;  %5756 = vmatpush1.bf16.msra.mxu1 %v10357_v13  ;;  %v10449_v12 = vld [vmem:[#allocation5 + $0x1548] ss:$16 sps:$4 sm:$0xff]   ;;  %v10454_v13 = vld [vmem:[#allocation5 + $0x1564] ss:$16 sps:$4 sm:$0xff]  }
 0x310   :  { %5265 = vmatprep.subr.bf16.mxu0 %v10362_v15  ;;  %5757 = vmatprep.subr.bf16.mxu1 %v10365_v16  ;;  %v10457_v15 = vld [vmem:[#allocation5 + $0x156c] ss:$16 sps:$4 sm:$0xff]   ;;  %v10452_v16 = vld [vmem:[#allocation5 + $0x1560] ss:$16 sps:$4 sm:$0xff]  }
 0x313   :  { %5266 = vmatpush1.bf16.msra.mxu0 %v10360_v18  ;;  %5758 = vmatpush1.bf16.msra.mxu1 %v10363_v20  ;;  %v10455_v18 = vld [vmem:[#allocation5 + $0x1568] ss:$16 sps:$4 sm:$0xff]   ;;  %v10460_v20 = vld [vmem:[#allocation5 + $0x1584] ss:$16 sps:$4 sm:$0xff]  }
 0x314   :  { %5267 = vmatprep.subr.bf16.mxu0 %v10368_v11  ;;  %5759 = vmatprep.subr.bf16.mxu1 %v10371_v21  ;;  %v10463_v11 = vld [vmem:[#allocation5 + $0x158c] ss:$16 sps:$4 sm:$0xff]   ;;  %v10458_v21 = vld [vmem:[#allocation5 + $0x1580] ss:$16 sps:$4 sm:$0xff]  }
 0x317   :  { %5268 = vmatpush1.bf16.msra.mxu0 %v10366_v14  ;;  %5760 = vmatpush1.bf16.msra.mxu1 %v10369_v23  ;;  %v10461_v14 = vld [vmem:[#allocation5 + $0x1588] ss:$16 sps:$4 sm:$0xff]   ;;  %v10466_v23 = vld [vmem:[#allocation5 + $0x15a4] ss:$16 sps:$4 sm:$0xff]  }
 0x318   :  { %5269 = vmatprep.subr.bf16.mxu0 %v10374_v24  ;;  %5761 = vmatprep.subr.bf16.mxu1 %v10377_v17  ;;  %v10469_v24 = vld [vmem:[#allocation5 + $0x15ac] ss:$16 sps:$4 sm:$0xff]   ;;  %v10464_v17 = vld [vmem:[#allocation5 + $0x15a0] ss:$16 sps:$4 sm:$0xff]  }
 0x31b   :  { %5270 = vmatpush1.bf16.msra.mxu0 %v10372_v26  ;;  %5762 = vmatpush1.bf16.msra.mxu1 %v10375_v27  ;;  %v10467_v26 = vld [vmem:[#allocation5 + $0x15a8] ss:$16 sps:$4 sm:$0xff]   ;;  %v10472_v27 = vld [vmem:[#allocation5 + $0x15c4] ss:$16 sps:$4 sm:$0xff]  }
 0x31c   :  { %5271 = vmatprep.subr.bf16.mxu0 %v10380_v19  ;;  %5763 = vmatprep.subr.bf16.mxu1 %v10383_v29  ;;  %v10475_v19 = vld [vmem:[#allocation5 + $0x15cc] ss:$16 sps:$4 sm:$0xff]   ;;  %v10470_v29 = vld [vmem:[#allocation5 + $0x15c0] ss:$16 sps:$4 sm:$0xff]  }
 0x31f   :  { %5272 = vmatpush1.bf16.msra.mxu0 %v10378_v30  ;;  %5764 = vmatpush1.bf16.msra.mxu1 %v10381_v22  ;;  %v10473_v30 = vld [vmem:[#allocation5 + $0x15c8] ss:$16 sps:$4 sm:$0xff]   ;;  %v10478_v22 = vld [vmem:[#allocation5 + $0x15e4] ss:$16 sps:$4 sm:$0xff]  }
 0x320   :  { %5282 = vmatprep.subr.bf16.mxu0 %v10388_v32  ;;  %5774 = vmatprep.subr.bf16.mxu1 %v10391_v33  ;;  %v10481_v32 = vld [vmem:[#allocation5 + $0x15ec] ss:$16 sps:$4 sm:$0xff]   ;;  %v10476_v33 = vld [vmem:[#allocation5 + $0x15e0] ss:$16 sps:$4 sm:$0xff]  }
 0x322   :  { %5274 = vmatmul.mubr.bf16.vlgmr.msra.gmra.mrb[0].mxu0 %v8169_v34  ;;  %5766 = vmatmul.mubr.bf16.vlgmr.msra.gmra.mrb[0].mxu1 %v8169_v34  ;;  %v10479_v34 = vld [vmem:[#allocation5 + $0x15e8] ss:$16 sps:$4 sm:$0xff]  }
 0x323   :  { %5283 = vmatpush1.bf16.msra.mxu0 %v10386_v35  ;;  %5775 = vmatpush1.bf16.msra.mxu1 %v10389_v36  ;;  %v10486_v35 = vld [vmem:[#allocation5 + $0x1604] ss:$16 sps:$4 sm:$0xff]   ;;  %v10489_v36 = vld [vmem:[#allocation5 + $0x160c] ss:$16 sps:$4 sm:$0xff]  }
 0x324   :  { %5284 = vmatprep.subr.bf16.mxu0 %v10394_v37  ;;  %5776 = vmatprep.subr.bf16.mxu1 %v10397_v28  ;;  %v8171_v37 = vcombine.low %v11465_v25, %v11465_v25  ;;  %v11471_v28 = vld [vmem:[#allocation2 + $0x58] sm:$0xff]  ;;  %v10498_v25 = vld [vmem:[#allocation5 + $0x1644] ss:$16 sps:$4 sm:$0xff]  }
 0x325   :  { %5314 = vmatprep.mubr.bf16.mxu0 %v8172_v38  ;;  %5806 = vmatprep.mubr.bf16.mxu1 %v8172_v38  ;;  %v10484_v38 = vld [vmem:[#allocation5 + $0x1600] ss:$16 sps:$4 sm:$0xff]  }
 0x327   :  { %5285 = vmatpush1.bf16.msra.mxu0 %v10392_v39  ;;  %5777 = vmatpush1.bf16.msra.mxu1 %v10395_v40  ;;  %v10487_v39 = vld [vmem:[#allocation5 + $0x1608] ss:$16 sps:$4 sm:$0xff]   ;;  %v10492_v40 = vld [vmem:[#allocation5 + $0x1624] ss:$16 sps:$4 sm:$0xff]  }
 0x328   :  { %5286 = vmatprep.subr.bf16.mxu0 %v10400_v31  ;;  %5778 = vmatprep.subr.bf16.mxu1 %v10403_v41  ;;  %v10495_v31 = vld [vmem:[#allocation5 + $0x162c] ss:$16 sps:$4 sm:$0xff]   ;;  %v8174_v41 = vcombine.high %v11471_v28, %v11471_v28 }
 0x32b   :  { %5287 = vmatpush1.bf16.msra.mxu0 %v10398_v42  ;;  %5779 = vmatpush1.bf16.msra.mxu1 %v10401_v43  ;;  %v10490_v42 = vld [vmem:[#allocation5 + $0x1620] ss:$16 sps:$4 sm:$0xff]   ;;  %v10493_v43 = vld [vmem:[#allocation5 + $0x1628] ss:$16 sps:$4 sm:$0xff]  }
 0x32c   :  { %5288 = vmatprep.subr.bf16.mxu0 %v10406_v44  ;;  %5780 = vmatprep.subr.bf16.mxu1 %v10409_v45  ;;  %v10501_v44 = vld [vmem:[#allocation5 + $0x164c] ss:$16 sps:$4 sm:$0xff]   ;;  %v10496_v45 = vld [vmem:[#allocation5 + $0x1640] ss:$16 sps:$4 sm:$0xff]  }
 0x32f   :  { %5289 = vmatpush1.bf16.msra.mxu0 %v10404_v46  ;;  %5781 = vmatpush1.bf16.msra.mxu1 %v10407_v47  ;;  %v10499_v46 = vld [vmem:[#allocation5 + $0x1648] ss:$16 sps:$4 sm:$0xff]   ;;  %v10504_v47 = vld [vmem:[#allocation5 + $0x1664] ss:$16 sps:$4 sm:$0xff]  }
 0x330   :  { %5290 = vmatprep.subr.bf16.mxu0 %v10412_v48  ;;  %5782 = vmatprep.subr.bf16.mxu1 %v10415_v49  ;;  %v10507_v48 = vld [vmem:[#allocation5 + $0x166c] ss:$16 sps:$4 sm:$0xff]   ;;  %v10502_v49 = vld [vmem:[#allocation5 + $0x1660] ss:$16 sps:$4 sm:$0xff]  }
 0x333   :  { %5291 = vmatpush1.bf16.msra.mxu0 %v10410_v50  ;;  %5783 = vmatpush1.bf16.msra.mxu1 %v10413_v51  ;;  %v10505_v50 = vld [vmem:[#allocation5 + $0x1668] ss:$16 sps:$4 sm:$0xff]   ;;  %v10510_v51 = vld [vmem:[#allocation5 + $0x1684] ss:$16 sps:$4 sm:$0xff]  }
 0x334   :  { %5292 = vmatprep.subr.bf16.mxu0 %v10418_v52  ;;  %5784 = vmatprep.subr.bf16.mxu1 %v10421_v53  ;;  %v10513_v52 = vld [vmem:[#allocation5 + $0x168c] ss:$16 sps:$4 sm:$0xff]   ;;  %v10508_v53 = vld [vmem:[#allocation5 + $0x1680] ss:$16 sps:$4 sm:$0xff]  }
 0x337   :  { %5293 = vmatpush1.bf16.msra.mxu0 %v10416_v54  ;;  %5785 = vmatpush1.bf16.msra.mxu1 %v10419_v55  ;;  %v10511_v54 = vld [vmem:[#allocation5 + $0x1688] ss:$16 sps:$4 sm:$0xff]   ;;  %v10516_v55 = vld [vmem:[#allocation5 + $0x16a4] ss:$16 sps:$4 sm:$0xff]  }
 0x338   :  { %5294 = vmatprep.subr.bf16.mxu0 %v10424_v56  ;;  %5786 = vmatprep.subr.bf16.mxu1 %v10427_v57  ;;  %v10519_v56 = vld [vmem:[#allocation5 + $0x16ac] ss:$16 sps:$4 sm:$0xff]   ;;  %v10514_v57 = vld [vmem:[#allocation5 + $0x16a0] ss:$16 sps:$4 sm:$0xff]  }
 0x33b   :  { %5295 = vmatpush1.bf16.msra.mxu0 %v10422_v58  ;;  %5787 = vmatpush1.bf16.msra.mxu1 %v10425_v59  ;;  %v10517_v58 = vld [vmem:[#allocation5 + $0x16a8] ss:$16 sps:$4 sm:$0xff]   ;;  %v10522_v59 = vld [vmem:[#allocation5 + $0x16c4] ss:$16 sps:$4 sm:$0xff]  }
 0x33c   :  { %5296 = vmatprep.subr.bf16.mxu0 %v10430_v60  ;;  %5788 = vmatprep.subr.bf16.mxu1 %v10433_v61  ;;  %v10525_v60 = vld [vmem:[#allocation5 + $0x16cc] ss:$16 sps:$4 sm:$0xff]   ;;  %v10520_v61 = vld [vmem:[#allocation5 + $0x16c0] ss:$16 sps:$4 sm:$0xff]  }
 0x33f   :  { %5297 = vmatpush1.bf16.msra.mxu0 %v10428_v62  ;;  %5789 = vmatpush1.bf16.msra.mxu1 %v10431_v63  ;;  %v10523_v62 = vld [vmem:[#allocation5 + $0x16c8] ss:$16 sps:$4 sm:$0xff]   ;;  %v10528_v63 = vld [vmem:[#allocation5 + $0x16e4] ss:$16 sps:$4 sm:$0xff]  }
 0x340   :  { %5298 = vmatprep.subr.bf16.mxu0 %v10436_v0  ;;  %5790 = vmatprep.subr.bf16.mxu1 %v10439_v1  ;;  %v10531_v0 = vld [vmem:[#allocation5 + $0x16ec] ss:$16 sps:$4 sm:$0xff]   ;;  %v10526_v1 = vld [vmem:[#allocation5 + $0x16e0] ss:$16 sps:$4 sm:$0xff]  }
 0x343   :  { %5299 = vmatpush1.bf16.msra.mxu0 %v10434_v2  ;;  %5791 = vmatpush1.bf16.msra.mxu1 %v10437_v3  ;;  %v10529_v2 = vld [vmem:[#allocation5 + $0x16e8] ss:$16 sps:$4 sm:$0xff]   ;;  %v10534_v3 = vld [vmem:[#allocation5 + $0x1704] ss:$16 sps:$4 sm:$0xff]  }
 0x344   :  { %5300 = vmatprep.subr.bf16.mxu0 %v10442_v4  ;;  %5792 = vmatprep.subr.bf16.mxu1 %v10445_v5  ;;  %v10537_v4 = vld [vmem:[#allocation5 + $0x170c] ss:$16 sps:$4 sm:$0xff]   ;;  %v10532_v5 = vld [vmem:[#allocation5 + $0x1700] ss:$16 sps:$4 sm:$0xff]  }
 0x347   :  { %5301 = vmatpush1.bf16.msra.mxu0 %v10440_v6  ;;  %5793 = vmatpush1.bf16.msra.mxu1 %v10443_v7  ;;  %v10535_v6 = vld [vmem:[#allocation5 + $0x1708] ss:$16 sps:$4 sm:$0xff]   ;;  %v10540_v7 = vld [vmem:[#allocation5 + $0x1724] ss:$16 sps:$4 sm:$0xff]  }
 0x348   :  { %5302 = vmatprep.subr.bf16.mxu0 %v10448_v8  ;;  %5794 = vmatprep.subr.bf16.mxu1 %v10451_v9  ;;  %v10543_v8 = vld [vmem:[#allocation5 + $0x172c] ss:$16 sps:$4 sm:$0xff]   ;;  %v10538_v9 = vld [vmem:[#allocation5 + $0x1720] ss:$16 sps:$4 sm:$0xff]  }
 0x34b   :  { %5303 = vmatpush1.bf16.msra.mxu0 %v10446_v10  ;;  %5795 = vmatpush1.bf16.msra.mxu1 %v10449_v12  ;;  %v10541_v10 = vld [vmem:[#allocation5 + $0x1728] ss:$16 sps:$4 sm:$0xff]   ;;  %v10546_v12 = vld [vmem:[#allocation5 + $0x1744] ss:$16 sps:$4 sm:$0xff]  }
 0x34c   :  { %5304 = vmatprep.subr.bf16.mxu0 %v10454_v13  ;;  %5796 = vmatprep.subr.bf16.mxu1 %v10457_v15  ;;  %v10549_v13 = vld [vmem:[#allocation5 + $0x174c] ss:$16 sps:$4 sm:$0xff]   ;;  %v10544_v15 = vld [vmem:[#allocation5 + $0x1740] ss:$16 sps:$4 sm:$0xff]  }
 0x34f   :  { %5305 = vmatpush1.bf16.msra.mxu0 %v10452_v16  ;;  %5797 = vmatpush1.bf16.msra.mxu1 %v10455_v18  ;;  %v10547_v16 = vld [vmem:[#allocation5 + $0x1748] ss:$16 sps:$4 sm:$0xff]   ;;  %v10552_v18 = vld [vmem:[#allocation5 + $0x1764] ss:$16 sps:$4 sm:$0xff]  }
 0x350   :  { %5306 = vmatprep.subr.bf16.mxu0 %v10460_v20  ;;  %5798 = vmatprep.subr.bf16.mxu1 %v10463_v11  ;;  %v10555_v20 = vld [vmem:[#allocation5 + $0x176c] ss:$16 sps:$4 sm:$0xff]   ;;  %v10550_v11 = vld [vmem:[#allocation5 + $0x1760] ss:$16 sps:$4 sm:$0xff]  }
 0x353   :  { %5307 = vmatpush1.bf16.msra.mxu0 %v10458_v21  ;;  %5799 = vmatpush1.bf16.msra.mxu1 %v10461_v14  ;;  %v10553_v21 = vld [vmem:[#allocation5 + $0x1768] ss:$16 sps:$4 sm:$0xff]   ;;  %v10558_v14 = vld [vmem:[#allocation5 + $0x1784] ss:$16 sps:$4 sm:$0xff]  }
 0x354   :  { %5308 = vmatprep.subr.bf16.mxu0 %v10466_v23  ;;  %5800 = vmatprep.subr.bf16.mxu1 %v10469_v24  ;;  %v10561_v23 = vld [vmem:[#allocation5 + $0x178c] ss:$16 sps:$4 sm:$0xff]   ;;  %v10556_v24 = vld [vmem:[#allocation5 + $0x1780] ss:$16 sps:$4 sm:$0xff]  }
 0x357   :  { %5309 = vmatpush1.bf16.msra.mxu0 %v10464_v17  ;;  %5801 = vmatpush1.bf16.msra.mxu1 %v10467_v26  ;;  %v10559_v17 = vld [vmem:[#allocation5 + $0x1788] ss:$16 sps:$4 sm:$0xff]   ;;  %v10564_v26 = vld [vmem:[#allocation5 + $0x17a4] ss:$16 sps:$4 sm:$0xff]  }
 0x358   :  { %5310 = vmatprep.subr.bf16.mxu0 %v10472_v27  ;;  %5802 = vmatprep.subr.bf16.mxu1 %v10475_v19  ;;  %v10567_v27 = vld [vmem:[#allocation5 + $0x17ac] ss:$16 sps:$4 sm:$0xff]   ;;  %v10562_v19 = vld [vmem:[#allocation5 + $0x17a0] ss:$16 sps:$4 sm:$0xff]  }
 0x35b   :  { %5311 = vmatpush1.bf16.msra.mxu0 %v10470_v29  ;;  %5803 = vmatpush1.bf16.msra.mxu1 %v10473_v30  ;;  %v10565_v29 = vld [vmem:[#allocation5 + $0x17a8] ss:$16 sps:$4 sm:$0xff]   ;;  %v10570_v30 = vld [vmem:[#allocation5 + $0x17c4] ss:$16 sps:$4 sm:$0xff]  }
 0x35c   :  { %5312 = vmatprep.subr.bf16.mxu0 %v10478_v22  ;;  %5804 = vmatprep.subr.bf16.mxu1 %v10481_v32  ;;  %v10573_v22 = vld [vmem:[#allocation5 + $0x17cc] ss:$16 sps:$4 sm:$0xff]   ;;  %v10568_v32 = vld [vmem:[#allocation5 + $0x17c0] ss:$16 sps:$4 sm:$0xff]  }
 0x35f   :  { %5313 = vmatpush1.bf16.msra.mxu0 %v10476_v33  ;;  %5805 = vmatpush1.bf16.msra.mxu1 %v10479_v34  ;;  %v10571_v33 = vld [vmem:[#allocation5 + $0x17c8] ss:$16 sps:$4 sm:$0xff]   ;;  %v10576_v34 = vld [vmem:[#allocation5 + $0x17e4] ss:$16 sps:$4 sm:$0xff]  }
 0x360   :  { %5323 = vmatprep.subr.bf16.mxu0 %v10486_v35  ;;  %5815 = vmatprep.subr.bf16.mxu1 %v10489_v36  ;;  %v10579_v35 = vld [vmem:[#allocation5 + $0x17ec] ss:$16 sps:$4 sm:$0xff]   ;;  %v10574_v36 = vld [vmem:[#allocation5 + $0x17e0] ss:$16 sps:$4 sm:$0xff]  }
 0x362   :  { %5315 = vmatmul.mubr.bf16.vlgmr.msra.gmra.mrb[0].mxu0 %v8171_v37  ;;  %5807 = vmatmul.mubr.bf16.vlgmr.msra.gmra.mrb[0].mxu1 %v8171_v37  ;;  %v10577_v37 = vld [vmem:[#allocation5 + $0x17e8] ss:$16 sps:$4 sm:$0xff]  }
 0x363   :  { %5324 = vmatpush1.bf16.msra.mxu0 %v10484_v38  ;;  %5816 = vmatpush1.bf16.msra.mxu1 %v10487_v39  ;;  %v10584_v38 = vld [vmem:[#allocation8 + $0x4] ss:$16 sps:$4 sm:$0xff]   ;;  %v10587_v39 = vld [vmem:[#allocation8 + $0xc] ss:$16 sps:$4 sm:$0xff]  }
 0x364   :  { %5325 = vmatprep.subr.bf16.mxu0 %v10492_v40  ;;  %5817 = vmatprep.subr.bf16.mxu1 %v10495_v31  ;;  %v8173_v40 = vcombine.low %v11471_v28, %v11471_v28  ;;  %v10582_v31 = vld [vmem:[#allocation8] ss:$16 sps:$4 sm:$0xff]  }
 0x365   :  { %5355 = vmatprep.mubr.bf16.mxu0 %v8174_v41  ;;  %5847 = vmatprep.mubr.bf16.mxu1 %v8174_v41  ;;  %v10585_v41 = vld [vmem:[#allocation8 + $0x8] ss:$16 sps:$4 sm:$0xff]   ;;  %v10594_v28 = vld [vmem:[#allocation8 + $0x40] ss:$16 sps:$4 sm:$0xff]  }
 0x367   :  { %5326 = vmatpush1.bf16.msra.mxu0 %v10490_v42  ;;  %5818 = vmatpush1.bf16.msra.mxu1 %v10493_v43  ;;  %v10590_v42 = vld [vmem:[#allocation8 + $0x24] ss:$16 sps:$4 sm:$0xff]   ;;  %v10593_v43 = vld [vmem:[#allocation8 + $0x2c] ss:$16 sps:$4 sm:$0xff]  }
 0x368   :  { %5327 = vmatprep.subr.bf16.mxu0 %v10498_v25  ;;  %5819 = vmatprep.subr.bf16.mxu1 %v10501_v44  ;;  %v10588_v25 = vld [vmem:[#allocation8 + $0x20] ss:$16 sps:$4 sm:$0xff]   ;;  %v10591_v44 = vld [vmem:[#allocation8 + $0x28] ss:$16 sps:$4 sm:$0xff]  }
 0x36b   :  { %5328 = vmatpush1.bf16.msra.mxu0 %v10496_v45  ;;  %5820 = vmatpush1.bf16.msra.mxu1 %v10499_v46  ;;  %v10596_v45 = vld [vmem:[#allocation8 + $0x44] ss:$16 sps:$4 sm:$0xff]   ;;  %v10599_v46 = vld [vmem:[#allocation8 + $0x4c] ss:$16 sps:$4 sm:$0xff]  }
 0x36c   :  { %5329 = vmatprep.subr.bf16.mxu0 %v10504_v47  ;;  %5821 = vmatprep.subr.bf16.mxu1 %v10507_v48  ;;  %v10597_v47 = vld [vmem:[#allocation8 + $0x48] ss:$16 sps:$4 sm:$0xff]   ;;  %v10602_v48 = vld [vmem:[#allocation8 + $0x64] ss:$16 sps:$4 sm:$0xff]  }
 0x36f   :  { %5330 = vmatpush1.bf16.msra.mxu0 %v10502_v49  ;;  %5822 = vmatpush1.bf16.msra.mxu1 %v10505_v50  ;;  %v10605_v49 = vld [vmem:[#allocation8 + $0x6c] ss:$16 sps:$4 sm:$0xff]   ;;  %v10600_v50 = vld [vmem:[#allocation8 + $0x60] ss:$16 sps:$4 sm:$0xff]  }
 0x370   :  { %5331 = vmatprep.subr.bf16.mxu0 %v10510_v51  ;;  %5823 = vmatprep.subr.bf16.mxu1 %v10513_v52  ;;  %v10603_v51 = vld [vmem:[#allocation8 + $0x68] ss:$16 sps:$4 sm:$0xff]   ;;  %v10608_v52 = vld [vmem:[#allocation8 + $0x84] ss:$16 sps:$4 sm:$0xff]  }
 0x373   :  { %5332 = vmatpush1.bf16.msra.mxu0 %v10508_v53  ;;  %5824 = vmatpush1.bf16.msra.mxu1 %v10511_v54  ;;  %v10611_v53 = vld [vmem:[#allocation8 + $0x8c] ss:$16 sps:$4 sm:$0xff]   ;;  %v10606_v54 = vld [vmem:[#allocation8 + $0x80] ss:$16 sps:$4 sm:$0xff]  }
 0x374   :  { %5333 = vmatprep.subr.bf16.mxu0 %v10516_v55  ;;  %5825 = vmatprep.subr.bf16.mxu1 %v10519_v56  ;;  %v10609_v55 = vld [vmem:[#allocation8 + $0x88] ss:$16 sps:$4 sm:$0xff]   ;;  %v10614_v56 = vld [vmem:[#allocation8 + $0xa4] ss:$16 sps:$4 sm:$0xff]  }
 0x377   :  { %5334 = vmatpush1.bf16.msra.mxu0 %v10514_v57  ;;  %5826 = vmatpush1.bf16.msra.mxu1 %v10517_v58  ;;  %v10617_v57 = vld [vmem:[#allocation8 + $0xac] ss:$16 sps:$4 sm:$0xff]   ;;  %v10612_v58 = vld [vmem:[#allocation8 + $0xa0] ss:$16 sps:$4 sm:$0xff]  }
 0x378   :  { %5335 = vmatprep.subr.bf16.mxu0 %v10522_v59  ;;  %5827 = vmatprep.subr.bf16.mxu1 %v10525_v60  ;;  %v10615_v59 = vld [vmem:[#allocation8 + $0xa8] ss:$16 sps:$4 sm:$0xff]   ;;  %v10620_v60 = vld [vmem:[#allocation8 + $0xc4] ss:$16 sps:$4 sm:$0xff]  }
 0x37b   :  { %5336 = vmatpush1.bf16.msra.mxu0 %v10520_v61  ;;  %5828 = vmatpush1.bf16.msra.mxu1 %v10523_v62  ;;  %v10623_v61 = vld [vmem:[#allocation8 + $0xcc] ss:$16 sps:$4 sm:$0xff]   ;;  %v10618_v62 = vld [vmem:[#allocation8 + $0xc0] ss:$16 sps:$4 sm:$0xff]  }
 0x37c   :  { %5337 = vmatprep.subr.bf16.mxu0 %v10528_v63  ;;  %5829 = vmatprep.subr.bf16.mxu1 %v10531_v0  ;;  %v10621_v63 = vld [vmem:[#allocation8 + $0xc8] ss:$16 sps:$4 sm:$0xff]   ;;  %v10626_v0 = vld [vmem:[#allocation8 + $0xe4] ss:$16 sps:$4 sm:$0xff]  }
 0x37f   :  { %5338 = vmatpush1.bf16.msra.mxu0 %v10526_v1  ;;  %5830 = vmatpush1.bf16.msra.mxu1 %v10529_v2  ;;  %v10629_v1 = vld [vmem:[#allocation8 + $0xec] ss:$16 sps:$4 sm:$0xff]   ;;  %v10624_v2 = vld [vmem:[#allocation8 + $0xe0] ss:$16 sps:$4 sm:$0xff]  }
 0x380   :  { %5339 = vmatprep.subr.bf16.mxu0 %v10534_v3  ;;  %5831 = vmatprep.subr.bf16.mxu1 %v10537_v4  ;;  %v10627_v3 = vld [vmem:[#allocation8 + $0xe8] ss:$16 sps:$4 sm:$0xff]   ;;  %v10632_v4 = vld [vmem:[#allocation8 + $0x104] ss:$16 sps:$4 sm:$0xff]  }
 0x383   :  { %5340 = vmatpush1.bf16.msra.mxu0 %v10532_v5  ;;  %5832 = vmatpush1.bf16.msra.mxu1 %v10535_v6  ;;  %v10635_v5 = vld [vmem:[#allocation8 + $0x10c] ss:$16 sps:$4 sm:$0xff]   ;;  %v10630_v6 = vld [vmem:[#allocation8 + $0x100] ss:$16 sps:$4 sm:$0xff]  }
 0x384   :  { %5341 = vmatprep.subr.bf16.mxu0 %v10540_v7  ;;  %5833 = vmatprep.subr.bf16.mxu1 %v10543_v8  ;;  %v10633_v7 = vld [vmem:[#allocation8 + $0x108] ss:$16 sps:$4 sm:$0xff]   ;;  %v10638_v8 = vld [vmem:[#allocation8 + $0x124] ss:$16 sps:$4 sm:$0xff]  }
 0x387   :  { %5342 = vmatpush1.bf16.msra.mxu0 %v10538_v9  ;;  %5834 = vmatpush1.bf16.msra.mxu1 %v10541_v10  ;;  %v10641_v9 = vld [vmem:[#allocation8 + $0x12c] ss:$16 sps:$4 sm:$0xff]   ;;  %v10636_v10 = vld [vmem:[#allocation8 + $0x120] ss:$16 sps:$4 sm:$0xff]  }
 0x388   :  { %5343 = vmatprep.subr.bf16.mxu0 %v10546_v12  ;;  %5835 = vmatprep.subr.bf16.mxu1 %v10549_v13  ;;  %v10639_v12 = vld [vmem:[#allocation8 + $0x128] ss:$16 sps:$4 sm:$0xff]   ;;  %v10644_v13 = vld [vmem:[#allocation8 + $0x144] ss:$16 sps:$4 sm:$0xff]  }
 0x38b   :  { %5344 = vmatpush1.bf16.msra.mxu0 %v10544_v15  ;;  %5836 = vmatpush1.bf16.msra.mxu1 %v10547_v16  ;;  %v10647_v15 = vld [vmem:[#allocation8 + $0x14c] ss:$16 sps:$4 sm:$0xff]   ;;  %v10642_v16 = vld [vmem:[#allocation8 + $0x140] ss:$16 sps:$4 sm:$0xff]  }
 0x38c   :  { %5345 = vmatprep.subr.bf16.mxu0 %v10552_v18  ;;  %5837 = vmatprep.subr.bf16.mxu1 %v10555_v20  ;;  %v10645_v18 = vld [vmem:[#allocation8 + $0x148] ss:$16 sps:$4 sm:$0xff]   ;;  %v10650_v20 = vld [vmem:[#allocation8 + $0x164] ss:$16 sps:$4 sm:$0xff]  }
 0x38f   :  { %5346 = vmatpush1.bf16.msra.mxu0 %v10550_v11  ;;  %5838 = vmatpush1.bf16.msra.mxu1 %v10553_v21  ;;  %v10653_v11 = vld [vmem:[#allocation8 + $0x16c] ss:$16 sps:$4 sm:$0xff]   ;;  %v10648_v21 = vld [vmem:[#allocation8 + $0x160] ss:$16 sps:$4 sm:$0xff]  }
 0x390   :  { %5347 = vmatprep.subr.bf16.mxu0 %v10558_v14  ;;  %5839 = vmatprep.subr.bf16.mxu1 %v10561_v23  ;;  %v10651_v14 = vld [vmem:[#allocation8 + $0x168] ss:$16 sps:$4 sm:$0xff]   ;;  %v10656_v23 = vld [vmem:[#allocation8 + $0x184] ss:$16 sps:$4 sm:$0xff]  }
 0x393   :  { %5348 = vmatpush1.bf16.msra.mxu0 %v10556_v24  ;;  %5840 = vmatpush1.bf16.msra.mxu1 %v10559_v17  ;;  %v10659_v24 = vld [vmem:[#allocation8 + $0x18c] ss:$16 sps:$4 sm:$0xff]   ;;  %v10654_v17 = vld [vmem:[#allocation8 + $0x180] ss:$16 sps:$4 sm:$0xff]  }
 0x394   :  { %5349 = vmatprep.subr.bf16.mxu0 %v10564_v26  ;;  %5841 = vmatprep.subr.bf16.mxu1 %v10567_v27  ;;  %v10657_v26 = vld [vmem:[#allocation8 + $0x188] ss:$16 sps:$4 sm:$0xff]   ;;  %v10662_v27 = vld [vmem:[#allocation8 + $0x1a4] ss:$16 sps:$4 sm:$0xff]  }
 0x397   :  { %5350 = vmatpush1.bf16.msra.mxu0 %v10562_v19  ;;  %5842 = vmatpush1.bf16.msra.mxu1 %v10565_v29  ;;  %v10665_v19 = vld [vmem:[#allocation8 + $0x1ac] ss:$16 sps:$4 sm:$0xff]   ;;  %v10660_v29 = vld [vmem:[#allocation8 + $0x1a0] ss:$16 sps:$4 sm:$0xff]  }
 0x398   :  { %5351 = vmatprep.subr.bf16.mxu0 %v10570_v30  ;;  %5843 = vmatprep.subr.bf16.mxu1 %v10573_v22  ;;  %v10663_v30 = vld [vmem:[#allocation8 + $0x1a8] ss:$16 sps:$4 sm:$0xff]   ;;  %v10668_v22 = vld [vmem:[#allocation8 + $0x1c4] ss:$16 sps:$4 sm:$0xff]  }
 0x39b   :  { %5352 = vmatpush1.bf16.msra.mxu0 %v10568_v32  ;;  %5844 = vmatpush1.bf16.msra.mxu1 %v10571_v33  ;;  %v10671_v32 = vld [vmem:[#allocation8 + $0x1cc] ss:$16 sps:$4 sm:$0xff]   ;;  %v10666_v33 = vld [vmem:[#allocation8 + $0x1c0] ss:$16 sps:$4 sm:$0xff]  }
 0x39c   :  { %5353 = vmatprep.subr.bf16.mxu0 %v10576_v34  ;;  %5845 = vmatprep.subr.bf16.mxu1 %v10579_v35  ;;  %v10669_v34 = vld [vmem:[#allocation8 + $0x1c8] ss:$16 sps:$4 sm:$0xff]   ;;  %v10674_v35 = vld [vmem:[#allocation8 + $0x1e4] ss:$16 sps:$4 sm:$0xff]  }
 0x39f   :  { %5354 = vmatpush1.bf16.msra.mxu0 %v10574_v36  ;;  %5846 = vmatpush1.bf16.msra.mxu1 %v10577_v37  ;;  %v10677_v36 = vld [vmem:[#allocation8 + $0x1ec] ss:$16 sps:$4 sm:$0xff]   ;;  %v10672_v37 = vld [vmem:[#allocation8 + $0x1e0] ss:$16 sps:$4 sm:$0xff]  }
 0x3a0   :  { %6654 = vmatprep.subr.bf16.mxu0 %v10584_v38  ;;  %6736 = vmatprep.subr.bf16.mxu1 %v10587_v39  ;;  %v10675_v38 = vld [vmem:[#allocation8 + $0x1e8] ss:$16 sps:$4 sm:$0xff]   ;;  %v10680_v39 = vld [vmem:[#allocation8 + $0x204] ss:$16 sps:$4 sm:$0xff]  }
 0x3a2   :  { %5356 = vmatmul.mubr.bf16.vlgmr.msra.gmra.mrb[0].mxu0 %v8173_v40  ;;  %5848 = vmatmul.mubr.bf16.vlgmr.msra.gmra.mrb[0].mxu1 %v8173_v40  ;;  %v10683_v40 = vld [vmem:[#allocation8 + $0x20c] ss:$16 sps:$4 sm:$0xff]  }
 0x3a3   :  { %6655 = vmatpush1.bf16.msra.mxu0 %v10582_v31  ;;  %6737 = vmatpush1.bf16.msra.mxu1 %v10585_v41  ;;  %v928_v31 = vlaneseq }
 0x3a4   :  { %6656 = vmatprep.subr.bf16.mxu0 %v10590_v42  ;;  %6738 = vmatprep.subr.bf16.mxu1 %v10593_v43  ;;  %v11482_v43 = vld [vmem:[#allocation7] sm:$0xf] }
 0x3a5   :  { %v11477_v41 = vshrl.u32 %v928_v31, 7  ;;  %v10740_v31 = vld [vmem:[#allocation8 + $0x344] ss:$16 sps:$4 sm:$0xff]  }
 0x3a7   :  { %6657 = vmatpush1.bf16.msra.mxu0 %v10588_v25  ;;  %6739 = vmatpush1.bf16.msra.mxu1 %v10591_v44  ;;  %v11480_v42 = vsub.s32 0, %v11477_v41  ;;  %v11485_v25 = vsub.s32 1, %v11477_v41  ;;  %v11488_v44 = vsub.s32 3, %v11477_v41 }
 0x3a8   :  { %6658 = vmatprep.subr.bf16.mxu0 %v10596_v45  ;;  %6740 = vmatprep.subr.bf16.mxu1 %v10599_v46 }
 0x3a9   :  { %v931_v45 = vrot.slane %v11482_v43, %v11480_v42  ;;  %v935_v46 = vrot.slane %v11482_v43, %v11485_v25 }
 0x3ab   :  { %6659 = vmatpush1.bf16.msra.mxu0 %v10594_v28  ;;  %6741 = vmatpush1.bf16.msra.mxu1 %v10597_v47  ;;  %v943_v28 = vrot.slane %v11482_v43, %v11488_v44 }
 0x3ac   :  { %6660 = vmatprep.subr.bf16.mxu0 %v10602_v48  ;;  %6742 = vmatprep.subr.bf16.mxu1 %v10605_v49 }
 0x3af   :  { %6661 = vmatpush1.bf16.msra.mxu0 %v10600_v50  ;;  %6743 = vmatpush1.bf16.msra.mxu1 %v10603_v51 }
 0x3b0   :  { %6662 = vmatprep.subr.bf16.mxu0 %v10608_v52  ;;  %6744 = vmatprep.subr.bf16.mxu1 %v10611_v53 }
 0x3b3   :  { %6663 = vmatpush1.bf16.msra.mxu0 %v10606_v54  ;;  %6745 = vmatpush1.bf16.msra.mxu1 %v10609_v55 }
 0x3b4   :  { %6664 = vmatprep.subr.bf16.mxu0 %v10614_v56  ;;  %6746 = vmatprep.subr.bf16.mxu1 %v10617_v57 }
 0x3b7   :  { %6665 = vmatpush1.bf16.msra.mxu0 %v10612_v58  ;;  %6747 = vmatpush1.bf16.msra.mxu1 %v10615_v59 }
 0x3b8   :  { %6666 = vmatprep.subr.bf16.mxu0 %v10620_v60  ;;  %6748 = vmatprep.subr.bf16.mxu1 %v10623_v61 }
 0x3bb   :  { %6667 = vmatpush1.bf16.msra.mxu0 %v10618_v62  ;;  %6749 = vmatpush1.bf16.msra.mxu1 %v10621_v63  ;;  %v10678_v62 = vld [vmem:[#allocation8 + $0x200] ss:$16 sps:$4 sm:$0xff]   ;;  %v10681_v63 = vld [vmem:[#allocation8 + $0x208] ss:$16 sps:$4 sm:$0xff]  }
 0x3bc   :  { %6668 = vmatprep.subr.bf16.mxu0 %v10626_v0  ;;  %6750 = vmatprep.subr.bf16.mxu1 %v10629_v1  ;;  %v10686_v1 = vld [vmem:[#allocation8 + $0x224] ss:$16 sps:$4 sm:$0xff]  }
 0x3bf   :  { %6669 = vmatpush1.bf16.msra.mxu0 %v10624_v2  ;;  %6751 = vmatpush1.bf16.msra.mxu1 %v10627_v3  ;;  %v10689_v2 = vld [vmem:[#allocation8 + $0x22c] ss:$16 sps:$4 sm:$0xff]  }
 0x3c0   :  { %6670 = vmatprep.subr.bf16.mxu0 %v10632_v4  ;;  %6752 = vmatprep.subr.bf16.mxu1 %v10635_v5  ;;  %v10684_v4 = vld [vmem:[#allocation8 + $0x220] ss:$16 sps:$4 sm:$0xff]   ;;  %v10687_v5 = vld [vmem:[#allocation8 + $0x228] ss:$16 sps:$4 sm:$0xff]  }
 0x3c3   :  { %6671 = vmatpush1.bf16.msra.mxu0 %v10630_v6  ;;  %6753 = vmatpush1.bf16.msra.mxu1 %v10633_v7  ;;  %v10692_v6 = vld [vmem:[#allocation8 + $0x244] ss:$16 sps:$4 sm:$0xff]   ;;  %v10695_v7 = vld [vmem:[#allocation8 + $0x24c] ss:$16 sps:$4 sm:$0xff]  }
 0x3c4   :  { %6672 = vmatprep.subr.bf16.mxu0 %v10638_v8  ;;  %6754 = vmatprep.subr.bf16.mxu1 %v10641_v9  ;;  %v10690_v8 = vld [vmem:[#allocation8 + $0x240] ss:$16 sps:$4 sm:$0xff]   ;;  %v10693_v9 = vld [vmem:[#allocation8 + $0x248] ss:$16 sps:$4 sm:$0xff]  }
 0x3c7   :  { %6673 = vmatpush1.bf16.msra.mxu0 %v10636_v10  ;;  %6755 = vmatpush1.bf16.msra.mxu1 %v10639_v12  ;;  %v10698_v10 = vld [vmem:[#allocation8 + $0x264] ss:$16 sps:$4 sm:$0xff]   ;;  %v10701_v12 = vld [vmem:[#allocation8 + $0x26c] ss:$16 sps:$4 sm:$0xff]  }
 0x3c8   :  { %6674 = vmatprep.subr.bf16.mxu0 %v10644_v13  ;;  %6756 = vmatprep.subr.bf16.mxu1 %v10647_v15  ;;  %v10696_v13 = vld [vmem:[#allocation8 + $0x260] ss:$16 sps:$4 sm:$0xff]   ;;  %v10699_v15 = vld [vmem:[#allocation8 + $0x268] ss:$16 sps:$4 sm:$0xff]  }
 0x3cb   :  { %6675 = vmatpush1.bf16.msra.mxu0 %v10642_v16  ;;  %6757 = vmatpush1.bf16.msra.mxu1 %v10645_v18  ;;  %v10704_v16 = vld [vmem:[#allocation8 + $0x284] ss:$16 sps:$4 sm:$0xff]   ;;  %v10707_v18 = vld [vmem:[#allocation8 + $0x28c] ss:$16 sps:$4 sm:$0xff]  }
 0x3cc   :  { %6676 = vmatprep.subr.bf16.mxu0 %v10650_v20  ;;  %6758 = vmatprep.subr.bf16.mxu1 %v10653_v11  ;;  %v10702_v20 = vld [vmem:[#allocation8 + $0x280] ss:$16 sps:$4 sm:$0xff]   ;;  %v10705_v11 = vld [vmem:[#allocation8 + $0x288] ss:$16 sps:$4 sm:$0xff]  }
 0x3cf   :  { %6677 = vmatpush1.bf16.msra.mxu0 %v10648_v21  ;;  %6759 = vmatpush1.bf16.msra.mxu1 %v10651_v14  ;;  %v10710_v21 = vld [vmem:[#allocation8 + $0x2a4] ss:$16 sps:$4 sm:$0xff]   ;;  %v10713_v14 = vld [vmem:[#allocation8 + $0x2ac] ss:$16 sps:$4 sm:$0xff]  }
 0x3d0   :  { %6678 = vmatprep.subr.bf16.mxu0 %v10656_v23  ;;  %6760 = vmatprep.subr.bf16.mxu1 %v10659_v24  ;;  %v10708_v23 = vld [vmem:[#allocation8 + $0x2a0] ss:$16 sps:$4 sm:$0xff]   ;;  %v10711_v24 = vld [vmem:[#allocation8 + $0x2a8] ss:$16 sps:$4 sm:$0xff]  }
 0x3d3   :  { %6679 = vmatpush1.bf16.msra.mxu0 %v10654_v17  ;;  %6761 = vmatpush1.bf16.msra.mxu1 %v10657_v26  ;;  %v10716_v17 = vld [vmem:[#allocation8 + $0x2c4] ss:$16 sps:$4 sm:$0xff]   ;;  %v10719_v26 = vld [vmem:[#allocation8 + $0x2cc] ss:$16 sps:$4 sm:$0xff]  }
 0x3d4   :  { %6680 = vmatprep.subr.bf16.mxu0 %v10662_v27  ;;  %6762 = vmatprep.subr.bf16.mxu1 %v10665_v19  ;;  %v10714_v27 = vld [vmem:[#allocation8 + $0x2c0] ss:$16 sps:$4 sm:$0xff]   ;;  %v10717_v19 = vld [vmem:[#allocation8 + $0x2c8] ss:$16 sps:$4 sm:$0xff]  }
 0x3d7   :  { %6681 = vmatpush1.bf16.msra.mxu0 %v10660_v29  ;;  %6763 = vmatpush1.bf16.msra.mxu1 %v10663_v30  ;;  %v10722_v29 = vld [vmem:[#allocation8 + $0x2e4] ss:$16 sps:$4 sm:$0xff]   ;;  %v10725_v30 = vld [vmem:[#allocation8 + $0x2ec] ss:$16 sps:$4 sm:$0xff]  }
 0x3d8   :  { %6682 = vmatprep.subr.bf16.mxu0 %v10668_v22  ;;  %6764 = vmatprep.subr.bf16.mxu1 %v10671_v32  ;;  %v10720_v22 = vld [vmem:[#allocation8 + $0x2e0] ss:$16 sps:$4 sm:$0xff]   ;;  %v10723_v32 = vld [vmem:[#allocation8 + $0x2e8] ss:$16 sps:$4 sm:$0xff]  }
 0x3db   :  { %6683 = vmatpush1.bf16.msra.mxu0 %v10666_v33  ;;  %6765 = vmatpush1.bf16.msra.mxu1 %v10669_v34  ;;  %v10728_v33 = vld [vmem:[#allocation8 + $0x304] ss:$16 sps:$4 sm:$0xff]   ;;  %v10731_v34 = vld [vmem:[#allocation8 + $0x30c] ss:$16 sps:$4 sm:$0xff]  }
 0x3dc   :  { %6684 = vmatprep.subr.bf16.mxu0 %v10674_v35  ;;  %6766 = vmatprep.subr.bf16.mxu1 %v10677_v36  ;;  %v10726_v35 = vld [vmem:[#allocation8 + $0x300] ss:$16 sps:$4 sm:$0xff]   ;;  %v10729_v36 = vld [vmem:[#allocation8 + $0x308] ss:$16 sps:$4 sm:$0xff]  }
 0x3df   :  { %6685 = vmatpush1.bf16.msra.mxu0 %v10672_v37  ;;  %6767 = vmatpush1.bf16.msra.mxu1 %v10675_v38  ;;  %v10734_v37 = vld [vmem:[#allocation8 + $0x324] ss:$16 sps:$4 sm:$0xff]   ;;  %v10737_v38 = vld [vmem:[#allocation8 + $0x32c] ss:$16 sps:$4 sm:$0xff]  }
 0x3e0   :  { %6695 = vmatprep.subr.bf16.mxu0 %v10680_v39  ;;  %6777 = vmatprep.subr.bf16.mxu1 %v10683_v40  ;;  %v10732_v39 = vld [vmem:[#allocation8 + $0x320] ss:$16 sps:$4 sm:$0xff]   ;;  %v10735_v40 = vld [vmem:[#allocation8 + $0x328] ss:$16 sps:$4 sm:$0xff]  }
 0x475   :  { %v5357_v47 = vpop.f32.mrb[0].mxu0  ;;  %v11496_v48 = vpop.f32.mrb[0].mxu1 }
 0x476   :  { %v9276_v49 = vadd.f32 %v5357_v47, %v931_v45  ;;  %v5359_v50 = vpop.f32.mrb[1].mxu0  ;;  %v5851_v51 = vpop.f32.mrb[1].mxu1  ;;  %v10743_v45 = vld [vmem:[#allocation8 + $0x34c] ss:$16 sps:$4 sm:$0xff]   ;;  %v10746_v47 = vld [vmem:[#allocation8 + $0x364] ss:$16 sps:$4 sm:$0xff]  }
 0x477   :  { %v9277_v52 = vadd.f32 %v5359_v50, %v935_v46  ;;  %v9279_v53 = vadd.f32 %v5851_v51, %v943_v28  ;;  %v5361_v54 = vpop.f32.mrb[2].mxu0  ;;  %v5853_v55 = vpop.f32.mrb[2].mxu1  ;;  %v10738_v46 = vld [vmem:[#allocation8 + $0x340] ss:$16 sps:$4 sm:$0xff]   ;;  %v10741_v28 = vld [vmem:[#allocation8 + $0x348] ss:$16 sps:$4 sm:$0xff]  }
 0x478   :  { %v5856_v56 = vmax.f32 %v9276_v49, 0.0  ;;  %v5362_v57 = vpop.f32.mrb[3].mxu0  ;;  %v5854_v58 = vpop.f32.mrb[3].mxu1  ;;  %v10749_v49 = vld [vmem:[#allocation8 + $0x36c] ss:$16 sps:$4 sm:$0xff]  }
 0x479   :  { %v5857_v59 = vmax.f32 %v9277_v52, 0.0  ;;  %v5859_v60 = vmax.f32 %v9279_v53, 0.0  ;;  %v10744_v50 = vld [vmem:[#allocation8 + $0x360] ss:$16 sps:$4 sm:$0xff]   ;;  %v10747_v51 = vld [vmem:[#allocation8 + $0x368] ss:$16 sps:$4 sm:$0xff]  }
 0x47a   :  { %v5860_v0 = vpack.c.bf16 %v5856_v56, %v5856_v56  ;;  %v10752_v52 = vld [vmem:[#allocation8 + $0x384] ss:$16 sps:$4 sm:$0xff]   ;;  %v10755_v53 = vld [vmem:[#allocation8 + $0x38c] ss:$16 sps:$4 sm:$0xff]   ;;  %v10750_v54 = vld [vmem:[#allocation8 + $0x380] ss:$16 sps:$4 sm:$0xff]  }
 0x47b   :  { %v5861_v61 = vpack.c.bf16 %v5857_v59, %v5857_v59  ;;  %v5863_v3 = vpack.c.bf16 %v5859_v60, %v5859_v60  ;;  %v10753_v55 = vld [vmem:[#allocation8 + $0x388] ss:$16 sps:$4 sm:$0xff]   ;;  %v11499_v56 = vsub.s32 2, %v11477_v41  ;;  %v10758_v57 = vld [vmem:[#allocation8 + $0x3a4] ss:$16 sps:$4 sm:$0xff]  }
 0x47c   :  { %v10761_v58 = vld [vmem:[#allocation8 + $0x3ac] ss:$16 sps:$4 sm:$0xff]   ;;  %v10756_v59 = vld [vmem:[#allocation8 + $0x3a0] ss:$16 sps:$4 sm:$0xff]   ;;  %v10759_v60 = vld [vmem:[#allocation8 + $0x3a8] ss:$16 sps:$4 sm:$0xff]  }
 0x47d   :  { %6686 = vmatprep.mubr.bf16.mxu0 %v5861_v61  ;;  %6768 = vmatprep.mubr.bf16.mxu1 %v5861_v61  ;;  %v939_v61 = vrot.slane %v11482_v43, %v11499_v56  ;;  %v10765_v41 = vld [vmem:[#allocation8 + $0x3c8] ss:$16 sps:$4 sm:$0xff]  }
 0x47e   :  { %6687 = vmatmul.mubr.bf16.vlgmr.msra.gmra.mrb[4].mxu0 %v5860_v0  ;;  %6769 = vmatmul.mubr.bf16.vlgmr.msra.gmra.mrb[4].mxu1 %v5860_v0  ;;  %v10762_v0 = vld [vmem:[#allocation8 + $0x3c0] ss:$16 sps:$4 sm:$0xff]   ;;  %v10776_v43 = vld [vmem:[#allocation11 + $0x4] ss:$16 sps:$4 sm:$0xff]  }
 0x47f   :  { %6696 = vmatpush1.bf16.msra.mxu0 %v10678_v62  ;;  %6778 = vmatpush1.bf16.msra.mxu1 %v10681_v63  ;;  %v10764_v62 = vld [vmem:[#allocation8 + $0x3c4] ss:$16 sps:$4 sm:$0xff]   ;;  %v10767_v63 = vld [vmem:[#allocation8 + $0x3cc] ss:$16 sps:$4 sm:$0xff]  }
 0x480   :  { %6727 = vmatprep.mubr.bf16.mxu0 %v5863_v3  ;;  %6809 = vmatprep.mubr.bf16.mxu1 %v5863_v3  ;;  %v10773_v3 = vld [vmem:[#allocation8 + $0x3ec] ss:$16 sps:$4 sm:$0xff]  }
 0x481   :  { %6697 = vmatprep.subr.bf16.mxu0 %v10686_v1  ;;  %6779 = vmatprep.subr.bf16.mxu1 %v10689_v2  ;;  %v9278_v1 = vadd.f32 %v11496_v48, %v939_v61  ;;  %v10770_v2 = vld [vmem:[#allocation8 + $0x3e4] ss:$16 sps:$4 sm:$0xff]   ;;  %v10782_v48 = vld [vmem:[#allocation11 + $0x24] ss:$16 sps:$4 sm:$0xff]  }
 0x482   :  { %v10848_v61 = vld [vmem:[#allocation11 + $0x184] ss:$16 sps:$4 sm:$0xff]  }
 0x483   :  { %6698 = vmatpush1.bf16.msra.mxu0 %v10684_v4  ;;  %6780 = vmatpush1.bf16.msra.mxu1 %v10687_v5  ;;  %v10768_v4 = vld [vmem:[#allocation8 + $0x3e0] ss:$16 sps:$4 sm:$0xff]   ;;  %v10771_v5 = vld [vmem:[#allocation8 + $0x3e8] ss:$16 sps:$4 sm:$0xff]  }
 0x484   :  { %6699 = vmatprep.subr.bf16.mxu0 %v10692_v6  ;;  %6781 = vmatprep.subr.bf16.mxu1 %v10695_v7  ;;  %v5858_v6 = vmax.f32 %v9278_v1, 0.0  ;;  %v10779_v7 = vld [vmem:[#allocation11 + $0xc] ss:$16 sps:$4 sm:$0xff]  }
 0x485   :  { %v10857_v1 = vld [vmem:[#allocation11 + $0x1ac] ss:$16 sps:$4 sm:$0xff]  }
 0x487   :  { %6700 = vmatpush1.bf16.msra.mxu0 %v10690_v8  ;;  %6782 = vmatpush1.bf16.msra.mxu1 %v10693_v9  ;;  %v10774_v8 = vld [vmem:[#allocation11] ss:$16 sps:$4 sm:$0xff]   ;;  %v10777_v9 = vld [vmem:[#allocation11 + $0x8] ss:$16 sps:$4 sm:$0xff]  }
 0x488   :  { %6701 = vmatprep.subr.bf16.mxu0 %v10698_v10  ;;  %6783 = vmatprep.subr.bf16.mxu1 %v10701_v12  ;;  %v5862_v10 = vpack.c.bf16 %v5858_v6, %v5858_v6  ;;  %v10785_v12 = vld [vmem:[#allocation11 + $0x2c] ss:$16 sps:$4 sm:$0xff]   ;;  %v10858_v6 = vld [vmem:[#allocation11 + $0x1c0] ss:$16 sps:$4 sm:$0xff]  }
 0x48b   :  { %6702 = vmatpush1.bf16.msra.mxu0 %v10696_v13  ;;  %6784 = vmatpush1.bf16.msra.mxu1 %v10699_v15  ;;  %v10780_v13 = vld [vmem:[#allocation11 + $0x20] ss:$16 sps:$4 sm:$0xff]   ;;  %v10783_v15 = vld [vmem:[#allocation11 + $0x28] ss:$16 sps:$4 sm:$0xff]  }
 0x48c   :  { %6703 = vmatprep.subr.bf16.mxu0 %v10704_v16  ;;  %6785 = vmatprep.subr.bf16.mxu1 %v10707_v18  ;;  %v10788_v16 = vld [vmem:[#allocation11 + $0x44] ss:$16 sps:$4 sm:$0xff]   ;;  %v10791_v18 = vld [vmem:[#allocation11 + $0x4c] ss:$16 sps:$4 sm:$0xff]  }
 0x48f   :  { %6704 = vmatpush1.bf16.msra.mxu0 %v10702_v20  ;;  %6786 = vmatpush1.bf16.msra.mxu1 %v10705_v11  ;;  %v10786_v20 = vld [vmem:[#allocation11 + $0x40] ss:$16 sps:$4 sm:$0xff]   ;;  %v10789_v11 = vld [vmem:[#allocation11 + $0x48] ss:$16 sps:$4 sm:$0xff]  }
 0x490   :  { %6705 = vmatprep.subr.bf16.mxu0 %v10710_v21  ;;  %6787 = vmatprep.subr.bf16.mxu1 %v10713_v14  ;;  %v10794_v21 = vld [vmem:[#allocation11 + $0x64] ss:$16 sps:$4 sm:$0xff]   ;;  %v10797_v14 = vld [vmem:[#allocation11 + $0x6c] ss:$16 sps:$4 sm:$0xff]  }
 0x493   :  { %6706 = vmatpush1.bf16.msra.mxu0 %v10708_v23  ;;  %6788 = vmatpush1.bf16.msra.mxu1 %v10711_v24  ;;  %v10792_v23 = vld [vmem:[#allocation11 + $0x60] ss:$16 sps:$4 sm:$0xff]   ;;  %v10795_v24 = vld [vmem:[#allocation11 + $0x68] ss:$16 sps:$4 sm:$0xff]  }
 0x494   :  { %6707 = vmatprep.subr.bf16.mxu0 %v10716_v17  ;;  %6789 = vmatprep.subr.bf16.mxu1 %v10719_v26  ;;  %v10800_v17 = vld [vmem:[#allocation11 + $0x84] ss:$16 sps:$4 sm:$0xff]   ;;  %v10803_v26 = vld [vmem:[#allocation11 + $0x8c] ss:$16 sps:$4 sm:$0xff]  }
 0x497   :  { %6708 = vmatpush1.bf16.msra.mxu0 %v10714_v27  ;;  %6790 = vmatpush1.bf16.msra.mxu1 %v10717_v19  ;;  %v10798_v27 = vld [vmem:[#allocation11 + $0x80] ss:$16 sps:$4 sm:$0xff]   ;;  %v10801_v19 = vld [vmem:[#allocation11 + $0x88] ss:$16 sps:$4 sm:$0xff]  }
 0x498   :  { %6709 = vmatprep.subr.bf16.mxu0 %v10722_v29  ;;  %6791 = vmatprep.subr.bf16.mxu1 %v10725_v30  ;;  %v10806_v29 = vld [vmem:[#allocation11 + $0xa4] ss:$16 sps:$4 sm:$0xff]   ;;  %v10809_v30 = vld [vmem:[#allocation11 + $0xac] ss:$16 sps:$4 sm:$0xff]  }
 0x49b   :  { %6710 = vmatpush1.bf16.msra.mxu0 %v10720_v22  ;;  %6792 = vmatpush1.bf16.msra.mxu1 %v10723_v32  ;;  %v10804_v22 = vld [vmem:[#allocation11 + $0xa0] ss:$16 sps:$4 sm:$0xff]   ;;  %v10807_v32 = vld [vmem:[#allocation11 + $0xa8] ss:$16 sps:$4 sm:$0xff]  }
 0x49c   :  { %6711 = vmatprep.subr.bf16.mxu0 %v10728_v33  ;;  %6793 = vmatprep.subr.bf16.mxu1 %v10731_v34  ;;  %v10812_v33 = vld [vmem:[#allocation11 + $0xc4] ss:$16 sps:$4 sm:$0xff]   ;;  %v10815_v34 = vld [vmem:[#allocation11 + $0xcc] ss:$16 sps:$4 sm:$0xff]  }
 0x49f   :  { %6712 = vmatpush1.bf16.msra.mxu0 %v10726_v35  ;;  %6794 = vmatpush1.bf16.msra.mxu1 %v10729_v36  ;;  %v10810_v35 = vld [vmem:[#allocation11 + $0xc0] ss:$16 sps:$4 sm:$0xff]   ;;  %v10813_v36 = vld [vmem:[#allocation11 + $0xc8] ss:$16 sps:$4 sm:$0xff]  }
 0x4a0   :  { %6713 = vmatprep.subr.bf16.mxu0 %v10734_v37  ;;  %6795 = vmatprep.subr.bf16.mxu1 %v10737_v38  ;;  %v10818_v37 = vld [vmem:[#allocation11 + $0xe4] ss:$16 sps:$4 sm:$0xff]   ;;  %v10821_v38 = vld [vmem:[#allocation11 + $0xec] ss:$16 sps:$4 sm:$0xff]  }
 0x4a3   :  { %6714 = vmatpush1.bf16.msra.mxu0 %v10732_v39  ;;  %6796 = vmatpush1.bf16.msra.mxu1 %v10735_v40  ;;  %v10816_v39 = vld [vmem:[#allocation11 + $0xe0] ss:$16 sps:$4 sm:$0xff]   ;;  %v10819_v40 = vld [vmem:[#allocation11 + $0xe8] ss:$16 sps:$4 sm:$0xff]  }
 0x4a4   :  { %6715 = vmatprep.subr.bf16.mxu0 %v10740_v31  ;;  %6797 = vmatprep.subr.bf16.mxu1 %v10743_v45  ;;  %v10824_v31 = vld [vmem:[#allocation11 + $0x104] ss:$16 sps:$4 sm:$0xff]   ;;  %v10827_v45 = vld [vmem:[#allocation11 + $0x10c] ss:$16 sps:$4 sm:$0xff]  }
 0x4a7   :  { %6716 = vmatpush1.bf16.msra.mxu0 %v10738_v46  ;;  %6798 = vmatpush1.bf16.msra.mxu1 %v10741_v28  ;;  %v10822_v46 = vld [vmem:[#allocation11 + $0x100] ss:$16 sps:$4 sm:$0xff]   ;;  %v10825_v28 = vld [vmem:[#allocation11 + $0x108] ss:$16 sps:$4 sm:$0xff]  }
 0x4a8   :  { %6717 = vmatprep.subr.bf16.mxu0 %v10746_v47  ;;  %6799 = vmatprep.subr.bf16.mxu1 %v10749_v49  ;;  %v10830_v47 = vld [vmem:[#allocation11 + $0x124] ss:$16 sps:$4 sm:$0xff]   ;;  %v10833_v49 = vld [vmem:[#allocation11 + $0x12c] ss:$16 sps:$4 sm:$0xff]  }
 0x4ab   :  { %6718 = vmatpush1.bf16.msra.mxu0 %v10744_v50  ;;  %6800 = vmatpush1.bf16.msra.mxu1 %v10747_v51  ;;  %v10828_v50 = vld [vmem:[#allocation11 + $0x120] ss:$16 sps:$4 sm:$0xff]   ;;  %v10831_v51 = vld [vmem:[#allocation11 + $0x128] ss:$16 sps:$4 sm:$0xff]  }
 0x4ac   :  { %6719 = vmatprep.subr.bf16.mxu0 %v10752_v52  ;;  %6801 = vmatprep.subr.bf16.mxu1 %v10755_v53  ;;  %v10836_v52 = vld [vmem:[#allocation11 + $0x144] ss:$16 sps:$4 sm:$0xff]   ;;  %v10839_v53 = vld [vmem:[#allocation11 + $0x14c] ss:$16 sps:$4 sm:$0xff]  }
 0x4af   :  { %6720 = vmatpush1.bf16.msra.mxu0 %v10750_v54  ;;  %6802 = vmatpush1.bf16.msra.mxu1 %v10753_v55  ;;  %v10834_v54 = vld [vmem:[#allocation11 + $0x140] ss:$16 sps:$4 sm:$0xff]   ;;  %v10837_v55 = vld [vmem:[#allocation11 + $0x148] ss:$16 sps:$4 sm:$0xff]  }
 0x4b0   :  { %6721 = vmatprep.subr.bf16.mxu0 %v10758_v57  ;;  %6803 = vmatprep.subr.bf16.mxu1 %v10761_v58  ;;  %v10842_v57 = vld [vmem:[#allocation11 + $0x164] ss:$16 sps:$4 sm:$0xff]   ;;  %v10845_v58 = vld [vmem:[#allocation11 + $0x16c] ss:$16 sps:$4 sm:$0xff]  }
 0x4b3   :  { %6722 = vmatpush1.bf16.msra.mxu0 %v10756_v59  ;;  %6804 = vmatpush1.bf16.msra.mxu1 %v10759_v60  ;;  %v10840_v59 = vld [vmem:[#allocation11 + $0x160] ss:$16 sps:$4 sm:$0xff]   ;;  %v10843_v60 = vld [vmem:[#allocation11 + $0x168] ss:$16 sps:$4 sm:$0xff]  }
 0x4b4   :  { %6723 = vmatprep.subr.bf16.mxu0 %v10764_v62  ;;  %6805 = vmatprep.subr.bf16.mxu1 %v10767_v63  ;;  %v10851_v62 = vld [vmem:[#allocation11 + $0x18c] ss:$16 sps:$4 sm:$0xff]   ;;  %v10846_v63 = vld [vmem:[#allocation11 + $0x180] ss:$16 sps:$4 sm:$0xff]  }
 0x4b7   :  { %6724 = vmatpush1.bf16.msra.mxu0 %v10762_v0  ;;  %6806 = vmatpush1.bf16.msra.mxu1 %v10765_v41  ;;  %v10849_v0 = vld [vmem:[#allocation11 + $0x188] ss:$16 sps:$4 sm:$0xff]   ;;  %v10854_v41 = vld [vmem:[#allocation11 + $0x1a4] ss:$16 sps:$4 sm:$0xff]  }
 0x4b8   :  { %6725 = vmatprep.subr.bf16.mxu0 %v10770_v2  ;;  %6807 = vmatprep.subr.bf16.mxu1 %v10773_v3  ;;  %v10852_v2 = vld [vmem:[#allocation11 + $0x1a0] ss:$16 sps:$4 sm:$0xff]   ;;  %v10855_v3 = vld [vmem:[#allocation11 + $0x1a8] ss:$16 sps:$4 sm:$0xff]  }
 0x4bb   :  { %6726 = vmatpush1.bf16.msra.mxu0 %v10768_v4  ;;  %6808 = vmatpush1.bf16.msra.mxu1 %v10771_v5  ;;  %v10860_v4 = vld [vmem:[#allocation11 + $0x1c4] ss:$16 sps:$4 sm:$0xff]   ;;  %v10863_v5 = vld [vmem:[#allocation11 + $0x1cc] ss:$16 sps:$4 sm:$0xff]  }
 0x4bc   :  { %7616 = vmatprep.subr.bf16.mxu0 %v10776_v43  ;;  %7698 = vmatprep.subr.bf16.mxu1 %v10779_v7  ;;  %v10861_v43 = vld [vmem:[#allocation11 + $0x1c8] ss:$16 sps:$4 sm:$0xff]   ;;  %v10866_v7 = vld [vmem:[#allocation11 + $0x1e4] ss:$16 sps:$4 sm:$0xff]  }
 0x4be   :  { %6728 = vmatmul.mubr.bf16.vlgmr.msra.gmra.mrb[4].mxu0 %v5862_v10  ;;  %6810 = vmatmul.mubr.bf16.vlgmr.msra.gmra.mrb[4].mxu1 %v5862_v10  ;;  %v10867_v10 = vld [vmem:[#allocation11 + $0x1e8] ss:$16 sps:$4 sm:$0xff]  }
 0x4bf   :  { %7617 = vmatpush1.bf16.msra.mxu0 %v10774_v8  ;;  %7699 = vmatpush1.bf16.msra.mxu1 %v10777_v9  ;;  %v10869_v8 = vld [vmem:[#allocation11 + $0x1ec] ss:$16 sps:$4 sm:$0xff]   ;;  %v10864_v9 = vld [vmem:[#allocation11 + $0x1e0] ss:$16 sps:$4 sm:$0xff]  }
 0x4c0   :  { %7618 = vmatprep.subr.bf16.mxu0 %v10782_v48  ;;  %7700 = vmatprep.subr.bf16.mxu1 %v10785_v12  ;;  %v10872_v48 = vld [vmem:[#allocation11 + $0x204] ss:$16 sps:$4 sm:$0xff]   ;;  %v10875_v12 = vld [vmem:[#allocation11 + $0x20c] ss:$16 sps:$4 sm:$0xff]  }
 0x4c3   :  { %7619 = vmatpush1.bf16.msra.mxu0 %v10780_v13  ;;  %7701 = vmatpush1.bf16.msra.mxu1 %v10783_v15  ;;  %v11504_v13 = vld [vmem:[#allocation10] sm:$0xf] }
 0x4c4   :  { %7620 = vmatprep.subr.bf16.mxu0 %v10788_v16  ;;  %7702 = vmatprep.subr.bf16.mxu1 %v10791_v18  ;;  %v5997_v15 = vrot.slane %v11504_v13, %v11480_v42  ;;  %v6001_v16 = vrot.slane %v11504_v13, %v11485_v25  ;;  %v6009_v18 = vrot.slane %v11504_v13, %v11488_v44 }
 0x4c7   :  { %7621 = vmatpush1.bf16.msra.mxu0 %v10786_v20  ;;  %7703 = vmatpush1.bf16.msra.mxu1 %v10789_v11 }
 0x4c8   :  { %7622 = vmatprep.subr.bf16.mxu0 %v10794_v21  ;;  %7704 = vmatprep.subr.bf16.mxu1 %v10797_v14 }
 0x4cb   :  { %7623 = vmatpush1.bf16.msra.mxu0 %v10792_v23  ;;  %7705 = vmatpush1.bf16.msra.mxu1 %v10795_v24 }
 0x4cc   :  { %7624 = vmatprep.subr.bf16.mxu0 %v10800_v17  ;;  %7706 = vmatprep.subr.bf16.mxu1 %v10803_v26 }
 0x4cf   :  { %7625 = vmatpush1.bf16.msra.mxu0 %v10798_v27  ;;  %7707 = vmatpush1.bf16.msra.mxu1 %v10801_v19 }
 0x4d0   :  { %7626 = vmatprep.subr.bf16.mxu0 %v10806_v29  ;;  %7708 = vmatprep.subr.bf16.mxu1 %v10809_v30 }
 0x4d3   :  { %7627 = vmatpush1.bf16.msra.mxu0 %v10804_v22  ;;  %7709 = vmatpush1.bf16.msra.mxu1 %v10807_v32 }
 0x4d4   :  { %7628 = vmatprep.subr.bf16.mxu0 %v10812_v33  ;;  %7710 = vmatprep.subr.bf16.mxu1 %v10815_v34  ;;  %v10870_v34 = vld [vmem:[#allocation11 + $0x200] ss:$16 sps:$4 sm:$0xff]  }
 0x4d7   :  { %7629 = vmatpush1.bf16.msra.mxu0 %v10810_v35  ;;  %7711 = vmatpush1.bf16.msra.mxu1 %v10813_v36  ;;  %v10873_v35 = vld [vmem:[#allocation11 + $0x208] ss:$16 sps:$4 sm:$0xff]  }
 0x4d8   :  { %7630 = vmatprep.subr.bf16.mxu0 %v10818_v37  ;;  %7712 = vmatprep.subr.bf16.mxu1 %v10821_v38  ;;  %v10878_v37 = vld [vmem:[#allocation11 + $0x224] ss:$16 sps:$4 sm:$0xff]   ;;  %v10881_v38 = vld [vmem:[#allocation11 + $0x22c] ss:$16 sps:$4 sm:$0xff]  }
 0x4db   :  { %7631 = vmatpush1.bf16.msra.mxu0 %v10816_v39  ;;  %7713 = vmatpush1.bf16.msra.mxu1 %v10819_v40  ;;  %v10876_v40 = vld [vmem:[#allocation11 + $0x220] ss:$16 sps:$4 sm:$0xff]  }
 0x4dc   :  { %7632 = vmatprep.subr.bf16.mxu0 %v10824_v31  ;;  %7714 = vmatprep.subr.bf16.mxu1 %v10827_v45  ;;  %v10879_v31 = vld [vmem:[#allocation11 + $0x228] ss:$16 sps:$4 sm:$0xff]   ;;  %v10884_v45 = vld [vmem:[#allocation11 + $0x244] ss:$16 sps:$4 sm:$0xff]  }
 0x4df   :  { %7633 = vmatpush1.bf16.msra.mxu0 %v10822_v46  ;;  %7715 = vmatpush1.bf16.msra.mxu1 %v10825_v28  ;;  %v10887_v46 = vld [vmem:[#allocation11 + $0x24c] ss:$16 sps:$4 sm:$0xff]   ;;  %v10882_v28 = vld [vmem:[#allocation11 + $0x240] ss:$16 sps:$4 sm:$0xff]  }
 0x4e0   :  { %7634 = vmatprep.subr.bf16.mxu0 %v10830_v47  ;;  %7716 = vmatprep.subr.bf16.mxu1 %v10833_v49  ;;  %v10885_v47 = vld [vmem:[#allocation11 + $0x248] ss:$16 sps:$4 sm:$0xff]   ;;  %v10890_v49 = vld [vmem:[#allocation11 + $0x264] ss:$16 sps:$4 sm:$0xff]  }
 0x4e3   :  { %7635 = vmatpush1.bf16.msra.mxu0 %v10828_v50  ;;  %7717 = vmatpush1.bf16.msra.mxu1 %v10831_v51  ;;  %v10893_v50 = vld [vmem:[#allocation11 + $0x26c] ss:$16 sps:$4 sm:$0xff]   ;;  %v10888_v51 = vld [vmem:[#allocation11 + $0x260] ss:$16 sps:$4 sm:$0xff]  }
 0x4e4   :  { %7636 = vmatprep.subr.bf16.mxu0 %v10836_v52  ;;  %7718 = vmatprep.subr.bf16.mxu1 %v10839_v53  ;;  %v10891_v52 = vld [vmem:[#allocation11 + $0x268] ss:$16 sps:$4 sm:$0xff]   ;;  %v10896_v53 = vld [vmem:[#allocation11 + $0x284] ss:$16 sps:$4 sm:$0xff]  }
 0x4e7   :  { %7637 = vmatpush1.bf16.msra.mxu0 %v10834_v54  ;;  %7719 = vmatpush1.bf16.msra.mxu1 %v10837_v55  ;;  %v10899_v54 = vld [vmem:[#allocation11 + $0x28c] ss:$16 sps:$4 sm:$0xff]   ;;  %v10894_v55 = vld [vmem:[#allocation11 + $0x280] ss:$16 sps:$4 sm:$0xff]  }
 0x4e8   :  { %7638 = vmatprep.subr.bf16.mxu0 %v10842_v57  ;;  %7720 = vmatprep.subr.bf16.mxu1 %v10845_v58  ;;  %v10897_v57 = vld [vmem:[#allocation11 + $0x288] ss:$16 sps:$4 sm:$0xff]   ;;  %v10902_v58 = vld [vmem:[#allocation11 + $0x2a4] ss:$16 sps:$4 sm:$0xff]  }
 0x4eb   :  { %7639 = vmatpush1.bf16.msra.mxu0 %v10840_v59  ;;  %7721 = vmatpush1.bf16.msra.mxu1 %v10843_v60  ;;  %v10905_v59 = vld [vmem:[#allocation11 + $0x2ac] ss:$16 sps:$4 sm:$0xff]   ;;  %v10900_v60 = vld [vmem:[#allocation11 + $0x2a0] ss:$16 sps:$4 sm:$0xff]  }
 0x4ec   :  { %7640 = vmatprep.subr.bf16.mxu0 %v10848_v61  ;;  %7722 = vmatprep.subr.bf16.mxu1 %v10851_v62  ;;  %v10903_v61 = vld [vmem:[#allocation11 + $0x2a8] ss:$16 sps:$4 sm:$0xff]   ;;  %v10908_v62 = vld [vmem:[#allocation11 + $0x2c4] ss:$16 sps:$4 sm:$0xff]  }
 0x4ef   :  { %7641 = vmatpush1.bf16.msra.mxu0 %v10846_v63  ;;  %7723 = vmatpush1.bf16.msra.mxu1 %v10849_v0  ;;  %v10911_v63 = vld [vmem:[#allocation11 + $0x2cc] ss:$16 sps:$4 sm:$0xff]   ;;  %v10906_v0 = vld [vmem:[#allocation11 + $0x2c0] ss:$16 sps:$4 sm:$0xff]  }
 0x4f0   :  { %7642 = vmatprep.subr.bf16.mxu0 %v10854_v41  ;;  %7724 = vmatprep.subr.bf16.mxu1 %v10857_v1  ;;  %v10909_v41 = vld [vmem:[#allocation11 + $0x2c8] ss:$16 sps:$4 sm:$0xff]   ;;  %v10914_v1 = vld [vmem:[#allocation11 + $0x2e4] ss:$16 sps:$4 sm:$0xff]  }
 0x4f3   :  { %7643 = vmatpush1.bf16.msra.mxu0 %v10852_v2  ;;  %7725 = vmatpush1.bf16.msra.mxu1 %v10855_v3  ;;  %v10917_v2 = vld [vmem:[#allocation11 + $0x2ec] ss:$16 sps:$4 sm:$0xff]   ;;  %v10912_v3 = vld [vmem:[#allocation11 + $0x2e0] ss:$16 sps:$4 sm:$0xff]  }
 0x4f4   :  { %7644 = vmatprep.subr.bf16.mxu0 %v10860_v4  ;;  %7726 = vmatprep.subr.bf16.mxu1 %v10863_v5  ;;  %v10915_v4 = vld [vmem:[#allocation11 + $0x2e8] ss:$16 sps:$4 sm:$0xff]   ;;  %v10920_v5 = vld [vmem:[#allocation11 + $0x304] ss:$16 sps:$4 sm:$0xff]  }
 0x4f7   :  { %7645 = vmatpush1.bf16.msra.mxu0 %v10858_v6  ;;  %7727 = vmatpush1.bf16.msra.mxu1 %v10861_v43  ;;  %v10923_v6 = vld [vmem:[#allocation11 + $0x30c] ss:$16 sps:$4 sm:$0xff]   ;;  %v10918_v43 = vld [vmem:[#allocation11 + $0x300] ss:$16 sps:$4 sm:$0xff]  }
 0x4f8   :  { %7646 = vmatprep.subr.bf16.mxu0 %v10866_v7  ;;  %7728 = vmatprep.subr.bf16.mxu1 %v10869_v8  ;;  %v10921_v7 = vld [vmem:[#allocation11 + $0x308] ss:$16 sps:$4 sm:$0xff]   ;;  %v10926_v8 = vld [vmem:[#allocation11 + $0x324] ss:$16 sps:$4 sm:$0xff]  }
 0x4fb   :  { %7647 = vmatpush1.bf16.msra.mxu0 %v10864_v9  ;;  %7729 = vmatpush1.bf16.msra.mxu1 %v10867_v10  ;;  %v10929_v9 = vld [vmem:[#allocation11 + $0x32c] ss:$16 sps:$4 sm:$0xff]   ;;  %v10924_v10 = vld [vmem:[#allocation11 + $0x320] ss:$16 sps:$4 sm:$0xff]  }
 0x4fc   :  { %7657 = vmatprep.subr.bf16.mxu0 %v10872_v48  ;;  %7739 = vmatprep.subr.bf16.mxu1 %v10875_v12  ;;  %v10927_v48 = vld [vmem:[#allocation11 + $0x328] ss:$16 sps:$4 sm:$0xff]   ;;  %v10932_v12 = vld [vmem:[#allocation11 + $0x344] ss:$16 sps:$4 sm:$0xff]  }
 0x591   :  { %v6729_v20 = vpop.f32.mrb[4].mxu0  ;;  %v11512_v11 = vpop.f32.mrb[4].mxu1 }
 0x592   :  { %v9280_v21 = vadd.f32 %v6729_v20, %v5997_v15  ;;  %v6731_v14 = vpop.f32.mrb[5].mxu0  ;;  %v6813_v23 = vpop.f32.mrb[5].mxu1  ;;  %v10935_v15 = vld [vmem:[#allocation11 + $0x34c] ss:$16 sps:$4 sm:$0xff]   ;;  %v10938_v20 = vld [vmem:[#allocation11 + $0x364] ss:$16 sps:$4 sm:$0xff]  }
 0x593   :  { %v9281_v24 = vadd.f32 %v6731_v14, %v6001_v16  ;;  %v9283_v17 = vadd.f32 %v6813_v23, %v6009_v18  ;;  %v6733_v26 = vpop.f32.mrb[6].mxu0  ;;  %v6815_v27 = vpop.f32.mrb[6].mxu1  ;;  %v10930_v16 = vld [vmem:[#allocation11 + $0x340] ss:$16 sps:$4 sm:$0xff]   ;;  %v10933_v18 = vld [vmem:[#allocation11 + $0x348] ss:$16 sps:$4 sm:$0xff]  }
 0x594   :  { %v6818_v19 = vmax.f32 %v9280_v21, 0.0  ;;  %v6734_v29 = vpop.f32.mrb[7].mxu0  ;;  %v6816_v30 = vpop.f32.mrb[7].mxu1  ;;  %v10941_v21 = vld [vmem:[#allocation11 + $0x36c] ss:$16 sps:$4 sm:$0xff]  }
 0x595   :  { %v6819_v22 = vmax.f32 %v9281_v24, 0.0  ;;  %v6821_v32 = vmax.f32 %v9283_v17, 0.0  ;;  %v10936_v14 = vld [vmem:[#allocation11 + $0x360] ss:$16 sps:$4 sm:$0xff]   ;;  %v10939_v23 = vld [vmem:[#allocation11 + $0x368] ss:$16 sps:$4 sm:$0xff]  }
 0x596   :  { %v6822_v36 = vpack.c.bf16 %v6818_v19, %v6818_v19  ;;  %v10944_v24 = vld [vmem:[#allocation11 + $0x384] ss:$16 sps:$4 sm:$0xff]   ;;  %v10947_v17 = vld [vmem:[#allocation11 + $0x38c] ss:$16 sps:$4 sm:$0xff]   ;;  %v10942_v26 = vld [vmem:[#allocation11 + $0x380] ss:$16 sps:$4 sm:$0xff]  }
 0x597   :  { %v6823_v33 = vpack.c.bf16 %v6819_v22, %v6819_v22  ;;  %v6825_v39 = vpack.c.bf16 %v6821_v32, %v6821_v32  ;;  %v10945_v27 = vld [vmem:[#allocation11 + $0x388] ss:$16 sps:$4 sm:$0xff]   ;;  %v10950_v19 = vld [vmem:[#allocation11 + $0x3a4] ss:$16 sps:$4 sm:$0xff]   ;;  %v10953_v29 = vld [vmem:[#allocation11 + $0x3ac] ss:$16 sps:$4 sm:$0xff]   ;;  %v6005_v32 = vrot.slane %v11504_v13, %v11499_v56 }
 0x598   :  { %v10948_v30 = vld [vmem:[#allocation11 + $0x3a0] ss:$16 sps:$4 sm:$0xff]   ;;  %v10951_v22 = vld [vmem:[#allocation11 + $0x3a8] ss:$16 sps:$4 sm:$0xff]  }
 0x599   :  { %7648 = vmatprep.mubr.bf16.mxu0 %v6823_v33  ;;  %7730 = vmatprep.mubr.bf16.mxu1 %v6823_v33  ;;  %v10956_v33 = vld [vmem:[#allocation11 + $0x3c4] ss:$16 sps:$4 sm:$0xff]  }
 0x59a   :  { %7649 = vmatmul.mubr.bf16.vlgmr.msra.gmra.mrb[8].mxu0 %v6822_v36  ;;  %7731 = vmatmul.mubr.bf16.vlgmr.msra.gmra.mrb[8].mxu1 %v6822_v36  ;;  %v10957_v36 = vld [vmem:[#allocation11 + $0x3c8] ss:$16 sps:$4 sm:$0xff]  }
 0x59b   :  { %7658 = vmatpush1.bf16.msra.mxu0 %v10870_v34  ;;  %7740 = vmatpush1.bf16.msra.mxu1 %v10873_v35  ;;  %v10959_v34 = vld [vmem:[#allocation11 + $0x3cc] ss:$16 sps:$4 sm:$0xff]   ;;  %v10954_v35 = vld [vmem:[#allocation11 + $0x3c0] ss:$16 sps:$4 sm:$0xff]   ;;  %v10966_v13 = vld [vmem:[#allocation14 + $0x40] sm:$0xff]  }
 0x59c   :  { %7689 = vmatprep.mubr.bf16.mxu0 %v6825_v39  ;;  %7771 = vmatprep.mubr.bf16.mxu1 %v6825_v39  ;;  %v10965_v39 = vld [vmem:[#allocation11 + $0x3ec] ss:$16 sps:$4 sm:$0xff]  }
 0x59d   :  { %7659 = vmatprep.subr.bf16.mxu0 %v10878_v37  ;;  %7741 = vmatprep.subr.bf16.mxu1 %v10881_v38  ;;  %v9282_v37 = vadd.f32 %v11512_v11, %v6005_v32  ;;  %v10962_v38 = vld [vmem:[#allocation11 + $0x3e4] ss:$16 sps:$4 sm:$0xff]   ;;  %v10970_v11 = vld [vmem:[#allocation14 + $0x48] sm:$0xff]  }
 0x59f   :  { %7660 = vmatpush1.bf16.msra.mxu0 %v10876_v40  ;;  %7742 = vmatpush1.bf16.msra.mxu1 %v10879_v31  ;;  %v10960_v40 = vld [vmem:[#allocation11 + $0x3e0] ss:$16 sps:$4 sm:$0xff]   ;;  %v10963_v31 = vld [vmem:[#allocation11 + $0x3e8] ss:$16 sps:$4 sm:$0xff]  }
 0x5a0   :  { %7661 = vmatprep.subr.bf16.mxu0 %v10884_v45  ;;  %7743 = vmatprep.subr.bf16.mxu1 %v10887_v46  ;;  %v6820_v45 = vmax.f32 %v9282_v37, 0.0  ;;  %v10967_v46 = vld [vmem:[#allocation14 + $0xc0] sm:$0xff]  }
 0x5a3   :  { %7662 = vmatpush1.bf16.msra.mxu0 %v10882_v28  ;;  %7744 = vmatpush1.bf16.msra.mxu1 %v10885_v47  ;;  %v10968_v28 = vld [vmem:[#allocation14] sm:$0xff]  }
 0x5a4   :  { %7663 = vmatprep.subr.bf16.mxu0 %v10890_v49  ;;  %7745 = vmatprep.subr.bf16.mxu1 %v10893_v50  ;;  %v10969_v47 = vld [vmem:[#allocation14 + $0x80] sm:$0xff]   ;;  %v6824_v49 = vpack.c.bf16 %v6820_v45, %v6820_v45  ;;  %v10971_v50 = vld [vmem:[#allocation14 + $0xc8] sm:$0xff]  }
 0x5a7   :  { %7664 = vmatpush1.bf16.msra.mxu0 %v10888_v51  ;;  %7746 = vmatpush1.bf16.msra.mxu1 %v10891_v52  ;;  %v10972_v51 = vld [vmem:[#allocation14 + $0x8] sm:$0xff]  }
 0x5a8   :  { %7665 = vmatprep.subr.bf16.mxu0 %v10896_v53  ;;  %7747 = vmatprep.subr.bf16.mxu1 %v10899_v54  ;;  %v10973_v52 = vld [vmem:[#allocation14 + $0x88] sm:$0xff]   ;;  %v10974_v53 = vld [vmem:[#allocation14 + $0x50] sm:$0xff]  }
 0x5a9   :  { %v10975_v54 = vld [vmem:[#allocation14 + $0xd0] sm:$0xff]  }
 0x5ab   :  { %7666 = vmatpush1.bf16.msra.mxu0 %v10894_v55  ;;  %7748 = vmatpush1.bf16.msra.mxu1 %v10897_v57  ;;  %v10976_v55 = vld [vmem:[#allocation14 + $0x10] sm:$0xff]  }
 0x5ac   :  { %7667 = vmatprep.subr.bf16.mxu0 %v10902_v58  ;;  %7749 = vmatprep.subr.bf16.mxu1 %v10905_v59  ;;  %v10977_v57 = vld [vmem:[#allocation14 + $0x90] sm:$0xff]   ;;  %v10978_v58 = vld [vmem:[#allocation14 + $0x58] sm:$0xff]  }
 0x5ad   :  { %v10979_v59 = vld [vmem:[#allocation14 + $0xd8] sm:$0xff]  }
 0x5af   :  { %7668 = vmatpush1.bf16.msra.mxu0 %v10900_v60  ;;  %7750 = vmatpush1.bf16.msra.mxu1 %v10903_v61  ;;  %v10980_v60 = vld [vmem:[#allocation14 + $0x18] sm:$0xff]  }
 0x5b0   :  { %7669 = vmatprep.subr.bf16.mxu0 %v10908_v62  ;;  %7751 = vmatprep.subr.bf16.mxu1 %v10911_v63  ;;  %v10981_v61 = vld [vmem:[#allocation14 + $0x98] sm:$0xff]   ;;  %v10982_v62 = vld [vmem:[#allocation14 + $0x60] sm:$0xff]  }
 0x5b1   :  { %v10983_v63 = vld [vmem:[#allocation14 + $0xe0] sm:$0xff]  }
 0x5b3   :  { %7670 = vmatpush1.bf16.msra.mxu0 %v10906_v0  ;;  %7752 = vmatpush1.bf16.msra.mxu1 %v10909_v41  ;;  %v10984_v0 = vld [vmem:[#allocation14 + $0x20] sm:$0xff]  }
 0x5b4   :  { %7671 = vmatprep.subr.bf16.mxu0 %v10914_v1  ;;  %7753 = vmatprep.subr.bf16.mxu1 %v10917_v2  ;;  %v10985_v41 = vld [vmem:[#allocation14 + $0xa0] sm:$0xff]   ;;  %v10986_v1 = vld [vmem:[#allocation14 + $0x68] sm:$0xff]  }
 0x5b5   :  { %v10987_v2 = vld [vmem:[#allocation14 + $0xe8] sm:$0xff]  }
 0x5b7   :  { %7672 = vmatpush1.bf16.msra.mxu0 %v10912_v3  ;;  %7754 = vmatpush1.bf16.msra.mxu1 %v10915_v4  ;;  %v10988_v3 = vld [vmem:[#allocation14 + $0x28] sm:$0xff]  }
 0x5b8   :  { %7673 = vmatprep.subr.bf16.mxu0 %v10920_v5  ;;  %7755 = vmatprep.subr.bf16.mxu1 %v10923_v6  ;;  %v10989_v4 = vld [vmem:[#allocation14 + $0xa8] sm:$0xff]   ;;  %v10990_v5 = vld [vmem:[#allocation14 + $0x70] sm:$0xff]  }
 0x5b9   :  { %v10991_v6 = vld [vmem:[#allocation14 + $0xf0] sm:$0xff]  }
 0x5bb   :  { %7674 = vmatpush1.bf16.msra.mxu0 %v10918_v43  ;;  %7756 = vmatpush1.bf16.msra.mxu1 %v10921_v7  ;;  %v10992_v43 = vld [vmem:[#allocation14 + $0x30] sm:$0xff]  }
 0x5bc   :  { %7675 = vmatprep.subr.bf16.mxu0 %v10926_v8  ;;  %7757 = vmatprep.subr.bf16.mxu1 %v10929_v9  ;;  %v10993_v7 = vld [vmem:[#allocation14 + $0xb0] sm:$0xff]   ;;  %v10994_v8 = vld [vmem:[#allocation14 + $0x78] sm:$0xff]  }
 0x5bd   :  { %v10995_v9 = vld [vmem:[#allocation14 + $0xf8] sm:$0xff]  }
 0x5bf   :  { %7676 = vmatpush1.bf16.msra.mxu0 %v10924_v10  ;;  %7758 = vmatpush1.bf16.msra.mxu1 %v10927_v48  ;;  %v10996_v10 = vld [vmem:[#allocation14 + $0x38] sm:$0xff]  }
 0x5c0   :  { %7677 = vmatprep.subr.bf16.mxu0 %v10932_v12  ;;  %7759 = vmatprep.subr.bf16.mxu1 %v10935_v15  ;;  %v10997_v48 = vld [vmem:[#allocation14 + $0xb8] sm:$0xff]  }
 0x5c1   :  { %v6954_v12 = vld [vmem:[#allocation13] sm:$0xf] }
 0x5c2   :  { %v6959_v15 = vrot.slane %v6954_v12, %v11480_v42 }
 0x5c3   :  { %7678 = vmatpush1.bf16.msra.mxu0 %v10930_v16  ;;  %7760 = vmatpush1.bf16.msra.mxu1 %v10933_v18  ;;  %v6967_v16 = vrot.slane %v6954_v12, %v11499_v56  ;;  %v6963_v18 = vrot.slane %v6954_v12, %v11485_v25 }
 0x5c4   :  { %7679 = vmatprep.subr.bf16.mxu0 %v10938_v20  ;;  %7761 = vmatprep.subr.bf16.mxu1 %v10941_v21  ;;  %v6971_v20 = vrot.slane %v6954_v12, %v11488_v44 }
 0x5c7   :  { %7680 = vmatpush1.bf16.msra.mxu0 %v10936_v14  ;;  %7762 = vmatpush1.bf16.msra.mxu1 %v10939_v23 }
 0x5c8   :  { %7681 = vmatprep.subr.bf16.mxu0 %v10944_v24  ;;  %7763 = vmatprep.subr.bf16.mxu1 %v10947_v17 }
 0x5cb   :  { %7682 = vmatpush1.bf16.msra.mxu0 %v10942_v26  ;;  %7764 = vmatpush1.bf16.msra.mxu1 %v10945_v27 }
 0x5cc   :  { %7683 = vmatprep.subr.bf16.mxu0 %v10950_v19  ;;  %7765 = vmatprep.subr.bf16.mxu1 %v10953_v29 }
 0x5cf   :  { %7684 = vmatpush1.bf16.msra.mxu0 %v10948_v30  ;;  %7766 = vmatpush1.bf16.msra.mxu1 %v10951_v22 }
 0x5d0   :  { %7685 = vmatprep.subr.bf16.mxu0 %v10956_v33  ;;  %7767 = vmatprep.subr.bf16.mxu1 %v10959_v34 }
 0x5d3   :  { %7686 = vmatpush1.bf16.msra.mxu0 %v10954_v35  ;;  %7768 = vmatpush1.bf16.msra.mxu1 %v10957_v36 }
 0x5d4   :  { %7687 = vmatprep.subr.bf16.mxu0 %v10962_v38  ;;  %7769 = vmatprep.subr.bf16.mxu1 %v10965_v39  ;;  %v9199_v39 = vld [vmem:[#allocation16] ss:$0 sm:$0xff] }
 0x5d7   :  { %7688 = vmatpush1.bf16.msra.mxu0 %v10960_v40  ;;  %7770 = vmatpush1.bf16.msra.mxu1 %v10963_v31 }
 0x5d8   :  { %9232 = vmatprep.subr.bf16.mxu0 %v10966_v13  ;;  %9254 = vmatprep.subr.bf16.mxu1 %v10967_v46 }
 0x5da   :  { %7690 = vmatmul.mubr.bf16.vlgmr.msra.gmra.mrb[8].mxu0 %v6824_v49  ;;  %7772 = vmatmul.mubr.bf16.vlgmr.msra.gmra.mrb[8].mxu1 %v6824_v49 }
 0x5db   :  { %9233 = vmatpush3.bf16.msra.mxu0 %v10968_v28  ;;  %9255 = vmatpush3.bf16.msra.mxu1 %v10969_v47 }
 0x5dc   :  { %9234 = vmatprep.subr.bf16.mxu0 %v10970_v11  ;;  %9256 = vmatprep.subr.bf16.mxu1 %v10971_v50 }
 0x5df   :  { %9235 = vmatpush3.bf16.msra.mxu0 %v10972_v51  ;;  %9257 = vmatpush3.bf16.msra.mxu1 %v10973_v52 }
 0x5e0   :  { %9236 = vmatprep.subr.bf16.mxu0 %v10974_v53  ;;  %9258 = vmatprep.subr.bf16.mxu1 %v10975_v54 }
 0x5e3   :  { %9237 = vmatpush3.bf16.msra.mxu0 %v10976_v55  ;;  %9259 = vmatpush3.bf16.msra.mxu1 %v10977_v57 }
 0x5e4   :  { %9238 = vmatprep.subr.bf16.mxu0 %v10978_v58  ;;  %9260 = vmatprep.subr.bf16.mxu1 %v10979_v59 }
 0x5e7   :  { %9239 = vmatpush3.bf16.msra.mxu0 %v10980_v60  ;;  %9261 = vmatpush3.bf16.msra.mxu1 %v10981_v61 }
 0x5e8   :  { %9240 = vmatprep.subr.bf16.mxu0 %v10982_v62  ;;  %9262 = vmatprep.subr.bf16.mxu1 %v10983_v63 }
 0x5eb   :  { %9241 = vmatpush3.bf16.msra.mxu0 %v10984_v0  ;;  %9263 = vmatpush3.bf16.msra.mxu1 %v10985_v41 }
 0x5ec   :  { %9242 = vmatprep.subr.bf16.mxu0 %v10986_v1  ;;  %9264 = vmatprep.subr.bf16.mxu1 %v10987_v2 }
 0x5ef   :  { %9243 = vmatpush3.bf16.msra.mxu0 %v10988_v3  ;;  %9265 = vmatpush3.bf16.msra.mxu1 %v10989_v4 }
 0x5f0   :  { %9244 = vmatprep.subr.bf16.mxu0 %v10990_v5  ;;  %9266 = vmatprep.subr.bf16.mxu1 %v10991_v6 }
 0x5f3   :  { %9245 = vmatpush3.bf16.msra.mxu0 %v10992_v43  ;;  %9267 = vmatpush3.bf16.msra.mxu1 %v10993_v7 }
 0x5f4   :  { %9246 = vmatprep.subr.bf16.mxu0 %v10994_v8  ;;  %9268 = vmatprep.subr.bf16.mxu1 %v10995_v9 }
 0x5f7   :  { %9247 = vmatpush3.bf16.msra.mxu0 %v10996_v10  ;;  %9269 = vmatpush3.bf16.msra.mxu1 %v10997_v48 }
 0x6ad   :  { %v7691_v21 = vpop.f32.mrb[8].mxu0  ;;  %v7773_v14 = vpop.f32.mrb[8].mxu1 }
 0x6ae   :  { %v9284_v23 = vadd.f32 %v7691_v21, %v6959_v15  ;;  %v9286_v24 = vadd.f32 %v7773_v14, %v6967_v16  ;;  %v7693_v17 = vpop.f32.mrb[9].mxu0  ;;  %v7775_v26 = vpop.f32.mrb[9].mxu1 }
 0x6af   :  { %v9285_v27 = vadd.f32 %v7693_v17, %v6963_v18  ;;  %v9287_v19 = vadd.f32 %v7775_v26, %v6971_v20  ;;  %v7695_v29 = vpop.f32.mrb[10].mxu0  ;;  %v7777_v30 = vpop.f32.mrb[10].mxu1 }
 0x6b0   :  { %v7780_v22 = vmax.f32 %v9284_v23, 0.0  ;;  %v7782_v32 = vmax.f32 %v9286_v24, 0.0  ;;  %v7696_v33 = vpop.f32.mrb[11].mxu0  ;;  %v7778_v42 = vpop.f32.mrb[11].mxu1 }
 0x6b1   :  { %v7781_v34 = vmax.f32 %v9285_v27, 0.0  ;;  %v7783_v56 = vmax.f32 %v9287_v19, 0.0 }
 0x6b2   :  { %v7784_v36 = vpack.c.bf16 %v7780_v22, %v7780_v22  ;;  %v7786_v44 = vpack.c.bf16 %v7782_v32, %v7782_v32 }
 0x6b3   :  { %v7785_v35 = vpack.c.bf16 %v7781_v34, %v7781_v34  ;;  %v7787_v25 = vpack.c.bf16 %v7783_v56, %v7783_v56 }
 0x6b5   :  { %8083 = vmatprep.mubr.bf16.mxu0 %v7785_v35  ;;  %8123 = vmatprep.mubr.bf16.mxu1 %v7787_v25 }
 0x6b6   :  { %8084 = vmatmul.mubr.bf16.vlgmr.msra.gmra.mrb[12].mxu0 %v7784_v36  ;;  %8124 = vmatmul.mubr.bf16.vlgmr.msra.gmra.mrb[12].mxu1 %v7786_v44 }
 0x789   :  { %v9248_v37 = vpop.f32.mrb[12].mxu0  ;;  %v9270_v38 = vpop.f32.mrb[12].mxu1 }
 0x78a   :  { %v9249_v40 = vpop.f32.mrb[13].mxu0  ;;  %v9271_v31 = vpop.f32.mrb[13].mxu1 }
 0x78b   :  { %v9250_v45 = vadd.f32 %v9249_v40, %v9248_v37  ;;  %v9272_v13 = vadd.f32 %v9271_v31, %v9270_v38  ;;  %v9251_v46 = vpop.f32.mrb[14].mxu0  ;;  %v9273_v28 = vpop.f32.mrb[14].mxu1 }
 0x78c   :  { %v9252_v47 = vpop.f32.mrb[15].mxu0  ;;  %v9274_v49 = vpop.f32.mrb[15].mxu1 }
 0x78d   :  { %v8086_v11 = vadd.f32 %v9250_v45, %v9199_v39 }
 0x78f   :  { %v8126_v50 = vadd.f32 %v9272_v13, %v8086_v11 }
 0x791   :  { %8131 = vst [vmem:[#allocation17] sm:$0xff] %v8126_v50 }
 0x792   :  { %11207 = shalt.err (!%p11204_p6)
}
 0x793   :  { %s11208_s18 = scalar_lea.hbm %s11542_s9, 128 }
 0x794   :  { %p11209_p7 = scmp.ne.s32.totalorder %s11542_s9, %s11208_s18  ;;  %p11212_p8 = scmp.lt.u32.totalorder %s11208_s18, %s11542_s9 }
 0x796   :  { %p11214_p9 = pnand %p11212_p8, %p11209_p7 }
 0x798   :  { %11217 = shalt.err (!%p11214_p9)
}
 0x799   :  { %8141 = dma.vmem_to_hbm [thread:$0]  %s8139_s25, 128, %s11542_s9, [#allocation4]  }
 0x79a   :  { %11228 = dma.done.wait [#allocation4], 128  }
 0x79b   :  { %11229 = vsyncadd [#allocation4], 4294967168 }
 0x79c   :  { %8145 = vsyncpa [#allocation3], 1 }
 0x79d   :  { %8146 = vsyncpa [#allocation6], 1 }
 0x79e   :  { %8147 = vsyncpa [#allocation9], 1 }
 0x79f   :  { %8148 = vsyncpa [#allocation12], 1 }
 0x7a0   :  { %8149 = vsyncpa [#allocation15], 1 }
 0x7a1   :  { %8150 = vsyncpa [#allocation4], 1 }

</bundles_post_ra>
